<compile_context>
chip_gen: v7x
topology: tpu7x:2x2x1
jax: 0.10.0
libtpu: 0.0.40
codegen_flags: <defaults>
</compile_context>

<pallas_src>
import functools
import numpy as np
import jax
import jax.numpy as jnp
from jax.experimental import pallas as pl
from jax.experimental.pallas import tpu as pltpu

NEG_SLOPE = 0.2
BN_EPS = 1e-5
LANE = 128
VMEM_LIMIT = 32 * 1024 * 1024   # explicit scoped-VMEM budget (v7x-safe)


def _round_up(v, m):
    return ((v + m - 1) // m) * m


# ----------------------------------------------------------------------------
# Fused conv kernel (im2col-free).
# Grid = (N, Cout tiles, row tiles).  The whole padded image (flattened over
# H*W) lives in VMEM; each tap contributes a shifted (tm, Cin) window matmul.
# ----------------------------------------------------------------------------
def _fused_conv_kernel(x_ref, w_ref, b_ref, o_ref, *,
                       tap_offsets, tm, mblocks, neg_slope):
    # x_ref: (1, L, Cin)        whole padded image, spatially flattened (bf16)
    # w_ref: (ntaps, Cin, tn)   per-tap weights (bf16)
    # b_ref: (1, tn)            folded conv+BN bias (f32)
    # o_ref: (1, tm, tn)        output rows (bf16), lane-dense
    if mblocks == 1:
        base = 0
    else:
        base = pl.multiple_of(pl.program_id(2) * tm, 8)
    tn = o_ref.shape[-1]
    acc = jnp.zeros((tm, tn), jnp.float32)
    for t, off in enumerate(tap_offsets):
        win = x_ref[0, pl.ds(base + off, tm), :]             # (tm, Cin)
        acc = acc + jnp.dot(win, w_ref[t],
                            preferred_element_type=jnp.float32)
    y = acc + b_ref[...]
    y = jnp.where(y >= 0.0, y, neg_slope * y)                # LeakyReLU(0.2)
    o_ref[0] = y.astype(o_ref.dtype)


def conv_layer(x_nhwc, p):
    """One conv(+folded BN)+LeakyReLU layer.

    x_nhwc: (N, H, W, Cin_real) bf16.  Returns (N, Hout, Wout, Cout_pad) bf16.
    """
    N, H, W, C = x_nhwc.shape
    k, stride = p["k"], p["stride"]
    if stride == 1:
        pad = (k - 1) // 2
        xp = jnp.pad(x_nhwc, ((0, 0), (pad, pad), (pad, pad), (0, 0)))
        Hp, Wp = H + 2 * pad, W + 2 * pad
        Hout, Wout, ck = H, W, k
    else:
        # 4x4 / stride-2 / pad-1 conv == 2x2 / stride-1 conv on the
        # space-to-depth(2) transform of the padded input.
        assert k == 4 and H % 2 == 0 and W % 2 == 0
        xp = jnp.pad(x_nhwc, ((0, 0), (1, 1), (1, 1), (0, 0)))
        Hp, Wp = (H + 2) // 2, (W + 2) // 2
        xp = xp.reshape(N, Hp, 2, Wp, 2, C).transpose(0, 1, 3, 2, 4, 5)
        xp = xp.reshape(N, Hp, Wp, 4 * C)
        Hout, Wout, ck = H // 2, W // 2, 2

    cin_eff = xp.shape[-1]
    cin_p = p["cin_p"]
    assert p["ck"] == ck and cin_p >= cin_eff
    if cin_p > cin_eff:                      # only conv0 (3 -> 8)
        xp = jnp.pad(xp, ((0, 0), (0, 0), (0, 0), (0, cin_p - cin_eff)))

    # Flatten spatial dims.  For flattened output position q = h*Wp + w the
    # tap (ti, tj) reads flat row q + ti*Wp + tj (positions w >= Wout are
    # garbage columns sliced away afterwards).
    P = Hout * Wp
    P8 = _round_up(P, 8)
    tm = P8 if P8 <= 2048 else 512
    P_pad = _round_up(P, tm)
    mblocks = P_pad // tm
    max_off = (ck - 1) * (Wp + 1)
    L = _round_up(max(Hp * Wp, P_pad + max_off), 8)
    xf = xp.reshape(N, Hp * Wp, cin_p)
    if L > Hp * Wp:
        xf = jnp.pad(xf, ((0, 0), (0, L - Hp * Wp), (0, 0)))
    xf = xf.astype(jnp.bfloat16)

    cout_pad = p["cout_pad"]
    tn = 256 if cout_pad % 256 == 0 else 128
    taps = tuple(ti * Wp + tj for ti in range(ck) for tj in range(ck))

    kernel = functools.partial(_fused_conv_kernel, tap_offsets=taps, tm=tm,
                               mblocks=mblocks, neg_slope=NEG_SLOPE)
    cost = pl.CostEstimate(
        flops=2 * N * P_pad * (ck * ck * cin_p) * cout_pad,
        transcendentals=0,
        bytes_accessed=(N * L * cin_p + ck * ck * cin_p * cout_pad) * 2
                       + cout_pad * 4 + N * P_pad * cout_pad * 2)

    out = pl.pallas_call(
        kernel,
        out_shape=jax.ShapeDtypeStruct((N, P_pad, cout_pad), jnp.bfloat16),
        grid_spec=pltpu.PrefetchScalarGridSpec(
            num_scalar_prefetch=0,
            grid=(N, cout_pad // tn, mblocks),
            in_specs=[
                pl.BlockSpec((1, L, cin_p), lambda n, j, m: (n, 0, 0)),
                pl.BlockSpec((ck * ck, cin_p, tn), lambda n, j, m: (0, 0, j)),
                pl.BlockSpec((1, tn), lambda n, j, m: (0, j)),
            ],
            out_specs=pl.BlockSpec((1, tm, tn), lambda n, j, m: (n, m, j)),
        ),
        compiler_params=pltpu.CompilerParams(
            dimension_semantics=("parallel", "parallel", "arbitrary"),
            vmem_limit_bytes=VMEM_LIMIT),
        cost_estimate=cost,
    )(xf, p["w"], p["bias"])

    out = out[:, :Hout * Wp, :].reshape(N, Hout, Wp, cout_pad)
    return out[:, :, :Wout, :]


# ----------------------------------------------------------------------------
# Fused classifier: FC1 + LeakyReLU + FC2 in one launch (bf16 MXU operands).
# ----------------------------------------------------------------------------
def _classifier_kernel(x_ref, w1_ref, b1_ref, w2_ref, b2_ref, o_ref):
    h = jnp.dot(x_ref[...], w1_ref[...], preferred_element_type=jnp.float32)
    h = h + b1_ref[...]
    h = jnp.where(h >= 0.0, h, NEG_SLOPE * h)
    y = jnp.dot(h.astype(jnp.bfloat16), w2_ref[...],
                preferred_element_type=jnp.float32) + b2_ref[...]
    o_ref[...] = y


def classifier(x, fc1, fc2, n_valid):
    M, K = x.shape
    H1 = fc1["w"].shape[1]
    H2 = fc2["w"].shape[1]
    tm = min(128, _round_up(M, 8))
    Mp = _round_up(M, tm)
    if Mp != M:
        x = jnp.pad(x, ((0, Mp - M), (0, 0)))
    cost = pl.CostEstimate(
        flops=2 * Mp * K * H1 + 2 * Mp * H1 * H2,
        transcendentals=0,
        bytes_accessed=Mp * K * 2 + K * H1 * 2 + H1 * H2 * 2 + Mp * H2 * 4)
    out = pl.pallas_call(
        _classifier_kernel,
        out_shape=jax.ShapeDtypeStruct((Mp, H2), jnp.float32),
        grid_spec=pltpu.PrefetchScalarGridSpec(
            num_scalar_prefetch=0,
            grid=(Mp // tm,),
            in_specs=[
                pl.BlockSpec((tm, K), lambda i: (i, 0)),
                pl.BlockSpec((K, H1), lambda i: (0, 0)),
                pl.BlockSpec((1, H1), lambda i: (0, 0)),
                pl.BlockSpec((H1, H2), lambda i: (0, 0)),
                pl.BlockSpec((1, H2), lambda i: (0, 0)),
            ],
            out_specs=pl.BlockSpec((tm, H2), lambda i: (i, 0)),
        ),
        compiler_params=pltpu.CompilerParams(
            dimension_semantics=("parallel",),
            vmem_limit_bytes=VMEM_LIMIT),
        cost_estimate=cost,
    )(x, fc1["w"], fc1["b"], fc2["w"], fc2["b"])
    return out[:n_valid, :1]


# ----------------------------------------------------------------------------
# Parameter initialization (deterministic, synthetic; eval-mode BN folded).
# ----------------------------------------------------------------------------
def conv_configs(in_nc, nf):
    # (Cin, Cout, kernel, stride, has_bn); padding = (k-1)//2 = 1 everywhere.
    return [
        (in_nc,  nf,     3, 1, False),
        (nf,     nf,     4, 2, True),
        (nf,     2 * nf, 3, 1, True),
        (2 * nf, 2 * nf, 4, 2, True),
        (2 * nf, 4 * nf, 3, 1, True),
        (4 * nf, 4 * nf, 4, 2, True),
        (4 * nf, 8 * nf, 3, 1, True),
        (8 * nf, 8 * nf, 4, 2, True),
        (8 * nf, 8 * nf, 3, 1, True),
        (8 * nf, 8 * nf, 4, 2, True),
    ]


def init_params(key, in_nc, base_nf, input_patch_size):
    convs = []
    for (cin, cout, k, stride, has_bn) in conv_configs(in_nc, base_nf):
        key, kw_, kb_, kg_, kbe_, km_, kv_ = jax.random.split(key, 7)
        w = jax.random.normal(kw_, (k, k, cin, cout), jnp.float32) * (
            1.0 / np.sqrt(k * k * cin))
        b = jax.random.normal(kb_, (cout,), jnp.float32) * 0.05
        if has_bn:
            gamma = 1.0 + 0.1 * jax.random.normal(kg_, (cout,), jnp.float32)
            beta = 0.1 * jax.random.normal(kbe_, (cout,), jnp.float32)
            mean = 0.1 * jax.random.normal(km_, (cout,), jnp.float32)
            var = jnp.abs(jax.random.normal(kv_, (cout,), jnp.float32)) + 0.5
            scale = gamma / jnp.sqrt(var + BN_EPS)        # fold eval-mode BN
            bias = (b - mean) * scale + beta
        else:
            scale = jnp.ones((cout,), jnp.float32)
            bias = b
        w = w * scale[None, None, None, :]                # fold scale into W
        cout_pad = _round_up(cout, LANE)

        if stride == 1:
            cin_eff, ck = cin, k
            wk = w.reshape(k * k, cin, cout)              # tap t = i*k + j
        else:
            # Space-to-depth weight rearrangement:
            #   W2[bi, bj, (2*di+dj)*Cin + c, o] = W[2*bi+di, 2*bj+dj, c, o]
            cin_eff, ck = 4 * cin, 2
            wk = w.reshape(2, 2, 2, 2, cin, cout)         # [bi, di, bj, dj, c, o]
            wk = wk.transpose(0, 2, 1, 3, 4, 5)           # [bi, bj, di, dj, c, o]
            wk = wk.reshape(4, 4 * cin, cout)             # tap t = bi*2 + bj
        cin_p = _round_up(cin_eff, 8)                     # NO per-tap 128 padding
        wk = jnp.pad(wk, ((0, 0), (0, cin_p - cin_eff), (0, cout_pad - cout)))
        bias = jnp.pad(bias, (0, cout_pad - cout)).reshape(1, cout_pad)
        convs.append(dict(
            w=wk.astype(jnp.bfloat16), bias=bias.astype(jnp.float32),
            k=k, stride=stride, ck=ck, cin_p=cin_p,
            cout=cout, cout_pad=cout_pad))

    # FC input size (mirrors the np.ceil((P-1)/2) bookkeeping in __init__).
    fc_size = float(input_patch_size)
    for _ in range(5):
        fc_size = np.ceil((fc_size - 1) / 2)
    fcs = int(fc_size)
    c_real = base_nf * 8
    c_pad = _round_up(c_real, LANE)
    fc_in = c_real * fcs * fcs

    key, k1, k1b, k2, k2b = jax.random.split(key, 5)
    w1 = jax.random.normal(k1, (fc_in, 100), jnp.float32) * (1.0 / np.sqrt(fc_in))
    b1 = jax.random.normal(k1b, (100,), jnp.float32) * 0.05
    # Fold the NCHW flatten order (c, h, w) AND the channel padding into the
    # FC1 weight rows so the channel-padded NHWC activation flattens directly.
    w1 = w1.reshape(c_real, fcs, fcs, 100).transpose(1, 2, 0, 3)   # (h, w, c, 100)
    w1 = jnp.pad(w1, ((0, 0), (0, 0), (0, c_pad - c_real), (0, 28)))
    w1 = w1.reshape(fcs * fcs * c_pad, 128).astype(jnp.bfloat16)
    b1 = jnp.pad(b1, (0, 28)).reshape(1, 128)

    w2 = jax.random.normal(k2, (100, 1), jnp.float32) * 0.1
    b2 = jax.random.normal(k2b, (1,), jnp.float32) * 0.05
    w2 = jnp.pad(w2, ((0, 28), (0, 127))).astype(jnp.bfloat16)     # (128, 128)
    b2 = jnp.pad(b2, (0, 127)).reshape(1, 128)

    return dict(convs=convs, fc1=dict(w=w1, b=b1), fc2=dict(w=w2, b=b2))


# ----------------------------------------------------------------------------
# Forward pass
# ----------------------------------------------------------------------------
def discriminator_forward(x_nchw, params):
    N = x_nchw.shape[0]
    x = jnp.transpose(x_nchw, (0, 2, 3, 1)).astype(jnp.bfloat16)   # NCHW -> NHWC
    n_layers = len(params["convs"])
    for li, p in enumerate(params["convs"]):
        y = conv_layer(x, p)                      # (N, Hout, Wout, cout_pad)
        if li + 1 < n_layers:
            x = y[..., :p["cout"]]                # feed only real channels on
        else:
            x = y                                 # keep pad for the FC flatten
    xf = x.reshape(N, -1).astype(jnp.bfloat16)    # matches padded FC1 rows
    return classifier(xf, params["fc1"], params["fc2"], n_valid=N)   # (N, 1)


if __name__ == "__main__":
    # Small-shape instance: batch=2, in_nc=3, base_nf=8, input patch 32x32
    # (32 -> 16 -> 8 -> 4 -> 2 -> 1 through the five stride-2 convs).
    batch, in_nc, base_nf, patch = 2, 3, 8, 32

    key = jax.random.PRNGKey(0)
    key, kx, kp = jax.random.split(key, 3)
    x = jax.random.normal(kx, (batch, in_nc, patch, patch), jnp.float32)
    params = init_params(kp, in_nc, base_nf, patch)

    out = discriminator_forward(x, params)
    out = jax.block_until_ready(out)

    assert out.shape == (batch, 1), f"unexpected output shape {out.shape}"
    assert bool(jnp.all(jnp.isfinite(out))), "non-finite values in output"
    print("KERNEL_OK")
</pallas_src>

<mosaic_0001>
module attributes {stable_mosaic.version = 11 : i64} {
  func.func @_fused_conv_kernel(%arg0: i32, %arg1: i32, %arg2: i32, %arg3: memref<1x1160x8xbf16, #tpu.memory_space<vmem>>, %arg4: memref<9x8x128xbf16, #tpu.memory_space<vmem>>, %arg5: memref<1x128xf32, #tpu.memory_space<vmem>>, %arg6: memref<1x1088x128xbf16, #tpu.memory_space<vmem>>) attributes {dimension_semantics = [#tpu.dimension_semantics<parallel>, #tpu.dimension_semantics<parallel>, #tpu.dimension_semantics<arbitrary>], iteration_bounds = array<i64: 2, 1, 1>, scalar_prefetch = 0 : i64, scratch_operands = 0 : i64, tpu.core_type = #tpu.core_type<tc>, window_params = [{transform_indices = @transform_0, window_bounds = array<i64: 1, 1160, 8>}, {transform_indices = @transform_1, window_bounds = array<i64: 9, 8, 128>}, {transform_indices = @transform_2, window_bounds = array<i64: 1, 128>}, {transform_indices = @transform_3, window_bounds = array<i64: 1, 1088, 128>}]} {
    %cst = arith.constant 0.000000e+00 : f32
    %0 = vector.broadcast %cst : f32 to vector<1088x128xf32>
    %c0 = arith.constant 0 : index
    %c0_0 = arith.constant 0 : index
    %c0_1 = arith.constant 0 : index
    %1 = vector.load %arg3[%c0, %c0_0, %c0_1] : memref<1x1160x8xbf16, #tpu.memory_space<vmem>>, vector<1x1088x8xbf16>
    %2 = vector.shape_cast %1 : vector<1x1088x8xbf16> to vector<1088x8xbf16>
    %c0_2 = arith.constant 0 : index
    %c0_3 = arith.constant 0 : index
    %c0_4 = arith.constant 0 : index
    %3 = vector.load %arg4[%c0_2, %c0_3, %c0_4] : memref<9x8x128xbf16, #tpu.memory_space<vmem>>, vector<1x8x128xbf16>
    %4 = vector.shape_cast %3 : vector<1x8x128xbf16> to vector<8x128xbf16>
    %cst_5 = arith.constant dense<0.000000e+00> : vector<1088x128xf32>
    %5 = tpu.matmul %2, %4, %cst_5 {dimension_numbers = #tpu.dot_dimension_numbers<[1], [0], [0], [1], [0, 0, 1, 1], [], []>} : vector<1088x8xbf16>, vector<8x128xbf16>, vector<1088x128xf32> -> vector<1088x128xf32>
    %6 = arith.addf %0, %5 : vector<1088x128xf32>
    %c0_6 = arith.constant 0 : index
    %c1 = arith.constant 1 : index
    %c0_7 = arith.constant 0 : index
    %7 = vector.load %arg3[%c0_6, %c1, %c0_7] : memref<1x1160x8xbf16, #tpu.memory_space<vmem>>, vector<1x1088x8xbf16>
    %8 = vector.shape_cast %7 : vector<1x1088x8xbf16> to vector<1088x8xbf16>
    %c1_8 = arith.constant 1 : index
    %c0_9 = arith.constant 0 : index
    %c0_10 = arith.constant 0 : index
    %9 = vector.load %arg4[%c1_8, %c0_9, %c0_10] : memref<9x8x128xbf16, #tpu.memory_space<vmem>>, vector<1x8x128xbf16>
    %10 = vector.shape_cast %9 : vector<1x8x128xbf16> to vector<8x128xbf16>
    %cst_11 = arith.constant dense<0.000000e+00> : vector<1088x128xf32>
    %11 = tpu.matmul %8, %10, %cst_11 {dimension_numbers = #tpu.dot_dimension_numbers<[1], [0], [0], [1], [0, 0, 1, 1], [], []>} : vector<1088x8xbf16>, vector<8x128xbf16>, vector<1088x128xf32> -> vector<1088x128xf32>
    %12 = arith.addf %6, %11 : vector<1088x128xf32>
    %c0_12 = arith.constant 0 : index
    %c2 = arith.constant 2 : index
    %c0_13 = arith.constant 0 : index
    %13 = vector.load %arg3[%c0_12, %c2, %c0_13] : memref<1x1160x8xbf16, #tpu.memory_space<vmem>>, vector<1x1088x8xbf16>
    %14 = vector.shape_cast %13 : vector<1x1088x8xbf16> to vector<1088x8xbf16>
    %c2_14 = arith.constant 2 : index
    %c0_15 = arith.constant 0 : index
    %c0_16 = arith.constant 0 : index
    %15 = vector.load %arg4[%c2_14, %c0_15, %c0_16] : memref<9x8x128xbf16, #tpu.memory_space<vmem>>, vector<1x8x128xbf16>
    %16 = vector.shape_cast %15 : vector<1x8x128xbf16> to vector<8x128xbf16>
    %cst_17 = arith.constant dense<0.000000e+00> : vector<1088x128xf32>
    %17 = tpu.matmul %14, %16, %cst_17 {dimension_numbers = #tpu.dot_dimension_numbers<[1], [0], [0], [1], [0, 0, 1, 1], [], []>} : vector<1088x8xbf16>, vector<8x128xbf16>, vector<1088x128xf32> -> vector<1088x128xf32>
    %18 = arith.addf %12, %17 : vector<1088x128xf32>
    %c0_18 = arith.constant 0 : index
    %c34 = arith.constant 34 : index
    %c0_19 = arith.constant 0 : index
    %19 = vector.load %arg3[%c0_18, %c34, %c0_19] : memref<1x1160x8xbf16, #tpu.memory_space<vmem>>, vector<1x1088x8xbf16>
    %20 = vector.shape_cast %19 : vector<1x1088x8xbf16> to vector<1088x8xbf16>
    %c3 = arith.constant 3 : index
    %c0_20 = arith.constant 0 : index
    %c0_21 = arith.constant 0 : index
    %21 = vector.load %arg4[%c3, %c0_20, %c0_21] : memref<9x8x128xbf16, #tpu.memory_space<vmem>>, vector<1x8x128xbf16>
    %22 = vector.shape_cast %21 : vector<1x8x128xbf16> to vector<8x128xbf16>
    %cst_22 = arith.constant dense<0.000000e+00> : vector<1088x128xf32>
    %23 = tpu.matmul %20, %22, %cst_22 {dimension_numbers = #tpu.dot_dimension_numbers<[1], [0], [0], [1], [0, 0, 1, 1], [], []>} : vector<1088x8xbf16>, vector<8x128xbf16>, vector<1088x128xf32> -> vector<1088x128xf32>
    %24 = arith.addf %18, %23 : vector<1088x128xf32>
    %c0_23 = arith.constant 0 : index
    %c35 = arith.constant 35 : index
    %c0_24 = arith.constant 0 : index
    %25 = vector.load %arg3[%c0_23, %c35, %c0_24] : memref<1x1160x8xbf16, #tpu.memory_space<vmem>>, vector<1x1088x8xbf16>
    %26 = vector.shape_cast %25 : vector<1x1088x8xbf16> to vector<1088x8xbf16>
    %c4 = arith.constant 4 : index
    %c0_25 = arith.constant 0 : index
    %c0_26 = arith.constant 0 : index
    %27 = vector.load %arg4[%c4, %c0_25, %c0_26] : memref<9x8x128xbf16, #tpu.memory_space<vmem>>, vector<1x8x128xbf16>
    %28 = vector.shape_cast %27 : vector<1x8x128xbf16> to vector<8x128xbf16>
    %cst_27 = arith.constant dense<0.000000e+00> : vector<1088x128xf32>
    %29 = tpu.matmul %26, %28, %cst_27 {dimension_numbers = #tpu.dot_dimension_numbers<[1], [0], [0], [1], [0, 0, 1, 1], [], []>} : vector<1088x8xbf16>, vector<8x128xbf16>, vector<1088x128xf32> -> vector<1088x128xf32>
    %30 = arith.addf %24, %29 : vector<1088x128xf32>
    %c0_28 = arith.constant 0 : index
    %c36 = arith.constant 36 : index
    %c0_29 = arith.constant 0 : index
    %31 = vector.load %arg3[%c0_28, %c36, %c0_29] : memref<1x1160x8xbf16, #tpu.memory_space<vmem>>, vector<1x1088x8xbf16>
    %32 = vector.shape_cast %31 : vector<1x1088x8xbf16> to vector<1088x8xbf16>
    %c5 = arith.constant 5 : index
    %c0_30 = arith.constant 0 : index
    %c0_31 = arith.constant 0 : index
    %33 = vector.load %arg4[%c5, %c0_30, %c0_31] : memref<9x8x128xbf16, #tpu.memory_space<vmem>>, vector<1x8x128xbf16>
    %34 = vector.shape_cast %33 : vector<1x8x128xbf16> to vector<8x128xbf16>
    %cst_32 = arith.constant dense<0.000000e+00> : vector<1088x128xf32>
    %35 = tpu.matmul %32, %34, %cst_32 {dimension_numbers = #tpu.dot_dimension_numbers<[1], [0], [0], [1], [0, 0, 1, 1], [], []>} : vector<1088x8xbf16>, vector<8x128xbf16>, vector<1088x128xf32> -> vector<1088x128xf32>
    %36 = arith.addf %30, %35 : vector<1088x128xf32>
    %c0_33 = arith.constant 0 : index
    %c68 = arith.constant 68 : index
    %c0_34 = arith.constant 0 : index
    %37 = vector.load %arg3[%c0_33, %c68, %c0_34] : memref<1x1160x8xbf16, #tpu.memory_space<vmem>>, vector<1x1088x8xbf16>
    %38 = vector.shape_cast %37 : vector<1x1088x8xbf16> to vector<1088x8xbf16>
    %c6 = arith.constant 6 : index
    %c0_35 = arith.constant 0 : index
    %c0_36 = arith.constant 0 : index
    %39 = vector.load %arg4[%c6, %c0_35, %c0_36] : memref<9x8x128xbf16, #tpu.memory_space<vmem>>, vector<1x8x128xbf16>
    %40 = vector.shape_cast %39 : vector<1x8x128xbf16> to vector<8x128xbf16>
    %cst_37 = arith.constant dense<0.000000e+00> : vector<1088x128xf32>
    %41 = tpu.matmul %38, %40, %cst_37 {dimension_numbers = #tpu.dot_dimension_numbers<[1], [0], [0], [1], [0, 0, 1, 1], [], []>} : vector<1088x8xbf16>, vector<8x128xbf16>, vector<1088x128xf32> -> vector<1088x128xf32>
    %42 = arith.addf %36, %41 : vector<1088x128xf32>
    %c0_38 = arith.constant 0 : index
    %c69 = arith.constant 69 : index
    %c0_39 = arith.constant 0 : index
    %43 = vector.load %arg3[%c0_38, %c69, %c0_39] : memref<1x1160x8xbf16, #tpu.memory_space<vmem>>, vector<1x1088x8xbf16>
    %44 = vector.shape_cast %43 : vector<1x1088x8xbf16> to vector<1088x8xbf16>
    %c7 = arith.constant 7 : index
    %c0_40 = arith.constant 0 : index
    %c0_41 = arith.constant 0 : index
    %45 = vector.load %arg4[%c7, %c0_40, %c0_41] : memref<9x8x128xbf16, #tpu.memory_space<vmem>>, vector<1x8x128xbf16>
    %46 = vector.shape_cast %45 : vector<1x8x128xbf16> to vector<8x128xbf16>
    %cst_42 = arith.constant dense<0.000000e+00> : vector<1088x128xf32>
    %47 = tpu.matmul %44, %46, %cst_42 {dimension_numbers = #tpu.dot_dimension_numbers<[1], [0], [0], [1], [0, 0, 1, 1], [], []>} : vector<1088x8xbf16>, vector<8x128xbf16>, vector<1088x128xf32> -> vector<1088x128xf32>
    %48 = arith.addf %42, %47 : vector<1088x128xf32>
    %c0_43 = arith.constant 0 : index
    %c70 = arith.constant 70 : index
    %c0_44 = arith.constant 0 : index
    %49 = vector.load %arg3[%c0_43, %c70, %c0_44] : memref<1x1160x8xbf16, #tpu.memory_space<vmem>>, vector<1x1088x8xbf16>
    %50 = vector.shape_cast %49 : vector<1x1088x8xbf16> to vector<1088x8xbf16>
    %c8 = arith.constant 8 : index
    %c0_45 = arith.constant 0 : index
    %c0_46 = arith.constant 0 : index
    %51 = vector.load %arg4[%c8, %c0_45, %c0_46] : memref<9x8x128xbf16, #tpu.memory_space<vmem>>, vector<1x8x128xbf16>
    %52 = vector.shape_cast %51 : vector<1x8x128xbf16> to vector<8x128xbf16>
    %cst_47 = arith.constant dense<0.000000e+00> : vector<1088x128xf32>
    %53 = tpu.matmul %50, %52, %cst_47 {dimension_numbers = #tpu.dot_dimension_numbers<[1], [0], [0], [1], [0, 0, 1, 1], [], []>} : vector<1088x8xbf16>, vector<8x128xbf16>, vector<1088x128xf32> -> vector<1088x128xf32>
    %54 = arith.addf %48, %53 : vector<1088x128xf32>
    %c0_48 = arith.constant 0 : index
    %c0_49 = arith.constant 0 : index
    %55 = vector.load %arg5[%c0_48, %c0_49] : memref<1x128xf32, #tpu.memory_space<vmem>>, vector<1x128xf32>
    %56 = vector.broadcast %55 : vector<1x128xf32> to vector<1088x128xf32>
    %57 = arith.addf %54, %56 : vector<1088x128xf32>
    %cst_50 = arith.constant 0.000000e+00 : f32
    %58 = vector.broadcast %cst_50 : f32 to vector<1088x128xf32>
    %59 = arith.cmpf oge, %57, %58 : vector<1088x128xf32>
    %cst_51 = arith.constant 2.000000e-01 : f32
    %60 = vector.broadcast %cst_51 : f32 to vector<1088x128xf32>
    %61 = arith.mulf %60, %57 : vector<1088x128xf32>
    %62 = arith.select %59, %57, %61 : vector<1088x128xi1>, vector<1088x128xf32>
    %63 = arith.truncf %62 : vector<1088x128xf32> to vector<1088x128xbf16>
    %c0_52 = arith.constant 0 : index
    %c0_53 = arith.constant 0 : index
    %c0_54 = arith.constant 0 : index
    %64 = vector.load %arg6[%c0_52, %c0_53, %c0_54] : memref<1x1088x128xbf16, #tpu.memory_space<vmem>>, vector<1x1088x128xbf16>
    %65 = vector.shape_cast %64 : vector<1x1088x128xbf16> to vector<1088x128xbf16>
    %66 = vector.shape_cast %63 : vector<1088x128xbf16> to vector<1x1088x128xbf16>
    tpu.vector_store %arg6[%c0_52, %c0_53, %c0_54], %66 {strides = array<i32>} : memref<1x1088x128xbf16, #tpu.memory_space<vmem>>, vector<1x1088x128xbf16>,
    return
  }
  func.func @transform_0(%arg0: i32, %arg1: i32, %arg2: i32) -> (i32, i32, i32) {
    %c0_i32 = arith.constant 0 : i32
    %c0_i32_0 = arith.constant 0 : i32
    %c0_i32_1 = arith.constant 0 : i32
    return %arg0, %c0_i32, %c0_i32_0 : i32, i32, i32
  }
  func.func @transform_1(%arg0: i32, %arg1: i32, %arg2: i32) -> (i32, i32, i32) {
    %c0_i32 = arith.constant 0 : i32
    %c0_i32_0 = arith.constant 0 : i32
    %c0_i32_1 = arith.constant 0 : i32
    return %c0_i32, %c0_i32_0, %arg1 : i32, i32, i32
  }
  func.func @transform_2(%arg0: i32, %arg1: i32, %arg2: i32) -> (i32, i32) {
    %c0_i32 = arith.constant 0 : i32
    %c0_i32_0 = arith.constant 0 : i32
    return %c0_i32, %arg1 : i32, i32
  }
  func.func @transform_3(%arg0: i32, %arg1: i32, %arg2: i32) -> (i32, i32, i32) {
    %c0_i32 = arith.constant 0 : i32
    return %arg0, %arg2, %arg1 : i32, i32, i32
  }
}

</mosaic_0001>

<bundles_post_ra>
// kernel: tpu_custom_call.1
= control target key start
LH: loop header
LB: loop body
LE: loop exit
PB: predicated region body
PF: predicated region fallthrough
CT: control target
= control target key end

     0   :  { %8 = vsyncpa [#allocation3], 0  ;;  %s21537_s0 = inlined_call_operand.vmem [shape: bf16[2,1160,8], index: 0, kind: input, shape index: {}]   ;;  %s21538_s1 = inlined_call_operand.vmem [shape: bf16[9,8,128], index: 1, kind: input, shape index: {}]   ;;  %s21539_s2 = inlined_call_operand.vmem [shape: f32[1,128], index: 2, kind: input, shape index: {}]   ;;  %s21540_s3 = inlined_call_operand.hbm [shape: bf16[2,1088,128], index: 3, kind: output, shape index: {}]  }
   0x1   :  { %10 = vsyncpa [#allocation3 + $0x1], 0  ;;  %s18631_s12 = smov 0   ;;  %s18633_s13 = smov 0  }
   0x2   :  { %s18635_s14 = smov 0   ;;  %s18637_s15 = smov 0  }
   0x3   :  { %s18639_s16 = smov 0   ;;  %s18641_s17 = smov 0  }
   0x4 LB: > { %s13475_s18 = sadd.s32 4294967295, %s18606_s17   ;;  %s13476_s19 = sadd.s32 4294967294, %s18606_s17   ;;  %s18606_s17 = sphi %s18641_s17, %s16_s17   ;;  %s18602_s16 = sphi %s18639_s16, %s21761_s16   ;;  %s18598_s15 = sphi %s18637_s15, %s21760_s15   ;;  %s18594_s14 = sphi %s18635_s14, %s21759_s14   ;;  %s18590_s13 = sphi %s18633_s13, %s21758_s13   ;;  %s18586_s12 = sphi %s18631_s12, %s21757_s12  }
   0x5   : > { %s35_s20 = sadd.s32 1, %s18602_s16  ;;  %s124_s21 = sadd.s32 1, %s18594_s14 }
   0x6   : > { %p37_p0 = scmp.ge.s32.totalorder %s35_s20, 2  ;;  %p134_p1 = scmp.ne.s32.totalorder %s18594_s14, %s18590_s13 }
   0x7   : > { %p135_p2 = scmp.eq.s32.totalorder %s13475_s18, 1  ;;  %p140_p3 = scmp.ne.s32.totalorder %s18590_s13, %s18586_s12 }
   0x8   : > { %s21763_s20 = smov (%p37_p0, %s35_s20), 0  ;;  %p141_p5 = scmp.eq.s32.totalorder %s13476_s19, 1 }
   0x9   : > { %p18671_p4 = por %p135_p2, %p134_p1  ;;  %s117_s23 = ssub.s32 %s18602_s16, %s21763_s20 }
   0xa   : > { %p13481_p6 = scmp.ge.s32.totalorder %s18606_s17, 1  ;;  %p122_p7 = scmp.eq.s32.totalorder %s117_s23, 0 }
   0xb   : > { %p18678_p8 = por %p141_p5, %p140_p3  ;;  %p180_p9 = scmp.lt.s32.totalorder %s18606_s17, 3 }
   0xc   : > { %s18684_s25 = scalar_select %p122_p7, %s18594_s14, %s124_s21  }
   0xd   : > { %p181_p10 = pnand %p13481_p6, %p180_p9 }
   0xf   : > { %184 = sbr.rel (%p181_p10) target bundleno = 1498 (0x5da), region = 32 }
  0x16   : > { %v13483_v0 = vld [vmem:[%s21538_s1 + $0x4] sm:$0xf]  ;;  %vm1462_vm0 = vcmask 1043456   ;;  %v13897_v1 = vld [vmem:[%s21538_s1 + $0x10] sm:$0xf]  ;;  %p211_p11 = scmp.lt.s32.totalorder %s18598_s15, 1 }
  0x17   : > { %17951 = vmatprep.subr.msk.bf16.mxu1 %vm1462_vm0, %v13483_v0  ;;  %17955 = vmatprep.subr.msk.bf16.mxu0 %vm1462_vm0, %v13897_v1  ;;  %v1464_v2 = vsel %vm1462_vm0, %v13483_v0, 0  ;;  %v18697_v3 = vsel %vm1462_vm0, %v13897_v1, 0  ;;  %v361_v4 = vld [vmem:[%s21538_s1] sm:$0xf]  ;;  %v13967_v5 = vld [vmem:[%s21538_s1 + $0x14] sm:$0xf] }
  0x18   : > { %21598 = vst [vmem:[#allocation5_spill] sm:$0xff] %v18697_v3  ;;  %15620 = vmatpush3.bf16.msra.mxu1 %v1464_v2  ;;  %16172 = vmatpush3.bf16.msra.mxu0 %v18697_v3  ;;  %s212_s30 = scalar_select %p211_p11, %s18598_s15, 1  ;;  %vm708_vm1 = vsmask.f32 7424  ;;  %vm1257_vm2 = vcmask 64512   ;;  %v2180_v6 = vsel %vm1462_vm0, %v361_v4, 0 }
  0x19   : > { %17952 = vmatprep.subr.msk.bf16.mxu1 %vm1462_vm0, %v361_v4  ;;  %17957 = vmatprep.subr.msk.bf16.mxu0 %vm1462_vm0, %v13967_v5  ;;  %vm5368_vm3 = vsmask.f32 6400  ;;  %v18722_v12 = vsel %vm1462_vm0, %v13967_v5, 0  ;;  %vm6915_vm4 = vcmask 1045504   ;;  %vm2765_vm5 = vcmask 1046528   ;;  %s208_s9 = sand.u32 1, %s18590_s13  }
  0x1a   : > { %s17962_s8 = smul.u32 580, %s212_s30  ;;  %vm9518_vm6 = vsmask.f32 5376  ;;  %vm11065_vm7 = vcmask 1044480   ;;  %s18608_s5 = smov [#allocation2]  }
  0x1b   : > { %s21087_s10 = smul.u32 544, %s208_s9  ;;  %s18532_s6 = sshll.u32 %s18608_s5, 4  ;;  %s18533_s6 = int_to_ptr.vmem [resolvable:$false] %s18532_s6 }
  0x1c   : > { %s18712_s11 = scalar_lea.vmem %s21537_s0, %s17962_s8  ;;  %s17963_s26 = smul.u32 8704, %s18598_s15 }
  0x1d   : > { %v225_v7 = vld [vmem:[%s18712_s11] sm:$0xf]  ;;  %v226_v8 = vld [vmem:[%s18712_s11 + $0x4] sm:$0xf]  ;;  %v18022_v10 = vld [vmem:[%s18712_s11 + $0x8] sm:$0xff]   ;;  %s21110_s18 = scalar_lea.vmem [#allocation2], %s21087_s10 }
  0x1e   : > { %v18717_v9 = vcombine.low %v225_v7, %v226_v8  ;;  %v3823_v11 = vld [vmem:[%s18712_s11 + $0x10] sm:$0xe]  ;;  %v3824_v13 = vld [vmem:[%s18712_s11 + $0x14] sm:$0xf]  ;;  %v717_v16 = vshll.u32 %v18022_v10, 16  ;;  %v721_v17 = vshrl.u32 %v18022_v10, 16  ;;  %s21483_s30 = scalar_lea.hbm %s21540_s3, %s17963_s26 }
  0x1f   : > { %v18024_v18 = vld [vmem:[%s18712_s11 + $0x18] sm:$0xff]   ;;  %v18025_v19 = vld [vmem:[%s18712_s11 + $0x10] sm:$0xff]   ;;  %v18729_v20 = vcombine.low %v3823_v11, %v3824_v13  ;;  %v18026_v28 = vld [vmem:[%s18712_s11 + $0x20] sm:$0xff]   ;;  %s13371_s27 = sshll.u32 %s21110_s18, 4  ;;  %s21491_s15 = scalar_lea.sflag [#allocation3], %s208_s9  ;;  %s21485_s27 = int_to_ptr.vmem [resolvable:$true] %s13371_s27 }
  0x20   : > { %v710_v14 = vshrl.u32 %v18717_v9, 16  ;;  %v712_v15 = vshll.u32 %v18717_v9, 16  ;;  %v719_v22 = vrot.slane %v717_v16, 1  ;;  %v5378_v23 = vshrl.u32 %v18024_v18, 16  ;;  %v18027_v33 = vld [vmem:[%s18712_s11 + $0x18] sm:$0xff]   ;;  %v18028_v34 = vld [vmem:[%s18712_s11 + $0x28] sm:$0xff]   ;;  %p18535_p1 = scmp.lt.s32.totalorder %s21485_s27, %s18533_s6 }
  0x21   : > { %21599 = vst [vmem:[#allocation6_spill] sm:$0xff] %v18729_v20  ;;  %v5381_v24 = vshll.u32 %v18024_v18, 16  ;;  %v5370_v25 = vshrl.u32 %v18729_v20, 16  ;;  %v5373_v26 = vshll.u32 %v18729_v20, 16  ;;  %v725_v27 = vshll.u32 %v18025_v19, 16  ;;  %v18029_v47 = vld [vmem:[%s18712_s11 + $0x20] sm:$0xff]  }
  0x22   : > { %v714_v21 = vrot.slane %v712_v15, 1  ;;  %v723_v30 = vor.u32 %v721_v17, %v719_v22  ;;  %v5380_v31 = vrot.slane %v5378_v23, 1  ;;  %v5387_v38 = vshrl.u32 %v18026_v28, 16  ;;  %v18030_v48 = vld [vmem:[%s18712_s11 + $0x30] sm:$0xff]   ;;  %v18031_v53 = vld [vmem:[%s18712_s11 + $0x28] sm:$0xff]   ;;  %v18032_v58 = vld [vmem:[%s18712_s11 + $0x38] sm:$0xff]  }
  0x23   : > { %v5383_v32 = vrot.slane %v5381_v24, 2  ;;  %v5372_v35 = vrot.slane %v5370_v25, 1  ;;  %v5375_v36 = vrot.slane %v5373_v26, 2  ;;  %v727_v37 = vrot.slane %v725_v27, 1  ;;  %v18033_v63 = vld [vmem:[%s18712_s11 + $0x30] sm:$0xff]   ;;  %v18034_v15 = vld [vmem:[%s18712_s11 + $0x40] sm:$0xff]  }
  0x24   : > { %v715_v29 = vor.u32 %v714_v21, %v710_v14  ;;  %v5390_v41 = vshll.u32 %v18026_v28, 16  ;;  %v729_v42 = vshrl.u32 %v18025_v19, 16  ;;  %v5389_v45 = vrot.slane %v5387_v38, 1  ;;  %v18035_v25 = vld [vmem:[%s18712_s11 + $0x38] sm:$0xff]   ;;  %v18037_v38 = vld [vmem:[%s18712_s11 + $0x40] sm:$0xff]   ;;  %s18528_s4 = scalar_lea.vmem %s21485_s27, 8704 }
  0x25   : > { %v5384_v40 = vor.u32 %v5383_v32, %v5380_v31  ;;  %v5376_v43 = vor.u32 %v5375_v36, %v5372_v35  ;;  %v728_v44 = vsel %vm708_vm1, %v723_v30, %v727_v37  ;;  %v733_v46 = vshll.u32 %v18027_v33, 16  ;;  %p18529_p12 = scmp.ne.s32.totalorder %s21485_s27, %s18528_s4  ;;  %s18534_s7 = scalar_lea.vmem %s18533_s6, 17408 }
  0x26   : > { %v720_v39 = vsel %vm708_vm1, %v715_v29, %v719_v22  ;;  %v5392_v49 = vrot.slane %v5390_v41, 2  ;;  %v731_v50 = vor.u32 %v729_v42, %v727_v37  ;;  %v5396_v51 = vshrl.u32 %v18028_v34, 16  ;;  %p18536_p2 = scmp.lt.s32.totalorder %s18534_s7, %s18528_s4 }
  0x27   : > { %15621 = vmatprep.mubr.msk.bf16.mxu1 %vm1257_vm2, %v720_v39  ;;  %v5399_v52 = vshll.u32 %v18028_v34, 16  ;;  %v5385_v54 = vsel %vm5368_vm3, %v5376_v43, %v5384_v40  ;;  %v735_v55 = vrot.slane %v733_v46, 1  ;;  %v737_v56 = vshrl.u32 %v18027_v33, 16  ;;  %v18036_v33 = vld [vmem:[%s18712_s11 + $0x48] sm:$0xff]   ;;  %v18038_v46 = vld [vmem:[%s18712_s11 + $0x50] sm:$0xff]   ;;  %p18530_p13 = pnand %p18529_p12, %p18671_p4 }
  0x28   : > { %15622 = vmatmul.mubr.msk.bf16.vlgmr.msra.gmra.mrb[0].mxu1 %vm1257_vm2, %v728_v44  ;;  %v741_v57 = vshll.u32 %v18029_v47, 16  ;;  %16173 = vmatprep.mubr.msk.bf16.mxu0 %vm1257_vm2, %v5385_v54  ;;  %v5393_v59 = vor.u32 %v5392_v49, %v5389_v45  ;;  %v5398_v60 = vrot.slane %v5396_v51, 1  ;;  %v5405_v62 = vshrl.u32 %v18030_v48, 16  ;;  %p18537_p3 = por %p18536_p2, %p18535_p1 }
  0x29   : > { %15758 = vmatpush3.bf16.msra.mxu1 %v2180_v6  ;;  %v5401_v61 = vrot.slane %v5399_v52, 2  ;;  %v736_v0 = vsel %vm708_vm1, %v731_v50, %v735_v55  ;;  %v739_v1 = vor.u32 %v737_v56, %v735_v55  ;;  %v5408_v4 = vshll.u32 %v18030_v48, 16  ;;  %v18040_v55 = vld [vmem:[%s18712_s11 + $0x58] sm:$0xff]   ;;  %p18531_p0 = pneg %p18530_p13 }
  0x2a   : > { %v743_v2 = vrot.slane %v741_v57, 1  ;;  %v5394_v5 = vsel %vm5368_vm3, %v5384_v40, %v5393_v59  ;;  %15625 = vmatprep.mubr.msk.bf16.mxu1 %vm1257_vm2, %v736_v0  ;;  %v5407_v7 = vrot.slane %v5405_v62, 1  ;;  %v745_v8 = vshrl.u32 %v18029_v47, 16  ;;  %v18039_v47 = vld [vmem:[%s18712_s11 + $0x48] sm:$0xff]  }
  0x2b   : > { %v5402_v6 = vor.u32 %v5401_v61, %v5398_v60  ;;  %16174 = vmatmul.mubr.msk.bf16.vlgmr.msra.gmra.mrb[0].mxu0 %vm1257_vm2, %v5394_v5  ;;  %v5410_v11 = vrot.slane %v5408_v4, 2  ;;  %v749_v13 = vshll.u32 %v18031_v53, 16  ;;  %v5414_v14 = vshrl.u32 %v18032_v58, 16  ;;  %p18538_p5 = pnand %p18537_p3, %p18531_p0 }
  0x2c   : > { %v744_v10 = vsel %vm708_vm1, %v739_v1, %v743_v2  ;;  %16310 = vmatpush3.bf16.msra.mxu0 %v18722_v12  ;;  %v747_v17 = vor.u32 %v745_v8, %v743_v2  ;;  %v5417_v18 = vshll.u32 %v18032_v58, 16  ;;  %v753_v19 = vshrl.u32 %v18031_v53, 16  ;;  %v18042_v2 = vld [vmem:[%s18712_s11 + $0x60] sm:$0xff]  }
  0x2d   : > { %v5403_v16 = vsel %vm5368_vm3, %v5393_v59, %v5402_v6  ;;  %v5411_v21 = vor.u32 %v5410_v11, %v5407_v7  ;;  %v751_v22 = vrot.slane %v749_v13, 1  ;;  %v5416_v23 = vrot.slane %v5414_v14, 1  ;;  %v18043_v13 = vld [vmem:[%s18712_s11 + $0x58] sm:$0xff]  }
  0x2e   : > { %16177 = vmatprep.mubr.msk.bf16.mxu0 %vm1257_vm2, %v5403_v16  ;;  %v757_v24 = vshll.u32 %v18033_v63, 16  ;;  %v5419_v26 = vrot.slane %v5417_v18, 2  ;;  %v5423_v27 = vshrl.u32 %v18034_v15, 16  ;;  %v5426_v28 = vshll.u32 %v18034_v15, 16  ;;  %v18044_v18 = vld [vmem:[%s18712_s11 + $0x68] sm:$0xff]  }
  0x2f   : > { %v761_v12 = vshrl.u32 %v18033_v63, 16  ;;  %v5412_v29 = vsel %vm5368_vm3, %v5402_v6, %v5411_v21  ;;  %v752_v30 = vsel %vm708_vm1, %v747_v17, %v751_v22  ;;  %v755_v31 = vor.u32 %v753_v19, %v751_v22  ;;  %v18041_v63 = vld [vmem:[%s18712_s11 + $0x50] sm:$0xff]  }
  0x30   : > { %15626 = vmatmul.mubr.msk.bf16.gmra.mrb[4].mxu1 %vm1257_vm2, %v744_v10  ;;  %v759_v32 = vrot.slane %v757_v24, 1  ;;  %v5420_v34 = vor.u32 %v5419_v26, %v5416_v23  ;;  %v5425_v35 = vrot.slane %v5423_v27, 1  ;;  %v5428_v36 = vrot.slane %v5426_v28, 2  ;;  %v18045_v28 = vld [vmem:[%s18712_s11 + $0x60] sm:$0xff]  }
  0x31   : > { %15629 = vmatprep.mubr.msk.bf16.mxu1 %vm1257_vm2, %v752_v30  ;;  %v765_v37 = vshll.u32 %v18035_v25, 16  ;;  %v5432_v40 = vshrl.u32 %v18036_v33, 16  ;;  %v5435_v41 = vshll.u32 %v18036_v33, 16  ;;  %v769_v45 = vshrl.u32 %v18035_v25, 16 }
  0x32   : > { %v763_v39 = vor.u32 %v761_v12, %v759_v32  ;;  %v5421_v42 = vsel %vm5368_vm3, %v5411_v21, %v5420_v34  ;;  %v760_v43 = vsel %vm708_vm1, %v755_v31, %v759_v32  ;;  %v773_v50 = vshll.u32 %v18037_v38, 16  ;;  %v18046_v12 = vld [vmem:[%s18712_s11 + $0x70] sm:$0xff]   ;;  %v18047_v31 = vld [vmem:[%s18712_s11 + $0x68] sm:$0xff]  }
  0x33   : > { %v767_v44 = vrot.slane %v765_v37, 1  ;;  %16178 = vmatmul.mubr.msk.bf16.gmra.mrb[4].mxu0 %vm1257_vm2, %v5412_v29  ;;  %v5434_v48 = vrot.slane %v5432_v40, 1  ;;  %v5437_v49 = vrot.slane %v5435_v41, 2  ;;  %v777_v51 = vshrl.u32 %v18037_v38, 16  ;;  %v18048_v40 = vld [vmem:[%s18712_s11 + $0x78] sm:$0xff]  }
  0x34   : > { %16181 = vmatprep.mubr.msk.bf16.mxu0 %vm1257_vm2, %v5421_v42  ;;  %v5429_v52 = vor.u32 %v5428_v36, %v5425_v35  ;;  %v5441_v54 = vshrl.u32 %v18038_v46, 16  ;;  %v775_v57 = vrot.slane %v773_v50, 1  ;;  %v5444_v58 = vshll.u32 %v18038_v46, 16  ;;  %v18050_v50 = vld [vmem:[%s18712_s11 + $0x80] sm:$0xff]  }
  0x35   : > { %v768_v53 = vsel %vm708_vm1, %v763_v39, %v767_v44  ;;  %v5438_v56 = vor.u32 %v5437_v49, %v5434_v48  ;;  %v781_v59 = vshll.u32 %v18039_v47, 16  ;;  %v5450_v61 = vshrl.u32 %v18040_v55, 16  ;;  %v18049_v49 = vld [vmem:[%s18712_s11 + $0x70] sm:$0xff]  }
  0x36   : > { %v5443_v60 = vrot.slane %v5441_v54, 1  ;;  %v5453_v62 = vshll.u32 %v18040_v55, 16  ;;  %v771_v0 = vor.u32 %v769_v45, %v767_v44  ;;  %v5446_v1 = vrot.slane %v5444_v58, 2 }
  0x37   : > { %v5430_v4 = vsel %vm5368_vm3, %v5420_v34, %v5429_v52  ;;  %v779_v5 = vor.u32 %v777_v51, %v775_v57  ;;  %v783_v6 = vrot.slane %v781_v59, 1  ;;  %v5439_v7 = vsel %vm5368_vm3, %v5429_v52, %v5438_v56 }
  0x38   : > { %15630 = vmatmul.mubr.msk.bf16.gmra.mrb[8].mxu1 %vm1257_vm2, %v760_v43  ;;  %v5452_v8 = vrot.slane %v5450_v61, 1  ;;  %v5455_v10 = vrot.slane %v5453_v62, 2  ;;  %v789_v11 = vshll.u32 %v18041_v63, 16  ;;  %v776_v14 = vsel %vm708_vm1, %v771_v0, %v775_v57  ;;  %v18051_v62 = vld [vmem:[%s18712_s11 + $0x78] sm:$0xff]  }
  0x39   : > { %15633 = vmatprep.mubr.msk.bf16.mxu1 %vm1257_vm2, %v768_v53  ;;  %v5447_v15 = vor.u32 %v5446_v1, %v5443_v60  ;;  %v785_v16 = vshrl.u32 %v18039_v47, 16  ;;  %v5459_v17 = vshrl.u32 %v18042_v2, 16  ;;  %v784_v19 = vsel %vm708_vm1, %v779_v5, %v783_v6 }
  0x3a   : > { %v5462_v21 = vshll.u32 %v18042_v2, 16  ;;  %v793_v22 = vshrl.u32 %v18041_v63, 16  ;;  %v797_v23 = vshll.u32 %v18043_v13, 16  ;;  %v5456_v24 = vor.u32 %v5455_v10, %v5452_v8 }
  0x3b   : > { %16182 = vmatmul.mubr.msk.bf16.gmra.mrb[8].mxu0 %vm1257_vm2, %v5430_v4  ;;  %v5468_v25 = vshrl.u32 %v18044_v18, 16  ;;  %v5471_v26 = vshll.u32 %v18044_v18, 16  ;;  %v791_v27 = vrot.slane %v789_v11, 1  ;;  %v787_v29 = vor.u32 %v785_v16, %v783_v6  ;;  %v18052_v4 = vld [vmem:[%s18712_s11 + $0x88] sm:$0xff]  }
  0x3c   : > { %16185 = vmatprep.mubr.msk.bf16.mxu0 %vm1257_vm2, %v5439_v7  ;;  %v5461_v30 = vrot.slane %v5459_v17, 1  ;;  %v5448_v32 = vsel %vm5368_vm3, %v5438_v56, %v5447_v15  ;;  %v5464_v33 = vrot.slane %v5462_v21, 2  ;;  %v799_v35 = vrot.slane %v797_v23, 1  ;;  %v18054_v23 = vld [vmem:[%s18712_s11 + $0x90] sm:$0xff]  }
  0x3d   : > { %v795_v34 = vor.u32 %v793_v22, %v791_v27  ;;  %v5457_v36 = vsel %vm5368_vm3, %v5447_v15, %v5456_v24  ;;  %v5470_v37 = vrot.slane %v5468_v25, 1  ;;  %v5473_v38 = vrot.slane %v5471_v26, 2  ;;  %v18053_v22 = vld [vmem:[%s18712_s11 + $0x80] sm:$0xff]  }
  0x3e   : > { %v801_v39 = vshrl.u32 %v18043_v13, 16  ;;  %v805_v41 = vshll.u32 %v18045_v28, 16  ;;  %v5477_v42 = vshrl.u32 %v18046_v12, 16  ;;  %v792_v43 = vsel %vm708_vm1, %v787_v29, %v791_v27 }
  0x3f   : > { %v5480_v44 = vshll.u32 %v18046_v12, 16  ;;  %v813_v45 = vshll.u32 %v18047_v31, 16  ;;  %v5465_v46 = vor.u32 %v5464_v33, %v5461_v30  ;;  %v800_v47 = vsel %vm708_vm1, %v795_v34, %v799_v35 }
  0x40   : > { %15634 = vmatmul.mubr.msk.bf16.gmra.mrb[12].mxu1 %vm1257_vm2, %v776_v14  ;;  %v809_v48 = vshrl.u32 %v18045_v28, 16  ;;  %v5474_v51 = vor.u32 %v5473_v38, %v5470_v37  ;;  %v5486_v52 = vshrl.u32 %v18048_v40, 16  ;;  %v5489_v53 = vshll.u32 %v18048_v40, 16  ;;  %v18056_v28 = vld [vmem:[%s18712_s11 + $0x98] sm:$0xff]  }
  0x41   : > { %15637 = vmatprep.mubr.msk.bf16.mxu1 %vm1257_vm2, %v784_v19  ;;  %v807_v54 = vrot.slane %v805_v41, 1  ;;  %v5479_v55 = vrot.slane %v5477_v42, 1  ;;  %v803_v56 = vor.u32 %v801_v39, %v799_v35  ;;  %v5482_v57 = vrot.slane %v5480_v44, 2 }
  0x42   : > { %v815_v58 = vrot.slane %v813_v45, 1  ;;  %v5466_v59 = vsel %vm5368_vm3, %v5456_v24, %v5465_v46  ;;  %v821_v61 = vshll.u32 %v18049_v49, 16  ;;  %v5475_v63 = vsel %vm5368_vm3, %v5465_v46, %v5474_v51  ;;  %v18055_v24 = vld [vmem:[%s18712_s11 + $0x88] sm:$0xff]   ;;  %v18058_v45 = vld [vmem:[%s18712_s11 + $0xa0] sm:$0xff]  }
  0x43   : > { %16186 = vmatmul.mubr.msk.bf16.gmra.mrb[12].mxu0 %vm1257_vm2, %v5448_v32  ;;  %v811_v60 = vor.u32 %v809_v48, %v807_v54  ;;  %v5488_v0 = vrot.slane %v5486_v52, 1  ;;  %v5491_v1 = vrot.slane %v5489_v53, 2  ;;  %v5495_v2 = vshrl.u32 %v18050_v50, 16  ;;  %v18059_v53 = vld [vmem:[%s18712_s11 + $0x98] sm:$0xff]  }
  0x44   : > { %16189 = vmatprep.mubr.msk.bf16.mxu0 %vm1257_vm2, %v5457_v36  ;;  %v817_v5 = vshrl.u32 %v18047_v31, 16  ;;  %v5498_v6 = vshll.u32 %v18050_v50, 16  ;;  %v808_v7 = vsel %vm708_vm1, %v803_v56, %v807_v54  ;;  %v5483_v8 = vor.u32 %v5482_v57, %v5479_v55  ;;  %v18060_v56 = vld [vmem:[%s18712_s11 + $0xa8] sm:$0xff]  }
  0x45   : > { %v816_v10 = vsel %vm708_vm1, %v811_v60, %v815_v58  ;;  %v823_v11 = vrot.slane %v821_v61, 1  ;;  %v825_v13 = vshrl.u32 %v18049_v49, 16  ;;  %v829_v14 = vshll.u32 %v18051_v62, 16 }
  0x46   : > { %v5492_v15 = vor.u32 %v5491_v1, %v5488_v0  ;;  %v5497_v16 = vrot.slane %v5495_v2, 1  ;;  %v5504_v17 = vshrl.u32 %v18052_v4, 16  ;;  %v5507_v18 = vshll.u32 %v18052_v4, 16 }
  0x47   : > { %v819_v19 = vor.u32 %v817_v5, %v815_v58  ;;  %v5500_v21 = vrot.slane %v5498_v6, 2  ;;  %v5484_v25 = vsel %vm5368_vm3, %v5474_v51, %v5483_v8  ;;  %v827_v26 = vor.u32 %v825_v13, %v823_v11  ;;  %v18062_v13 = vld [vmem:[%s18712_s11 + $0xb0] sm:$0xff]  }
  0x48   : > { %15638 = vmatmul.mubr.msk.bf16.gmra.mrb[16].mxu1 %vm1257_vm2, %v792_v43  ;;  %v831_v27 = vrot.slane %v829_v14, 1  ;;  %v5493_v12 = vsel %vm5368_vm3, %v5483_v8, %v5492_v15  ;;  %v5506_v29 = vrot.slane %v5504_v17, 1  ;;  %v5509_v30 = vrot.slane %v5507_v18, 2  ;;  %v18057_v43 = vld [vmem:[%s18712_s11 + $0x90] sm:$0xff]   ;;  %v18063_v17 = vld [vmem:[%s18712_s11 + $0xa8] sm:$0xff]  }
  0x49   : > { %15641 = vmatprep.mubr.msk.bf16.mxu1 %vm1257_vm2, %v800_v47  ;;  %v824_v31 = vsel %vm708_vm1, %v819_v19, %v823_v11  ;;  %v5501_v32 = vor.u32 %v5500_v21, %v5497_v16  ;;  %v837_v33 = vshll.u32 %v18053_v22, 16  ;;  %v833_v34 = vshrl.u32 %v18051_v62, 16 }
  0x4a   : > { %v5513_v35 = vshrl.u32 %v18054_v23, 16  ;;  %v5516_v36 = vshll.u32 %v18054_v23, 16  ;;  %v841_v37 = vshrl.u32 %v18053_v22, 16  ;;  %v832_v38 = vsel %vm708_vm1, %v827_v26, %v831_v27  ;;  %v18064_v22 = vld [vmem:[%s18712_s11 + $0xb8] sm:$0xff]  }
  0x4b   : > { %16190 = vmatmul.mubr.msk.bf16.gmra.mrb[16].mxu0 %vm1257_vm2, %v5466_v59  ;;  %v845_v39 = vshll.u32 %v18055_v24, 16  ;;  %v5522_v40 = vshrl.u32 %v18056_v28, 16  ;;  %v5510_v41 = vor.u32 %v5509_v30, %v5506_v29  ;;  %v5525_v42 = vshll.u32 %v18056_v28, 16 }
  0x4c   : > { %16193 = vmatprep.mubr.msk.bf16.mxu0 %vm1257_vm2, %v5475_v63  ;;  %v839_v44 = vrot.slane %v837_v33, 1  ;;  %v5502_v46 = vsel %vm5368_vm3, %v5492_v15, %v5501_v32  ;;  %v835_v47 = vor.u32 %v833_v34, %v831_v27  ;;  %v5515_v48 = vrot.slane %v5513_v35, 1  ;;  %v18065_v35 = vld [vmem:[%s18712_s11 + $0xb0] sm:$0xff]  }
  0x4d   : > { %v5518_v49 = vrot.slane %v5516_v36, 2  ;;  %v847_v51 = vrot.slane %v845_v39, 1  ;;  %v5524_v52 = vrot.slane %v5522_v40, 1  ;;  %v5511_v54 = vsel %vm5368_vm3, %v5501_v32, %v5510_v41 }
  0x4e   : > { %v843_v50 = vor.u32 %v841_v37, %v839_v44  ;;  %v5527_v55 = vrot.slane %v5525_v42, 2  ;;  %v849_v57 = vshrl.u32 %v18055_v24, 16  ;;  %v853_v58 = vshll.u32 %v18057_v43, 16 }
  0x4f   : > { %v5531_v59 = vshrl.u32 %v18058_v45, 16  ;;  %v840_v60 = vsel %vm708_vm1, %v835_v47, %v839_v44  ;;  %v5534_v61 = vshll.u32 %v18058_v45, 16  ;;  %v5519_v62 = vor.u32 %v5518_v49, %v5515_v48  ;;  %v18068_v47 = vld [vmem:[%s18712_s11 + $0xc8] sm:$0xff]  }
  0x50   : > { %15642 = vmatmul.mubr.msk.bf16.gmra.mrb[20].mxu1 %vm1257_vm2, %v808_v7  ;;  %v848_v63 = vsel %vm708_vm1, %v843_v50, %v847_v51  ;;  %v857_v0 = vshrl.u32 %v18057_v43, 16  ;;  %v861_v1 = vshll.u32 %v18059_v53, 16  ;;  %v5528_v2 = vor.u32 %v5527_v55, %v5524_v52  ;;  %v18067_v43 = vld [vmem:[%s18712_s11 + $0xb8] sm:$0xff]  }
  0x51   : > { %15645 = vmatprep.mubr.msk.bf16.mxu1 %vm1257_vm2, %v816_v10  ;;  %v5540_v4 = vshrl.u32 %v18060_v56, 16  ;;  %v5543_v5 = vshll.u32 %v18060_v56, 16  ;;  %v851_v6 = vor.u32 %v849_v57, %v847_v51  ;;  %v855_v7 = vrot.slane %v853_v58, 1  ;;  %v18061_v10 = vld [vmem:[%s18712_s11 + $0xa0] sm:$0xff]  }
  0x52   : > { %v5533_v8 = vrot.slane %v5531_v59, 1  ;;  %v5536_v11 = vrot.slane %v5534_v61, 2  ;;  %v5520_v14 = vsel %vm5368_vm3, %v5510_v41, %v5519_v62  ;;  %v863_v16 = vrot.slane %v861_v1, 1  ;;  %v18069_v61 = vld [vmem:[%s18712_s11 + $0xc0] sm:$0xff]  }
  0x53   : > { %16194 = vmatmul.mubr.msk.bf16.gmra.mrb[20].mxu0 %vm1257_vm2, %v5484_v25  ;;  %v859_v15 = vor.u32 %v857_v0, %v855_v7  ;;  %v5529_v18 = vsel %vm5368_vm3, %v5519_v62, %v5528_v2  ;;  %v5542_v19 = vrot.slane %v5540_v4, 1  ;;  %v5545_v21 = vrot.slane %v5543_v5, 2  ;;  %v18070_v62 = vld [vmem:[%s18712_s11 + $0xd0] sm:$0xff]  }
  0x54   : > { %16197 = vmatprep.mubr.msk.bf16.mxu0 %vm1257_vm2, %v5493_v12  ;;  %v856_v23 = vsel %vm708_vm1, %v851_v6, %v855_v7  ;;  %v869_v24 = vshll.u32 %v18061_v10, 16  ;;  %v5537_v25 = vor.u32 %v5536_v11, %v5533_v8  ;;  %v865_v26 = vshrl.u32 %v18059_v53, 16  ;;  %v18071_v6 = vld [vmem:[%s18712_s11 + $0xc8] sm:$0xff]   ;;  %v18072_v11 = vld [vmem:[%s18712_s11 + $0xd8] sm:$0xff]  }
  0x55   : > { %v5549_v27 = vshrl.u32 %v18062_v13, 16  ;;  %v5552_v28 = vshll.u32 %v18062_v13, 16  ;;  %v864_v12 = vsel %vm708_vm1, %v859_v15, %v863_v16  ;;  %v873_v29 = vshrl.u32 %v18061_v10, 16 }
  0x56   : > { %v877_v30 = vshll.u32 %v18063_v17, 16  ;;  %v5558_v32 = vshrl.u32 %v18064_v22, 16  ;;  %v5561_v33 = vshll.u32 %v18064_v22, 16  ;;  %v871_v34 = vrot.slane %v869_v24, 1 }
  0x57   : > { %v5538_v36 = vsel %vm5368_vm3, %v5528_v2, %v5537_v25  ;;  %v867_v37 = vor.u32 %v865_v26, %v863_v16  ;;  %v5551_v39 = vrot.slane %v5549_v27, 1  ;;  %v5554_v40 = vrot.slane %v5552_v28, 2  ;;  %v18073_v28 = vld [vmem:[%s18712_s11 + $0xd0] sm:$0xff]  }
  0x58   : > { %15646 = vmatmul.mubr.msk.bf16.gmra.mrb[24].mxu1 %vm1257_vm2, %v824_v31  ;;  %v5546_v31 = vor.u32 %v5545_v21, %v5542_v19  ;;  %v875_v41 = vor.u32 %v873_v29, %v871_v34  ;;  %v879_v42 = vrot.slane %v877_v30, 1  ;;  %v5560_v45 = vrot.slane %v5558_v32, 1 }
  0x59   : > { %15649 = vmatprep.mubr.msk.bf16.mxu1 %vm1257_vm2, %v832_v38  ;;  %v18066_v38 = vld [vmem:[%s18712_s11 + $0xc0] sm:$0xff]   ;;  %v885_v48 = vshll.u32 %v18065_v35, 16  ;;  %v872_v49 = vsel %vm708_vm1, %v867_v37, %v871_v34  ;;  %v881_v50 = vshrl.u32 %v18063_v17, 16  ;;  %v5555_v53 = vor.u32 %v5554_v40, %v5551_v39 }
  0x5a   : > { %v5547_v44 = vsel %vm5368_vm3, %v5537_v25, %v5546_v31  ;;  %v5567_v51 = vshrl.u32 %v18066_v38, 16  ;;  %v5570_v52 = vshll.u32 %v18066_v38, 16  ;;  %v889_v55 = vshrl.u32 %v18065_v35, 16  ;;  %v18076_v35 = vld [vmem:[%s18712_s11 + $0xe8] sm:$0xff]  }
  0x5b   : > { %16198 = vmatmul.mubr.msk.bf16.gmra.mrb[24].mxu0 %vm1257_vm2, %v5502_v46  ;;  %v5563_v46 = vrot.slane %v5561_v33, 2  ;;  %v893_v56 = vshll.u32 %v18067_v43, 16  ;;  %v5576_v58 = vshrl.u32 %v18068_v47, 16  ;;  %v5579_v59 = vshll.u32 %v18068_v47, 16 }
  0x5c   : > { %16201 = vmatprep.mubr.msk.bf16.mxu0 %vm1257_vm2, %v5511_v54  ;;  %v880_v54 = vsel %vm708_vm1, %v875_v41, %v879_v42  ;;  %v5569_v0 = vrot.slane %v5567_v51, 1  ;;  %v5572_v1 = vrot.slane %v5570_v52, 2  ;;  %v5556_v2 = vsel %vm5368_vm3, %v5546_v31, %v5555_v53  ;;  %v18075_v31 = vld [vmem:[%s18712_s11 + $0xd8] sm:$0xff]   ;;  %v18077_v52 = vld [vmem:[%s18712_s11 + $0xe0] sm:$0xff]  }
  0x5d   : > { %v5564_v57 = vor.u32 %v5563_v46, %v5560_v45  ;;  %v895_v5 = vrot.slane %v893_v56, 1  ;;  %v5578_v8 = vrot.slane %v5576_v58, 1  ;;  %v5581_v10 = vrot.slane %v5579_v59, 2 }
  0x5e   : > { %v901_v13 = vshll.u32 %v18069_v61, 16  ;;  %v897_v16 = vshrl.u32 %v18067_v43, 16  ;;  %v5588_v17 = vshll.u32 %v18070_v62, 16  ;;  %v905_v21 = vshrl.u32 %v18069_v61, 16 }
  0x5f   : > { %v5565_v7 = vsel %vm5368_vm3, %v5555_v53, %v5564_v57  ;;  %v909_v22 = vshll.u32 %v18071_v6, 16  ;;  %v5594_v24 = vshrl.u32 %v18072_v11, 16  ;;  %v5597_v25 = vshll.u32 %v18072_v11, 16  ;;  %v18078_v53 = vld [vmem:[%s18712_s11 + $0xf0] sm:$0xff]  }
  0x60   : > { %15650 = vmatmul.mubr.msk.bf16.gmra.mrb[28].mxu1 %vm1257_vm2, %v840_v60  ;;  %v887_v60 = vrot.slane %v885_v48, 1  ;;  %v903_v26 = vrot.slane %v901_v13, 1  ;;  %v899_v29 = vor.u32 %v897_v16, %v895_v5  ;;  %v5590_v30 = vrot.slane %v5588_v17, 2 }
  0x61   : > { %15653 = vmatprep.mubr.msk.bf16.mxu1 %vm1257_vm2, %v848_v63  ;;  %v883_v63 = vor.u32 %v881_v50, %v879_v42  ;;  %v911_v34 = vrot.slane %v909_v22, 1  ;;  %v5596_v37 = vrot.slane %v5594_v24, 1  ;;  %v5599_v38 = vrot.slane %v5597_v25, 2  ;;  %v18081_v22 = vld [vmem:[%s18712_s11 + $0xf0] sm:$0xff]  }
  0x62   : > { %v891_v4 = vor.u32 %v889_v55, %v887_v60  ;;  %v907_v33 = vor.u32 %v905_v21, %v903_v26  ;;  %v913_v39 = vshrl.u32 %v18071_v6, 16  ;;  %v917_v40 = vshll.u32 %v18073_v28, 16 }
  0x63   : > { %16202 = vmatmul.mubr.msk.bf16.gmra.mrb[28].mxu0 %vm1257_vm2, %v5520_v14  ;;  %v5585_v14 = vshrl.u32 %v18070_v62, 16  ;;  %v888_v15 = vsel %vm708_vm1, %v883_v63, %v887_v60  ;;  %v904_v42 = vsel %vm708_vm1, %v899_v29, %v903_v26  ;;  %v921_v47 = vshrl.u32 %v18073_v28, 16  ;;  %v18079_v62 = vld [vmem:[%s18712_s11 + $0xe8] sm:$0xff]  }
  0x64   : > { %16205 = vmatprep.mubr.msk.bf16.mxu0 %vm1257_vm2, %v5529_v18  ;;  %v5573_v18 = vor.u32 %v5572_v1, %v5569_v0  ;;  %v896_v19 = vsel %vm708_vm1, %v891_v4, %v895_v5  ;;  %v912_v46 = vsel %vm708_vm1, %v907_v33, %v911_v34  ;;  %v5612_v48 = vshrl.u32 %v18076_v35, 16  ;;  %v18080_v1 = vld [vmem:[%s18712_s11 + $0xf8] sm:$0xff]   ;;  %v18084_v28 = vld [vmem:[%s18712_s11 + $0x108] sm:$0xff]  }
  0x65   : > { %v5587_v27 = vrot.slane %v5585_v14, 1  ;;  %v5615_v50 = vshll.u32 %v18076_v35, 16  ;;  %v919_v51 = vrot.slane %v917_v40, 1  ;;  %v915_v55 = vor.u32 %v913_v39, %v911_v34 }
  0x66   : > { %v5574_v32 = vsel %vm5368_vm3, %v5564_v57, %v5573_v18  ;;  %v5614_v61 = vrot.slane %v5612_v48, 1  ;;  %v933_v4 = vshll.u32 %v18077_v52, 16  ;;  %v5621_v5 = vshrl.u32 %v18078_v53, 16  ;;  %v18086_v48 = vld [vmem:[%s18712_s11 + $0x110] sm:$0xff]  }
  0x67   : > { %v5591_v45 = vor.u32 %v5590_v30, %v5587_v27  ;;  %v923_v60 = vor.u32 %v921_v47, %v919_v51  ;;  %v5617_v0 = vrot.slane %v5615_v50, 2  ;;  %v5624_v6 = vshll.u32 %v18078_v53, 16  ;;  %v18083_v27 = vld [vmem:[%s18712_s11 + $0xf8] sm:$0xff]   ;;  %v18087_v53 = vld [vmem:[%s18712_s11 + $0x108] sm:$0xff]  }
  0x68   : > { %15654 = vmatmul.mubr.msk.bf16.gmra.mrb[32].mxu1 %vm1257_vm2, %v856_v23  ;;  %v5582_v23 = vor.u32 %v5581_v10, %v5578_v8  ;;  %v937_v11 = vshrl.u32 %v18077_v52, 16  ;;  %v941_v13 = vshll.u32 %v18079_v62, 16  ;;  %v5633_v16 = vshll.u32 %v18080_v1, 16 }
  0x69   : > { %15657 = vmatprep.mubr.msk.bf16.mxu1 %vm1257_vm2, %v864_v12  ;;  %v18074_v12 = vld [vmem:[%s18712_s11 + $0xe0] sm:$0xff]   ;;  %v5618_v14 = vor.u32 %v5617_v0, %v5614_v61  ;;  %v5626_v21 = vrot.slane %v5624_v6, 2  ;;  %v949_v33 = vshll.u32 %v18081_v22, 16  ;;  %v945_v34 = vshrl.u32 %v18079_v62, 16 }
  0x6a   : > { %v5603_v41 = vshrl.u32 %v18074_v12, 16  ;;  %v5606_v43 = vshll.u32 %v18074_v12, 16  ;;  %v5592_v59 = vsel %vm5368_vm3, %v5582_v23, %v5591_v45  ;;  %v943_v26 = vrot.slane %v941_v13, 1 }
  0x6b   : > { %16206 = vmatmul.mubr.msk.bf16.gmra.mrb[32].mxu0 %vm1257_vm2, %v5538_v36  ;;  %v5583_v36 = vsel %vm5368_vm3, %v5573_v18, %v5582_v23  ;;  %v935_v18 = vrot.slane %v933_v4, 1  ;;  %v18082_v23 = vld [vmem:[%s18712_s11 + $0x100] sm:$0xff]   ;;  %v5635_v30 = vrot.slane %v5633_v16, 2  ;;  %v957_v39 = vshll.u32 %v18083_v27, 16 }
  0x6c   : > { %16209 = vmatprep.mubr.msk.bf16.mxu0 %vm1257_vm2, %v5547_v44  ;;  %v925_v44 = vshll.u32 %v18075_v31, 16  ;;  %v5605_v56 = vrot.slane %v5603_v41, 1  ;;  %v5608_v57 = vrot.slane %v5606_v43, 2  ;;  %v5639_v35 = vshrl.u32 %v18082_v23, 16 }
  0x6d   : > { %v939_v25 = vor.u32 %v937_v11, %v935_v18  ;;  %v5648_v40 = vshrl.u32 %v18084_v28, 16  ;;  %v951_v43 = vrot.slane %v949_v33, 1  ;;  %v5657_v61 = vshrl.u32 %v18086_v48, 16  ;;  %v6909_v33 = vld [vmem:[%s18712_s11 + $0x10] sm:$0xc] }
  0x6e   : > { %v927_v58 = vrot.slane %v925_v44, 1  ;;  %v5609_v8 = vor.u32 %v5608_v57, %v5605_v56  ;;  %v18085_v44 = vld [vmem:[%s18712_s11 + $0x100] sm:$0xff]   ;;  %v5641_v47 = vrot.slane %v5639_v35, 1  ;;  %v18088_v57 = vld [vmem:[%s18712_s11 + $0x118] sm:$0xff]   ;;  %v5660_v62 = vshll.u32 %v18086_v48, 16 }
  0x6f   : > { %v5650_v52 = vrot.slane %v5648_v40, 1  ;;  %v5669_v6 = vshll.u32 %v18088_v57, 16  ;;  %v5659_v11 = vrot.slane %v5657_v61, 1 }
  0x70   : > { %15658 = vmatmul.mubr.msk.bf16.gmra.mrb[36].mxu1 %vm1257_vm2, %v872_v49  ;;  %v5600_v49 = vor.u32 %v5599_v38, %v5596_v37  ;;  %v928_v10 = vsel %vm708_vm1, %v923_v60, %v927_v58  ;;  %v5619_v12 = vsel %vm5368_vm3, %v5609_v8, %v5618_v14  ;;  %v953_v37 = vshrl.u32 %v18081_v22, 16 }
  0x71   : > { %15661 = vmatprep.mubr.msk.bf16.mxu1 %vm1257_vm2, %v880_v54  ;;  %v18885_v54 = vld [vmem:[%s21538_s1 + $0x18] sm:$0xf]  ;;  %v944_v38 = vsel %vm708_vm1, %v939_v25, %v943_v26  ;;  %v5662_v13 = vrot.slane %v5660_v62, 2  ;;  %v5671_v22 = vrot.slane %v5669_v6, 2 }
  0x72   : > { %17958 = vmatprep.subr.msk.bf16.mxu0 %vm1462_vm0, %v18885_v54  ;;  %v5601_v63 = vsel %vm5368_vm3, %v5591_v45, %v5600_v49  ;;  %v5610_v24 = vsel %vm5368_vm3, %v5600_v49, %v5609_v8  ;;  %v955_v50 = vor.u32 %v953_v37, %v951_v43  ;;  %v18089_v8 = vld [vmem:[%s18712_s11 + $0x110] sm:$0xff]   ;;  %v18096_v62 = vld [vmem:[%s18712_s11 + $0x138] sm:$0xff]  }
  0x73   : > { %16210 = vmatmul.mubr.msk.bf16.gmra.mrb[36].mxu0 %vm1257_vm2, %v5556_v2  ;;  %v929_v2 = vshrl.u32 %v18075_v31, 16 }
  0x74   : > { %16213 = vmatprep.mubr.msk.bf16.mxu0 %vm1257_vm2, %v5565_v7  ;;  %v920_v7 = vsel %vm708_vm1, %v915_v55, %v919_v51  ;;  %v959_v51 = vrot.slane %v957_v39, 1 }
  0x75   : > { %v931_v17 = vor.u32 %v929_v2, %v927_v58  ;;  %v961_v58 = vshrl.u32 %v18083_v27, 16  ;;  %v973_v2 = vshll.u32 %v18087_v53, 16 }
  0x76   : > { %v960_v0 = vsel %vm708_vm1, %v955_v50, %v959_v51 }
  0x77   : > { %v936_v31 = vsel %vm708_vm1, %v931_v17, %v935_v18  ;;  %v975_v17 = vrot.slane %v973_v2, 1  ;;  %v18091_v18 = vld [vmem:[%s18712_s11 + $0x118] sm:$0xff]  }
  0x78   : > { %15662 = vmatmul.mubr.msk.bf16.gmra.mrb[40].mxu1 %vm1257_vm2, %v888_v15  ;;  %v5630_v15 = vshrl.u32 %v18080_v1, 16  ;;  %v969_v1 = vshrl.u32 %v18085_v44, 16 }
  0x79   : > { %15665 = vmatprep.mubr.msk.bf16.mxu1 %vm1257_vm2, %v896_v19  ;;  %v5623_v19 = vrot.slane %v5621_v5, 1  ;;  %v5666_v5 = vshrl.u32 %v18088_v57, 16  ;;  %v18095_v57 = vld [vmem:[%s18712_s11 + $0x130] sm:$0xff]  }
  0x7a   : > { %v5632_v29 = vrot.slane %v5630_v15, 1 }
  0x7b   : > { %16214 = vmatmul.mubr.msk.bf16.gmra.mrb[40].mxu0 %vm1257_vm2, %v5574_v32  ;;  %v5627_v32 = vor.u32 %v5626_v21, %v5623_v19  ;;  %v5668_v21 = vrot.slane %v5666_v5, 1 }
  0x7c   : > { %16217 = vmatprep.mubr.msk.bf16.mxu0 %vm1257_vm2, %v5583_v36  ;;  %v5642_v36 = vshll.u32 %v18082_v23, 16  ;;  %v5636_v41 = vor.u32 %v5635_v30, %v5632_v29  ;;  %v977_v23 = vshrl.u32 %v18087_v53, 16  ;;  %v985_v29 = vshrl.u32 %v18089_v8, 16  ;;  %v18234_v53 = vld [vmem:[%s18712_s11 + $0x18] sm:$0xff]  }
  0x7d   : > { %v5628_v45 = vsel %vm5368_vm3, %v5618_v14, %v5627_v32  ;;  %v18090_v14 = vld [vmem:[%s18712_s11 + $0x120] sm:$0xff]   ;;  %v989_v30 = vshll.u32 %v18091_v18, 16 }
  0x7e   : > { %v5644_v49 = vrot.slane %v5642_v36, 2  ;;  %v5637_v55 = vsel %vm5368_vm3, %v5627_v32, %v5636_v41  ;;  %v5675_v27 = vshrl.u32 %v18090_v14, 16  ;;  %v979_v36 = vor.u32 %v977_v23, %v975_v17 }
  0x7f   : > { %v991_v40 = vrot.slane %v989_v30, 1  ;;  %v18238_v30 = vld [vmem:[%s18712_s11 + $0x38] sm:$0xff]  }
  0x80   : > { %15666 = vmatmul.mubr.msk.bf16.gmra.mrb[44].mxu1 %vm1257_vm2, %v904_v42  ;;  %v5651_v42 = vshll.u32 %v18084_v28, 16  ;;  %v5678_v28 = vshll.u32 %v18090_v14, 16  ;;  %v5677_v37 = vrot.slane %v5675_v27, 1  ;;  %v18097_v14 = vld [vmem:[%s18712_s11 + $0x140] sm:$0xff]   ;;  %v1025_v27 = vshrl.u32 %v18096_v62, 16 }
  0x81   : > { %15669 = vmatprep.mubr.msk.bf16.mxu1 %vm1257_vm2, %v912_v46  ;;  %v947_v46 = vor.u32 %v945_v34, %v943_v26  ;;  %v5663_v26 = vor.u32 %v5662_v13, %v5659_v11  ;;  %v18093_v34 = vld [vmem:[%s18712_s11 + $0x120] sm:$0xff]   ;;  %v1029_v23 = vshll.u32 %v18097_v14, 16 }
  0x82   : > { %v5653_v56 = vrot.slane %v5651_v42, 2  ;;  %v1001_v50 = vshrl.u32 %v18093_v34, 16 }
  0x83   : > { %16218 = vmatmul.mubr.msk.bf16.gmra.mrb[44].mxu0 %vm1257_vm2, %v5592_v59  ;;  %v965_v59 = vshll.u32 %v18085_v44, 16  ;;  %v952_v60 = vsel %vm708_vm1, %v947_v46, %v951_v43  ;;  %v18233_v43 = vld [vmem:[%s18712_s11 + $0x14] sm:$0xf] }
  0x84   : > { %16221 = vmatprep.mubr.msk.bf16.mxu0 %vm1257_vm2, %v5601_v63  ;;  %v5645_v63 = vor.u32 %v5644_v49, %v5641_v47  ;;  %v5654_v4 = vor.u32 %v5653_v56, %v5650_v52  ;;  %v13968_v44 = vcombine.low %v6909_v33, %v18233_v43  ;;  %v993_v47 = vshrl.u32 %v18091_v18, 16  ;;  %v18099_v33 = vld [vmem:[%s18712_s11 + $0x150] sm:$0xff]  }
  0x86   : > { %v5646_v15 = vsel %vm5368_vm3, %v5636_v41, %v5645_v63  ;;  %v5655_v19 = vsel %vm5368_vm3, %v5645_v63, %v5654_v4  ;;  %v5664_v35 = vsel %vm5368_vm3, %v5654_v4, %v5663_v26  ;;  %v18094_v41 = vld [vmem:[%s18712_s11 + $0x128] sm:$0xff]   ;;  %v6916_v52 = vrot.slane %v13968_v44, 2  ;;  %v18235_v4 = vld [vmem:[%s18712_s11 + $0x20] sm:$0xff]  }
  0x87   : > { %v1009_v2 = vshrl.u32 %v18094_v41, 16  ;;  %v6919_v5 = vrot.slane %v18235_v4, 2  ;;  %v18239_v44 = vld [vmem:[%s18712_s11 + $0x40] sm:$0xff]  }
  0x88   : > { %15670 = vmatmul.mubr.msk.bf16.gmra.mrb[48].mxu1 %vm1257_vm2, %v920_v7  ;;  %v967_v7 = vrot.slane %v965_v59, 1 }
  0x89   : > { %15673 = vmatprep.mubr.msk.bf16.mxu1 %vm1257_vm2, %v928_v10  ;;  %v963_v10 = vor.u32 %v961_v58, %v959_v51  ;;  %v1005_v51 = vshll.u32 %v18094_v41, 16  ;;  %v995_v58 = vor.u32 %v993_v47, %v991_v40  ;;  %v18101_v41 = vld [vmem:[%s18712_s11 + $0x160] sm:$0xff]   ;;  %v1049_v47 = vshrl.u32 %v18099_v33, 16 }
  0x8a   : > { %v971_v16 = vor.u32 %v969_v1, %v967_v7  ;;  %v1065_v4 = vshrl.u32 %v18101_v41, 16 }
  0x8b   : > { %16222 = vmatmul.mubr.msk.bf16.gmra.mrb[48].mxu0 %vm1257_vm2, %v5610_v24  ;;  %v981_v24 = vshll.u32 %v18089_v8, 16  ;;  %v968_v25 = vsel %vm708_vm1, %v963_v10, %v967_v7  ;;  %v1007_v61 = vrot.slane %v1005_v51, 1  ;;  %v1017_v7 = vshrl.u32 %v18095_v57, 16  ;;  %v18236_v10 = vld [vmem:[%s18712_s11 + $0x28] sm:$0xff]  }
  0x8c   : > { %16225 = vmatprep.mubr.msk.bf16.mxu0 %vm1257_vm2, %v5619_v12  ;;  %v976_v12 = vsel %vm708_vm1, %v971_v16, %v975_v17  ;;  %v1021_v8 = vshll.u32 %v18096_v62, 16  ;;  %v6921_v11 = vrot.slane %v18236_v10, 2  ;;  %v18240_v51 = vld [vmem:[%s18712_s11 + $0x48] sm:$0xff]  }
  0x8d   : > { %v983_v32 = vrot.slane %v981_v24, 1 }
  0x8e   : > { %v1023_v18 = vrot.slane %v1021_v8, 1  ;;  %v18243_v8 = vld [vmem:[%s18712_s11 + $0x60] sm:$0xff]  }
  0x8f   : > { %v987_v39 = vor.u32 %v985_v29, %v983_v32  ;;  %v984_v46 = vsel %vm708_vm1, %v979_v36, %v983_v32  ;;  %v1031_v32 = vrot.slane %v1029_v23, 1  ;;  %v6935_v10 = vrot.slane %v18243_v8, 2  ;;  %v18106_v23 = vld [vmem:[%s18712_s11 + $0x188] sm:$0xff]  }
  0x90   : > { %15674 = vmatmul.mubr.msk.bf16.gmra.mrb[52].mxu1 %vm1257_vm2, %v936_v31  ;;  %v5672_v31 = vor.u32 %v5671_v22, %v5668_v21  ;;  %v8797_v21 = vsel %vm1462_vm0, %v18885_v54, 0  ;;  %v6922_v22 = vsel %vm6915_vm4, %v6919_v5, %v6921_v11 }
  0x91   : > { %15677 = vmatprep.mubr.msk.bf16.mxu1 %vm1257_vm2, %v944_v38  ;;  %v5680_v38 = vrot.slane %v5678_v28, 2  ;;  %v992_v49 = vsel %vm708_vm1, %v987_v39, %v991_v40  ;;  %v18975_v28 = vld [vmem:[%s21538_s1 + $0x8] sm:$0xf]  ;;  %v1045_v40 = vshll.u32 %v18099_v33, 16 }
  0x92   : > { %v5673_v42 = vsel %vm5368_vm3, %v5663_v26, %v5672_v31  ;;  %17953 = vmatprep.subr.msk.bf16.mxu1 %vm1462_vm0, %v18975_v28 }
  0x93   : > { %16226 = vmatmul.mubr.msk.bf16.gmra.mrb[52].mxu0 %vm1257_vm2, %v5628_v45  ;;  %v997_v45 = vshll.u32 %v18093_v34, 16  ;;  %v18944_v48 = vor.u32 %v5680_v38, %v5677_v37  ;;  %v1027_v34 = vor.u32 %v1025_v27, %v1023_v18  ;;  %v18100_v38 = vld [vmem:[%s18712_s11 + $0x158] sm:$0xff]  }
  0x94   : > { %16229 = vmatprep.mubr.msk.bf16.mxu0 %vm1257_vm2, %v5637_v55  ;;  %v6917_v55 = vrot.slane %v18234_v53, 2  ;;  %v18241_v53 = vld [vmem:[%s18712_s11 + $0x50] sm:$0xff]  }
  0x95   : > { %21600 = vst [vmem:[#allocation7_spill] sm:$0xff] %v18944_v48  ;;  %v999_v56 = vrot.slane %v997_v45, 1  ;;  %v5682_v59 = vsel %vm5368_vm3, %v5672_v31, %v18944_v48  ;;  %v6925_v31 = vrot.slane %v18238_v30, 2  ;;  %v6927_v45 = vrot.slane %v18239_v44, 2  ;;  %v18246_v44 = vld [vmem:[%s18712_s11 + $0x78] sm:$0xff]  }
  0x96   : > { %v6918_v63 = vsel %vm6915_vm4, %v6916_v52, %v6917_v55  ;;  %v6920_v16 = vsel %vm6915_vm4, %v6917_v55, %v6919_v5  ;;  %v6929_v52 = vrot.slane %v18240_v51, 2  ;;  %v6931_v55 = vrot.slane %v18241_v53, 2  ;;  %v19549_v48 = vld [vmem:[%s18712_s11 + $0x58] sm:$0xff]  }
  0x97   : > { %v1000_v1 = vsel %vm708_vm1, %v995_v58, %v999_v56  ;;  %21605 = vst [vmem:[#allocation12_spill] sm:$0xff] %v19549_v48  ;;  %v8468_v20 = vrot.slane %v19549_v48, 2 }
  0x98   : > { %15678 = vmatmul.mubr.msk.bf16.gmra.mrb[56].mxu1 %vm1257_vm2, %v952_v60  ;;  %v1003_v60 = vor.u32 %v1001_v50, %v999_v56  ;;  %v18102_v50 = vld [vmem:[%s18712_s11 + $0x168] sm:$0xff]   ;;  %v1047_v56 = vrot.slane %v1045_v40, 1 }
  0x99   : > { %15681 = vmatprep.mubr.msk.bf16.mxu1 %vm1257_vm2, %v960_v0  ;;  %v1013_v0 = vshll.u32 %v18095_v57, 16  ;;  %v1061_v57 = vshll.u32 %v18101_v41, 16  ;;  %v1069_v62 = vshll.u32 %v18102_v50, 16 }
  0x9a   : > { %v1008_v6 = vsel %vm708_vm1, %v1003_v60, %v1007_v61  ;;  %v1051_v60 = vor.u32 %v1049_v47, %v1047_v56 }
  0x9b   : > { %16230 = vmatmul.mubr.msk.bf16.gmra.mrb[56].mxu0 %vm1257_vm2, %v5646_v15  ;;  %v1015_v13 = vrot.slane %v1013_v0, 1  ;;  %v1011_v15 = vor.u32 %v1009_v2, %v1007_v61  ;;  %v18103_v0 = vld [vmem:[%s18712_s11 + $0x170] sm:$0xff]   ;;  %v1057_v2 = vshrl.u32 %v18100_v38, 16 }
  0x9c   : > { %16233 = vmatprep.mubr.msk.bf16.mxu0 %vm1257_vm2, %v5655_v19  ;;  %v18098_v19 = vld [vmem:[%s18712_s11 + $0x148] sm:$0xff]  }
  0x9d   : > { %v1019_v17 = vor.u32 %v1017_v7, %v1015_v13  ;;  %v1016_v24 = vsel %vm708_vm1, %v1011_v15, %v1015_v13  ;;  %v1037_v29 = vshll.u32 %v18098_v19, 16  ;;  %v1041_v43 = vshrl.u32 %v18098_v19, 16 }
  0x9e   : > { %v1063_v13 = vrot.slane %v1061_v57, 1  ;;  %v1077_v19 = vshll.u32 %v18103_v0, 16 }
  0x9f   : > { %v1024_v54 = vsel %vm708_vm1, %v1019_v17, %v1023_v18  ;;  %v1039_v37 = vrot.slane %v1037_v29, 1  ;;  %v1073_v18 = vshrl.u32 %v18102_v50, 16  ;;  %v18245_v29 = vld [vmem:[%s18712_s11 + $0x70] sm:$0xff]  }
  0xa0   : > { %15682 = vmatmul.mubr.msk.bf16.gmra.mrb[60].mxu1 %vm1257_vm2, %v968_v25  ;;  %v18237_v25 = vld [vmem:[%s18712_s11 + $0x30] sm:$0xff]   ;;  %v1067_v17 = vor.u32 %v1065_v4, %v1063_v13  ;;  %v6939_v30 = vrot.slane %v18245_v29, 2 }
  0xa1   : > { %15685 = vmatprep.mubr.msk.bf16.mxu1 %vm1257_vm2, %v976_v12  ;;  %v6923_v26 = vrot.slane %v18237_v25, 2  ;;  %v1033_v12 = vshrl.u32 %v18097_v14, 16  ;;  %v1043_v58 = vor.u32 %v1041_v43, %v1039_v37  ;;  %v1071_v14 = vrot.slane %v1069_v62, 1  ;;  %v18249_v4 = vld [vmem:[%s18712_s11 + $0x90] sm:$0xff]  }
  0xa2   : > { %v1081_v25 = vshrl.u32 %v18103_v0, 16 }
  0xa3   : > { %16234 = vmatmul.mubr.msk.bf16.gmra.mrb[60].mxu0 %vm1257_vm2, %v5664_v35  ;;  %v6924_v35 = vsel %vm6915_vm4, %v6921_v11, %v6923_v26  ;;  %v1035_v36 = vor.u32 %v1033_v12, %v1031_v32  ;;  %v6926_v39 = vsel %vm6915_vm4, %v6923_v26, %v6925_v31  ;;  %v18104_v11 = vld [vmem:[%s18712_s11 + $0x178] sm:$0xff]   ;;  %v1072_v27 = vsel %vm708_vm1, %v1067_v17, %v1071_v14 }
  0xa4   : > { %16237 = vmatprep.mubr.msk.bf16.mxu0 %vm1257_vm2, %v5673_v42  ;;  %v1032_v42 = vsel %vm708_vm1, %v1027_v34, %v1031_v32  ;;  %v1085_v26 = vshll.u32 %v18104_v11, 16  ;;  %v1075_v33 = vor.u32 %v1073_v18, %v1071_v14  ;;  %v1089_v41 = vshrl.u32 %v18104_v11, 16 }
  0xa8   : > { %15686 = vmatmul.mubr.msk.bf16.gmra.mrb[64].mxu1 %vm1257_vm2, %v984_v46  ;;  %v1040_v46 = vsel %vm708_vm1, %v1035_v36, %v1039_v37  ;;  %v1087_v36 = vrot.slane %v1085_v26, 1  ;;  %v1101_v37 = vshll.u32 %v18106_v23, 16  ;;  %v18112_v26 = vld [vmem:[%s18712_s11 + $0x1b8] sm:$0xff]  }
  0xa9   : > { %15689 = vmatprep.mubr.msk.bf16.mxu1 %vm1257_vm2, %v992_v49  ;;  %v1053_v49 = vshll.u32 %v18100_v38, 16 }
  0xaa   : > { %v1103_v51 = vrot.slane %v1101_v37, 1 }
  0xab   : > { %16238 = vmatmul.mubr.msk.bf16.gmra.mrb[64].mxu0 %vm1257_vm2, %v5682_v59  ;;  %v6928_v59 = vsel %vm6915_vm4, %v6925_v31, %v6927_v45  ;;  %v1055_v61 = vrot.slane %v1053_v49, 1  ;;  %v1079_v31 = vrot.slane %v1077_v19, 1  ;;  %v18108_v49 = vld [vmem:[%s18712_s11 + $0x198] sm:$0xff]  }
  0xac   : > { %16311 = vmatprep.mubr.msk.bf16.mxu0 %vm1257_vm2, %v6918_v63  ;;  %v6930_v63 = vsel %vm6915_vm4, %v6927_v45, %v6929_v52  ;;  %v6941_v45 = vrot.slane %v18246_v44, 2  ;;  %v1121_v18 = vshrl.u32 %v18108_v49, 16 }
  0xad   : > { %v1056_v5 = vsel %vm708_vm1, %v1051_v60, %v1055_v61  ;;  %v1059_v15 = vor.u32 %v1057_v2, %v1055_v61  ;;  %v1080_v40 = vsel %vm708_vm1, %v1075_v33, %v1079_v31  ;;  %v18110_v60 = vld [vmem:[%s18712_s11 + $0x1a8] sm:$0xff]   ;;  %v18113_v33 = vld [vmem:[%s18712_s11 + $0x1c0] sm:$0xff]  }
  0xae   : > { %v1133_v14 = vshll.u32 %v18110_v60, 16 }
  0xb0   : > { %15690 = vmatmul.mubr.msk.bf16.gmra.mrb[68].mxu1 %vm1257_vm2, %v1000_v1  ;;  %v1048_v1 = vsel %vm708_vm1, %v1043_v58, %v1047_v56  ;;  %v1105_v56 = vshrl.u32 %v18106_v23, 16  ;;  %v18109_v58 = vld [vmem:[%s18712_s11 + $0x1a0] sm:$0xff]  }
  0xb1   : > { %15693 = vmatprep.mubr.msk.bf16.mxu1 %vm1257_vm2, %v1008_v6  ;;  %v18242_v6 = vld [vmem:[%s18712_s11 + $0x58] sm:$0xff]   ;;  %v1129_v19 = vshrl.u32 %v18109_v58, 16 }
  0xb2   : > { %v6933_v7 = vrot.slane %v18242_v6, 2  ;;  %v1107_v8 = vor.u32 %v1105_v56, %v1103_v51  ;;  %v1153_v56 = vshrl.u32 %v18112_v26, 16 }
  0xb3   : > { %16312 = vmatmul.mubr.msk.bf16.vlgmr.msra.gmra.mrb[0].mxu0 %vm1257_vm2, %v6920_v16  ;;  %v6932_v16 = vsel %vm6915_vm4, %v6929_v52, %v6931_v55  ;;  %v1091_v52 = vor.u32 %v1089_v41, %v1087_v36 }
  0xb4   : > { %16448 = vmatpush3.bf16.msra.mxu0 %v8797_v21  ;;  %16315 = vmatprep.mubr.msk.bf16.mxu0 %vm1257_vm2, %v6922_v22  ;;  %v18105_v21 = vld [vmem:[%s18712_s11 + $0x180] sm:$0xff]   ;;  %v6934_v22 = vsel %vm6915_vm4, %v6931_v55, %v6933_v7  ;;  %v6936_v34 = vsel %vm6915_vm4, %v6933_v7, %v6935_v10  ;;  %v1125_v7 = vshll.u32 %v18109_v58, 16 }
  0xb5   : > { %v1093_v32 = vshll.u32 %v18105_v21, 16 }
  0xb7   : > { %v1095_v50 = vrot.slane %v1093_v32, 1 }
  0xb8   : > { %15694 = vmatmul.mubr.msk.bf16.gmra.mrb[72].mxu1 %vm1257_vm2, %v1016_v24  ;;  %v1064_v24 = vsel %vm708_vm1, %v1059_v15, %v1063_v13 }
  0xb9   : > { %15697 = vmatprep.mubr.msk.bf16.mxu1 %vm1257_vm2, %v1024_v54  ;;  %v18244_v54 = vld [vmem:[%s18712_s11 + $0x68] sm:$0xff]   ;;  %v1096_v61 = vsel %vm708_vm1, %v1091_v52, %v1095_v50 }
  0xba   : > { %v6937_v12 = vrot.slane %v18244_v54, 2  ;;  %v1135_v54 = vrot.slane %v1133_v14, 1 }
  0xbb   : > { %16316 = vmatmul.mubr.msk.bf16.gmra.mrb[4].mxu0 %vm1257_vm2, %v6924_v35  ;;  %v1083_v35 = vor.u32 %v1081_v25, %v1079_v31  ;;  %v1137_v31 = vshrl.u32 %v18110_v60, 16 }
  0xbc   : > { %16319 = vmatprep.mubr.msk.bf16.mxu0 %vm1257_vm2, %v6926_v39  ;;  %v6938_v38 = vsel %vm6915_vm4, %v6935_v10, %v6937_v12  ;;  %v18107_v39 = vld [vmem:[%s18712_s11 + $0x190] sm:$0xff]   ;;  %v6940_v53 = vsel %vm6915_vm4, %v6937_v12, %v6939_v30 }
  0xbd   : > { %v1088_v43 = vsel %vm708_vm1, %v1083_v35, %v1087_v36  ;;  %v1109_v57 = vshll.u32 %v18107_v39, 16  ;;  %v1113_v62 = vshrl.u32 %v18107_v39, 16  ;;  %v18114_v35 = vld [vmem:[%s18712_s11 + $0x1c8] sm:$0xff]  }
  0xbf   : > { %v1111_v6 = vrot.slane %v1109_v57, 1  ;;  %v1161_v57 = vshrl.u32 %v18113_v33, 16 }
  0xc0   : > { %15698 = vmatmul.mubr.msk.bf16.gmra.mrb[76].mxu1 %vm1257_vm2, %v1032_v42  ;;  %v1097_v42 = vshrl.u32 %v18105_v21, 16 }
  0xc1   : > { %15701 = vmatprep.mubr.msk.bf16.mxu1 %vm1257_vm2, %v1040_v46  ;;  %v18247_v46 = vld [vmem:[%s18712_s11 + $0x80] sm:$0xff]   ;;  %v1115_v11 = vor.u32 %v1113_v62, %v1111_v6  ;;  %v1112_v17 = vsel %vm708_vm1, %v1107_v8, %v1111_v6  ;;  %v1169_v6 = vshrl.u32 %v18114_v35, 16 }
  0xc2   : > { %v6943_v47 = vrot.slane %v18247_v46, 2  ;;  %v1099_v55 = vor.u32 %v1097_v42, %v1095_v50  ;;  %v18253_v42 = vld [vmem:[%s18712_s11 + $0xb0] sm:$0xff]   ;;  %v1139_v46 = vor.u32 %v1137_v31, %v1135_v54 }
  0xc3   : > { %16320 = vmatmul.mubr.msk.bf16.gmra.mrb[8].mxu0 %vm1257_vm2, %v6928_v59  ;;  %v6942_v59 = vsel %vm6915_vm4, %v6939_v30, %v6941_v45 }
  0xc4   : > { %16323 = vmatprep.mubr.msk.bf16.mxu0 %vm1257_vm2, %v6930_v63  ;;  %v1117_v63 = vshll.u32 %v18108_v49, 16  ;;  %v1104_v0 = vsel %vm708_vm1, %v1099_v55, %v1103_v51  ;;  %v6944_v10 = vsel %vm6915_vm4, %v6941_v45, %v6943_v47  ;;  %v1157_v45 = vshll.u32 %v18113_v33, 16  ;;  %v18258_v33 = vld [vmem:[%s18712_s11 + $0xd8] sm:$0xff]  }
  0xc5   : > { %v1165_v51 = vshll.u32 %v18114_v35, 16 }
  0xc6   : > { %v1119_v13 = vrot.slane %v1117_v63, 1  ;;  %v19083_v63 = vld [vmem:[%s18712_s11 + $0x1d8] sm:$0xff]  }
  0xc7   : > { %v1181_v14 = vshll.u32 %v19083_v63, 16 }
  0xc8   : > { %15702 = vmatmul.mubr.msk.bf16.gmra.mrb[80].mxu1 %vm1257_vm2, %v1048_v1  ;;  %v18248_v1 = vld [vmem:[%s18712_s11 + $0x88] sm:$0xff]   ;;  %v1120_v21 = vsel %vm708_vm1, %v1115_v11, %v1119_v13  ;;  %v1123_v12 = vor.u32 %v1121_v18, %v1119_v13  ;;  %v18257_v18 = vld [vmem:[%s18712_s11 + $0xd0] sm:$0xff]  }
  0xc9   : > { %15705 = vmatprep.mubr.msk.bf16.mxu1 %vm1257_vm2, %v1056_v5  ;;  %v6945_v2 = vrot.slane %v18248_v1, 2  ;;  %v6947_v5 = vrot.slane %v18249_v4, 2  ;;  %v1167_v1 = vrot.slane %v1165_v51, 1 }
  0xcb   : > { %16324 = vmatmul.mubr.msk.bf16.gmra.mrb[12].mxu0 %vm1257_vm2, %v6932_v16  ;;  %v6946_v15 = vsel %vm6915_vm4, %v6943_v47, %v6945_v2  ;;  %v18111_v16 = vld [vmem:[%s18712_s11 + $0x1b0] sm:$0xff]   ;;  %v6948_v29 = vsel %vm6915_vm4, %v6945_v2, %v6947_v5 }
  0xcc   : > { %16327 = vmatprep.mubr.msk.bf16.mxu0 %vm1257_vm2, %v6934_v22  ;;  %v18250_v22 = vld [vmem:[%s18712_s11 + $0x98] sm:$0xff]   ;;  %v1141_v32 = vshll.u32 %v18111_v16, 16  ;;  %v1145_v37 = vshrl.u32 %v18111_v16, 16  ;;  %v18256_v16 = vld [vmem:[%s18712_s11 + $0xc8] sm:$0xff]  }
  0xcd   : > { %v6949_v23 = vrot.slane %v18250_v22, 2 }
  0xce   : > { %v1143_v44 = vrot.slane %v1141_v32, 1 }
  0xd0   : > { %15706 = vmatmul.mubr.msk.bf16.gmra.mrb[84].mxu1 %vm1257_vm2, %v1064_v24  ;;  %v18251_v24 = vld [vmem:[%s18712_s11 + $0xa0] sm:$0xff]   ;;  %v1147_v49 = vor.u32 %v1145_v37, %v1143_v44  ;;  %v1144_v55 = vsel %vm708_vm1, %v1139_v46, %v1143_v44 }
  0xd1   : > { %15709 = vmatprep.mubr.msk.bf16.mxu1 %vm1257_vm2, %v1072_v27  ;;  %v6951_v25 = vrot.slane %v18251_v24, 2  ;;  %v1127_v27 = vrot.slane %v1125_v7, 1  ;;  %v1171_v24 = vor.u32 %v1169_v6, %v1167_v1  ;;  %v18259_v46 = vld [vmem:[%s18712_s11 + $0xe0] sm:$0xff]  }
  0xd3   : > { %16328 = vmatmul.mubr.msk.bf16.gmra.mrb[16].mxu0 %vm1257_vm2, %v6936_v34  ;;  %v1131_v30 = vor.u32 %v1129_v19, %v1127_v27  ;;  %v6950_v34 = vsel %vm6915_vm4, %v6947_v5, %v6949_v23  ;;  %v1128_v36 = vsel %vm708_vm1, %v1123_v12, %v1127_v27  ;;  %v6952_v47 = vsel %vm6915_vm4, %v6949_v23, %v6951_v25 }
  0xd4   : > { %16331 = vmatprep.mubr.msk.bf16.mxu0 %vm1257_vm2, %v6938_v38  ;;  %v1149_v38 = vshll.u32 %v18112_v26, 16  ;;  %v6963_v19 = vrot.slane %v18257_v18, 2  ;;  %v1185_v23 = vshrl.u32 %v19083_v63, 16  ;;  %v1183_v27 = vrot.slane %v1181_v14, 1 }
  0xd5   : > { %v1136_v39 = vsel %vm708_vm1, %v1131_v30, %v1135_v54 }
  0xd6   : > { %v1151_v50 = vrot.slane %v1149_v38, 1  ;;  %v1187_v37 = vor.u32 %v1185_v23, %v1183_v27  ;;  %v19164_v23 = vld [vmem:[%s18712_s11 + $0x218] sm:$0xff]  }
  0xd8   : > { %15710 = vmatmul.mubr.msk.bf16.gmra.mrb[88].mxu1 %vm1257_vm2, %v1080_v40  ;;  %v18252_v40 = vld [vmem:[%s18712_s11 + $0xa8] sm:$0xff]   ;;  %v1152_v58 = vsel %vm708_vm1, %v1147_v49, %v1151_v50  ;;  %v1155_v2 = vor.u32 %v1153_v56, %v1151_v50 }
  0xd9   : > { %15713 = vmatprep.mubr.msk.bf16.mxu1 %vm1257_vm2, %v1088_v43  ;;  %v6953_v41 = vrot.slane %v18252_v40, 2  ;;  %v6955_v43 = vrot.slane %v18253_v42, 2 }
  0xdb   : > { %16332 = vmatmul.mubr.msk.bf16.gmra.mrb[20].mxu0 %vm1257_vm2, %v6940_v53  ;;  %v6954_v52 = vsel %vm6915_vm4, %v6951_v25, %v6953_v41  ;;  %v19074_v53 = vld [vmem:[%s18712_s11 + $0x1d0] sm:$0xff]   ;;  %v6956_v4 = vsel %vm6915_vm4, %v6953_v41, %v6955_v43  ;;  %v19124_v41 = vld [vmem:[%s18712_s11 + $0x1f8] sm:$0xff]  }
  0xdc   : > { %16335 = vmatprep.mubr.msk.bf16.mxu0 %vm1257_vm2, %v6942_v59  ;;  %v18254_v59 = vld [vmem:[%s18712_s11 + $0xb8] sm:$0xff]   ;;  %v1173_v7 = vshll.u32 %v19074_v53, 16  ;;  %v1177_v13 = vshrl.u32 %v19074_v53, 16  ;;  %v1213_v51 = vshll.u32 %v19124_v41, 16 }
  0xdd   : > { %v6957_v60 = vrot.slane %v18254_v59, 2 }
  0xde   : > { %v1175_v22 = vrot.slane %v1173_v7, 1 }
  0xdf   : > { %v6958_v8 = vsel %vm6915_vm4, %v6955_v43, %v6957_v60 }
  0xe0   : > { %15714 = vmatmul.mubr.msk.bf16.gmra.mrb[92].mxu1 %vm1257_vm2, %v1096_v61  ;;  %v18255_v61 = vld [vmem:[%s18712_s11 + $0xc0] sm:$0xff]   ;;  %v1179_v26 = vor.u32 %v1177_v13, %v1175_v22  ;;  %v18262_v13 = vld [vmem:[%s18712_s11 + $0xf8] sm:$0xff]  }
  0xe1   : > { %15717 = vmatprep.mubr.msk.bf16.mxu1 %vm1257_vm2, %v1104_v0  ;;  %v6959_v62 = vrot.slane %v18255_v61, 2  ;;  %v1159_v0 = vrot.slane %v1157_v45, 1  ;;  %v1215_v61 = vrot.slane %v1213_v51, 1  ;;  %v6973_v14 = vrot.slane %v18262_v13, 2  ;;  %v19210_v13 = vld [vmem:[%s18712_s11 + $0x8] sm:$0xff]  }
  0xe2   : > { %v1184_v32 = vsel %vm708_vm1, %v1179_v26, %v1183_v27 }
  0xe3   : > { %16336 = vmatmul.mubr.msk.bf16.gmra.mrb[24].mxu0 %vm1257_vm2, %v6944_v10  ;;  %v1163_v5 = vor.u32 %v1161_v57, %v1159_v0  ;;  %v19091_v10 = vld [vmem:[%s18712_s11 + $0x1e0] sm:$0xff]   ;;  %v1160_v11 = vsel %vm708_vm1, %v1155_v2, %v1159_v0  ;;  %v6960_v25 = vsel %vm6915_vm4, %v6957_v60, %v6959_v62 }
  0xe4   : > { %16339 = vmatprep.mubr.msk.bf16.mxu0 %vm1257_vm2, %v6946_v15  ;;  %v1189_v54 = vshll.u32 %v19091_v10, 16  ;;  %v1193_v30 = vshrl.u32 %v19091_v10, 16  ;;  %v19139_v57 = vld [vmem:[%s18712_s11 + $0x200] sm:$0xff]  }
  0xe5   : > { %v1168_v15 = vsel %vm708_vm1, %v1163_v5, %v1167_v1  ;;  %v1221_v1 = vshll.u32 %v19139_v57, 16  ;;  %v18261_v5 = vld [vmem:[%s18712_s11 + $0xf0] sm:$0xff]  }
  0xe6   : > { %v1191_v35 = vrot.slane %v1189_v54, 1  ;;  %v6971_v6 = vrot.slane %v18261_v5, 2  ;;  %v18263_v54 = vld [vmem:[%s18712_s11 + $0x100] sm:$0xff]  }
  0xe8   : > { %15718 = vmatmul.mubr.msk.bf16.gmra.mrb[96].mxu1 %vm1257_vm2, %v1112_v17  ;;  %v6961_v17 = vrot.slane %v18256_v16, 2  ;;  %v1192_v44 = vsel %vm708_vm1, %v1187_v37, %v1191_v35  ;;  %v19159_v16 = vld [vmem:[%s18712_s11 + $0x210] sm:$0xff]   ;;  %v18125_v37 = vld [vmem:[%s18712_s11 + $0x220] ss:$0 sps:$4 sm:$0x11]  }
  0xe9   : > { %15721 = vmatprep.mubr.msk.bf16.mxu1 %vm1257_vm2, %v1120_v21  ;;  %v19102_v21 = vld [vmem:[%s18712_s11 + $0x1e8] sm:$0xff]  }
  0xea   : > { %v6962_v12 = vsel %vm6915_vm4, %v6959_v62, %v6961_v17  ;;  %v1197_v31 = vshll.u32 %v19102_v21, 16  ;;  %v6964_v38 = vsel %vm6915_vm4, %v6961_v17, %v6963_v19  ;;  %v1201_v45 = vshrl.u32 %v19102_v21, 16  ;;  %v19144_v62 = vld [vmem:[%s18712_s11 + $0x208] sm:$0xff]  }
  0xeb   : > { %16340 = vmatmul.mubr.msk.bf16.gmra.mrb[28].mxu0 %vm1257_vm2, %v6948_v29  ;;  %v1176_v29 = vsel %vm708_vm1, %v1171_v24, %v1175_v22  ;;  %v6974_v24 = vsel %vm6915_vm4, %v6971_v6, %v6973_v14  ;;  %v1233_v27 = vshrl.u32 %v19144_v62, 16 }
  0xec   : > { %16343 = vmatprep.mubr.msk.bf16.mxu0 %vm1257_vm2, %v6950_v34  ;;  %v6965_v34 = vrot.slane %v18258_v33, 2  ;;  %v1199_v40 = vrot.slane %v1197_v31, 1  ;;  %v1245_v31 = vshll.u32 %v19164_v23, 16 }
  0xee   : > { %v6966_v42 = vsel %vm6915_vm4, %v6963_v19, %v6965_v34 }
  0xf0   : > { %15722 = vmatmul.mubr.msk.bf16.gmra.mrb[100].mxu1 %vm1257_vm2, %v1128_v36  ;;  %v19119_v36 = vld [vmem:[%s18712_s11 + $0x1f0] sm:$0xff]  }
  0xf1   : > { %15725 = vmatprep.mubr.msk.bf16.mxu1 %vm1257_vm2, %v1136_v39  ;;  %v1195_v39 = vor.u32 %v1193_v30, %v1191_v35  ;;  %v1205_v43 = vshll.u32 %v19119_v36, 16  ;;  %v1209_v50 = vshrl.u32 %v19119_v36, 16  ;;  %v1241_v30 = vshrl.u32 %v19159_v16, 16 }
  0xf3   : > { %16344 = vmatmul.mubr.msk.bf16.gmra.mrb[32].mxu0 %vm1257_vm2, %v6952_v47  ;;  %v6967_v47 = vrot.slane %v18259_v46, 2  ;;  %v1200_v49 = vsel %vm708_vm1, %v1195_v39, %v1199_v40  ;;  %v1207_v56 = vrot.slane %v1205_v43, 1  ;;  %v18265_v46 = vld [vmem:[%s18712_s11 + $0x110] sm:$0xff]  }
  0xf4   : > { %16347 = vmatprep.mubr.msk.bf16.mxu0 %vm1257_vm2, %v6954_v52  ;;  %v18260_v52 = vld [vmem:[%s18712_s11 + $0xe8] sm:$0xff]  }
  0xf5   : > { %v6968_v59 = vsel %vm6915_vm4, %v6965_v34, %v6967_v47  ;;  %v1211_v60 = vor.u32 %v1209_v50, %v1207_v56  ;;  %v18266_v50 = vld [vmem:[%s18712_s11 + $0x118] sm:$0xff]  }
  0xf6   : > { %v6981_v51 = vrot.slane %v18266_v50, 2  ;;  %v19281_v50 = vld [vmem:[%s18712_s11 + $0x48] sm:$0xff]  }
  0xf7   : > { %v1216_v7 = vsel %vm708_vm1, %v1211_v60, %v1215_v61 }
  0xf8   : > { %15726 = vmatmul.mubr.msk.bf16.gmra.mrb[104].mxu1 %vm1257_vm2, %v1144_v55  ;;  %v6969_v55 = vrot.slane %v18260_v52, 2 }
  0xf9   : > { %15729 = vmatprep.mubr.msk.bf16.mxu1 %vm1257_vm2, %v1152_v58  ;;  %v1203_v58 = vor.u32 %v1201_v45, %v1199_v40  ;;  %v1247_v40 = vrot.slane %v1245_v31, 1  ;;  %v1253_v45 = vshll.u32 %v18125_v37, 16  ;;  %v19249_v31 = vld [vmem:[%s18712_s11 + $0x28] sm:$0xff]  }
  0xfa   : > { %v6970_v0 = vsel %vm6915_vm4, %v6967_v47, %v6969_v55  ;;  %v6972_v18 = vsel %vm6915_vm4, %v6969_v55, %v6971_v6  ;;  %v6979_v47 = vrot.slane %v18265_v46, 2  ;;  %v18128_v6 = vld [vmem:[%s18712_s11 + $0x138] sm:$0xff]   ;;  %v18134_v37 = vld [vmem:[%s18712_s11 + $0x168] sm:$0xff]  }
  0xfb   : > { %16348 = vmatmul.mubr.msk.bf16.gmra.mrb[36].mxu0 %vm1257_vm2, %v6956_v4  ;;  %v1208_v2 = vsel %vm708_vm1, %v1203_v58, %v1207_v56  ;;  %v1217_v4 = vshrl.u32 %v19124_v41, 16  ;;  %v1255_v55 = vrot.slane %v1253_v45, 1  ;;  %v18136_v46 = vld [vmem:[%s18712_s11 + $0x178] sm:$0xff]  }
  0xfc   : > { %16351 = vmatprep.mubr.msk.bf16.mxu0 %vm1257_vm2, %v6958_v8  ;;  %v1225_v8 = vshrl.u32 %v19139_v57, 16  ;;  %v6982_v58 = vsel %vm6915_vm4, %v6979_v47, %v6981_v51 }
  0xfd   : > { %v1219_v17 = vor.u32 %v1217_v4, %v1215_v61  ;;  %v18267_v61 = vld [vmem:[%s18712_s11 + $0x120] sm:$0xff]   ;;  %v18127_v4 = vld [vmem:[%s18712_s11 + $0x130] sm:$0xff]  }
 0x100   : > { %15730 = vmatmul.mubr.msk.bf16.gmra.mrb[108].mxu1 %vm1257_vm2, %v1160_v11  ;;  %v1229_v11 = vshll.u32 %v19144_v62, 16 }
 0x101   : > { %15733 = vmatprep.mubr.msk.bf16.mxu1 %vm1257_vm2, %v1168_v15  ;;  %v1223_v15 = vrot.slane %v1221_v1, 1 }
 0x102   : > { %v1231_v22 = vrot.slane %v1229_v11, 1  ;;  %v6989_v11 = vrot.slane %v18128_v6, 2 }
 0x103   : > { %16352 = vmatmul.mubr.msk.bf16.gmra.mrb[40].mxu0 %vm1257_vm2, %v6960_v25  ;;  %v1227_v19 = vor.u32 %v1225_v8, %v1223_v15  ;;  %v1237_v25 = vshll.u32 %v19159_v16, 16  ;;  %v1224_v26 = vsel %vm708_vm1, %v1219_v17, %v1223_v15  ;;  %v6987_v8 = vrot.slane %v18127_v4, 2  ;;  %v18129_v15 = vld [vmem:[%s18712_s11 + $0x140] sm:$0xff]   ;;  %v18130_v17 = vld [vmem:[%s18712_s11 + $0x148] sm:$0xff]  }
 0x104   : > { %16355 = vmatprep.mubr.msk.bf16.mxu0 %vm1257_vm2, %v6962_v12  ;;  %v6975_v12 = vrot.slane %v18263_v54, 2  ;;  %v1235_v35 = vor.u32 %v1233_v27, %v1231_v22  ;;  %v18131_v27 = vld [vmem:[%s18712_s11 + $0x150] sm:$0xff]  }
 0x105   : > { %v1239_v34 = vrot.slane %v1237_v25, 1  ;;  %v19238_v25 = vld [vmem:[%s18712_s11 + $0x20] sm:$0xff]  }
 0x107   : > { %v1243_v39 = vor.u32 %v1241_v30, %v1239_v34  ;;  %v1240_v43 = vsel %vm708_vm1, %v1235_v35, %v1239_v34  ;;  %v18133_v34 = vld [vmem:[%s18712_s11 + $0x160] sm:$0xff]  }
 0x108   : > { %15734 = vmatmul.mubr.msk.bf16.gmra.mrb[112].mxu1 %vm1257_vm2, %v1176_v29  ;;  %v1232_v29 = vsel %vm708_vm1, %v1227_v19, %v1231_v22  ;;  %v19228_v19 = vld [vmem:[%s21538_s1 + $0x1c] sm:$0xf]  ;;  %v6993_v22 = vrot.slane %v18130_v17, 2  ;;  %v18142_v17 = vld [vmem:[%s18712_s11 + $0x1a8] sm:$0xff]  }
 0x109   : > { %15737 = vmatprep.mubr.msk.bf16.mxu1 %vm1257_vm2, %v1184_v32  ;;  %v18264_v32 = vld [vmem:[%s18712_s11 + $0x108] sm:$0xff]   ;;  %17959 = vmatprep.subr.msk.bf16.mxu0 %vm1462_vm0, %v19228_v19 }
 0x10a   : > { %v6977_v33 = vrot.slane %v18264_v32, 2  ;;  %v19254_v32 = vld [vmem:[%s18712_s11 + $0x30] sm:$0xff]  }
 0x10b   : > { %16356 = vmatmul.mubr.msk.bf16.gmra.mrb[44].mxu0 %vm1257_vm2, %v6964_v38  ;;  %v6976_v38 = vsel %vm6915_vm4, %v6973_v14, %v6975_v12 }
 0x10c   : > { %16359 = vmatprep.mubr.msk.bf16.mxu0 %vm1257_vm2, %v6966_v42  ;;  %v6978_v42 = vsel %vm6915_vm4, %v6975_v12, %v6977_v33  ;;  %v6980_v56 = vsel %vm6915_vm4, %v6977_v33, %v6979_v47  ;;  %v18132_v12 = vld [vmem:[%s18712_s11 + $0x158] sm:$0xff]  }
 0x10d   : > { %v6997_v30 = vrot.slane %v18132_v12, 2  ;;  %v18143_v12 = vld [vmem:[%s18712_s11 + $0x1b0] sm:$0xff]  }
 0x110   : > { %15738 = vmatmul.mubr.msk.bf16.gmra.mrb[116].mxu1 %vm1257_vm2, %v1192_v44  ;;  %v1249_v44 = vshrl.u32 %v19164_v23, 16 }
 0x111   : > { %15741 = vmatprep.mubr.msk.bf16.mxu1 %vm1257_vm2, %v1200_v49  ;;  %v1248_v49 = vsel %vm708_vm1, %v1243_v39, %v1247_v40  ;;  %v7001_v39 = vrot.slane %v18134_v37, 2  ;;  %v19350_v37 = vld [vmem:[%s18712_s11 + $0x90] sm:$0xff]  }
 0x112   : > { %v1251_v52 = vor.u32 %v1249_v44, %v1247_v40  ;;  %v19265_v40 = vld [vmem:[%s18712_s11 + $0x38] sm:$0xff]   ;;  %v18135_v44 = vld [vmem:[%s18712_s11 + $0x170] sm:$0xff]  }
 0x113   : > { %16360 = vmatmul.mubr.msk.bf16.gmra.mrb[48].mxu0 %vm1257_vm2, %v6968_v59  ;;  %v18126_v59 = vld [vmem:[%s18712_s11 + $0x128] sm:$0xff]   ;;  %v7003_v47 = vrot.slane %v18135_v44, 2 }
 0x114   : > { %16363 = vmatprep.mubr.msk.bf16.mxu0 %vm1257_vm2, %v6970_v0  ;;  %v1256_v60 = vsel %vm708_vm1, %v1251_v52, %v1255_v55  ;;  %v6983_v0 = vrot.slane %v18267_v61, 2  ;;  %v6985_v1 = vrot.slane %v18126_v59, 2  ;;  %v18137_v55 = vld [vmem:[%s18712_s11 + $0x180] sm:$0xff]   ;;  %v19297_v61 = vld [vmem:[%s18712_s11 + $0x58] sm:$0xff]   ;;  %v18146_v44 = vld [vmem:[%s18712_s11 + $0x1c8] sm:$0xff]  }
 0x115   : > { %v7004_v52 = vsel %vm6915_vm4, %v7001_v39, %v7003_v47  ;;  %v7007_v59 = vrot.slane %v18137_v55, 2  ;;  %v18147_v55 = vld [vmem:[%s18712_s11 + $0x1d0] sm:$0xff]  }
 0x116   : > { %v6986_v5 = vsel %vm6915_vm4, %v6983_v0, %v6985_v1  ;;  %v6988_v14 = vsel %vm6915_vm4, %v6985_v1, %v6987_v8 }
 0x118   : > { %15742 = vmatmul.mubr.msk.bf16.gmra.mrb[120].mxu1 %vm1257_vm2, %v1208_v2  ;;  %v6984_v2 = vsel %vm6915_vm4, %v6981_v51, %v6983_v0  ;;  %v19286_v51 = vld [vmem:[%s18712_s11 + $0x50] sm:$0xff]   ;;  %v19302_v0 = vld [vmem:[%s18712_s11 + $0x60] sm:$0xff]  }
 0x119   : > { %15745 = vmatprep.mubr.msk.bf16.mxu1 %vm1257_vm2, %v1216_v7  ;;  %v3108_v7 = vsel %vm1462_vm0, %v18975_v28, 0  ;;  %v6990_v28 = vsel %vm6915_vm4, %v6987_v8, %v6989_v11  ;;  %v19313_v8 = vld [vmem:[%s18712_s11 + $0x68] sm:$0xff]  }
 0x11b   : > { %16364 = vmatmul.mubr.msk.bf16.gmra.mrb[52].mxu0 %vm1257_vm2, %v6972_v18  ;;  %v6991_v18 = vrot.slane %v18129_v15, 2  ;;  %v18141_v15 = vld [vmem:[%s18712_s11 + $0x1a0] sm:$0xff]  }
 0x11c   : > { %16367 = vmatprep.mubr.msk.bf16.mxu0 %vm1257_vm2, %v6974_v24  ;;  %v19233_v24 = vld [vmem:[%s18712_s11 + $0x18] sm:$0xff]  }
 0x11d   : > { %v6994_v54 = vsel %vm6915_vm4, %v6991_v18, %v6993_v22 }
 0x120   : > { %15746 = vmatmul.mubr.msk.bf16.gmra.mrb[124].mxu1 %vm1257_vm2, %v1224_v26  ;;  %v6992_v26 = vsel %vm6915_vm4, %v6989_v11, %v6991_v18  ;;  %v19318_v11 = vld [vmem:[%s18712_s11 + $0x70] sm:$0xff]   ;;  %v7015_v18 = vrot.slane %v18141_v15, 2 }
 0x121   : > { %15749 = vmatprep.mubr.msk.bf16.mxu1 %vm1257_vm2, %v1232_v29  ;;  %v6995_v29 = vrot.slane %v18131_v27, 2  ;;  %v19334_v27 = vld [vmem:[%s18712_s11 + $0x80] sm:$0xff]  }
 0x123   : > { %16368 = vmatmul.mubr.msk.bf16.gmra.mrb[56].mxu0 %vm1257_vm2, %v6976_v38  ;;  %v6996_v33 = vsel %vm6915_vm4, %v6993_v22, %v6995_v29  ;;  %v6998_v35 = vsel %vm6915_vm4, %v6995_v29, %v6997_v30  ;;  %v6999_v38 = vrot.slane %v18133_v34, 2  ;;  %v7017_v22 = vrot.slane %v18142_v17, 2  ;;  %v19398_v17 = vld [vmem:[%s18712_s11 + $0xc0] sm:$0xff]  }
 0x124   : > { %16371 = vmatprep.mubr.msk.bf16.mxu0 %vm1257_vm2, %v6978_v42  ;;  %v19270_v42 = vld [vmem:[%s18712_s11 + $0x40] sm:$0xff]  }
 0x125   : > { %v7002_v45 = vsel %vm6915_vm4, %v6999_v38, %v7001_v39  ;;  %v7018_v29 = vsel %vm6915_vm4, %v7015_v18, %v7017_v22  ;;  %v18145_v39 = vld [vmem:[%s18712_s11 + $0x1c0] sm:$0xff]  }
 0x128   : > { %15750 = vmatmul.mubr.msk.bf16.gmra.mrb[128].mxu1 %vm1257_vm2, %v1240_v43  ;;  %v7000_v43 = vsel %vm6915_vm4, %v6997_v30, %v6999_v38  ;;  %v18144_v30 = vld [vmem:[%s18712_s11 + $0x1b8] sm:$0xff]  }
 0x129   : > { %15753 = vmatprep.mubr.msk.bf16.mxu1 %vm1257_vm2, %v1248_v49  ;;  %v7005_v49 = vrot.slane %v18136_v46, 2  ;;  %v7021_v34 = vrot.slane %v18144_v30, 2  ;;  %v7025_v46 = vrot.slane %v18146_v44, 2  ;;  %v18154_v44 = vld [vmem:[%s18712_s11 + $0x208] sm:$0xff]  }
 0x12b   : > { %16372 = vmatmul.mubr.msk.bf16.gmra.mrb[60].mxu0 %vm1257_vm2, %v6980_v56  ;;  %v7006_v56 = vsel %vm6915_vm4, %v7003_v47, %v7005_v49  ;;  %v7008_v1 = vsel %vm6915_vm4, %v7005_v49, %v7007_v59  ;;  %v19361_v47 = vld [vmem:[%s18712_s11 + $0x98] sm:$0xff]   ;;  %v19366_v49 = vld [vmem:[%s18712_s11 + $0xa0] sm:$0xff]  }
 0x12c   : > { %16375 = vmatprep.mubr.msk.bf16.mxu0 %vm1257_vm2, %v6982_v58  ;;  %v18138_v58 = vld [vmem:[%s18712_s11 + $0x188] sm:$0xff]  }
 0x130   : > { %15754 = vmatmul.mubr.msk.bf16.gmra.mrb[132].mxu1 %vm1257_vm2, %v1256_v60  ;;  %v7009_v60 = vrot.slane %v18138_v58, 2  ;;  %v18148_v58 = vld [vmem:[%s18712_s11 + $0x1d8] sm:$0xff]  }
 0x131   : > { %15759 = vmatprep.mubr.msk.bf16.mxu1 %vm1257_vm2, %v18717_v9  ;;  %v19215_v9 = vld [vmem:[%s18712_s11 + $0x10] sm:$0xff]  }
 0x132   : > { %v7010_v4 = vsel %vm6915_vm4, %v7007_v59, %v7009_v60  ;;  %v7027_v59 = vrot.slane %v18147_v55, 2  ;;  %v19430_v55 = vld [vmem:[%s18712_s11 + $0xe0] sm:$0xff]  }
 0x133   : > { %16376 = vmatmul.mubr.msk.bf16.gmra.mrb[64].mxu0 %vm1257_vm2, %v6984_v2  ;;  %v18139_v2 = vld [vmem:[%s18712_s11 + $0x190] sm:$0xff]  }
 0x134   : > { %16379 = vmatprep.mubr.msk.bf16.mxu0 %vm1257_vm2, %v6986_v5  ;;  %v18140_v5 = vld [vmem:[%s18712_s11 + $0x198] sm:$0xff]   ;;  %v7011_v6 = vrot.slane %v18139_v2, 2  ;;  %v19382_v2 = vld [vmem:[%s18712_s11 + $0xb0] sm:$0xff]  }
 0x138   : > { %15760 = vmatmul.mubr.msk.bf16.vlgmr.msra.gmra.mrb[0].mxu1 %vm1257_vm2, %v19210_v13 }
 0x139   : > { %15896 = vmatpush3.bf16.msra.mxu1 %v3108_v7  ;;  %15763 = vmatprep.mubr.msk.bf16.mxu1 %vm1257_vm2, %v19215_v9  ;;  %v7013_v7 = vrot.slane %v18140_v5, 2  ;;  %v18149_v5 = vld [vmem:[%s18712_s11 + $0x1e0] sm:$0xff]  }
 0x13b   : > { %16380 = vmatmul.mubr.msk.bf16.gmra.mrb[68].mxu0 %vm1257_vm2, %v6988_v14  ;;  %v7012_v14 = vsel %vm6915_vm4, %v7009_v60, %v7011_v6  ;;  %v7029_v60 = vrot.slane %v18148_v58, 2  ;;  %v18155_v58 = vld [vmem:[%s18712_s11 + $0x210] sm:$0xff]  }
 0x13c   : > { %16383 = vmatprep.mubr.msk.bf16.mxu0 %vm1257_vm2, %v6990_v28  ;;  %v7014_v28 = vsel %vm6915_vm4, %v7011_v6, %v7013_v7 }
 0x13d   : > { %v7030_v6 = vsel %vm6915_vm4, %v7027_v59, %v7029_v60 }
 0x140   : > { %15764 = vmatmul.mubr.msk.bf16.gmra.mrb[4].mxu1 %vm1257_vm2, %v19233_v24 }
 0x141   : > { %15767 = vmatprep.mubr.msk.bf16.mxu1 %vm1257_vm2, %v19238_v25 }
 0x143   : > { %16384 = vmatmul.mubr.msk.bf16.gmra.mrb[72].mxu0 %vm1257_vm2, %v6992_v26  ;;  %v19329_v26 = vld [vmem:[%s18712_s11 + $0x78] sm:$0xff]  }
 0x144   : > { %16387 = vmatprep.mubr.msk.bf16.mxu0 %vm1257_vm2, %v6994_v54  ;;  %v7016_v54 = vsel %vm6915_vm4, %v7013_v7, %v7015_v18  ;;  %v18150_v7 = vld [vmem:[%s18712_s11 + $0x1e8] sm:$0xff]  }
 0x145   : > { %v7033_v15 = vrot.slane %v18150_v7, 2  ;;  %v19446_v7 = vld [vmem:[%s18712_s11 + $0xf0] sm:$0xff]  }
 0x148   : > { %15768 = vmatmul.mubr.msk.bf16.gmra.mrb[8].mxu1 %vm1257_vm2, %v19249_v31 }
 0x149   : > { %15771 = vmatprep.mubr.msk.bf16.mxu1 %vm1257_vm2, %v19254_v32 }
 0x14b   : > { %16388 = vmatmul.mubr.msk.bf16.gmra.mrb[76].mxu0 %vm1257_vm2, %v6996_v33  ;;  %v7019_v33 = vrot.slane %v18143_v12, 2  ;;  %v18152_v12 = vld [vmem:[%s18712_s11 + $0x1f8] sm:$0xff]  }
 0x14c   : > { %16391 = vmatprep.mubr.msk.bf16.mxu0 %vm1257_vm2, %v6998_v35  ;;  %v19345_v35 = vld [vmem:[%s18712_s11 + $0x88] sm:$0xff]   ;;  %v7037_v30 = vrot.slane %v18152_v12, 2 }
 0x14d   : > { %v7020_v38 = vsel %vm6915_vm4, %v7017_v22, %v7019_v33  ;;  %v18151_v22 = vld [vmem:[%s18712_s11 + $0x1f0] sm:$0xff]  }
 0x150   : > { %15772 = vmatmul.mubr.msk.bf16.gmra.mrb[12].mxu1 %vm1257_vm2, %v19265_v40 }
 0x151   : > { %15775 = vmatprep.mubr.msk.bf16.mxu1 %vm1257_vm2, %v19270_v42 }
 0x153   : > { %16392 = vmatmul.mubr.msk.bf16.gmra.mrb[80].mxu0 %vm1257_vm2, %v7000_v43  ;;  %v7022_v43 = vsel %vm6915_vm4, %v7019_v33, %v7021_v34  ;;  %v19409_v33 = vld [vmem:[%s18712_s11 + $0xc8] sm:$0xff]  }
 0x154   : > { %16395 = vmatprep.mubr.msk.bf16.mxu0 %vm1257_vm2, %v7002_v45  ;;  %v7023_v45 = vrot.slane %v18145_v39, 2  ;;  %v18153_v39 = vld [vmem:[%s18712_s11 + $0x200] sm:$0xff]  }
 0x158   : > { %15776 = vmatmul.mubr.msk.bf16.gmra.mrb[16].mxu1 %vm1257_vm2, %v19281_v50 }
 0x159   : > { %15779 = vmatprep.mubr.msk.bf16.mxu1 %vm1257_vm2, %v19286_v51 }
 0x15b   : > { %16396 = vmatmul.mubr.msk.bf16.gmra.mrb[84].mxu0 %vm1257_vm2, %v7004_v52  ;;  %v7024_v52 = vsel %vm6915_vm4, %v7021_v34, %v7023_v45  ;;  %v19414_v34 = vld [vmem:[%s18712_s11 + $0xd0] sm:$0xff]  }
 0x15c   : > { %16399 = vmatprep.mubr.msk.bf16.mxu0 %vm1257_vm2, %v7006_v56  ;;  %v7026_v56 = vsel %vm6915_vm4, %v7023_v45, %v7025_v46  ;;  %v7039_v45 = vrot.slane %v18153_v39, 2  ;;  %v19464_v39 = vld [vmem:[%s18712_s11 + $0x100] sm:$0xff]  }
 0x160   : > { %15780 = vmatmul.mubr.msk.bf16.gmra.mrb[20].mxu1 %vm1257_vm2, %v19297_v61 }
 0x161   : > { %15783 = vmatprep.mubr.msk.bf16.mxu1 %vm1257_vm2, %v19302_v0 }
 0x163   : > { %16400 = vmatmul.mubr.msk.bf16.gmra.mrb[88].mxu0 %vm1257_vm2, %v7008_v1  ;;  %v19377_v1 = vld [vmem:[%s18712_s11 + $0xa8] sm:$0xff]  }
 0x164   : > { %16403 = vmatprep.mubr.msk.bf16.mxu0 %vm1257_vm2, %v7010_v4  ;;  %v7028_v4 = vsel %vm6915_vm4, %v7025_v46, %v7027_v59  ;;  %v7041_v46 = vrot.slane %v18154_v44, 2  ;;  %v18159_v44 = vld [vmem:[%s18712_s11 + $0x230] ss:$0 sps:$4 sm:$0x33]  }
 0x166   : > { %v7042_v59 = vsel %vm6915_vm4, %v7039_v45, %v7041_v46 }
 0x168   : > { %15784 = vmatmul.mubr.msk.bf16.gmra.mrb[24].mxu1 %vm1257_vm2, %v19313_v8 }
 0x169   : > { %15787 = vmatprep.mubr.msk.bf16.mxu1 %vm1257_vm2, %v19318_v11 }
 0x16b   : > { %16404 = vmatmul.mubr.msk.bf16.gmra.mrb[92].mxu0 %vm1257_vm2, %v7012_v14  ;;  %v7031_v14 = vrot.slane %v18149_v5, 2 }
 0x16c   : > { %16407 = vmatprep.mubr.msk.bf16.mxu0 %vm1257_vm2, %v7014_v28  ;;  %v19393_v28 = vld [vmem:[%s18712_s11 + $0xb8] sm:$0xff]  }
 0x16d   : > { %v7032_v18 = vsel %vm6915_vm4, %v7029_v60, %v7031_v14  ;;  %v18156_v60 = vld [vmem:[%s18712_s11 + $0x218] sm:$0xff]  }
 0x16e   : > { %v7045_v5 = vrot.slane %v18156_v60, 2 }
 0x170   : > { %15788 = vmatmul.mubr.msk.bf16.gmra.mrb[28].mxu1 %vm1257_vm2, %v19329_v26 }
 0x171   : > { %15791 = vmatprep.mubr.msk.bf16.mxu1 %vm1257_vm2, %v19334_v27 }
 0x173   : > { %16408 = vmatmul.mubr.msk.bf16.gmra.mrb[96].mxu0 %vm1257_vm2, %v7016_v54  ;;  %v7034_v54 = vsel %vm6915_vm4, %v7031_v14, %v7033_v15 }
 0x174   : > { %16411 = vmatprep.mubr.msk.bf16.mxu0 %vm1257_vm2, %v7018_v29  ;;  %v7035_v29 = vrot.slane %v18151_v22, 2  ;;  %v18158_v22 = vld [vmem:[%s18712_s11 + $0x228] sm:$0xff]  }
 0x175   : > { %v7049_v12 = vrot.slane %v18158_v22, 2  ;;  %v19496_v22 = vld [vmem:[%s18712_s11 + $0x38] sm:$0xff]  }
 0x178   : > { %15792 = vmatmul.mubr.msk.bf16.gmra.mrb[32].mxu1 %vm1257_vm2, %v19345_v35 }
 0x179   : > { %15795 = vmatprep.mubr.msk.bf16.mxu1 %vm1257_vm2, %v19350_v37 }
 0x17b   : > { %16412 = vmatmul.mubr.msk.bf16.gmra.mrb[100].mxu0 %vm1257_vm2, %v7020_v38  ;;  %v7036_v38 = vsel %vm6915_vm4, %v7033_v15, %v7035_v29  ;;  %v18157_v15 = vld [vmem:[%s18712_s11 + $0x220] sm:$0xff]  }
 0x17c   : > { %16415 = vmatprep.mubr.msk.bf16.mxu0 %vm1257_vm2, %v7022_v43  ;;  %v7038_v43 = vsel %vm6915_vm4, %v7035_v29, %v7037_v30  ;;  %v19457_v29 = vld [vmem:[%s18712_s11 + $0xf8] sm:$0xff]  }
 0x180   : > { %15796 = vmatmul.mubr.msk.bf16.gmra.mrb[36].mxu1 %vm1257_vm2, %v19361_v47 }
 0x181   : > { %15799 = vmatprep.mubr.msk.bf16.mxu1 %vm1257_vm2, %v19366_v49 }
 0x183   : > { %16416 = vmatmul.mubr.msk.bf16.gmra.mrb[104].mxu0 %vm1257_vm2, %v7024_v52  ;;  %v19425_v52 = vld [vmem:[%s18712_s11 + $0xd8] sm:$0xff]  }
 0x184   : > { %16419 = vmatprep.mubr.msk.bf16.mxu0 %vm1257_vm2, %v7026_v56  ;;  %v7040_v56 = vsel %vm6915_vm4, %v7037_v30, %v7039_v45  ;;  %v7973_v30 = vld [vmem:[%s18712_s11 + $0x20] sm:$0xc] }
 0x188   : > { %15800 = vmatmul.mubr.msk.bf16.gmra.mrb[40].mxu1 %vm1257_vm2, %v19377_v1 }
 0x189   : > { %15803 = vmatprep.mubr.msk.bf16.mxu1 %vm1257_vm2, %v19382_v2 }
 0x18b   : > { %16420 = vmatmul.mubr.msk.bf16.gmra.mrb[108].mxu0 %vm1257_vm2, %v7028_v4  ;;  %v7043_v4 = vrot.slane %v18155_v58, 2  ;;  %v7051_v58 = vrot.slane %v18159_v44, 2  ;;  %v19514_v44 = vld [vmem:[%s18712_s11 + $0x40] sm:$0xff]  }
 0x18c   : > { %16423 = vmatprep.mubr.msk.bf16.mxu0 %vm1257_vm2, %v7030_v6  ;;  %v19441_v6 = vld [vmem:[%s18712_s11 + $0xe8] sm:$0xff]   ;;  %21601 = vst [vmem:[#allocation8_spill] sm:$0xff] %v19514_v44 }
 0x18d   : > { %v7044_v14 = vsel %vm6915_vm4, %v7041_v46, %v7043_v4 }
 0x190   : > { %15804 = vmatmul.mubr.msk.bf16.gmra.mrb[44].mxu1 %vm1257_vm2, %v19393_v28 }
 0x191   : > { %15807 = vmatprep.mubr.msk.bf16.mxu1 %vm1257_vm2, %v19398_v17 }
 0x193   : > { %16424 = vmatmul.mubr.msk.bf16.gmra.mrb[112].mxu0 %vm1257_vm2, %v7032_v18  ;;  %v7046_v18 = vsel %vm6915_vm4, %v7043_v4, %v7045_v5  ;;  %v19481_v4 = vld [vmem:[%s18712_s11 + $0x108] sm:$0xff]  }
 0x194   : > { %16427 = vmatprep.mubr.msk.bf16.mxu0 %vm1257_vm2, %v7034_v54  ;;  %v7047_v54 = vrot.slane %v18157_v15, 2  ;;  %v19492_v15 = vld [vmem:[%s18712_s11 + $0x30] sm:$0xff]  }
 0x196   : > { %v7050_v45 = vsel %vm6915_vm4, %v7047_v54, %v7049_v12 }
 0x198   : > { %15808 = vmatmul.mubr.msk.bf16.gmra.mrb[48].mxu1 %vm1257_vm2, %v19409_v33 }
 0x199   : > { %15811 = vmatprep.mubr.msk.bf16.mxu1 %vm1257_vm2, %v19414_v34 }
 0x19b   : > { %16428 = vmatmul.mubr.msk.bf16.gmra.mrb[116].mxu0 %vm1257_vm2, %v7036_v38  ;;  %v7974_v38 = vld [vmem:[%s18712_s11 + $0x24] sm:$0xf] }
 0x19c   : > { %16431 = vmatprep.mubr.msk.bf16.mxu0 %vm1257_vm2, %v7038_v43  ;;  %v7048_v43 = vsel %vm6915_vm4, %v7045_v5, %v7047_v54  ;;  %v19471_v46 = vcombine.low %v7973_v30, %v7974_v38  ;;  %v19486_v5 = vld [vmem:[%s18712_s11 + $0x110] sm:$0xff]   ;;  %v8458_v54 = vrot.slane %v19492_v15, 2  ;;  %v8460_v30 = vrot.slane %v19496_v22, 2  ;;  %v19503_v38 = vld [vmem:[%s18712_s11 + $0x118] sm:$0xff]  }
 0x1a0   : > { %15812 = vmatmul.mubr.msk.bf16.gmra.mrb[52].mxu1 %vm1257_vm2, %v19425_v52 }
 0x1a1   : > { %15815 = vmatprep.mubr.msk.bf16.mxu1 %vm1257_vm2, %v19430_v55 }
 0x1a3   : > { %16432 = vmatmul.mubr.msk.bf16.gmra.mrb[120].mxu0 %vm1257_vm2, %v7040_v56  ;;  %v19474_v56 = vld [vmem:[%s18712_s11 + $0x28] sm:$0xff]  }
 0x1a4   : > { %16435 = vmatprep.mubr.msk.bf16.mxu0 %vm1257_vm2, %v7042_v59  ;;  %v8455_v59 = vrot.slane %v19471_v46, 2  ;;  %v8456_v60 = vrot.slane %v19474_v56, 2 }
 0x1a8   : > { %15816 = vmatmul.mubr.msk.bf16.gmra.mrb[56].mxu1 %vm1257_vm2, %v19441_v6 }
 0x1a9   : > { %15819 = vmatprep.mubr.msk.bf16.mxu1 %vm1257_vm2, %v19446_v7 }
 0x1ab   : > { %16436 = vmatmul.mubr.msk.bf16.gmra.mrb[124].mxu0 %vm1257_vm2, %v7044_v14  ;;  %v7052_v14 = vsel %vm6915_vm4, %v7049_v12, %v7051_v58  ;;  %v19508_v12 = vld [vmem:[%s18712_s11 + $0x120] sm:$0xff]   ;;  %v8461_v58 = vsel %vm6915_vm4, %v8458_v54, %v8460_v30 }
 0x1ac   : > { %16439 = vmatprep.mubr.msk.bf16.mxu0 %vm1257_vm2, %v7046_v18  ;;  %v8457_v18 = vsel %vm6915_vm4, %v8455_v59, %v8456_v60  ;;  %v19520_v59 = vld [vmem:[%s18712_s11 + $0x48] sm:$0xff]  }
 0x1ad   : > { %21602 = vst [vmem:[#allocation9_spill] sm:$0xff] %v19520_v59 }
 0x1b0   : > { %15820 = vmatmul.mubr.msk.bf16.gmra.mrb[60].mxu1 %vm1257_vm2, %v19457_v29 }
 0x1b1   : > { %15823 = vmatprep.mubr.msk.bf16.mxu1 %vm1257_vm2, %v19464_v39 }
 0x1b3   : > { %16440 = vmatmul.mubr.msk.bf16.gmra.mrb[128].mxu0 %vm1257_vm2, %v7048_v43  ;;  %v8459_v43 = vsel %vm6915_vm4, %v8456_v60, %v8458_v54  ;;  %v8462_v60 = vrot.slane %v19514_v44, 2  ;;  %v19539_v54 = vld [vmem:[%s18712_s11 + $0x130] sm:$0xff]   ;;  %v18183_v44 = vld [vmem:[%s18712_s11 + $0xd8] sm:$0xff]  }
 0x1b4   : > { %16443 = vmatprep.mubr.msk.bf16.mxu0 %vm1257_vm2, %v7050_v45  ;;  %v10344_v45 = vsel %vm1462_vm0, %v19228_v19, 0  ;;  %v8464_v19 = vrot.slane %v19520_v59, 2  ;;  %21603 = vst [vmem:[#allocation10_spill] sm:$0xff] %v19539_v54  ;;  %v19704_v59 = vld [vmem:[%s18712_s11 + $0x1a8] sm:$0xff]  }
 0x1b5   : > { %21632 = vst [vmem:[#allocation39_spill] sm:$0xff] %v19704_v59 }
 0x1b8   : > { %15824 = vmatmul.mubr.msk.bf16.gmra.mrb[64].mxu1 %vm1257_vm2, %v19481_v4 }
 0x1b9   : > { %15827 = vmatprep.mubr.msk.bf16.mxu1 %vm1257_vm2, %v19486_v5 }
 0x1bb   : > { %16444 = vmatmul.mubr.msk.bf16.gmra.mrb[132].mxu0 %vm1257_vm2, %v7052_v14  ;;  %v19526_v14 = vld [vmem:[%s21538_s1 + $0xc] sm:$0xf] }
 0x1bc   : > { %16449 = vmatprep.mubr.msk.bf16.mxu0 %vm1257_vm2, %v8457_v18  ;;  %17954 = vmatprep.subr.msk.bf16.mxu1 %vm1462_vm0, %v19526_v14  ;;  %v19534_v18 = vld [vmem:[%s18712_s11 + $0x128] sm:$0xff]  }
 0x1c0   : > { %15828 = vmatmul.mubr.msk.bf16.gmra.mrb[68].mxu1 %vm1257_vm2, %v19503_v38 }
 0x1c1   : > { %15831 = vmatprep.mubr.msk.bf16.mxu1 %vm1257_vm2, %v19508_v12 }
 0x1c3   : > { %16450 = vmatmul.mubr.msk.bf16.vlgmr.msra.gmra.mrb[0].mxu0 %vm1257_vm2, %v8459_v43  ;;  %v8463_v43 = vsel %vm6915_vm4, %v8460_v30, %v8462_v60  ;;  %v19561_v30 = vld [vmem:[%s18712_s11 + $0x140] sm:$0xff]  }
 0x1c4   : > { %16586 = vmatpush3.bf16.msra.mxu0 %v10344_v45  ;;  %16453 = vmatprep.mubr.msk.bf16.mxu0 %vm1257_vm2, %v8461_v58  ;;  %v19545_v45 = vld [vmem:[%s18712_s11 + $0x50] sm:$0xff]   ;;  %v8465_v58 = vsel %vm6915_vm4, %v8462_v60, %v8464_v19  ;;  %21607 = vst [vmem:[#allocation14_spill] sm:$0xff] %v19561_v30 }
 0x1c5   : > { %21604 = vst [vmem:[#allocation11_spill] sm:$0xff] %v19545_v45  ;;  %v8466_v3 = vrot.slane %v19545_v45, 2  ;;  %v19571_v45 = vld [vmem:[%s18712_s11 + $0x68] sm:$0xff]  }
 0x1c6   : > { %21609 = vst [vmem:[#allocation16_spill] sm:$0xff] %v19571_v45 }
 0x1c7   : > { %v8467_v60 = vsel %vm6915_vm4, %v8464_v19, %v8466_v3  ;;  %v19583_v19 = vld [vmem:[%s18712_s11 + $0x150] sm:$0xff]  }
 0x1c8   : > { %15832 = vmatmul.mubr.msk.bf16.gmra.mrb[72].mxu1 %vm1257_vm2, %v19534_v18  ;;  %21611 = vst [vmem:[#allocation18_spill] sm:$0xff] %v19583_v19 }
 0x1c9   : > { %15835 = vmatprep.mubr.msk.bf16.mxu1 %vm1257_vm2, %v19539_v54  ;;  %v19556_v54 = vld [vmem:[%s18712_s11 + $0x138] sm:$0xff]  }
 0x1ca   : > { %21606 = vst [vmem:[#allocation13_spill] sm:$0xff] %v19556_v54 }
 0x1cb   : > { %16454 = vmatmul.mubr.msk.bf16.gmra.mrb[4].mxu0 %vm1257_vm2, %v8463_v43  ;;  %v19567_v43 = vld [vmem:[%s18712_s11 + $0x60] sm:$0xff]  }
 0x1cc   : > { %16457 = vmatprep.mubr.msk.bf16.mxu0 %vm1257_vm2, %v8465_v58  ;;  %21608 = vst [vmem:[#allocation15_spill] sm:$0xff] %v19567_v43  ;;  %v8469_v58 = vsel %vm6915_vm4, %v8466_v3, %v8468_v20  ;;  %v8470_v48 = vrot.slane %v19567_v43, 2  ;;  %v19593_v43 = vld [vmem:[%s18712_s11 + $0x78] sm:$0xff]  }
 0x1cd   : > { %21613 = vst [vmem:[#allocation20_spill] sm:$0xff] %v19593_v43 }
 0x1ce   : > { %v8471_v3 = vsel %vm6915_vm4, %v8468_v20, %v8470_v48  ;;  %v19605_v20 = vld [vmem:[%s18712_s11 + $0x160] sm:$0xff]  }
 0x1cf   : > { %21615 = vst [vmem:[#allocation22_spill] sm:$0xff] %v19605_v20 }
 0x1d0   : > { %15836 = vmatmul.mubr.msk.bf16.gmra.mrb[76].mxu1 %vm1257_vm2, %v19556_v54  ;;  %v8472_v54 = vrot.slane %v19571_v45, 2 }
 0x1d1   : > { %15839 = vmatprep.mubr.msk.bf16.mxu1 %vm1257_vm2, %v19561_v30  ;;  %v19578_v30 = vld [vmem:[%s18712_s11 + $0x148] sm:$0xff]  }
 0x1d2   : > { %21610 = vst [vmem:[#allocation17_spill] sm:$0xff] %v19578_v30 }
 0x1d3   : > { %16458 = vmatmul.mubr.msk.bf16.gmra.mrb[8].mxu0 %vm1257_vm2, %v8467_v60  ;;  %v19589_v60 = vld [vmem:[%s18712_s11 + $0x70] sm:$0xff]  }
 0x1d4   : > { %16461 = vmatprep.mubr.msk.bf16.mxu0 %vm1257_vm2, %v8469_v58  ;;  %21612 = vst [vmem:[#allocation19_spill] sm:$0xff] %v19589_v60  ;;  %v8473_v58 = vsel %vm6915_vm4, %v8470_v48, %v8472_v54  ;;  %v8474_v45 = vrot.slane %v19589_v60, 2  ;;  %v19615_v60 = vld [vmem:[%s18712_s11 + $0x88] sm:$0xff]  }
 0x1d5   : > { %21617 = vst [vmem:[#allocation24_spill] sm:$0xff] %v19615_v60 }
 0x1d6   : > { %v8475_v48 = vsel %vm6915_vm4, %v8472_v54, %v8474_v45  ;;  %v19627_v54 = vld [vmem:[%s18712_s11 + $0x170] sm:$0xff]  }
 0x1d7   : > { %21619 = vst [vmem:[#allocation26_spill] sm:$0xff] %v19627_v54 }
 0x1d8   : > { %15840 = vmatmul.mubr.msk.bf16.gmra.mrb[80].mxu1 %vm1257_vm2, %v19578_v30  ;;  %v8476_v30 = vrot.slane %v19593_v43, 2 }
 0x1d9   : > { %15843 = vmatprep.mubr.msk.bf16.mxu1 %vm1257_vm2, %v19583_v19  ;;  %v19600_v19 = vld [vmem:[%s18712_s11 + $0x158] sm:$0xff]  }
 0x1da   : > { %21614 = vst [vmem:[#allocation21_spill] sm:$0xff] %v19600_v19 }
 0x1db   : > { %16462 = vmatmul.mubr.msk.bf16.gmra.mrb[12].mxu0 %vm1257_vm2, %v8471_v3  ;;  %v19611_v3 = vld [vmem:[%s18712_s11 + $0x80] sm:$0xff]  }
 0x1dc   : > { %16465 = vmatprep.mubr.msk.bf16.mxu0 %vm1257_vm2, %v8473_v58  ;;  %21616 = vst [vmem:[#allocation23_spill] sm:$0xff] %v19611_v3  ;;  %v8477_v58 = vsel %vm6915_vm4, %v8474_v45, %v8476_v30  ;;  %v8478_v43 = vrot.slane %v19611_v3, 2  ;;  %v19637_v3 = vld [vmem:[%s18712_s11 + $0x98] sm:$0xff]  }
 0x1dd   : > { %21621 = vst [vmem:[#allocation28_spill] sm:$0xff] %v19637_v3 }
 0x1de   : > { %v8479_v45 = vsel %vm6915_vm4, %v8476_v30, %v8478_v43  ;;  %v19649_v30 = vld [vmem:[%s18712_s11 + $0x180] sm:$0xff]  }
 0x1df   : > { %21623 = vst [vmem:[#allocation30_spill] sm:$0xff] %v19649_v30 }
 0x1e0   : > { %15844 = vmatmul.mubr.msk.bf16.gmra.mrb[84].mxu1 %vm1257_vm2, %v19600_v19  ;;  %v8480_v19 = vrot.slane %v19615_v60, 2 }
 0x1e1   : > { %15847 = vmatprep.mubr.msk.bf16.mxu1 %vm1257_vm2, %v19605_v20  ;;  %v19622_v20 = vld [vmem:[%s18712_s11 + $0x168] sm:$0xff]  }
 0x1e2   : > { %21618 = vst [vmem:[#allocation25_spill] sm:$0xff] %v19622_v20 }
 0x1e3   : > { %16466 = vmatmul.mubr.msk.bf16.gmra.mrb[16].mxu0 %vm1257_vm2, %v8475_v48  ;;  %v19633_v48 = vld [vmem:[%s18712_s11 + $0x90] sm:$0xff]  }
 0x1e4   : > { %16469 = vmatprep.mubr.msk.bf16.mxu0 %vm1257_vm2, %v8477_v58  ;;  %21620 = vst [vmem:[#allocation27_spill] sm:$0xff] %v19633_v48  ;;  %v8481_v58 = vsel %vm6915_vm4, %v8478_v43, %v8480_v19  ;;  %v8482_v60 = vrot.slane %v19633_v48, 2  ;;  %v19659_v48 = vld [vmem:[%s18712_s11 + $0xa8] sm:$0xff]  }
 0x1e5   : > { %21625 = vst [vmem:[#allocation32_spill] sm:$0xff] %v19659_v48 }
 0x1e6   : > { %v8483_v43 = vsel %vm6915_vm4, %v8480_v19, %v8482_v60  ;;  %v19671_v19 = vld [vmem:[%s18712_s11 + $0x190] sm:$0xff]  }
 0x1e7   : > { %21627 = vst [vmem:[#allocation34_spill] sm:$0xff] %v19671_v19 }
 0x1e8   : > { %15848 = vmatmul.mubr.msk.bf16.gmra.mrb[88].mxu1 %vm1257_vm2, %v19622_v20  ;;  %v8484_v20 = vrot.slane %v19637_v3, 2 }
 0x1e9   : > { %15851 = vmatprep.mubr.msk.bf16.mxu1 %vm1257_vm2, %v19627_v54  ;;  %v19644_v54 = vld [vmem:[%s18712_s11 + $0x178] sm:$0xff]  }
 0x1ea   : > { %21622 = vst [vmem:[#allocation29_spill] sm:$0xff] %v19644_v54 }
 0x1eb   : > { %16470 = vmatmul.mubr.msk.bf16.gmra.mrb[20].mxu0 %vm1257_vm2, %v8479_v45  ;;  %v19655_v45 = vld [vmem:[%s18712_s11 + $0xa0] sm:$0xff]  }
 0x1ec   : > { %16473 = vmatprep.mubr.msk.bf16.mxu0 %vm1257_vm2, %v8481_v58  ;;  %21624 = vst [vmem:[#allocation31_spill] sm:$0xff] %v19655_v45  ;;  %v8485_v58 = vsel %vm6915_vm4, %v8482_v60, %v8484_v20  ;;  %v8486_v3 = vrot.slane %v19655_v45, 2  ;;  %v19681_v45 = vld [vmem:[%s18712_s11 + $0xb8] sm:$0xff]  }
 0x1ed   : > { %21629 = vst [vmem:[#allocation36_spill] sm:$0xff] %v19681_v45 }
 0x1ee   : > { %v8487_v60 = vsel %vm6915_vm4, %v8484_v20, %v8486_v3  ;;  %v19693_v20 = vld [vmem:[%s18712_s11 + $0x1a0] sm:$0xff]  }
 0x1ef   : > { %21631 = vst [vmem:[#allocation38_spill] sm:$0xff] %v19693_v20 }
 0x1f0   : > { %15852 = vmatmul.mubr.msk.bf16.gmra.mrb[92].mxu1 %vm1257_vm2, %v19644_v54  ;;  %v8488_v54 = vrot.slane %v19659_v48, 2 }
 0x1f1   : > { %15855 = vmatprep.mubr.msk.bf16.mxu1 %vm1257_vm2, %v19649_v30  ;;  %v19666_v30 = vld [vmem:[%s18712_s11 + $0x188] sm:$0xff]  }
 0x1f2   : > { %21626 = vst [vmem:[#allocation33_spill] sm:$0xff] %v19666_v30 }
 0x1f3   : > { %16474 = vmatmul.mubr.msk.bf16.gmra.mrb[24].mxu0 %vm1257_vm2, %v8483_v43  ;;  %v19677_v43 = vld [vmem:[%s18712_s11 + $0xb0] sm:$0xff]  }
 0x1f4   : > { %16477 = vmatprep.mubr.msk.bf16.mxu0 %vm1257_vm2, %v8485_v58  ;;  %21628 = vst [vmem:[#allocation35_spill] sm:$0xff] %v19677_v43  ;;  %v8489_v58 = vsel %vm6915_vm4, %v8486_v3, %v8488_v54  ;;  %v8490_v48 = vrot.slane %v19677_v43, 2  ;;  %v18181_v43 = vld [vmem:[%s18712_s11 + $0xc8] sm:$0xff]  }
 0x1f6   : > { %v8491_v3 = vsel %vm6915_vm4, %v8488_v54, %v8490_v48 }
 0x1f8   : > { %15856 = vmatmul.mubr.msk.bf16.gmra.mrb[96].mxu1 %vm1257_vm2, %v19666_v30  ;;  %v8492_v30 = vrot.slane %v19681_v45, 2 }
 0x1f9   : > { %15859 = vmatprep.mubr.msk.bf16.mxu1 %vm1257_vm2, %v19671_v19  ;;  %v19688_v19 = vld [vmem:[%s18712_s11 + $0x198] sm:$0xff]  }
 0x1fa   : > { %21630 = vst [vmem:[#allocation37_spill] sm:$0xff] %v19688_v19 }
 0x1fb   : > { %16478 = vmatmul.mubr.msk.bf16.gmra.mrb[28].mxu0 %vm1257_vm2, %v8487_v60  ;;  %v18180_v60 = vld [vmem:[%s18712_s11 + $0xc0] sm:$0xff]  }
 0x1fc   : > { %16481 = vmatprep.mubr.msk.bf16.mxu0 %vm1257_vm2, %v8489_v58  ;;  %v8493_v58 = vsel %vm6915_vm4, %v8490_v48, %v8492_v30  ;;  %v8494_v45 = vrot.slane %v18180_v60, 2  ;;  %v18182_v48 = vld [vmem:[%s18712_s11 + $0xd0] sm:$0xff]   ;;  %v8500_v60 = vrot.slane %v18183_v44, 2 }
 0x1fe   : > { %v8495_v54 = vsel %vm6915_vm4, %v8492_v30, %v8494_v45 }
 0x200   : > { %15860 = vmatmul.mubr.msk.bf16.gmra.mrb[100].mxu1 %vm1257_vm2, %v19688_v19  ;;  %v8496_v19 = vrot.slane %v18181_v43, 2  ;;  %v8498_v43 = vrot.slane %v18182_v48, 2 }
 0x201   : > { %15863 = vmatprep.mubr.msk.bf16.mxu1 %vm1257_vm2, %v19693_v20  ;;  %v18321_v20 = vld [vmem:[%s18712_s11 + $0x1b0] sm:$0xff]  }
 0x202   : > { %v8499_v30 = vsel %vm6915_vm4, %v8496_v19, %v8498_v43 }
 0x203   : > { %16482 = vmatmul.mubr.msk.bf16.gmra.mrb[32].mxu0 %vm1257_vm2, %v8491_v3  ;;  %v8497_v3 = vsel %vm6915_vm4, %v8494_v45, %v8496_v19  ;;  %v18184_v45 = vld [vmem:[%s18712_s11 + $0xe0] sm:$0xff]  }
 0x204   : > { %16485 = vmatprep.mubr.msk.bf16.mxu0 %vm1257_vm2, %v8493_v58  ;;  %v19717_v58 = vld [vmem:[%s18712_s11 + $0x1b8] sm:$0xff]   ;;  %v8502_v44 = vrot.slane %v18184_v45, 2 }
 0x205   : > { %21633 = vst [vmem:[#allocation40_spill] sm:$0xff] %v19717_v58 }
 0x206   : > { %v8503_v19 = vsel %vm6915_vm4, %v8500_v60, %v8502_v44 }
 0x208   : > { %15864 = vmatmul.mubr.msk.bf16.gmra.mrb[104].mxu1 %vm1257_vm2, %v19704_v59  ;;  %v18185_v59 = vld [vmem:[%s18712_s11 + $0xe8] sm:$0xff]  }
 0x209   : > { %15867 = vmatprep.mubr.msk.bf16.mxu1 %vm1257_vm2, %v18321_v20  ;;  %v18323_v20 = vld [vmem:[%s18712_s11 + $0x1c0] sm:$0xff]   ;;  %v8504_v48 = vrot.slane %v18185_v59, 2 }
 0x20b   : > { %16486 = vmatmul.mubr.msk.bf16.gmra.mrb[36].mxu0 %vm1257_vm2, %v8495_v54  ;;  %v8501_v54 = vsel %vm6915_vm4, %v8498_v43, %v8500_v60  ;;  %v8505_v43 = vsel %vm6915_vm4, %v8502_v44, %v8504_v48  ;;  %v18188_v60 = vld [vmem:[%s18712_s11 + $0x100] sm:$0xff]  }
 0x20c   : > { %16489 = vmatprep.mubr.msk.bf16.mxu0 %vm1257_vm2, %v8497_v3  ;;  %v18324_v3 = vld [vmem:[%s18712_s11 + $0x1c8] sm:$0xff]   ;;  %v8510_v44 = vrot.slane %v18188_v60, 2  ;;  %v18325_v60 = vld [vmem:[%s18712_s11 + $0x4] sm:$0xf] }
 0x210   : > { %15868 = vmatmul.mubr.msk.bf16.gmra.mrb[108].mxu1 %vm1257_vm2, %v19717_v58  ;;  %v18187_v58 = vld [vmem:[%s18712_s11 + $0xf8] sm:$0xff]  }
 0x211   : > { %15871 = vmatprep.mubr.msk.bf16.mxu1 %vm1257_vm2, %v18323_v20  ;;  %v18186_v20 = vld [vmem:[%s18712_s11 + $0xf0] sm:$0xff]   ;;  %v8508_v59 = vrot.slane %v18187_v58, 2 }
 0x213   : > { %16490 = vmatmul.mubr.msk.bf16.gmra.mrb[40].mxu0 %vm1257_vm2, %v8499_v30  ;;  %v8506_v30 = vrot.slane %v18186_v20, 2 }
 0x214   : > { %16493 = vmatprep.mubr.msk.bf16.mxu0 %vm1257_vm2, %v8501_v54  ;;  %v18189_v54 = vld [vmem:[%s18712_s11 + $0x108] sm:$0xff]  }
 0x215   : > { %v8509_v45 = vsel %vm6915_vm4, %v8506_v30, %v8508_v59  ;;  %v8512_v58 = vrot.slane %v18189_v54, 2  ;;  %v18194_v54 = vld [vmem:[%s18712_s11 + $0x130] sm:$0xff]  }
 0x218   : > { %15872 = vmatmul.mubr.msk.bf16.gmra.mrb[112].mxu1 %vm1257_vm2, %v18324_v3  ;;  %v18191_v3 = vld [vmem:[%s18712_s11 + $0x118] sm:$0xff]  }
 0x219   : > { %15875 = vmatprep.mubr.msk.bf16.mxu1 %vm1257_vm2, %v19074_v53  ;;  %v8507_v53 = vsel %vm6915_vm4, %v8504_v48, %v8506_v30  ;;  %v8513_v48 = vsel %vm6915_vm4, %v8510_v44, %v8512_v58  ;;  %v8516_v20 = vrot.slane %v18191_v3, 2  ;;  %v18193_v30 = vld [vmem:[%s18712_s11 + $0x128] sm:$0xff]  }
 0x21b   : > { %16494 = vmatmul.mubr.msk.bf16.gmra.mrb[44].mxu0 %vm1257_vm2, %v8503_v19 }
 0x21c   : > { %16497 = vmatprep.mubr.msk.bf16.mxu0 %vm1257_vm2, %v8505_v43 }
 0x220   : > { %15876 = vmatmul.mubr.msk.bf16.gmra.mrb[116].mxu1 %vm1257_vm2, %v19083_v63  ;;  %v8511_v63 = vsel %vm6915_vm4, %v8508_v59, %v8510_v44  ;;  %v2759_v59 = vld [vmem:[%s18712_s11] sm:$0xe] }
 0x221   : > { %15879 = vmatprep.mubr.msk.bf16.mxu1 %vm1257_vm2, %v19091_v10  ;;  %v18190_v10 = vld [vmem:[%s18712_s11 + $0x110] sm:$0xff]  }
 0x222   : > { %v8514_v19 = vrot.slane %v18190_v10, 2  ;;  %v18196_v10 = vld [vmem:[%s18712_s11 + $0x138] sm:$0xff]  }
 0x223   : > { %16498 = vmatmul.mubr.msk.bf16.gmra.mrb[48].mxu0 %vm1257_vm2, %v8507_v53 }
 0x224   : > { %16501 = vmatprep.mubr.msk.bf16.mxu0 %vm1257_vm2, %v8509_v45  ;;  %v8517_v43 = vsel %vm6915_vm4, %v8514_v19, %v8516_v20  ;;  %v13690_v45 = vcombine.low %v2759_v59, %v18325_v60  ;;  %v18199_v60 = vld [vmem:[%s18712_s11 + $0x150] sm:$0xff]  }
 0x226   : > { %v2766_v44 = vrot.slane %v13690_v45, 1  ;;  %v2775_v45 = vrot.slane %v19249_v31, 1 }
 0x228   : > { %15880 = vmatmul.mubr.msk.bf16.gmra.mrb[120].mxu1 %vm1257_vm2, %v19102_v21  ;;  %v8515_v21 = vsel %vm6915_vm4, %v8512_v58, %v8514_v19  ;;  %v2767_v58 = vrot.slane %v19210_v13, 1  ;;  %v2769_v13 = vrot.slane %v19215_v9, 1  ;;  %v18197_v19 = vld [vmem:[%s18712_s11 + $0x140] sm:$0xff]  }
 0x229   : > { %15883 = vmatprep.mubr.msk.bf16.mxu1 %vm1257_vm2, %v19119_v36  ;;  %v18192_v36 = vld [vmem:[%s18712_s11 + $0x120] sm:$0xff]   ;;  %v8526_v9 = vrot.slane %v18197_v19, 2 }
 0x22a   : > { %v8518_v53 = vrot.slane %v18192_v36, 2  ;;  %v18198_v36 = vld [vmem:[%s18712_s11 + $0x148] sm:$0xff]  }
 0x22b   : > { %16502 = vmatmul.mubr.msk.bf16.gmra.mrb[52].mxu0 %vm1257_vm2, %v8511_v63  ;;  %v8528_v59 = vrot.slane %v18198_v36, 2  ;;  %v18203_v36 = vld [vmem:[%s18712_s11 + $0x170] sm:$0xff]  }
 0x22c   : > { %16505 = vmatprep.mubr.msk.bf16.mxu0 %vm1257_vm2, %v8513_v48  ;;  %v2768_v48 = vsel %vm2765_vm5, %v2766_v44, %v2767_v58  ;;  %v19817_v44 = vld [vmem:[%s21538_s1 + $0x20] sm:$0xf] }
 0x22d   : > { %17960 = vmatprep.subr.msk.bf16.mxu0 %vm1462_vm0, %v19817_v44 }
 0x230   : > { %15884 = vmatmul.mubr.msk.bf16.gmra.mrb[124].mxu1 %vm1257_vm2, %v19124_v41  ;;  %v8520_v41 = vrot.slane %v18193_v30, 2 }
 0x231   : > { %15887 = vmatprep.mubr.msk.bf16.mxu1 %vm1257_vm2, %v19139_v57  ;;  %v8519_v57 = vsel %vm6915_vm4, %v8516_v20, %v8518_v53  ;;  %v2771_v20 = vrot.slane %v19233_v24, 1  ;;  %v2773_v24 = vrot.slane %v19238_v25, 1 }
 0x232   : > { %v8521_v63 = vsel %vm6915_vm4, %v8518_v53, %v8520_v41 }
 0x233   : > { %16506 = vmatmul.mubr.msk.bf16.gmra.mrb[56].mxu0 %vm1257_vm2, %v8515_v21  ;;  %v2772_v30 = vsel %vm2765_vm5, %v2769_v13, %v2771_v20  ;;  %v2774_v25 = vsel %vm2765_vm5, %v2771_v20, %v2773_v24  ;;  %v2776_v31 = vsel %vm2765_vm5, %v2773_v24, %v2775_v45 }
 0x234   : > { %16509 = vmatprep.mubr.msk.bf16.mxu0 %vm1257_vm2, %v8517_v43  ;;  %v2770_v43 = vsel %vm2765_vm5, %v2767_v58, %v2769_v13  ;;  %v18202_v13 = vld [vmem:[%s18712_s11 + $0x168] sm:$0xff]  }
 0x238   : > { %15888 = vmatmul.mubr.msk.bf16.gmra.mrb[128].mxu1 %vm1257_vm2, %v19144_v62  ;;  %v8522_v62 = vrot.slane %v18194_v54, 2  ;;  %v8530_v54 = vrot.slane %v18199_v60, 2  ;;  %v18205_v60 = vld [vmem:[%s18712_s11 + $0x180] sm:$0xff]  }
 0x239   : > { %15891 = vmatprep.mubr.msk.bf16.mxu1 %vm1257_vm2, %v19159_v16  ;;  %v8524_v16 = vrot.slane %v18196_v10, 2 }
 0x23a   : > { %v8523_v3 = vsel %vm6915_vm4, %v8520_v41, %v8522_v62  ;;  %v8529_v41 = vsel %vm6915_vm4, %v8526_v9, %v8528_v59  ;;  %v8531_v10 = vsel %vm6915_vm4, %v8528_v59, %v8530_v54  ;;  %v8538_v59 = vrot.slane %v18203_v36, 2 }
 0x23b   : > { %16510 = vmatmul.mubr.msk.bf16.gmra.mrb[60].mxu0 %vm1257_vm2, %v8519_v57  ;;  %v8525_v21 = vsel %vm6915_vm4, %v8522_v62, %v8524_v16  ;;  %v8527_v53 = vsel %vm6915_vm4, %v8524_v16, %v8526_v9  ;;  %v18200_v57 = vld [vmem:[%s18712_s11 + $0x158] sm:$0xff]   ;;  %v18201_v62 = vld [vmem:[%s18712_s11 + $0x160] sm:$0xff]  }
 0x23c   : > { %16513 = vmatprep.mubr.msk.bf16.mxu0 %vm1257_vm2, %v8521_v63  ;;  %v8532_v58 = vrot.slane %v18200_v57, 2  ;;  %v2777_v63 = vrot.slane %v19254_v32, 1  ;;  %v8534_v19 = vrot.slane %v18201_v62, 2  ;;  %v8536_v32 = vrot.slane %v18202_v13, 2  ;;  %v18204_v9 = vld [vmem:[%s18712_s11 + $0x178] sm:$0xff]  }
 0x23d   : > { %v18208_v62 = vld [vmem:[%s18712_s11 + $0x198] sm:$0xff]  }
 0x23e   : > { %v8533_v16 = vsel %vm6915_vm4, %v8530_v54, %v8532_v58 }
 0x240   : > { %15892 = vmatmul.mubr.msk.bf16.gmra.mrb[132].mxu1 %vm1257_vm2, %v19164_v23  ;;  %v4647_v23 = vsel %vm1462_vm0, %v19526_v14, 0  ;;  %v18326_v14 = vld [vmem:[%s21538_s1 + $0x10] sm:$0xf] }
 0x241   : > { %15897 = vmatprep.mubr.msk.bf16.mxu1 %vm1257_vm2, %v2768_v48  ;;  %v2779_v48 = vrot.slane %v19265_v40, 1  ;;  %v2781_v40 = vrot.slane %v19270_v42, 1  ;;  %v8540_v42 = vrot.slane %v18204_v9, 2  ;;  %v18211_v9 = vld [vmem:[%s18712_s11 + $0x1b0] sm:$0xff]  }
 0x243   : > { %16514 = vmatmul.mubr.msk.bf16.gmra.mrb[64].mxu0 %vm1257_vm2, %v8523_v3  ;;  %v2778_v3 = vsel %vm2765_vm5, %v2775_v45, %v2777_v63  ;;  %v2780_v20 = vsel %vm2765_vm5, %v2777_v63, %v2779_v48  ;;  %v2787_v45 = vrot.slane %v19297_v61, 1  ;;  %v2789_v61 = vrot.slane %v19302_v0, 1 }
 0x244   : > { %16517 = vmatprep.mubr.msk.bf16.mxu0 %vm1257_vm2, %v8525_v21  ;;  %v8535_v21 = vsel %vm6915_vm4, %v8532_v58, %v8534_v19  ;;  %v18207_v58 = vld [vmem:[%s18712_s11 + $0x190] sm:$0xff]   ;;  %v2791_v63 = vrot.slane %v19313_v8, 1  ;;  %v8548_v0 = vrot.slane %v18208_v62, 2  ;;  %v2793_v8 = vrot.slane %v19318_v11, 1 }
 0x246   : > { %v2792_v13 = vsel %vm2765_vm5, %v2789_v61, %v2791_v63 }
 0x248   : > { %15898 = vmatmul.mubr.msk.bf16.vlgmr.msra.gmra.mrb[0].mxu1 %vm1257_vm2, %v2770_v43  ;;  %v2783_v43 = vrot.slane %v19281_v50, 1  ;;  %v2785_v50 = vrot.slane %v19286_v51, 1 }
 0x249   : > { %16034 = vmatpush3.bf16.msra.mxu1 %v4647_v23  ;;  %15901 = vmatprep.mubr.msk.bf16.mxu1 %vm1257_vm2, %v2772_v30  ;;  %v8537_v23 = vsel %vm6915_vm4, %v8534_v19, %v8536_v32  ;;  %v2782_v30 = vsel %vm2765_vm5, %v2779_v48, %v2781_v40  ;;  %v2790_v48 = vsel %vm2765_vm5, %v2787_v45, %v2789_v61  ;;  %v18209_v19 = vld [vmem:[%s18712_s11 + $0x1a0] sm:$0xff]  }
 0x24a   : > { %17956 = vmatprep.subr.msk.bf16.mxu1 %vm1462_vm0, %v18326_v14  ;;  %v2784_v24 = vsel %vm2765_vm5, %v2781_v40, %v2783_v43  ;;  %v8541_v14 = vsel %vm6915_vm4, %v8538_v59, %v8540_v42  ;;  %v2786_v57 = vsel %vm2765_vm5, %v2783_v43, %v2785_v50  ;;  %v2788_v54 = vsel %vm2765_vm5, %v2785_v50, %v2787_v45  ;;  %v18210_v40 = vld [vmem:[%s18712_s11 + $0x1a8] sm:$0xff]   ;;  %v18213_v45 = vld [vmem:[%s18712_s11 + $0x1c0] sm:$0xff]  }
 0x24b   : > { %16518 = vmatmul.mubr.msk.bf16.gmra.mrb[68].mxu0 %vm1257_vm2, %v8527_v53  ;;  %v8539_v53 = vsel %vm6915_vm4, %v8536_v32, %v8538_v59  ;;  %v8550_v36 = vrot.slane %v18209_v19, 2  ;;  %v8552_v11 = vrot.slane %v18210_v40, 2  ;;  %v8554_v50 = vrot.slane %v18211_v9, 2  ;;  %v18218_v19 = vld [vmem:[%s18712_s11 + $0x1e8] sm:$0xff]  }
 0x24c   : > { %16521 = vmatprep.mubr.msk.bf16.mxu0 %vm1257_vm2, %v8529_v41  ;;  %v18206_v41 = vld [vmem:[%s18712_s11 + $0x188] sm:$0xff]  }
 0x24d   : > { %v8544_v51 = vrot.slane %v18206_v41, 2  ;;  %v8553_v59 = vsel %vm6915_vm4, %v8550_v36, %v8552_v11 }
 0x250   : > { %15902 = vmatmul.mubr.msk.bf16.gmra.mrb[4].mxu1 %vm1257_vm2, %v2774_v25  ;;  %v8542_v25 = vrot.slane %v18205_v60, 2  ;;  %v8555_v60 = vsel %vm6915_vm4, %v8552_v11, %v8554_v50 }
 0x251   : > { %15905 = vmatprep.mubr.msk.bf16.mxu1 %vm1257_vm2, %v2776_v31 }
 0x252   : > { %v8543_v31 = vsel %vm6915_vm4, %v8540_v42, %v8542_v25 }
 0x253   : > { %16522 = vmatmul.mubr.msk.bf16.gmra.mrb[72].mxu0 %vm1257_vm2, %v8531_v10  ;;  %v8545_v10 = vsel %vm6915_vm4, %v8542_v25, %v8544_v51 }
 0x254   : > { %16525 = vmatprep.mubr.msk.bf16.mxu0 %vm1257_vm2, %v8533_v16  ;;  %v8546_v16 = vrot.slane %v18207_v58, 2  ;;  %v2807_v58 = vrot.slane %v19377_v1, 1  ;;  %v2809_v1 = vrot.slane %v19382_v2, 1  ;;  %v8568_v2 = vrot.slane %v18218_v19, 2 }
 0x256   : > { %v8549_v32 = vsel %vm6915_vm4, %v8546_v16, %v8548_v0 }
 0x258   : > { %15906 = vmatmul.mubr.msk.bf16.gmra.mrb[8].mxu1 %vm1257_vm2, %v2778_v3  ;;  %v8547_v3 = vsel %vm6915_vm4, %v8544_v51, %v8546_v16 }
 0x259   : > { %15909 = vmatprep.mubr.msk.bf16.mxu1 %vm1257_vm2, %v2780_v20  ;;  %v2795_v20 = vrot.slane %v19329_v26, 1  ;;  %v2797_v26 = vrot.slane %v19334_v27, 1 }
 0x25b   : > { %16526 = vmatmul.mubr.msk.bf16.gmra.mrb[76].mxu0 %vm1257_vm2, %v8535_v21  ;;  %v2794_v21 = vsel %vm2765_vm5, %v2791_v63, %v2793_v8  ;;  %v2796_v43 = vsel %vm2765_vm5, %v2793_v8, %v2795_v20  ;;  %v2798_v42 = vsel %vm2765_vm5, %v2795_v20, %v2797_v26  ;;  %v2811_v8 = vrot.slane %v19393_v28, 1 }
 0x25c   : > { %16529 = vmatprep.mubr.msk.bf16.mxu0 %vm1257_vm2, %v8537_v23  ;;  %v8551_v23 = vsel %vm6915_vm4, %v8548_v0, %v8550_v36  ;;  %v18217_v0 = vld [vmem:[%s18712_s11 + $0x1e0] sm:$0xff]   ;;  %v2810_v20 = vsel %vm2765_vm5, %v2807_v58, %v2809_v1  ;;  %v2813_v28 = vrot.slane %v19398_v17, 1  ;;  %v18219_v36 = vld [vmem:[%s18712_s11 + $0x1f0] sm:$0xff]  }
 0x25d   : > { %v2812_v40 = vsel %vm2765_vm5, %v2809_v1, %v2811_v8  ;;  %v8570_v9 = vrot.slane %v18219_v36, 2  ;;  %v2831_v1 = vrot.slane %v19481_v4, 1  ;;  %v9528_v4 = vshrl.u32 %v19474_v56, 16  ;;  %v18229_v36 = vld [vmem:[%s18712_s11 + $0x240] ss:$0 sps:$4 sm:$0x33]  }
 0x260   : > { %15910 = vmatmul.mubr.msk.bf16.gmra.mrb[12].mxu1 %vm1257_vm2, %v2782_v30  ;;  %v2799_v30 = vrot.slane %v19345_v35, 1  ;;  %v2801_v35 = vrot.slane %v19350_v37, 1 }
 0x261   : > { %15913 = vmatprep.mubr.msk.bf16.mxu1 %vm1257_vm2, %v2784_v24  ;;  %v18212_v24 = vld [vmem:[%s18712_s11 + $0x1b8] sm:$0xff]  }
 0x262   : > { %v8556_v27 = vrot.slane %v18212_v24, 2  ;;  %v2802_v25 = vsel %vm2765_vm5, %v2799_v30, %v2801_v35  ;;  %v18221_v24 = vld [vmem:[%s18712_s11 + $0x200] sm:$0xff]  }
 0x263   : > { %16530 = vmatmul.mubr.msk.bf16.gmra.mrb[80].mxu0 %vm1257_vm2, %v8539_v53  ;;  %v2800_v53 = vsel %vm2765_vm5, %v2797_v26, %v2799_v30  ;;  %v18220_v26 = vld [vmem:[%s18712_s11 + $0x1f8] sm:$0xff]  }
 0x264   : > { %16533 = vmatprep.mubr.msk.bf16.mxu0 %vm1257_vm2, %v8541_v14  ;;  %v2803_v14 = vrot.slane %v19361_v47, 1  ;;  %v8557_v41 = vsel %vm6915_vm4, %v8554_v50, %v8556_v27  ;;  %v2805_v47 = vrot.slane %v19366_v49, 1  ;;  %v8572_v17 = vrot.slane %v18220_v26, 2 }
 0x266   : > { %v2804_v51 = vsel %vm2765_vm5, %v2801_v35, %v2803_v14  ;;  %v2806_v62 = vsel %vm2765_vm5, %v2803_v14, %v2805_v47  ;;  %v2808_v16 = vsel %vm2765_vm5, %v2805_v47, %v2807_v58  ;;  %v8573_v50 = vsel %vm6915_vm4, %v8570_v9, %v8572_v17  ;;  %v18223_v14 = vld [vmem:[%s18712_s11 + $0x210] sm:$0xff]  }
 0x267   : > { %v8574_v35 = vrot.slane %v18221_v24, 2  ;;  %v9549_v24 = vshll.u32 %v19496_v22, 16 }
 0x268   : > { %15914 = vmatmul.mubr.msk.bf16.gmra.mrb[16].mxu1 %vm1257_vm2, %v2786_v57  ;;  %v18214_v57 = vld [vmem:[%s18712_s11 + $0x1c8] sm:$0xff]  }
 0x269   : > { %15917 = vmatprep.mubr.msk.bf16.mxu1 %vm1257_vm2, %v2788_v54  ;;  %v8558_v54 = vrot.slane %v18213_v45, 2  ;;  %v8560_v37 = vrot.slane %v18214_v57, 2  ;;  %v8575_v45 = vsel %vm6915_vm4, %v8572_v17, %v8574_v35  ;;  %v9540_v17 = vshll.u32 %v19492_v15, 16 }
 0x26b   : > { %16534 = vmatmul.mubr.msk.bf16.gmra.mrb[84].mxu0 %vm1257_vm2, %v8543_v31  ;;  %v8559_v61 = vsel %vm6915_vm4, %v8556_v27, %v8558_v54  ;;  %v18215_v31 = vld [vmem:[%s18712_s11 + $0x1d0] sm:$0xff]   ;;  %v8561_v63 = vsel %vm6915_vm4, %v8558_v54, %v8560_v37 }
 0x26c   : > { %16537 = vmatprep.mubr.msk.bf16.mxu0 %vm1257_vm2, %v8545_v10  ;;  %v18216_v10 = vld [vmem:[%s18712_s11 + $0x1d8] sm:$0xff]  }
 0x26d   : > { %v8564_v49 = vrot.slane %v18216_v10, 2 }
 0x270   : > { %15918 = vmatmul.mubr.msk.bf16.gmra.mrb[20].mxu1 %vm1257_vm2, %v2790_v48  ;;  %v8562_v48 = vrot.slane %v18215_v31, 2  ;;  %v2827_v31 = vrot.slane %v19457_v29, 1 }
 0x271   : > { %15921 = vmatprep.mubr.msk.bf16.mxu1 %vm1257_vm2, %v2792_v13 }
 0x272   : > { %v8563_v13 = vsel %vm6915_vm4, %v8560_v37, %v8562_v48 }
 0x273   : > { %16538 = vmatmul.mubr.msk.bf16.gmra.mrb[88].mxu0 %vm1257_vm2, %v8547_v3  ;;  %v8565_v3 = vsel %vm6915_vm4, %v8562_v48, %v8564_v49 }
 0x274   : > { %16541 = vmatprep.mubr.msk.bf16.mxu0 %vm1257_vm2, %v8549_v32  ;;  %v8566_v32 = vrot.slane %v18217_v0, 2 }
 0x276   : > { %v8569_v11 = vsel %vm6915_vm4, %v8566_v32, %v8568_v2 }
 0x278   : > { %15922 = vmatmul.mubr.msk.bf16.gmra.mrb[24].mxu1 %vm1257_vm2, %v2794_v21  ;;  %v8567_v21 = vsel %vm6915_vm4, %v8564_v49, %v8566_v32  ;;  %v18227_v49 = vld [vmem:[%s18712_s11 + $0x230] sm:$0xff]   ;;  %v9523_v32 = vshll.u32 %v19471_v46, 16 }
 0x279   : > { %15925 = vmatprep.mubr.msk.bf16.mxu1 %vm1257_vm2, %v2796_v43  ;;  %v2815_v43 = vrot.slane %v19409_v33, 1  ;;  %v2817_v33 = vrot.slane %v19414_v34, 1 }
 0x27a   : > { %v9525_v26 = vrot.slane %v9523_v32, 3 }
 0x27b   : > { %16542 = vmatmul.mubr.msk.bf16.gmra.mrb[92].mxu0 %vm1257_vm2, %v8551_v23  ;;  %v2814_v23 = vsel %vm2765_vm5, %v2811_v8, %v2813_v28  ;;  %v2816_v30 = vsel %vm2765_vm5, %v2813_v28, %v2815_v43  ;;  %v2818_v27 = vsel %vm2765_vm5, %v2815_v43, %v2817_v33  ;;  %v2835_v43 = vrot.slane %v19503_v38, 1 }
 0x27c   : > { %16545 = vmatprep.mubr.msk.bf16.mxu0 %vm1257_vm2, %v8553_v59  ;;  %v8571_v59 = vsel %vm6915_vm4, %v8568_v2, %v8570_v9  ;;  %v2833_v2 = vrot.slane %v19486_v5, 1  ;;  %v8590_v9 = vrot.slane %v18229_v36, 2  ;;  %v9546_v38 = vshrl.u32 %v19496_v22, 16 }
 0x27e   : > { %v2836_v5 = vsel %vm2765_vm5, %v2833_v2, %v2835_v43 }
 0x280   : > { %15926 = vmatmul.mubr.msk.bf16.gmra.mrb[28].mxu1 %vm1257_vm2, %v2798_v42  ;;  %v2819_v42 = vrot.slane %v19425_v52, 1  ;;  %v2821_v52 = vrot.slane %v19430_v55, 1 }
 0x281   : > { %15929 = vmatprep.mubr.msk.bf16.mxu1 %vm1257_vm2, %v2800_v53  ;;  %v18222_v53 = vld [vmem:[%s18712_s11 + $0x208] sm:$0xff]  }
 0x282   : > { %v8576_v34 = vrot.slane %v18222_v53, 2  ;;  %v2822_v54 = vsel %vm2765_vm5, %v2819_v42, %v2821_v52 }
 0x283   : > { %16546 = vmatmul.mubr.msk.bf16.gmra.mrb[96].mxu0 %vm1257_vm2, %v8555_v60  ;;  %v2820_v60 = vsel %vm2765_vm5, %v2817_v33, %v2819_v42  ;;  %v2837_v42 = vrot.slane %v19508_v12, 1  ;;  %v21634_v12 = vld [vmem:[#allocation8_spill] sm:$0xff] }
 0x284   : > { %16549 = vmatprep.mubr.msk.bf16.mxu0 %vm1257_vm2, %v8557_v41  ;;  %v2823_v41 = vrot.slane %v19441_v6, 1  ;;  %v8577_v57 = vsel %vm6915_vm4, %v8574_v35, %v8576_v34  ;;  %v2825_v6 = vrot.slane %v19446_v7, 1  ;;  %v2839_v35 = vrot.slane %v19534_v18, 1 }
 0x285   : > { %v2838_v22 = vsel %vm2765_vm5, %v2835_v43, %v2837_v42 }
 0x286   : > { %v2824_v37 = vsel %vm2765_vm5, %v2821_v52, %v2823_v41  ;;  %v2826_v10 = vsel %vm2765_vm5, %v2823_v41, %v2825_v6  ;;  %v2828_v48 = vsel %vm2765_vm5, %v2825_v6, %v2827_v31  ;;  %v9558_v41 = vshll.u32 %v21634_v12, 16 }
 0x288   : > { %15930 = vmatmul.mubr.msk.bf16.gmra.mrb[32].mxu1 %vm1257_vm2, %v2802_v25  ;;  %v18224_v25 = vld [vmem:[%s18712_s11 + $0x218] sm:$0xff]  }
 0x289   : > { %15933 = vmatprep.mubr.msk.bf16.mxu1 %vm1257_vm2, %v2804_v51  ;;  %v8578_v51 = vrot.slane %v18223_v14, 2  ;;  %v8580_v55 = vrot.slane %v18224_v25, 2  ;;  %v9555_v14 = vshrl.u32 %v21634_v12, 16  ;;  %v21635_v25 = vld [vmem:[#allocation9_spill] sm:$0xff] }
 0x28a   : > { %v9564_v18 = vshrl.u32 %v21635_v25, 16 }
 0x28b   : > { %16550 = vmatmul.mubr.msk.bf16.gmra.mrb[100].mxu0 %vm1257_vm2, %v8559_v61  ;;  %v8579_v47 = vsel %vm6915_vm4, %v8576_v34, %v8578_v51  ;;  %v18225_v61 = vld [vmem:[%s18712_s11 + $0x220] sm:$0xff]   ;;  %v8581_v58 = vsel %vm6915_vm4, %v8578_v51, %v8580_v55  ;;  %v9551_v34 = vrot.slane %v9549_v24, 3  ;;  %v21636_v51 = vld [vmem:[#allocation10_spill] sm:$0xff]  ;;  %v9557_v6 = vrot.slane %v9555_v14, 2 }
 0x28c   : > { %16553 = vmatprep.mubr.msk.bf16.mxu0 %vm1257_vm2, %v8561_v63  ;;  %v18226_v63 = vld [vmem:[%s18712_s11 + $0x228] sm:$0xff]   ;;  %v21647_v14 = vld [vmem:[#allocation20_spill] sm:$0xff] }
 0x28d   : > { %v8584_v7 = vrot.slane %v18226_v63, 2 }
 0x290   : > { %15934 = vmatmul.mubr.msk.bf16.gmra.mrb[36].mxu1 %vm1257_vm2, %v2806_v62  ;;  %v8582_v62 = vrot.slane %v18225_v61, 2  ;;  %v21637_v61 = vld [vmem:[#allocation13_spill] sm:$0xff] }
 0x291   : > { %15937 = vmatprep.mubr.msk.bf16.mxu1 %vm1257_vm2, %v2808_v16  ;;  %v2829_v16 = vrot.slane %v19464_v39, 1  ;;  %v9520_v39 = vshrl.u32 %v19471_v46, 16  ;;  %v9530_v46 = vrot.slane %v9528_v4, 2  ;;  %v21641_v4 = vld [vmem:[#allocation17_spill] sm:$0xff] }
 0x292   : > { %v8583_v29 = vsel %vm6915_vm4, %v8580_v55, %v8582_v62  ;;  %v8585_v0 = vsel %vm6915_vm4, %v8582_v62, %v8584_v7 }
 0x293   : > { %16554 = vmatmul.mubr.msk.bf16.gmra.mrb[104].mxu0 %vm1257_vm2, %v8563_v13  ;;  %v18228_v13 = vld [vmem:[%s18712_s11 + $0x238] sm:$0xff]   ;;  %v2830_v8 = vsel %vm2765_vm5, %v2827_v31, %v2829_v16  ;;  %v2832_v19 = vsel %vm2765_vm5, %v2829_v16, %v2831_v1  ;;  %v2843_v31 = vrot.slane %v21637_v61, 1 }
 0x294   : > { %16557 = vmatprep.mubr.msk.bf16.mxu0 %vm1257_vm2, %v8565_v3  ;;  %v8586_v3 = vrot.slane %v18227_v49, 2 }
 0x296   : > { %v8587_v28 = vsel %vm6915_vm4, %v8584_v7, %v8586_v3 }
 0x298   : > { %15938 = vmatmul.mubr.msk.bf16.gmra.mrb[40].mxu1 %vm1257_vm2, %v2810_v20  ;;  %v8588_v20 = vrot.slane %v18228_v13, 2 }
 0x299   : > { %15941 = vmatprep.mubr.msk.bf16.mxu1 %vm1257_vm2, %v2812_v40  ;;  %v9531_v40 = vshll.u32 %v19474_v56, 16  ;;  %v2834_v56 = vsel %vm2765_vm5, %v2831_v1, %v2833_v2 }
 0x29b   : > { %16558 = vmatmul.mubr.msk.bf16.gmra.mrb[108].mxu0 %vm1257_vm2, %v8567_v21  ;;  %v8589_v21 = vsel %vm6915_vm4, %v8586_v3, %v8588_v20  ;;  %v21640_v3 = vld [vmem:[#allocation14_spill] sm:$0xff] }
 0x29c   : > { %16561 = vmatprep.mubr.msk.bf16.mxu0 %vm1257_vm2, %v8569_v11  ;;  %v9522_v11 = vrot.slane %v9520_v39, 2 }
 0x29e   : > { %v9526_v33 = vor.u32 %v9525_v26, %v9522_v11  ;;  %v21642_v26 = vld [vmem:[#allocation15_spill] sm:$0xff] }
 0x2a0   : > { %15942 = vmatmul.mubr.msk.bf16.gmra.mrb[44].mxu1 %vm1257_vm2, %v2814_v23  ;;  %v9533_v23 = vrot.slane %v9531_v40, 3  ;;  %v2847_v40 = vrot.slane %v21641_v4, 1 }
 0x2a1   : > { %15945 = vmatprep.mubr.msk.bf16.mxu1 %vm1257_vm2, %v2816_v30  ;;  %v9537_v30 = vshrl.u32 %v19492_v15, 16 }
 0x2a3   : > { %16562 = vmatmul.mubr.msk.bf16.gmra.mrb[112].mxu0 %vm1257_vm2, %v8571_v59  ;;  %v9534_v59 = vor.u32 %v9533_v23, %v9530_v46  ;;  %v9539_v53 = vrot.slane %v9537_v30, 2  ;;  %v9591_v46 = vshrl.u32 %v21642_v26, 16  ;;  %v9594_v23 = vshll.u32 %v21642_v26, 16  ;;  %v21655_v26 = vld [vmem:[#allocation28_spill] sm:$0xff] }
 0x2a4   : > { %16565 = vmatprep.mubr.msk.bf16.mxu0 %vm1257_vm2, %v8573_v50  ;;  %v8591_v50 = vsel %vm6915_vm4, %v8588_v20, %v8590_v9  ;;  %v21643_v9 = vld [vmem:[#allocation16_spill] sm:$0xff] }
 0x2a5   : > { %v9535_v15 = vsel %vm9518_vm6, %v9526_v33, %v9534_v59  ;;  %v9603_v30 = vshll.u32 %v21643_v9, 16  ;;  %v9596_v24 = vrot.slane %v9594_v23, 3  ;;  %v9657_v23 = vshll.u32 %v21655_v26, 16 }
 0x2a8   : > { %15946 = vmatmul.mubr.msk.bf16.gmra.mrb[48].mxu1 %vm1257_vm2, %v2818_v27  ;;  %v9542_v27 = vrot.slane %v9540_v17, 3  ;;  %v21644_v17 = vld [vmem:[#allocation18_spill] sm:$0xff] }
 0x2a9   : > { %15949 = vmatprep.mubr.msk.bf16.mxu1 %vm1257_vm2, %v2820_v60  ;;  %v9548_v60 = vrot.slane %v9546_v38, 2  ;;  %v2849_v33 = vrot.slane %v21644_v17, 1  ;;  %v9593_v38 = vrot.slane %v9591_v46, 2  ;;  %v9654_v46 = vshrl.u32 %v21655_v26, 16 }
 0x2aa   : > { %v9543_v52 = vor.u32 %v9542_v27, %v9539_v53 }
 0x2ab   : > { %16566 = vmatmul.mubr.msk.bf16.gmra.mrb[116].mxu0 %vm1257_vm2, %v8575_v45  ;;  %v2840_v45 = vsel %vm2765_vm5, %v2837_v42, %v2839_v35  ;;  %v21645_v42 = vld [vmem:[#allocation21_spill] sm:$0xff] }
 0x2ac   : > { %16569 = vmatprep.mubr.msk.bf16.mxu0 %vm1257_vm2, %v8577_v57  ;;  %v9552_v57 = vor.u32 %v9551_v34, %v9548_v60  ;;  %v9544_v55 = vsel %vm9518_vm6, %v9534_v59, %v9543_v52  ;;  %v9597_v60 = vor.u32 %v9596_v24, %v9593_v38  ;;  %v9656_v24 = vrot.slane %v9654_v46, 2 }
 0x2ae   : > { %v9553_v63 = vsel %vm9518_vm6, %v9543_v52, %v9552_v57 }
 0x2b0   : > { %15950 = vmatmul.mubr.msk.bf16.gmra.mrb[52].mxu1 %vm1257_vm2, %v2822_v54  ;;  %v9567_v54 = vshll.u32 %v21635_v25, 16  ;;  %v21648_v25 = vld [vmem:[#allocation22_spill] sm:$0xff] }
 0x2b1   : > { %15953 = vmatprep.mubr.msk.bf16.mxu1 %vm1257_vm2, %v2824_v37  ;;  %v2841_v37 = vrot.slane %v21636_v51, 1 }
 0x2b2   : > { %v9569_v62 = vrot.slane %v9567_v54, 3 }
 0x2b3   : > { %16570 = vmatmul.mubr.msk.bf16.gmra.mrb[120].mxu0 %vm1257_vm2, %v8579_v47  ;;  %v9560_v47 = vrot.slane %v9558_v41, 3  ;;  %v2844_v16 = vsel %vm2765_vm5, %v2841_v37, %v2843_v31  ;;  %v9618_v41 = vshrl.u32 %v21647_v14, 16 }
 0x2b4   : > { %16573 = vmatprep.mubr.msk.bf16.mxu0 %vm1257_vm2, %v8581_v58  ;;  %v11408_v58 = vsel %vm1462_vm0, %v19817_v44, 0  ;;  %v21639_v44 = vld [vmem:[#allocation12_spill] sm:$0xff] }
 0x2b5   : > { %v9561_v7 = vor.u32 %v9560_v47, %v9557_v6  ;;  %v9620_v61 = vrot.slane %v9618_v41, 2 }
 0x2b7   : > { %v9562_v20 = vsel %vm9518_vm6, %v9552_v57, %v9561_v7  ;;  %v9621_v57 = vshll.u32 %v21647_v14, 16 }
 0x2b8   : > { %15954 = vmatmul.mubr.msk.bf16.gmra.mrb[56].mxu1 %vm1257_vm2, %v2826_v10  ;;  %v9566_v10 = vrot.slane %v9564_v18, 2  ;;  %v2853_v18 = vrot.slane %v21648_v25, 1 }
 0x2b9   : > { %15957 = vmatprep.mubr.msk.bf16.mxu1 %vm1257_vm2, %v2828_v48  ;;  %v2842_v48 = vsel %vm2765_vm5, %v2839_v35, %v2841_v37  ;;  %v9605_v35 = vrot.slane %v9603_v30, 3 }
 0x2ba   : > { %v9570_v13 = vor.u32 %v9569_v62, %v9566_v10  ;;  %v21650_v62 = vld [vmem:[#allocation23_spill] sm:$0xff] }
 0x2bb   : > { %16574 = vmatmul.mubr.msk.bf16.gmra.mrb[124].mxu0 %vm1257_vm2, %v8583_v29  ;;  %v21638_v29 = vld [vmem:[#allocation11_spill] sm:$0xff] }
 0x2bc   : > { %16577 = vmatprep.mubr.msk.bf16.mxu0 %vm1257_vm2, %v8585_v0  ;;  %v9573_v49 = vshrl.u32 %v21638_v29, 16  ;;  %v9576_v1 = vshll.u32 %v21638_v29, 16  ;;  %v9582_v0 = vshrl.u32 %v21639_v44, 16  ;;  %v9571_v2 = vsel %vm9518_vm6, %v9561_v7, %v9570_v13  ;;  %v21651_v29 = vld [vmem:[#allocation24_spill] sm:$0xff] }
 0x2bd   : > { %v9630_v7 = vshll.u32 %v21650_v62, 16 }
 0x2be   : > { %v9575_v39 = vrot.slane %v9573_v49, 2  ;;  %v9578_v32 = vrot.slane %v9576_v1, 3  ;;  %v9636_v49 = vshrl.u32 %v21651_v29, 16  ;;  %v9639_v1 = vshll.u32 %v21651_v29, 16 }
 0x2c0   : > { %15958 = vmatmul.mubr.msk.bf16.gmra.mrb[60].mxu1 %vm1257_vm2, %v2830_v8  ;;  %v9585_v8 = vshll.u32 %v21639_v44, 16  ;;  %v9579_v43 = vor.u32 %v9578_v32, %v9575_v39  ;;  %v9638_v32 = vrot.slane %v9636_v49, 2  ;;  %v9641_v4 = vrot.slane %v9639_v1, 3 }
 0x2c1   : > { %15961 = vmatprep.mubr.msk.bf16.mxu1 %vm1257_vm2, %v2832_v19  ;;  %v2845_v19 = vrot.slane %v21640_v3, 1  ;;  %v9632_v3 = vrot.slane %v9630_v7, 3 }
 0x2c2   : > { %v9580_v59 = vsel %vm9518_vm6, %v9570_v13, %v9579_v43  ;;  %v21652_v13 = vld [vmem:[#allocation26_spill] sm:$0xff] }
 0x2c3   : > { %16578 = vmatmul.mubr.msk.bf16.gmra.mrb[128].mxu0 %vm1257_vm2, %v8587_v28  ;;  %v9584_v28 = vrot.slane %v9582_v0, 2  ;;  %v2846_v36 = vsel %vm2765_vm5, %v2843_v31, %v2845_v19  ;;  %v2848_v11 = vsel %vm2765_vm5, %v2845_v19, %v2847_v40  ;;  %v9623_v31 = vrot.slane %v9621_v57, 3  ;;  %v21653_v19 = vld [vmem:[#allocation29_spill] sm:$0xff] }
 0x2c4   : > { %16581 = vmatprep.mubr.msk.bf16.mxu0 %vm1257_vm2, %v8589_v21  ;;  %v9587_v21 = vrot.slane %v9585_v8, 3  ;;  %v2857_v44 = vrot.slane %v21652_v13, 1 }
 0x2c8   : > { %15962 = vmatmul.mubr.msk.bf16.gmra.mrb[64].mxu1 %vm1257_vm2, %v2834_v56  ;;  %v9588_v56 = vor.u32 %v9587_v21, %v9584_v28  ;;  %v21654_v21 = vld [vmem:[#allocation27_spill] sm:$0xff] }
 0x2c9   : > { %15965 = vmatprep.mubr.msk.bf16.mxu1 %vm1257_vm2, %v2836_v5  ;;  %v9600_v5 = vshrl.u32 %v21643_v9, 16 }
 0x2ca   : > { %v9589_v53 = vsel %vm9518_vm6, %v9579_v43, %v9588_v56  ;;  %v9598_v54 = vsel %vm9518_vm6, %v9588_v56, %v9597_v60  ;;  %v9648_v43 = vshll.u32 %v21654_v21, 16  ;;  %v21656_v56 = vld [vmem:[#allocation30_spill] sm:$0xff] }
 0x2cb   : > { %16582 = vmatmul.mubr.msk.bf16.gmra.mrb[132].mxu0 %vm1257_vm2, %v8591_v50  ;;  %v2851_v50 = vrot.slane %v21645_v42, 1  ;;  %v9602_v27 = vrot.slane %v9600_v5, 2  ;;  %v2861_v9 = vrot.slane %v21656_v56, 1  ;;  %v9659_v42 = vrot.slane %v9657_v23, 3 }
 0x2cc   : > { %16587 = vmatprep.mubr.msk.bf16.mxu0 %vm1257_vm2, %v9535_v15  ;;  %v2850_v15 = vsel %vm2765_vm5, %v2847_v40, %v2849_v33  ;;  %v9650_v17 = vrot.slane %v9648_v43, 3 }
 0x2cd   : > { %v2852_v34 = vsel %vm2765_vm5, %v2849_v33, %v2851_v50  ;;  %v9606_v12 = vor.u32 %v9605_v35, %v9602_v27  ;;  %v21657_v33 = vld [vmem:[#allocation33_spill] sm:$0xff]  ;;  %v21658_v35 = vld [vmem:[#allocation31_spill] sm:$0xff] }
 0x2cf   : > { %v9607_v47 = vsel %vm9518_vm6, %v9597_v60, %v9606_v12  ;;  %v9666_v60 = vshll.u32 %v21658_v35, 16 }
 0x2d0   : > { %15966 = vmatmul.mubr.msk.bf16.gmra.mrb[68].mxu1 %vm1257_vm2, %v2838_v22  ;;  %v21646_v22 = vld [vmem:[#allocation19_spill] sm:$0xff] }
 0x2d1   : > { %15969 = vmatprep.mubr.msk.bf16.mxu1 %vm1257_vm2, %v2840_v45  ;;  %v9609_v52 = vshrl.u32 %v21646_v22, 16  ;;  %v9612_v45 = vshll.u32 %v21646_v22, 16  ;;  %v21659_v22 = vld [vmem:[#allocation32_spill] sm:$0xff]  ;;  %v9668_v25 = vrot.slane %v9666_v60, 3 }
 0x2d3   : > { %16588 = vmatmul.mubr.msk.bf16.vlgmr.msra.gmra.mrb[0].mxu0 %vm1257_vm2, %v9544_v55  ;;  %v9611_v51 = vrot.slane %v9609_v52, 2  ;;  %v9614_v37 = vrot.slane %v9612_v45, 3  ;;  %v21649_v55 = vld [vmem:[#allocation25_spill] sm:$0xff]  ;;  %v9672_v52 = vshrl.u32 %v21659_v22, 16  ;;  %v9675_v45 = vshll.u32 %v21659_v22, 16 }
 0x2d4   : > { %16724 = vmatpush3.bf16.msra.mxu0 %v11408_v58  ;;  %16591 = vmatprep.mubr.msk.bf16.mxu0 %vm1257_vm2, %v9553_v63  ;;  %v2855_v6 = vrot.slane %v21649_v55, 1  ;;  %v2854_v58 = vsel %vm2765_vm5, %v2851_v50, %v2853_v18 }
 0x2d5   : > { %v9615_v63 = vor.u32 %v9614_v37, %v9611_v51  ;;  %v9674_v37 = vrot.slane %v9672_v52, 2  ;;  %v9677_v55 = vrot.slane %v9675_v45, 3 }
 0x2d6   : > { %v2856_v10 = vsel %vm2765_vm5, %v2853_v18, %v2855_v6  ;;  %v2858_v40 = vsel %vm2765_vm5, %v2855_v6, %v2857_v44  ;;  %v21661_v18 = vld [vmem:[#allocation37_spill] sm:$0xff] }
 0x2d7   : > { %v9616_v0 = vsel %vm9518_vm6, %v9606_v12, %v9615_v63  ;;  %v21660_v12 = vld [vmem:[#allocation34_spill] sm:$0xff] }
 0x2d8   : > { %15970 = vmatmul.mubr.msk.bf16.gmra.mrb[72].mxu1 %vm1257_vm2, %v2842_v48  ;;  %v9627_v48 = vshrl.u32 %v21650_v62, 16  ;;  %v2865_v14 = vrot.slane %v21660_v12, 1  ;;  %v21663_v62 = vld [vmem:[#allocation36_spill] sm:$0xff] }
 0x2d9   : > { %15973 = vmatprep.mubr.msk.bf16.mxu1 %vm1257_vm2, %v2844_v16  ;;  %v9624_v16 = vor.u32 %v9623_v31, %v9620_v61  ;;  %v21662_v31 = vld [vmem:[#allocation35_spill] sm:$0xff]  ;;  %v9693_v7 = vshll.u32 %v21663_v62, 16 }
 0x2da   : > { %v9629_v8 = vrot.slane %v9627_v48, 2  ;;  %v9690_v48 = vshrl.u32 %v21663_v62, 16 }
 0x2db   : > { %16592 = vmatmul.mubr.msk.bf16.gmra.mrb[4].mxu0 %vm1257_vm2, %v9562_v20  ;;  %v2859_v20 = vrot.slane %v21653_v19, 1  ;;  %v9625_v39 = vsel %vm9518_vm6, %v9615_v63, %v9624_v16  ;;  %v9684_v63 = vshll.u32 %v21662_v31, 16  ;;  %v9695_v19 = vrot.slane %v9693_v7, 3 }
 0x2dc   : > { %16595 = vmatprep.mubr.msk.bf16.mxu0 %vm1257_vm2, %v9571_v2  ;;  %v9633_v2 = vor.u32 %v9632_v3, %v9629_v8  ;;  %v9692_v3 = vrot.slane %v9690_v48, 2 }
 0x2dd   : > { %v2860_v28 = vsel %vm2765_vm5, %v2857_v44, %v2859_v20  ;;  %v2862_v50 = vsel %vm2765_vm5, %v2859_v20, %v2861_v9  ;;  %v9686_v13 = vrot.slane %v9684_v63, 3  ;;  %v21665_v44 = vld [vmem:[#allocation39_spill] sm:$0xff] }
 0x2de   : > { %v9634_v5 = vsel %vm9518_vm6, %v9624_v16, %v9633_v2  ;;  %v21664_v16 = vld [vmem:[#allocation38_spill] sm:$0xff] }
 0x2df   : > { %v2869_v29 = vrot.slane %v21664_v16, 1 }
 0x2e0   : > { %15974 = vmatmul.mubr.msk.bf16.gmra.mrb[76].mxu1 %vm1257_vm2, %v2846_v36  ;;  %v9645_v36 = vshrl.u32 %v21654_v21, 16  ;;  %v18328_v21 = vld [vmem:[%s18712_s11 + $0xc8] sm:$0xff]  }
 0x2e1   : > { %15977 = vmatprep.mubr.msk.bf16.mxu1 %vm1257_vm2, %v2848_v11  ;;  %v9642_v11 = vor.u32 %v9641_v4, %v9638_v32  ;;  %v18327_v4 = vld [vmem:[%s18712_s11 + $0xc0] sm:$0xff]   ;;  %v9711_v43 = vshll.u32 %v18328_v21, 16 }
 0x2e2   : > { %v9647_v30 = vrot.slane %v9645_v36, 2  ;;  %v9708_v36 = vshrl.u32 %v18328_v21, 16 }
 0x2e3   : > { %16596 = vmatmul.mubr.msk.bf16.gmra.mrb[8].mxu0 %vm1257_vm2, %v9580_v59  ;;  %v2863_v59 = vrot.slane %v21657_v33, 1  ;;  %v9643_v38 = vsel %vm9518_vm6, %v9633_v2, %v9642_v11  ;;  %v9702_v2 = vshll.u32 %v18327_v4, 16  ;;  %v9713_v33 = vrot.slane %v9711_v43, 3 }
 0x2e4   : > { %16599 = vmatprep.mubr.msk.bf16.mxu0 %vm1257_vm2, %v9589_v53  ;;  %v9651_v53 = vor.u32 %v9650_v17, %v9647_v30  ;;  %v9710_v17 = vrot.slane %v9708_v36, 2 }
 0x2e5   : > { %v2864_v27 = vsel %vm2765_vm5, %v2861_v9, %v2863_v59  ;;  %v2866_v6 = vsel %vm2765_vm5, %v2863_v59, %v2865_v14  ;;  %v9704_v56 = vrot.slane %v9702_v2, 3  ;;  %v21666_v9 = vld [vmem:[#allocation40_spill] sm:$0xff] }
 0x2e6   : > { %v9652_v41 = vsel %vm9518_vm6, %v9642_v11, %v9651_v53  ;;  %v18329_v11 = vld [vmem:[%s18712_s11 + $0x1b0] sm:$0xff]  }
 0x2e7   : > { %v2873_v26 = vrot.slane %v18329_v11, 1 }
 0x2e8   : > { %15978 = vmatmul.mubr.msk.bf16.gmra.mrb[80].mxu1 %vm1257_vm2, %v2850_v15  ;;  %v9663_v15 = vshrl.u32 %v21658_v35, 16  ;;  %v18331_v35 = vld [vmem:[%s18712_s11 + $0xd8] sm:$0xff]  }
 0x2e9   : > { %15981 = vmatprep.mubr.msk.bf16.mxu1 %vm1257_vm2, %v2852_v34  ;;  %v9660_v34 = vor.u32 %v9659_v42, %v9656_v24  ;;  %v18330_v42 = vld [vmem:[%s18712_s11 + $0xd0] sm:$0xff]   ;;  %v9729_v60 = vshll.u32 %v18331_v35, 16 }
 0x2ea   : > { %v9665_v57 = vrot.slane %v9663_v15, 2  ;;  %v9726_v15 = vshrl.u32 %v18331_v35, 16 }
 0x2eb   : > { %16600 = vmatmul.mubr.msk.bf16.gmra.mrb[12].mxu0 %vm1257_vm2, %v9598_v54  ;;  %v2867_v54 = vrot.slane %v21661_v18, 1  ;;  %v9661_v51 = vsel %vm9518_vm6, %v9651_v53, %v9660_v34  ;;  %v9720_v53 = vshll.u32 %v18330_v42, 16  ;;  %v9731_v18 = vrot.slane %v9729_v60, 3 }
 0x2ec   : > { %16603 = vmatprep.mubr.msk.bf16.mxu0 %vm1257_vm2, %v9607_v47  ;;  %v9669_v47 = vor.u32 %v9668_v25, %v9665_v57  ;;  %v9728_v25 = vrot.slane %v9726_v15, 2 }
 0x2ed   : > { %v2868_v61 = vsel %vm2765_vm5, %v2865_v14, %v2867_v54  ;;  %v2870_v20 = vsel %vm2765_vm5, %v2867_v54, %v2869_v29  ;;  %v9722_v12 = vrot.slane %v9720_v53, 3  ;;  %v18333_v14 = vld [vmem:[%s18712_s11 + $0x1c8] sm:$0xff]  }
 0x2ee   : > { %v9670_v49 = vsel %vm9518_vm6, %v9660_v34, %v9669_v47  ;;  %v18332_v34 = vld [vmem:[%s18712_s11 + $0x1c0] sm:$0xff]  }
 0x2ef   : > { %v2877_v22 = vrot.slane %v18332_v34, 1 }
 0x2f0   : > { %15982 = vmatmul.mubr.msk.bf16.gmra.mrb[84].mxu1 %vm1257_vm2, %v2854_v58  ;;  %v9681_v58 = vshrl.u32 %v21662_v31, 16  ;;  %v18335_v31 = vld [vmem:[%s18712_s11 + $0xe8] sm:$0xff]  }
 0x2f1   : > { %15985 = vmatprep.mubr.msk.bf16.mxu1 %vm1257_vm2, %v2856_v10  ;;  %v9678_v10 = vor.u32 %v9677_v55, %v9674_v37  ;;  %v18334_v55 = vld [vmem:[%s18712_s11 + $0xe0] sm:$0xff]   ;;  %v9747_v63 = vshll.u32 %v18335_v31, 16 }
 0x2f2   : > { %v9683_v1 = vrot.slane %v9681_v58, 2  ;;  %v9744_v58 = vshrl.u32 %v18335_v31, 16 }
 0x2f3   : > { %16604 = vmatmul.mubr.msk.bf16.gmra.mrb[16].mxu0 %vm1257_vm2, %v9616_v0  ;;  %v2871_v0 = vrot.slane %v21665_v44, 1  ;;  %v9679_v8 = vsel %vm9518_vm6, %v9669_v47, %v9678_v10  ;;  %v9738_v47 = vshll.u32 %v18334_v55, 16  ;;  %v9749_v44 = vrot.slane %v9747_v63, 3 }
 0x2f4   : > { %16607 = vmatprep.mubr.msk.bf16.mxu0 %vm1257_vm2, %v9625_v39  ;;  %v9687_v39 = vor.u32 %v9686_v13, %v9683_v1  ;;  %v9746_v13 = vrot.slane %v9744_v58, 2 }
 0x2f5   : > { %v2872_v32 = vsel %vm2765_vm5, %v2869_v29, %v2871_v0  ;;  %v2874_v59 = vsel %vm2765_vm5, %v2871_v0, %v2873_v26  ;;  %v9740_v16 = vrot.slane %v9738_v47, 3  ;;  %v18337_v29 = vld [vmem:[%s18712_s11 + $0x1d8] sm:$0xff]  }
 0x2f6   : > { %v9688_v46 = vsel %vm9518_vm6, %v9678_v10, %v9687_v39  ;;  %v18336_v10 = vld [vmem:[%s18712_s11 + $0x1d0] sm:$0xff]  }
 0x2f7   : > { %v2881_v62 = vrot.slane %v18336_v10, 1 }
 0x2f8   : > { %15986 = vmatmul.mubr.msk.bf16.gmra.mrb[88].mxu1 %vm1257_vm2, %v2858_v40  ;;  %v9699_v40 = vshrl.u32 %v18327_v4, 16  ;;  %v18339_v4 = vld [vmem:[%s18712_s11 + $0xf8] sm:$0xff]  }
 0x2f9   : > { %15989 = vmatprep.mubr.msk.bf16.mxu1 %vm1257_vm2, %v2860_v28  ;;  %v9696_v28 = vor.u32 %v9695_v19, %v9692_v3  ;;  %v18338_v19 = vld [vmem:[%s18712_s11 + $0xf0] sm:$0xff]   ;;  %v9765_v2 = vshll.u32 %v18339_v4, 16 }
 0x2fa   : > { %v9701_v23 = vrot.slane %v9699_v40, 2  ;;  %v9762_v40 = vshrl.u32 %v18339_v4, 16 }
 0x2fb   : > { %16608 = vmatmul.mubr.msk.bf16.gmra.mrb[20].mxu0 %vm1257_vm2, %v9634_v5  ;;  %v2875_v5 = vrot.slane %v21666_v9, 1  ;;  %v9697_v30 = vsel %vm9518_vm6, %v9687_v39, %v9696_v28  ;;  %v9756_v39 = vshll.u32 %v18338_v19, 16  ;;  %v9767_v9 = vrot.slane %v9765_v2, 3 }
 0x2fc   : > { %16611 = vmatprep.mubr.msk.bf16.mxu0 %vm1257_vm2, %v9643_v38  ;;  %v9705_v38 = vor.u32 %v9704_v56, %v9701_v23  ;;  %v9764_v56 = vrot.slane %v9762_v40, 2 }
 0x2fd   : > { %v2876_v24 = vsel %vm2765_vm5, %v2873_v26, %v2875_v5  ;;  %v2878_v54 = vsel %vm2765_vm5, %v2875_v5, %v2877_v22  ;;  %v9758_v11 = vrot.slane %v9756_v39, 3  ;;  %v18341_v26 = vld [vmem:[%s18712_s11 + $0x1e8] sm:$0xff]  }
 0x2fe   : > { %v9706_v52 = vsel %vm9518_vm6, %v9696_v28, %v9705_v38  ;;  %v18340_v28 = vld [vmem:[%s18712_s11 + $0x1e0] sm:$0xff]  }
 0x2ff   : > { %v2885_v21 = vrot.slane %v18340_v28, 1 }
 0x300   : > { %15990 = vmatmul.mubr.msk.bf16.gmra.mrb[92].mxu1 %vm1257_vm2, %v2862_v50  ;;  %v9717_v50 = vshrl.u32 %v18330_v42, 16  ;;  %v18343_v42 = vld [vmem:[%s18712_s11 + $0x108] sm:$0xff]  }
 0x301   : > { %15993 = vmatprep.mubr.msk.bf16.mxu1 %vm1257_vm2, %v2864_v27  ;;  %v9714_v27 = vor.u32 %v9713_v33, %v9710_v17  ;;  %v18342_v33 = vld [vmem:[%s18712_s11 + $0x100] sm:$0xff]   ;;  %v9783_v53 = vshll.u32 %v18343_v42, 16 }
 0x302   : > { %v9719_v45 = vrot.slane %v9717_v50, 2  ;;  %v9780_v50 = vshrl.u32 %v18343_v42, 16  ;;  %v18356_v42 = vld [vmem:[%s18712_s11 + $0x220] ss:$0 sps:$4 sm:$0x11]  }
 0x303   : > { %16612 = vmatmul.mubr.msk.bf16.gmra.mrb[24].mxu0 %vm1257_vm2, %v9652_v41  ;;  %v2879_v41 = vrot.slane %v18333_v14, 1  ;;  %v9715_v57 = vsel %vm9518_vm6, %v9705_v38, %v9714_v27  ;;  %v9774_v38 = vshll.u32 %v18342_v33, 16  ;;  %v9785_v14 = vrot.slane %v9783_v53, 3 }
 0x304   : > { %16615 = vmatprep.mubr.msk.bf16.mxu0 %vm1257_vm2, %v9661_v51  ;;  %v9723_v51 = vor.u32 %v9722_v12, %v9719_v45  ;;  %v9782_v12 = vrot.slane %v9780_v50, 2  ;;  %v2901_v50 = vrot.slane %v18356_v42, 1 }
 0x305   : > { %v2880_v37 = vsel %vm2765_vm5, %v2877_v22, %v2879_v41  ;;  %v2882_v0 = vsel %vm2765_vm5, %v2879_v41, %v2881_v62  ;;  %v9776_v34 = vrot.slane %v9774_v38, 3  ;;  %v18345_v22 = vld [vmem:[%s18712_s11 + $0x1f8] sm:$0xff]  }
 0x306   : > { %v9724_v48 = vsel %vm9518_vm6, %v9714_v27, %v9723_v51  ;;  %v18344_v27 = vld [vmem:[%s18712_s11 + $0x1f0] sm:$0xff]  }
 0x307   : > { %v2889_v35 = vrot.slane %v18344_v27, 1 }
 0x308   : > { %15994 = vmatmul.mubr.msk.bf16.gmra.mrb[96].mxu1 %vm1257_vm2, %v2866_v6  ;;  %v9735_v6 = vshrl.u32 %v18334_v55, 16  ;;  %v18347_v55 = vld [vmem:[%s18712_s11 + $0x118] sm:$0xff]  }
 0x309   : > { %15997 = vmatprep.mubr.msk.bf16.mxu1 %vm1257_vm2, %v2868_v61  ;;  %v9732_v61 = vor.u32 %v9731_v18, %v9728_v25  ;;  %v18346_v18 = vld [vmem:[%s18712_s11 + $0x110] sm:$0xff]   ;;  %v9801_v47 = vshll.u32 %v18347_v55, 16 }
 0x30a   : > { %v9737_v7 = vrot.slane %v9735_v6, 2  ;;  %v9798_v6 = vshrl.u32 %v18347_v55, 16 }
 0x30b   : > { %16616 = vmatmul.mubr.msk.bf16.gmra.mrb[28].mxu0 %vm1257_vm2, %v9670_v49  ;;  %v2883_v49 = vrot.slane %v18337_v29, 1  ;;  %v9733_v1 = vsel %vm9518_vm6, %v9723_v51, %v9732_v61  ;;  %v9792_v51 = vshll.u32 %v18346_v18, 16  ;;  %v9803_v29 = vrot.slane %v9801_v47, 3 }
 0x30c   : > { %16619 = vmatprep.mubr.msk.bf16.mxu0 %vm1257_vm2, %v9679_v8  ;;  %v9741_v8 = vor.u32 %v9740_v16, %v9737_v7  ;;  %v9800_v16 = vrot.slane %v9798_v6, 2  ;;  %v18360_v6 = vld [vmem:[%s18712_s11 + $0x20] sm:$0xff]  }
 0x30d   : > { %v2884_v3 = vsel %vm2765_vm5, %v2881_v62, %v2883_v49  ;;  %v2886_v5 = vsel %vm2765_vm5, %v2883_v49, %v2885_v21  ;;  %v9794_v10 = vrot.slane %v9792_v51, 3  ;;  %v18349_v62 = vld [vmem:[%s18712_s11 + $0x208] sm:$0xff]   ;;  %v4308_v47 = vrot.slane %v18360_v6, 1 }
 0x30e   : > { %v9742_v36 = vsel %vm9518_vm6, %v9732_v61, %v9741_v8  ;;  %v18348_v61 = vld [vmem:[%s18712_s11 + $0x200] sm:$0xff]   ;;  %v18359_v51 = vld [vmem:[%s18712_s11 + $0x148] sm:$0xff]  }
 0x30f   : > { %v2893_v31 = vrot.slane %v18348_v61, 1  ;;  %v9855_v55 = vshll.u32 %v18359_v51, 16 }
 0x310   : > { %15998 = vmatmul.mubr.msk.bf16.gmra.mrb[100].mxu1 %vm1257_vm2, %v2870_v20  ;;  %v9753_v20 = vshrl.u32 %v18338_v19, 16  ;;  %v18351_v19 = vld [vmem:[%s18712_s11 + $0x128] sm:$0xff]  }
 0x311   : > { %16001 = vmatprep.mubr.msk.bf16.mxu1 %vm1257_vm2, %v2872_v32  ;;  %v9750_v32 = vor.u32 %v9749_v44, %v9746_v13  ;;  %v9819_v39 = vshll.u32 %v18351_v19, 16 }
 0x312   : > { %v9755_v43 = vrot.slane %v9753_v20, 2  ;;  %v9816_v20 = vshrl.u32 %v18351_v19, 16 }
 0x313   : > { %16620 = vmatmul.mubr.msk.bf16.gmra.mrb[32].mxu0 %vm1257_vm2, %v9688_v46  ;;  %v2887_v46 = vrot.slane %v18341_v26, 1  ;;  %v9751_v23 = vsel %vm9518_vm6, %v9741_v8, %v9750_v32  ;;  %v9821_v26 = vrot.slane %v9819_v39, 3  ;;  %v18364_v39 = vld [vmem:[%s18712_s11 + $0x30] sm:$0xff]  }
 0x314   : > { %16623 = vmatprep.mubr.msk.bf16.mxu0 %vm1257_vm2, %v9697_v30  ;;  %v9759_v30 = vor.u32 %v9758_v11, %v9755_v43  ;;  %v9818_v11 = vrot.slane %v9816_v20, 2  ;;  %v21668_v20 = vld [vmem:[#allocation5_spill] sm:$0xff] }
 0x315   : > { %v2888_v17 = vsel %vm2765_vm5, %v2885_v21, %v2887_v46  ;;  %v2890_v41 = vsel %vm2765_vm5, %v2887_v46, %v2889_v35  ;;  %v18353_v21 = vld [vmem:[%s18712_s11 + $0x218] sm:$0xff]  }
 0x316   : > { %v9760_v15 = vsel %vm9518_vm6, %v9750_v32, %v9759_v30  ;;  %v18352_v32 = vld [vmem:[%s18712_s11 + $0x210] sm:$0xff]  }
 0x317   : > { %v2897_v4 = vrot.slane %v18352_v32, 1  ;;  %v4312_v32 = vrot.slane %v18364_v39, 1 }
 0x318   : > { %16002 = vmatmul.mubr.msk.bf16.gmra.mrb[104].mxu1 %vm1257_vm2, %v2874_v59  ;;  %v9771_v59 = vshrl.u32 %v18342_v33, 16  ;;  %v18355_v33 = vld [vmem:[%s18712_s11 + $0x138] sm:$0xff]  }
 0x319   : > { %16005 = vmatprep.mubr.msk.bf16.mxu1 %vm1257_vm2, %v2876_v24  ;;  %v9768_v24 = vor.u32 %v9767_v9, %v9764_v56  ;;  %v18354_v9 = vld [vmem:[%s18712_s11 + $0x130] sm:$0xff]   ;;  %v9837_v38 = vshll.u32 %v18355_v33, 16 }
 0x31a   : > { %v9773_v60 = vrot.slane %v9771_v59, 2  ;;  %v9834_v59 = vshrl.u32 %v18355_v33, 16 }
 0x31b   : > { %16624 = vmatmul.mubr.msk.bf16.gmra.mrb[36].mxu0 %vm1257_vm2, %v9706_v52  ;;  %v2891_v52 = vrot.slane %v18345_v22, 1  ;;  %v9769_v45 = vsel %vm9518_vm6, %v9759_v30, %v9768_v24  ;;  %v9828_v30 = vshll.u32 %v18354_v9, 16 }
 0x31c   : > { %16627 = vmatprep.mubr.msk.bf16.mxu0 %vm1257_vm2, %v9715_v57  ;;  %v9777_v57 = vor.u32 %v9776_v34, %v9773_v60  ;;  %v18357_v60 = vld [vmem:[%s18712_s11 + $0x18] sm:$0xff]  }
 0x31d   : > { %v2892_v25 = vsel %vm2765_vm5, %v2889_v35, %v2891_v52  ;;  %v2894_v49 = vsel %vm2765_vm5, %v2891_v52, %v2893_v31  ;;  %v9830_v27 = vrot.slane %v9828_v30, 3  ;;  %v21667_v35 = vld [vmem:[#allocation6_spill] sm:$0xff]  ;;  %v4306_v34 = vrot.slane %v18357_v60, 1 }
 0x31e   : > { %v9778_v58 = vsel %vm9518_vm6, %v9768_v24, %v9777_v57  ;;  %v9836_v52 = vrot.slane %v9834_v59, 2 }
 0x320   : > { %16006 = vmatmul.mubr.msk.bf16.gmra.mrb[108].mxu1 %vm1257_vm2, %v2878_v54  ;;  %v9789_v54 = vshrl.u32 %v18346_v18, 16 }
 0x321   : > { %16009 = vmatprep.mubr.msk.bf16.mxu1 %vm1257_vm2, %v2880_v37  ;;  %v9786_v37 = vor.u32 %v9785_v14, %v9782_v12 }
 0x322   : > { %v9791_v63 = vrot.slane %v9789_v54, 2 }
 0x323   : > { %16628 = vmatmul.mubr.msk.bf16.gmra.mrb[40].mxu0 %vm1257_vm2, %v9724_v48  ;;  %v2895_v48 = vrot.slane %v18349_v62, 1  ;;  %v9787_v7 = vsel %vm9518_vm6, %v9777_v57, %v9786_v37  ;;  %v18358_v57 = vld [vmem:[%s18712_s11 + $0x140] sm:$0xff]  }
 0x324   : > { %16631 = vmatprep.mubr.msk.bf16.mxu0 %vm1257_vm2, %v9733_v1  ;;  %v18350_v1 = vld [vmem:[%s18712_s11 + $0x120] sm:$0xff]   ;;  %v9846_v18 = vshll.u32 %v18358_v57, 16 }
 0x325   : > { %v9807_v13 = vshrl.u32 %v18350_v1, 16  ;;  %v9810_v44 = vshll.u32 %v18350_v1, 16  ;;  %v2896_v8 = vsel %vm2765_vm5, %v2893_v31, %v2895_v48  ;;  %v2898_v46 = vsel %vm2765_vm5, %v2895_v48, %v2897_v4  ;;  %v18362_v1 = vld [vmem:[%s18712_s11 + $0x150] sm:$0xff]  }
 0x327   : > { %v9809_v40 = vrot.slane %v9807_v13, 2  ;;  %v9812_v2 = vrot.slane %v9810_v44, 3  ;;  %v9861_v13 = vshrl.u32 %v18362_v1, 16  ;;  %v9864_v44 = vshll.u32 %v18362_v1, 16 }
 0x328   : > { %16010 = vmatmul.mubr.msk.bf16.gmra.mrb[112].mxu1 %vm1257_vm2, %v2882_v0  ;;  %v9795_v0 = vor.u32 %v9794_v10, %v9791_v63  ;;  %v18361_v63 = vld [vmem:[%s18712_s11 + $0x28] sm:$0xff]  }
 0x329   : > { %16013 = vmatprep.mubr.msk.bf16.mxu1 %vm1257_vm2, %v2884_v3  ;;  %v9804_v3 = vor.u32 %v9803_v29, %v9800_v16  ;;  %v4310_v10 = vrot.slane %v18361_v63, 1  ;;  %v4309_v16 = vsel %vm2765_vm5, %v4306_v34, %v4308_v47 }
 0x32a   : > { %v9796_v28 = vsel %vm9518_vm6, %v9786_v37, %v9795_v0  ;;  %v9852_v37 = vshrl.u32 %v18359_v51, 16  ;;  %v18372_v51 = vld [vmem:[%s18712_s11 + $0x50] sm:$0xff]  }
 0x32b   : > { %16632 = vmatmul.mubr.msk.bf16.gmra.mrb[44].mxu0 %vm1257_vm2, %v9742_v36  ;;  %v2899_v36 = vrot.slane %v18353_v21, 1  ;;  %v9805_v43 = vsel %vm9518_vm6, %v9795_v0, %v9804_v3 }
 0x32c   : > { %16635 = vmatprep.mubr.msk.bf16.mxu0 %vm1257_vm2, %v9751_v23  ;;  %v9813_v23 = vor.u32 %v9812_v2, %v9809_v40  ;;  %v9854_v48 = vrot.slane %v9852_v37, 2  ;;  %v9863_v40 = vrot.slane %v9861_v13, 2  ;;  %v9866_v2 = vrot.slane %v9864_v44, 3  ;;  %v18375_v13 = vld [vmem:[%s18712_s11 + $0x188] sm:$0xff]  }
 0x32d   : > { %v2900_v56 = vsel %vm2765_vm5, %v2897_v4, %v2899_v36  ;;  %v2902_v12 = vsel %vm2765_vm5, %v2899_v36, %v2901_v50  ;;  %v4320_v37 = vrot.slane %v18372_v51, 1  ;;  %v9924_v44 = vshrl.u32 %v18375_v13, 16 }
 0x32e   : > { %v9814_v24 = vsel %vm9518_vm6, %v9804_v3, %v9813_v23 }
 0x330   : > { %16014 = vmatmul.mubr.msk.bf16.gmra.mrb[116].mxu1 %vm1257_vm2, %v2886_v5  ;;  %v9825_v5 = vshrl.u32 %v18354_v9, 16 }
 0x331   : > { %16017 = vmatprep.mubr.msk.bf16.mxu1 %vm1257_vm2, %v2888_v17  ;;  %v9822_v17 = vor.u32 %v9821_v26, %v9818_v11  ;;  %v4313_v26 = vsel %vm2765_vm5, %v4310_v10, %v4312_v32 }
 0x332   : > { %v9827_v53 = vrot.slane %v9825_v5, 2 }
 0x333   : > { %16636 = vmatmul.mubr.msk.bf16.gmra.mrb[48].mxu0 %vm1257_vm2, %v9760_v15  ;;  %v4305_v15 = vrot.slane %v21667_v35, 1  ;;  %v9823_v22 = vsel %vm9518_vm6, %v9813_v23, %v9822_v17 }
 0x334   : > { %16639 = vmatprep.mubr.msk.bf16.mxu0 %vm1257_vm2, %v9769_v45  ;;  %v9839_v45 = vrot.slane %v9837_v38, 3  ;;  %v9831_v14 = vor.u32 %v9830_v27, %v9827_v53  ;;  %v18368_v38 = vld [vmem:[%s18712_s11 + $0x40] sm:$0xff]   ;;  %v18369_v27 = vld [vmem:[%s18712_s11 + $0x48] sm:$0xff]  }
 0x335   : > { %v4318_v35 = vrot.slane %v18369_v27, 1 }
 0x336   : > { %v9840_v54 = vor.u32 %v9839_v45, %v9836_v52  ;;  %v9832_v61 = vsel %vm9518_vm6, %v9822_v17, %v9831_v14  ;;  %v18367_v17 = vld [vmem:[%s18712_s11 + $0x168] sm:$0xff]  }
 0x337   : > { %v9888_v33 = vshrl.u32 %v18367_v17, 16  ;;  %v9891_v59 = vshll.u32 %v18367_v17, 16 }
 0x338   : > { %16018 = vmatmul.mubr.msk.bf16.gmra.mrb[120].mxu1 %vm1257_vm2, %v2890_v41  ;;  %v4307_v41 = vsel %vm2765_vm5, %v4305_v15, %v4306_v34  ;;  %v9841_v62 = vsel %vm9518_vm6, %v9831_v14, %v9840_v54 }
 0x339   : > { %16021 = vmatprep.mubr.msk.bf16.mxu1 %vm1257_vm2, %v2892_v25  ;;  %v9843_v25 = vshrl.u32 %v18358_v57, 16  ;;  %v9890_v60 = vrot.slane %v9888_v33, 2  ;;  %v9893_v34 = vrot.slane %v9891_v59, 3 }
 0x33b   : > { %16640 = vmatmul.mubr.msk.bf16.gmra.mrb[52].mxu0 %vm1257_vm2, %v9778_v58  ;;  %v9845_v31 = vrot.slane %v9843_v25, 2  ;;  %v9848_v58 = vrot.slane %v9846_v18, 3  ;;  %v9894_v57 = vor.u32 %v9893_v34, %v9890_v60  ;;  %v18371_v25 = vld [vmem:[%s18712_s11 + $0x178] sm:$0xff]   ;;  %v18382_v34 = vld [vmem:[%s18712_s11 + $0x1a0] sm:$0xff]  }
 0x33c   : > { %16643 = vmatprep.mubr.msk.bf16.mxu0 %vm1257_vm2, %v9787_v7  ;;  %v9857_v7 = vrot.slane %v9855_v55, 3  ;;  %v9906_v18 = vshrl.u32 %v18371_v25, 16 }
 0x33d   : > { %v9849_v29 = vor.u32 %v9848_v58, %v9845_v31 }
 0x33e   : > { %v9858_v0 = vor.u32 %v9857_v7, %v9854_v48  ;;  %v9908_v63 = vrot.slane %v9906_v18, 2 }
 0x33f   : > { %v9850_v4 = vsel %vm9518_vm6, %v9840_v54, %v9849_v29  ;;  %v9909_v54 = vshll.u32 %v18371_v25, 16 }
 0x340   : > { %16022 = vmatmul.mubr.msk.bf16.gmra.mrb[124].mxu1 %vm1257_vm2, %v2894_v49  ;;  %v4311_v49 = vsel %vm2765_vm5, %v4308_v47, %v4310_v10  ;;  %v9859_v36 = vsel %vm9518_vm6, %v9849_v29, %v9858_v0 }
 0x341   : > { %16025 = vmatprep.mubr.msk.bf16.mxu1 %vm1257_vm2, %v2896_v8  ;;  %v18363_v8 = vld [vmem:[%s18712_s11 + $0x158] sm:$0xff]   ;;  %v9911_v10 = vrot.slane %v9909_v54, 3 }
 0x342   : > { %v9870_v3 = vshrl.u32 %v18363_v8, 16  ;;  %v9873_v19 = vshll.u32 %v18363_v8, 16  ;;  %v18376_v8 = vld [vmem:[%s18712_s11 + $0x60] sm:$0xff]  }
 0x343   : > { %16644 = vmatmul.mubr.msk.bf16.gmra.mrb[56].mxu0 %vm1257_vm2, %v9796_v28  ;;  %v18365_v28 = vld [vmem:[%s18712_s11 + $0x38] sm:$0xff]   ;;  %v9912_v1 = vor.u32 %v9911_v10, %v9908_v63  ;;  %v18386_v10 = vld [vmem:[%s18712_s11 + $0x1b0] sm:$0xff]  }
 0x344   : > { %16647 = vmatprep.mubr.msk.bf16.mxu0 %vm1257_vm2, %v9805_v43  ;;  %v4314_v21 = vrot.slane %v18365_v28, 1  ;;  %v9872_v43 = vrot.slane %v9870_v3, 2  ;;  %v9875_v11 = vrot.slane %v9873_v19, 3  ;;  %v4324_v3 = vrot.slane %v18376_v8, 1 }
 0x346   : > { %v4315_v23 = vsel %vm2765_vm5, %v4312_v32, %v4314_v21  ;;  %v9876_v30 = vor.u32 %v9875_v11, %v9872_v43  ;;  %v18377_v32 = vld [vmem:[%s18712_s11 + $0x68] sm:$0xff]   ;;  %v18378_v11 = vld [vmem:[%s18712_s11 + $0x190] sm:$0xff]  }
 0x348   : > { %16026 = vmatmul.mubr.msk.bf16.gmra.mrb[128].mxu1 %vm1257_vm2, %v2898_v46  ;;  %v9867_v46 = vor.u32 %v9866_v2, %v9863_v40  ;;  %v9926_v2 = vrot.slane %v9924_v44, 2 }
 0x349   : > { %16029 = vmatprep.mubr.msk.bf16.mxu1 %vm1257_vm2, %v2900_v56  ;;  %v18366_v56 = vld [vmem:[%s18712_s11 + $0x160] sm:$0xff]  }
 0x34a   : > { %v9879_v9 = vshrl.u32 %v18366_v56, 16  ;;  %v9882_v5 = vshll.u32 %v18366_v56, 16  ;;  %v9868_v42 = vsel %vm9518_vm6, %v9858_v0, %v9867_v46  ;;  %v9877_v15 = vsel %vm9518_vm6, %v9867_v46, %v9876_v30  ;;  %v18379_v56 = vld [vmem:[%s18712_s11 + $0x198] sm:$0xff]  }
 0x34b   : > { %16648 = vmatmul.mubr.msk.bf16.gmra.mrb[60].mxu0 %vm1257_vm2, %v9814_v24  ;;  %v4316_v24 = vrot.slane %v18368_v38, 1  ;;  %v9927_v0 = vshll.u32 %v18375_v13, 16  ;;  %v9936_v46 = vshll.u32 %v18378_v11, 16 }
 0x34c   : > { %16651 = vmatprep.mubr.msk.bf16.mxu0 %vm1257_vm2, %v9823_v22  ;;  %v9881_v50 = vrot.slane %v9879_v9, 2  ;;  %v9884_v53 = vrot.slane %v9882_v5, 3  ;;  %v9942_v9 = vshrl.u32 %v18379_v56, 16  ;;  %v9945_v5 = vshll.u32 %v18379_v56, 16 }
 0x34d   : > { %v4317_v22 = vsel %vm2765_vm5, %v4314_v21, %v4316_v24  ;;  %v4319_v45 = vsel %vm2765_vm5, %v4316_v24, %v4318_v35  ;;  %v9929_v28 = vrot.slane %v9927_v0, 3  ;;  %v9938_v38 = vrot.slane %v9936_v46, 3  ;;  %v18381_v24 = vld [vmem:[%s18712_s11 + $0x78] sm:$0xff]  }
 0x34e   : > { %v9885_v52 = vor.u32 %v9884_v53, %v9881_v50  ;;  %v9944_v53 = vrot.slane %v9942_v9, 2  ;;  %v9947_v27 = vrot.slane %v9945_v5, 3 }
 0x350   : > { %16030 = vmatmul.mubr.msk.bf16.gmra.mrb[132].mxu1 %vm1257_vm2, %v2902_v12  ;;  %v18370_v12 = vld [vmem:[%s18712_s11 + $0x170] sm:$0xff]   ;;  %v9886_v55 = vsel %vm9518_vm6, %v9876_v30, %v9885_v52  ;;  %v9895_v58 = vsel %vm9518_vm6, %v9885_v52, %v9894_v57  ;;  %v9954_v52 = vshll.u32 %v18382_v34, 16 }
 0x351   : > { %16035 = vmatprep.mubr.msk.bf16.mxu1 %vm1257_vm2, %v4307_v41  ;;  %v9897_v14 = vshrl.u32 %v18370_v12, 16  ;;  %v9900_v41 = vshll.u32 %v18370_v12, 16  ;;  %v18380_v30 = vld [vmem:[%s18712_s11 + $0x70] sm:$0xff]   ;;  %v18383_v12 = vld [vmem:[%s18712_s11 + $0x1a8] sm:$0xff]  }
 0x352   : > { %v4328_v17 = vrot.slane %v18380_v30, 1  ;;  %v9956_v51 = vrot.slane %v9954_v52, 3 }
 0x353   : > { %16652 = vmatmul.mubr.msk.bf16.gmra.mrb[64].mxu0 %vm1257_vm2, %v9832_v61  ;;  %v9899_v6 = vrot.slane %v9897_v14, 2  ;;  %v9902_v47 = vrot.slane %v9900_v41, 3  ;;  %v18373_v61 = vld [vmem:[%s18712_s11 + $0x58] sm:$0xff]   ;;  %v9960_v14 = vshrl.u32 %v18383_v12, 16  ;;  %v9963_v41 = vshll.u32 %v18383_v12, 16 }
 0x354   : > { %16655 = vmatprep.mubr.msk.bf16.mxu0 %vm1257_vm2, %v9841_v62  ;;  %v4322_v31 = vrot.slane %v18373_v61, 1  ;;  %v4321_v62 = vsel %vm2765_vm5, %v4318_v35, %v4320_v37 }
 0x355   : > { %v9903_v48 = vor.u32 %v9902_v47, %v9899_v6  ;;  %v9962_v47 = vrot.slane %v9960_v14, 2  ;;  %v9965_v61 = vrot.slane %v9963_v41, 3 }
 0x356   : > { %v4323_v7 = vsel %vm2765_vm5, %v4320_v37, %v4322_v31  ;;  %v4325_v21 = vsel %vm2765_vm5, %v4322_v31, %v4324_v3  ;;  %v18385_v37 = vld [vmem:[%s18712_s11 + $0x88] sm:$0xff]  }
 0x357   : > { %v9904_v19 = vsel %vm9518_vm6, %v9894_v57, %v9903_v48  ;;  %v9913_v40 = vsel %vm9518_vm6, %v9903_v48, %v9912_v1  ;;  %v18384_v57 = vld [vmem:[%s18712_s11 + $0x80] sm:$0xff]   ;;  %v9972_v48 = vshll.u32 %v18386_v10, 16 }
 0x358   : > { %16036 = vmatmul.mubr.msk.bf16.vlgmr.msra.gmra.mrb[0].mxu1 %vm1257_vm2, %v4309_v16  ;;  %v18374_v16 = vld [vmem:[%s18712_s11 + $0x180] sm:$0xff]   ;;  %v4332_v25 = vrot.slane %v18384_v57, 1 }
 0x359   : > { %16862 = vmatpush3.bf16.msra.mxu1 %v21668_v20  ;;  %16039 = vmatprep.mubr.msk.bf16.mxu1 %vm1257_vm2, %v4311_v49  ;;  %v9915_v29 = vshrl.u32 %v18374_v16, 16  ;;  %v9918_v49 = vshll.u32 %v18374_v16, 16  ;;  %v18387_v16 = vld [vmem:[%s18712_s11 + $0x1b8] sm:$0xff]   ;;  %v9974_v8 = vrot.slane %v9972_v48, 3 }
 0x35b   : > { %16656 = vmatmul.mubr.msk.bf16.gmra.mrb[68].mxu0 %vm1257_vm2, %v9850_v4  ;;  %v9917_v20 = vrot.slane %v9915_v29, 2  ;;  %v9920_v39 = vrot.slane %v9918_v49, 3  ;;  %v4326_v4 = vrot.slane %v18377_v32, 1  ;;  %v9978_v29 = vshrl.u32 %v18387_v16, 16 }
 0x35c   : > { %16659 = vmatprep.mubr.msk.bf16.mxu0 %vm1257_vm2, %v9859_v36  ;;  %v9981_v49 = vshll.u32 %v18387_v16, 16 }
 0x35d   : > { %v9921_v36 = vor.u32 %v9920_v39, %v9917_v20  ;;  %v4327_v43 = vsel %vm2765_vm5, %v4324_v3, %v4326_v4  ;;  %v4329_v35 = vsel %vm2765_vm5, %v4326_v4, %v4328_v17  ;;  %v18389_v3 = vld [vmem:[%s18712_s11 + $0x98] sm:$0xff]   ;;  %v9980_v39 = vrot.slane %v9978_v29, 2 }
 0x35e   : > { %v9983_v32 = vrot.slane %v9981_v49, 3 }
 0x35f   : > { %v9922_v33 = vsel %vm9518_vm6, %v9912_v1, %v9921_v36  ;;  %v18388_v1 = vld [vmem:[%s18712_s11 + $0x90] sm:$0xff]  }
 0x360   : > { %16040 = vmatmul.mubr.msk.bf16.gmra.mrb[4].mxu1 %vm1257_vm2, %v4313_v26  ;;  %v9933_v26 = vshrl.u32 %v18378_v11, 16  ;;  %v4336_v13 = vrot.slane %v18388_v1, 1  ;;  %v18391_v11 = vld [vmem:[%s18712_s11 + $0x1c8] sm:$0xff]  }
 0x361   : > { %16043 = vmatprep.mubr.msk.bf16.mxu1 %vm1257_vm2, %v4315_v23  ;;  %v9930_v23 = vor.u32 %v9929_v28, %v9926_v2  ;;  %v18390_v28 = vld [vmem:[%s18712_s11 + $0x1c0] sm:$0xff]   ;;  %v9999_v46 = vshll.u32 %v18391_v11, 16 }
 0x362   : > { %v9935_v59 = vrot.slane %v9933_v26, 2  ;;  %v9996_v26 = vshrl.u32 %v18391_v11, 16 }
 0x363   : > { %16660 = vmatmul.mubr.msk.bf16.gmra.mrb[72].mxu0 %vm1257_vm2, %v9868_v42  ;;  %v4330_v42 = vrot.slane %v18381_v24, 1  ;;  %v9931_v50 = vsel %vm9518_vm6, %v9921_v36, %v9930_v23  ;;  %v9990_v36 = vshll.u32 %v18390_v28, 16  ;;  %v10001_v24 = vrot.slane %v9999_v46, 3 }
 0x364   : > { %16663 = vmatprep.mubr.msk.bf16.mxu0 %vm1257_vm2, %v9877_v15  ;;  %v9939_v15 = vor.u32 %v9938_v38, %v9935_v59  ;;  %v9998_v38 = vrot.slane %v9996_v26, 2 }
 0x365   : > { %v4331_v60 = vsel %vm2765_vm5, %v4328_v17, %v4330_v42  ;;  %v4333_v31 = vsel %vm2765_vm5, %v4330_v42, %v4332_v25  ;;  %v9992_v30 = vrot.slane %v9990_v36, 3  ;;  %v18393_v17 = vld [vmem:[%s18712_s11 + $0xa8] sm:$0xff]  }
 0x366   : > { %v9940_v18 = vsel %vm9518_vm6, %v9930_v23, %v9939_v15  ;;  %v18392_v23 = vld [vmem:[%s18712_s11 + $0xa0] sm:$0xff]  }
 0x367   : > { %v4340_v56 = vrot.slane %v18392_v23, 1 }
 0x368   : > { %16044 = vmatmul.mubr.msk.bf16.gmra.mrb[8].mxu1 %vm1257_vm2, %v4317_v22  ;;  %v9951_v22 = vshrl.u32 %v18382_v34, 16  ;;  %v18395_v34 = vld [vmem:[%s18712_s11 + $0x1d8] sm:$0xff]  }
 0x369   : > { %16047 = vmatprep.mubr.msk.bf16.mxu1 %vm1257_vm2, %v4319_v45  ;;  %v9948_v45 = vor.u32 %v9947_v27, %v9944_v53  ;;  %v18394_v27 = vld [vmem:[%s18712_s11 + $0x1d0] sm:$0xff]   ;;  %v10017_v52 = vshll.u32 %v18395_v34, 16 }
 0x36a   : > { %v9953_v54 = vrot.slane %v9951_v22, 2  ;;  %v10014_v22 = vshrl.u32 %v18395_v34, 16 }
 0x36b   : > { %16664 = vmatmul.mubr.msk.bf16.gmra.mrb[76].mxu0 %vm1257_vm2, %v9886_v55  ;;  %v4334_v55 = vrot.slane %v18385_v37, 1  ;;  %v9949_v6 = vsel %vm9518_vm6, %v9939_v15, %v9948_v45  ;;  %v10008_v15 = vshll.u32 %v18394_v27, 16  ;;  %v10019_v37 = vrot.slane %v10017_v52, 3 }
 0x36c   : > { %16667 = vmatprep.mubr.msk.bf16.mxu0 %vm1257_vm2, %v9895_v58  ;;  %v9957_v58 = vor.u32 %v9956_v51, %v9953_v54  ;;  %v10016_v51 = vrot.slane %v10014_v22, 2 }
 0x36d   : > { %v4335_v63 = vsel %vm2765_vm5, %v4332_v25, %v4334_v55  ;;  %v4337_v4 = vsel %vm2765_vm5, %v4334_v55, %v4336_v13  ;;  %v10010_v57 = vrot.slane %v10008_v15, 3  ;;  %v18397_v25 = vld [vmem:[%s18712_s11 + $0xb8] sm:$0xff]  }
 0x36e   : > { %v9958_v44 = vsel %vm9518_vm6, %v9948_v45, %v9957_v58  ;;  %v18396_v45 = vld [vmem:[%s18712_s11 + $0xb0] sm:$0xff]  }
 0x36f   : > { %v4344_v12 = vrot.slane %v18396_v45, 1 }
 0x370   : > { %16048 = vmatmul.mubr.msk.bf16.gmra.mrb[12].mxu1 %vm1257_vm2, %v4321_v62  ;;  %v9969_v62 = vshrl.u32 %v18386_v10, 16  ;;  %v18399_v10 = vld [vmem:[%s18712_s11 + $0x1e8] sm:$0xff]  }
 0x371   : > { %16051 = vmatprep.mubr.msk.bf16.mxu1 %vm1257_vm2, %v4323_v7  ;;  %v9966_v7 = vor.u32 %v9965_v61, %v9962_v47  ;;  %v18398_v61 = vld [vmem:[%s18712_s11 + $0x1e0] sm:$0xff]   ;;  %v10035_v48 = vshll.u32 %v18399_v10, 16 }
 0x372   : > { %v9971_v0 = vrot.slane %v9969_v62, 2  ;;  %v10032_v62 = vshrl.u32 %v18399_v10, 16 }
 0x373   : > { %16668 = vmatmul.mubr.msk.bf16.gmra.mrb[80].mxu0 %vm1257_vm2, %v9904_v19  ;;  %v4338_v19 = vrot.slane %v18389_v3, 1  ;;  %v9967_v20 = vsel %vm9518_vm6, %v9957_v58, %v9966_v7  ;;  %v10026_v58 = vshll.u32 %v18398_v61, 16  ;;  %v10037_v3 = vrot.slane %v10035_v48, 3 }
 0x374   : > { %16671 = vmatprep.mubr.msk.bf16.mxu0 %vm1257_vm2, %v9913_v40  ;;  %v9975_v40 = vor.u32 %v9974_v8, %v9971_v0  ;;  %v10034_v8 = vrot.slane %v10032_v62, 2 }
 0x375   : > { %v4339_v2 = vsel %vm2765_vm5, %v4336_v13, %v4338_v19  ;;  %v4341_v42 = vsel %vm2765_vm5, %v4338_v19, %v4340_v56  ;;  %v10028_v1 = vrot.slane %v10026_v58, 3  ;;  %v18401_v13 = vld [vmem:[%s18712_s11 + $0xc8] sm:$0xff]  }
 0x376   : > { %v9976_v9 = vsel %vm9518_vm6, %v9966_v7, %v9975_v40  ;;  %v18400_v7 = vld [vmem:[%s18712_s11 + $0xc0] sm:$0xff]  }
 0x377   : > { %v4348_v16 = vrot.slane %v18400_v7, 1 }
 0x378   : > { %16052 = vmatmul.mubr.msk.bf16.gmra.mrb[16].mxu1 %vm1257_vm2, %v4325_v21  ;;  %v9987_v21 = vshrl.u32 %v18390_v28, 16  ;;  %v18403_v28 = vld [vmem:[%s18712_s11 + $0x1f8] sm:$0xff]  }
 0x379   : > { %16055 = vmatprep.mubr.msk.bf16.mxu1 %vm1257_vm2, %v4327_v43  ;;  %v9984_v43 = vor.u32 %v9983_v32, %v9980_v39  ;;  %v18402_v32 = vld [vmem:[%s18712_s11 + $0x1f0] sm:$0xff]   ;;  %v10053_v36 = vshll.u32 %v18403_v28, 16 }
 0x37a   : > { %v9989_v5 = vrot.slane %v9987_v21, 2  ;;  %v10050_v21 = vshrl.u32 %v18403_v28, 16 }
 0x37b   : > { %16672 = vmatmul.mubr.msk.bf16.gmra.mrb[84].mxu0 %vm1257_vm2, %v9922_v33  ;;  %v4342_v33 = vrot.slane %v18393_v17, 1  ;;  %v9985_v59 = vsel %vm9518_vm6, %v9975_v40, %v9984_v43  ;;  %v10044_v40 = vshll.u32 %v18402_v32, 16  ;;  %v10055_v17 = vrot.slane %v10053_v36, 3 }
 0x37c   : > { %16675 = vmatprep.mubr.msk.bf16.mxu0 %vm1257_vm2, %v9931_v50  ;;  %v9993_v50 = vor.u32 %v9992_v30, %v9989_v5  ;;  %v10052_v30 = vrot.slane %v10050_v21, 2 }
 0x37d   : > { %v4343_v53 = vsel %vm2765_vm5, %v4340_v56, %v4342_v33  ;;  %v4345_v55 = vsel %vm2765_vm5, %v4342_v33, %v4344_v12  ;;  %v10046_v23 = vrot.slane %v10044_v40, 3  ;;  %v18405_v56 = vld [vmem:[%s18712_s11 + $0xd8] sm:$0xff]  }
 0x37e   : > { %v9994_v14 = vsel %vm9518_vm6, %v9984_v43, %v9993_v50  ;;  %v18404_v43 = vld [vmem:[%s18712_s11 + $0xd0] sm:$0xff]  }
 0x37f   : > { %v4352_v11 = vrot.slane %v18404_v43, 1 }
 0x380   : > { %16056 = vmatmul.mubr.msk.bf16.gmra.mrb[20].mxu1 %vm1257_vm2, %v4329_v35  ;;  %v10005_v35 = vshrl.u32 %v18394_v27, 16  ;;  %v18407_v27 = vld [vmem:[%s18712_s11 + $0x208] sm:$0xff]  }
 0x381   : > { %16059 = vmatprep.mubr.msk.bf16.mxu1 %vm1257_vm2, %v4331_v60  ;;  %v10002_v60 = vor.u32 %v10001_v24, %v9998_v38  ;;  %v18406_v24 = vld [vmem:[%s18712_s11 + $0x200] sm:$0xff]   ;;  %v10071_v15 = vshll.u32 %v18407_v27, 16 }
 0x382   : > { %v10007_v41 = vrot.slane %v10005_v35, 2  ;;  %v10068_v35 = vshrl.u32 %v18407_v27, 16 }
 0x383   : > { %16676 = vmatmul.mubr.msk.bf16.gmra.mrb[88].mxu0 %vm1257_vm2, %v9940_v18  ;;  %v4346_v18 = vrot.slane %v18397_v25, 1  ;;  %v10003_v54 = vsel %vm9518_vm6, %v9993_v50, %v10002_v60  ;;  %v10062_v50 = vshll.u32 %v18406_v24, 16  ;;  %v10073_v25 = vrot.slane %v10071_v15, 3 }
 0x384   : > { %16679 = vmatprep.mubr.msk.bf16.mxu0 %vm1257_vm2, %v9949_v6  ;;  %v10011_v6 = vor.u32 %v10010_v57, %v10007_v41  ;;  %v10070_v57 = vrot.slane %v10068_v35, 2 }
 0x385   : > { %v4347_v47 = vsel %vm2765_vm5, %v4344_v12, %v4346_v18  ;;  %v4349_v19 = vsel %vm2765_vm5, %v4346_v18, %v4348_v16  ;;  %v10064_v45 = vrot.slane %v10062_v50, 3  ;;  %v18409_v12 = vld [vmem:[%s18712_s11 + $0xe8] sm:$0xff]  }
 0x386   : > { %v10012_v29 = vsel %vm9518_vm6, %v10002_v60, %v10011_v6  ;;  %v18408_v60 = vld [vmem:[%s18712_s11 + $0xe0] sm:$0xff]  }
 0x387   : > { %v4356_v34 = vrot.slane %v18408_v60, 1 }
 0x388   : > { %16060 = vmatmul.mubr.msk.bf16.gmra.mrb[24].mxu1 %vm1257_vm2, %v4333_v31  ;;  %v10023_v31 = vshrl.u32 %v18398_v61, 16  ;;  %v18411_v61 = vld [vmem:[%s18712_s11 + $0x218] sm:$0xff]  }
 0x389   : > { %16063 = vmatprep.mubr.msk.bf16.mxu1 %vm1257_vm2, %v4335_v63  ;;  %v10020_v63 = vor.u32 %v10019_v37, %v10016_v51  ;;  %v18410_v37 = vld [vmem:[%s18712_s11 + $0x210] sm:$0xff]   ;;  %v10089_v58 = vshll.u32 %v18411_v61, 16 }
 0x38a   : > { %v10025_v49 = vrot.slane %v10023_v31, 2  ;;  %v10086_v31 = vshrl.u32 %v18411_v61, 16 }
 0x38b   : > { %16680 = vmatmul.mubr.msk.bf16.gmra.mrb[92].mxu0 %vm1257_vm2, %v9958_v44  ;;  %v4350_v44 = vrot.slane %v18401_v13, 1  ;;  %v10021_v0 = vsel %vm9518_vm6, %v10011_v6, %v10020_v63  ;;  %v10080_v6 = vshll.u32 %v18410_v37, 16  ;;  %v10091_v13 = vrot.slane %v10089_v58, 3  ;;  %v20429_v58 = vld [vmem:[%s18712_s11 + $0x128] sm:$0xff]  }
 0x38c   : > { %16683 = vmatprep.mubr.msk.bf16.mxu0 %vm1257_vm2, %v9967_v20  ;;  %v10029_v20 = vor.u32 %v10028_v1, %v10025_v49  ;;  %v10088_v1 = vrot.slane %v10086_v31, 2 }
 0x38d   : > { %v4351_v39 = vsel %vm2765_vm5, %v4348_v16, %v4350_v44  ;;  %v4353_v33 = vsel %vm2765_vm5, %v4350_v44, %v4352_v11  ;;  %v10082_v7 = vrot.slane %v10080_v6, 3  ;;  %v18413_v16 = vld [vmem:[%s18712_s11 + $0xf8] sm:$0xff]  }
 0x38e   : > { %v10030_v26 = vsel %vm9518_vm6, %v10020_v63, %v10029_v20  ;;  %v18412_v63 = vld [vmem:[%s18712_s11 + $0xf0] sm:$0xff]  }
 0x38f   : > { %v4360_v10 = vrot.slane %v18412_v63, 1  ;;  %v4374_v63 = vrot.slane %v20429_v58, 1 }
 0x390   : > { %16064 = vmatmul.mubr.msk.bf16.gmra.mrb[28].mxu1 %vm1257_vm2, %v4337_v4  ;;  %v10041_v4 = vshrl.u32 %v18402_v32, 16  ;;  %v18415_v32 = vld [vmem:[%s18712_s11 + $0x228] sm:$0xff]  }
 0x391   : > { %16067 = vmatprep.mubr.msk.bf16.mxu1 %vm1257_vm2, %v4339_v2  ;;  %v10038_v2 = vor.u32 %v10037_v3, %v10034_v8  ;;  %v18414_v3 = vld [vmem:[%s18712_s11 + $0x220] sm:$0xff]   ;;  %v10107_v40 = vshll.u32 %v18415_v32, 16 }
 0x392   : > { %v10043_v46 = vrot.slane %v10041_v4, 2  ;;  %v10104_v4 = vshrl.u32 %v18415_v32, 16  ;;  %v18428_v32 = vld [vmem:[%s18712_s11 + $0x30] sm:$0xff]  }
 0x393   : > { %16684 = vmatmul.mubr.msk.bf16.gmra.mrb[96].mxu0 %vm1257_vm2, %v9976_v9  ;;  %v4354_v9 = vrot.slane %v18405_v56, 1  ;;  %v10039_v5 = vsel %vm9518_vm6, %v10029_v20, %v10038_v2  ;;  %v10098_v20 = vshll.u32 %v18414_v3, 16  ;;  %v10109_v56 = vrot.slane %v10107_v40, 3 }
 0x394   : > { %16687 = vmatprep.mubr.msk.bf16.mxu0 %vm1257_vm2, %v9985_v59  ;;  %v10047_v59 = vor.u32 %v10046_v23, %v10043_v46  ;;  %v10106_v23 = vrot.slane %v10104_v4, 2  ;;  %v11069_v4 = vrot.slane %v18428_v32, 3 }
 0x395   : > { %v4355_v38 = vsel %vm2765_vm5, %v4352_v11, %v4354_v9  ;;  %v4357_v18 = vsel %vm2765_vm5, %v4354_v9, %v4356_v34  ;;  %v10100_v43 = vrot.slane %v10098_v20, 3  ;;  %v18417_v11 = vld [vmem:[%s18712_s11 + $0x108] sm:$0xff]  }
 0x396   : > { %v10048_v22 = vsel %vm9518_vm6, %v10038_v2, %v10047_v59  ;;  %v18416_v2 = vld [vmem:[%s18712_s11 + $0x100] sm:$0xff]  }
 0x397   : > { %v4364_v28 = vrot.slane %v18416_v2, 1  ;;  %v18429_v2 = vld [vmem:[%s18712_s11 + $0x38] sm:$0xff]  }
 0x398   : > { %16068 = vmatmul.mubr.msk.bf16.gmra.mrb[32].mxu1 %vm1257_vm2, %v4341_v42  ;;  %v10059_v42 = vshrl.u32 %v18406_v24, 16  ;;  %v18419_v24 = vld [vmem:[%s18712_s11 + $0x238] sm:$0xff]  }
 0x399   : > { %16071 = vmatprep.mubr.msk.bf16.mxu1 %vm1257_vm2, %v4343_v53  ;;  %v10056_v53 = vor.u32 %v10055_v17, %v10052_v30  ;;  %v18418_v17 = vld [vmem:[%s18712_s11 + $0x230] sm:$0xff]   ;;  %v10125_v50 = vshll.u32 %v18419_v24, 16 }
 0x39a   : > { %v10061_v52 = vrot.slane %v10059_v42, 2  ;;  %v10122_v42 = vshrl.u32 %v18419_v24, 16  ;;  %v20483_v24 = vld [vmem:[%s18712_s11 + $0x158] sm:$0xff]  }
 0x39b   : > { %16688 = vmatmul.mubr.msk.bf16.gmra.mrb[100].mxu0 %vm1257_vm2, %v9994_v14  ;;  %v4358_v14 = vrot.slane %v18409_v12, 1  ;;  %v10057_v41 = vsel %vm9518_vm6, %v10047_v59, %v10056_v53  ;;  %v10116_v59 = vshll.u32 %v18418_v17, 16 }
 0x39c   : > { %16691 = vmatprep.mubr.msk.bf16.mxu0 %vm1257_vm2, %v10003_v54  ;;  %v10065_v54 = vor.u32 %v10064_v45, %v10061_v52  ;;  %v18230_v52 = vld [vmem:[%s18712_s11 + $0x240] ss:$0 sps:$4 sm:$0x77]   ;;  %v10124_v12 = vrot.slane %v10122_v42, 2  ;;  %v4386_v42 = vrot.slane %v20483_v24, 1 }
 0x39d   : > { %v4359_v51 = vsel %vm2765_vm5, %v4356_v34, %v4358_v14  ;;  %v4361_v44 = vsel %vm2765_vm5, %v4358_v14, %v4360_v10  ;;  %v10118_v60 = vrot.slane %v10116_v59, 3  ;;  %v18421_v34 = vld [vmem:[%s18712_s11 + $0x118] sm:$0xff]   ;;  %v10127_v14 = vrot.slane %v10125_v50, 3 }
 0x39e   : > { %v10066_v62 = vsel %vm9518_vm6, %v10056_v53, %v10065_v54  ;;  %v18420_v53 = vld [vmem:[%s18712_s11 + $0x110] sm:$0xff]  }
 0x39f   : > { %v4368_v27 = vrot.slane %v18420_v53, 1 }
 0x3a0   : > { %16072 = vmatmul.mubr.msk.bf16.gmra.mrb[36].mxu1 %vm1257_vm2, %v4345_v55  ;;  %v10077_v55 = vshrl.u32 %v18410_v37, 16  ;;  %v11059_v37 = vld [vmem:[%s18712_s11 + $0x20] sm:$0x8] }
 0x3a1   : > { %16075 = vmatprep.mubr.msk.bf16.mxu1 %vm1257_vm2, %v4347_v47  ;;  %v10074_v47 = vor.u32 %v10073_v25, %v10070_v57 }
 0x3a2   : > { %v10079_v48 = vrot.slane %v10077_v55, 2  ;;  %v18422_v55 = vld [vmem:[%s18712_s11 + $0x120] sm:$0xff]  }
 0x3a3   : > { %16692 = vmatmul.mubr.msk.bf16.gmra.mrb[104].mxu0 %vm1257_vm2, %v10012_v29  ;;  %v4362_v29 = vrot.slane %v18413_v16, 1  ;;  %v10075_v49 = vsel %vm9518_vm6, %v10065_v54, %v10074_v47  ;;  %v10134_v54 = vshll.u32 %v18230_v52, 16  ;;  %v4372_v6 = vrot.slane %v18422_v55, 1  ;;  %v20514_v55 = vld [vmem:[%s18712_s11 + $0x170] sm:$0xff]  }
 0x3a4   : > { %16695 = vmatprep.mubr.msk.bf16.mxu0 %vm1257_vm2, %v10021_v0  ;;  %v10083_v0 = vor.u32 %v10082_v7, %v10079_v48 }
 0x3a5   : > { %v4363_v8 = vsel %vm2765_vm5, %v4360_v10, %v4362_v29  ;;  %v4365_v9 = vsel %vm2765_vm5, %v4362_v29, %v4364_v28  ;;  %v10136_v31 = vrot.slane %v10134_v54, 3  ;;  %v4375_v29 = vsel %vm2765_vm5, %v4372_v6, %v4374_v63 }
 0x3a6   : > { %v10084_v21 = vsel %vm9518_vm6, %v10074_v47, %v10083_v0 }
 0x3a8   : > { %16076 = vmatmul.mubr.msk.bf16.gmra.mrb[40].mxu1 %vm1257_vm2, %v4349_v19  ;;  %v10095_v19 = vshrl.u32 %v18414_v3, 16  ;;  %v20447_v3 = vld [vmem:[%s18712_s11 + $0x138] sm:$0xff]  }
 0x3a9   : > { %16079 = vmatprep.mubr.msk.bf16.mxu1 %vm1257_vm2, %v4351_v39  ;;  %v10092_v39 = vor.u32 %v10091_v13, %v10088_v1  ;;  %v18425_v1 = vld [vmem:[%s18712_s11 + $0x28] sm:$0xff]  }
 0x3aa   : > { %v10097_v36 = vrot.slane %v10095_v19, 2  ;;  %v11067_v13 = vrot.slane %v18425_v1, 3  ;;  %v4378_v19 = vrot.slane %v20447_v3, 1 }
 0x3ab   : > { %16696 = vmatmul.mubr.msk.bf16.gmra.mrb[108].mxu0 %vm1257_vm2, %v10030_v26  ;;  %v4366_v26 = vrot.slane %v18417_v11, 1  ;;  %v10093_v46 = vsel %vm9518_vm6, %v10083_v0, %v10092_v39  ;;  %v20465_v11 = vld [vmem:[%s18712_s11 + $0x148] sm:$0xff]  }
 0x3ac   : > { %16699 = vmatprep.mubr.msk.bf16.mxu0 %vm1257_vm2, %v10039_v5  ;;  %v10101_v5 = vor.u32 %v10100_v43, %v10097_v36  ;;  %v11070_v43 = vsel %vm11065_vm7, %v11067_v13, %v11069_v4 }
 0x3ad   : > { %v4367_v30 = vsel %vm2765_vm5, %v4364_v28, %v4366_v26  ;;  %v11071_v28 = vrot.slane %v18429_v2, 3 }
 0x3ae   : > { %v10102_v35 = vsel %vm9518_vm6, %v10092_v39, %v10101_v5 }
 0x3b0   : > { %16080 = vmatmul.mubr.msk.bf16.gmra.mrb[44].mxu1 %vm1257_vm2, %v4353_v33  ;;  %v10113_v33 = vshrl.u32 %v18418_v17, 16 }
 0x3b1   : > { %16083 = vmatprep.mubr.msk.bf16.mxu1 %vm1257_vm2, %v4355_v38  ;;  %v10110_v38 = vor.u32 %v10109_v56, %v10106_v23  ;;  %v18432_v56 = vld [vmem:[%s18712_s11 + $0x40] sm:$0xff]  }
 0x3b2   : > { %v10115_v15 = vrot.slane %v10113_v33, 2  ;;  %v20478_v33 = vld [vmem:[%s18712_s11 + $0x150] sm:$0xff]  }
 0x3b3   : > { %16700 = vmatmul.mubr.msk.bf16.gmra.mrb[112].mxu0 %vm1257_vm2, %v10048_v22  ;;  %v4370_v22 = vrot.slane %v18421_v34, 1  ;;  %v10111_v45 = vsel %vm9518_vm6, %v10101_v5, %v10110_v38  ;;  %v4384_v59 = vrot.slane %v20478_v33, 1 }
 0x3b4   : > { %16703 = vmatprep.mubr.msk.bf16.mxu0 %vm1257_vm2, %v10057_v41  ;;  %v4369_v41 = vsel %vm2765_vm5, %v4366_v26, %v4368_v27  ;;  %v10119_v57 = vor.u32 %v10118_v60, %v10115_v15  ;;  %v4382_v26 = vrot.slane %v20465_v11, 1  ;;  %v18437_v60 = vld [vmem:[%s18712_s11 + $0x58] sm:$0xff]  }
 0x3b5   : > { %v4371_v25 = vsel %vm2765_vm5, %v4368_v27, %v4370_v22  ;;  %v4373_v7 = vsel %vm2765_vm5, %v4370_v22, %v4372_v6  ;;  %v18436_v27 = vld [vmem:[%s18712_s11 + $0x50] sm:$0xff]   ;;  %v4387_v15 = vsel %vm2765_vm5, %v4384_v59, %v4386_v42  ;;  %v11079_v34 = vrot.slane %v18437_v60, 3  ;;  %v20496_v22 = vld [vmem:[%s18712_s11 + $0x160] sm:$0xff]  }
 0x3b6   : > { %v10120_v47 = vsel %vm9518_vm6, %v10110_v38, %v10119_v57  ;;  %v4385_v53 = vsel %vm2765_vm5, %v4382_v26, %v4384_v59  ;;  %v4392_v6 = vrot.slane %v20514_v55, 1  ;;  %v18456_v60 = vld [vmem:[%s18712_s11 + $0xa0] sm:$0xff]  }
 0x3b8   : > { %16084 = vmatmul.mubr.msk.bf16.gmra.mrb[48].mxu1 %vm1257_vm2, %v4357_v18  ;;  %v10131_v18 = vshrl.u32 %v18230_v52, 16  ;;  %v4388_v52 = vrot.slane %v20496_v22, 1 }
 0x3b9   : > { %16087 = vmatprep.mubr.msk.bf16.mxu1 %vm1257_vm2, %v4359_v51  ;;  %v10128_v51 = vor.u32 %v10127_v14, %v10124_v12  ;;  %v20501_v12 = vld [vmem:[%s18712_s11 + $0x168] sm:$0xff]  }
 0x3ba   : > { %v10133_v61 = vrot.slane %v10131_v18, 2  ;;  %v4390_v14 = vrot.slane %v20501_v12, 1 }
 0x3bb   : > { %16704 = vmatmul.mubr.msk.bf16.gmra.mrb[116].mxu0 %vm1257_vm2, %v10066_v62  ;;  %v10129_v10 = vsel %vm9518_vm6, %v10119_v57, %v10128_v51  ;;  %v18424_v62 = vld [vmem:[%s18712_s11 + $0x24] sm:$0xf]  ;;  %v4389_v57 = vsel %vm2765_vm5, %v4386_v42, %v4388_v52 }
 0x3bc   : > { %16707 = vmatprep.mubr.msk.bf16.mxu0 %vm1257_vm2, %v10075_v49  ;;  %v14246_v48 = vcombine.low %v11059_v37, %v18424_v62  ;;  %v10137_v16 = vor.u32 %v10136_v31, %v10133_v61  ;;  %v4391_v54 = vsel %vm2765_vm5, %v4388_v52, %v4390_v14  ;;  %v20519_v61 = vld [vmem:[%s18712_s11 + $0x178] sm:$0xff]   ;;  %v18444_v62 = vld [vmem:[%s18712_s11 + $0x70] sm:$0xff]  }
 0x3bd   : > { %v4394_v31 = vrot.slane %v20519_v61, 1 }
 0x3be   : > { %v11066_v49 = vrot.slane %v14246_v48, 3  ;;  %v11085_v48 = vrot.slane %v18444_v62, 3  ;;  %v20604_v62 = vld [vmem:[%s18712_s11 + $0x1c0] sm:$0xff]  }
 0x3c0   : > { %16088 = vmatmul.mubr.msk.bf16.gmra.mrb[52].mxu1 %vm1257_vm2, %v4361_v44  ;;  %v20442_v44 = vld [vmem:[%s18712_s11 + $0x130] sm:$0xff]   ;;  %v11068_v20 = vsel %vm11065_vm7, %v11066_v49, %v11067_v13  ;;  %v20532_v49 = vld [vmem:[%s18712_s11 + $0x180] sm:$0xff]  }
 0x3c1   : > { %16091 = vmatprep.mubr.msk.bf16.mxu1 %vm1257_vm2, %v4363_v8  ;;  %v4376_v0 = vrot.slane %v20442_v44, 1  ;;  %v10138_v8 = vsel %vm9518_vm6, %v10128_v51, %v10137_v16  ;;  %v18441_v51 = vld [vmem:[%s18712_s11 + $0x68] sm:$0xff]   ;;  %v18445_v16 = vld [vmem:[%s18712_s11 + $0x78] sm:$0xff]   ;;  %v4396_v1 = vrot.slane %v20532_v49, 1 }
 0x3c2   : > { %v11083_v37 = vrot.slane %v18441_v51, 3 }
 0x3c3   : > { %16708 = vmatmul.mubr.msk.bf16.gmra.mrb[120].mxu0 %vm1257_vm2, %v10084_v21  ;;  %v4377_v39 = vsel %vm2765_vm5, %v4374_v63, %v4376_v0  ;;  %v4379_v40 = vsel %vm2765_vm5, %v4376_v0, %v4378_v19  ;;  %v20460_v21 = vld [vmem:[%s18712_s11 + $0x140] sm:$0xff]   ;;  %v20537_v0 = vld [vmem:[%s18712_s11 + $0x188] sm:$0xff]  }
 0x3c4   : > { %16711 = vmatprep.mubr.msk.bf16.mxu0 %vm1257_vm2, %v10093_v46  ;;  %v4380_v36 = vrot.slane %v20460_v21, 1  ;;  %v11072_v46 = vsel %vm11065_vm7, %v11069_v4, %v11071_v28  ;;  %v11086_v13 = vsel %vm11065_vm7, %v11083_v37, %v11085_v48 }
 0x3c6   : > { %v4381_v23 = vsel %vm2765_vm5, %v4378_v19, %v4380_v36  ;;  %v4383_v5 = vsel %vm2765_vm5, %v4380_v36, %v4382_v26  ;;  %v20555_v26 = vld [vmem:[%s18712_s11 + $0x198] sm:$0xff]  }
 0x3c8   : > { %16092 = vmatmul.mubr.msk.bf16.gmra.mrb[56].mxu1 %vm1257_vm2, %v4365_v9  ;;  %v11073_v9 = vrot.slane %v18432_v56, 3 }
 0x3c9   : > { %16095 = vmatprep.mubr.msk.bf16.mxu1 %vm1257_vm2, %v4367_v30  ;;  %v18433_v30 = vld [vmem:[%s18712_s11 + $0x48] sm:$0xff]  }
 0x3ca   : > { %v11075_v17 = vrot.slane %v18433_v30, 3  ;;  %v11074_v38 = vsel %vm11065_vm7, %v11071_v28, %v11073_v9  ;;  %v20550_v28 = vld [vmem:[%s18712_s11 + $0x190] sm:$0xff]  }
 0x3cb   : > { %16712 = vmatmul.mubr.msk.bf16.gmra.mrb[124].mxu0 %vm1257_vm2, %v10102_v35  ;;  %v11077_v35 = vrot.slane %v18436_v27, 3  ;;  %v4400_v36 = vrot.slane %v20550_v28, 1 }
 0x3cc   : > { %16715 = vmatprep.mubr.msk.bf16.mxu0 %vm1257_vm2, %v10111_v45  ;;  %v11076_v50 = vsel %vm11065_vm7, %v11073_v9, %v11075_v17  ;;  %v18452_v9 = vld [vmem:[%s18712_s11 + $0x90] sm:$0xff]  }
 0x3cd   : > { %v11078_v45 = vsel %vm11065_vm7, %v11075_v17, %v11077_v35  ;;  %v18453_v17 = vld [vmem:[%s18712_s11 + $0x98] sm:$0xff]  }
 0x3ce   : > { %v11095_v59 = vrot.slane %v18453_v17, 3  ;;  %v18468_v17 = vld [vmem:[%s18712_s11 + $0xd0] sm:$0xff]  }
 0x3d0   : > { %16096 = vmatmul.mubr.msk.bf16.gmra.mrb[60].mxu1 %vm1257_vm2, %v4369_v41  ;;  %v11080_v41 = vsel %vm11065_vm7, %v11077_v35, %v11079_v34 }
 0x3d1   : > { %16099 = vmatprep.mubr.msk.bf16.mxu1 %vm1257_vm2, %v4371_v25  ;;  %v18440_v25 = vld [vmem:[%s18712_s11 + $0x60] sm:$0xff]  }
 0x3d2   : > { %v11081_v18 = vrot.slane %v18440_v25, 3 }
 0x3d3   : > { %16716 = vmatmul.mubr.msk.bf16.gmra.mrb[128].mxu0 %vm1257_vm2, %v10120_v47 }
 0x3d4   : > { %16719 = vmatprep.mubr.msk.bf16.mxu0 %vm1257_vm2, %v10129_v10  ;;  %v11082_v47 = vsel %vm11065_vm7, %v11079_v34, %v11081_v18  ;;  %v11084_v63 = vsel %vm11065_vm7, %v11081_v18, %v11083_v37  ;;  %v4393_v10 = vsel %vm2765_vm5, %v4390_v14, %v4392_v6  ;;  %v11097_v34 = vrot.slane %v18456_v60, 3  ;;  %v20591_v18 = vld [vmem:[%s18712_s11 + $0x1b8] sm:$0xff]  }
 0x3d6   : > { %v11098_v25 = vsel %vm11065_vm7, %v11095_v59, %v11097_v34 }
 0x3d8   : > { %16100 = vmatmul.mubr.msk.bf16.gmra.mrb[64].mxu1 %vm1257_vm2, %v4373_v7  ;;  %v4395_v7 = vsel %vm2765_vm5, %v4392_v6, %v4394_v31  ;;  %v18460_v6 = vld [vmem:[%s18712_s11 + $0xb0] sm:$0xff]  }
 0x3d9   : > { %16103 = vmatprep.mubr.msk.bf16.mxu1 %vm1257_vm2, %v4375_v29  ;;  %v11087_v29 = vrot.slane %v18445_v16, 3  ;;  %v20609_v16 = vld [vmem:[%s18712_s11 + $0x1c8] sm:$0xff]  }
 0x3db   : > { %16720 = vmatmul.mubr.msk.bf16.gmra.mrb[132].mxu0 %vm1257_vm2, %v10138_v8  ;;  %v4398_v8 = vrot.slane %v20537_v0, 1  ;;  %v11088_v19 = vsel %vm11065_vm7, %v11085_v48, %v11087_v29  ;;  %v4412_v48 = vrot.slane %v20604_v62, 1 }
 0x3dc   : > { %16725 = vmatprep.mubr.msk.bf16.mxu0 %vm1257_vm2, %v11068_v20  ;;  %v4397_v20 = vsel %vm2765_vm5, %v4394_v31, %v4396_v1 }
 0x3dd   : > { %v4399_v4 = vsel %vm2765_vm5, %v4396_v1, %v4398_v8  ;;  %v4401_v56 = vsel %vm2765_vm5, %v4398_v8, %v4400_v36  ;;  %v18464_v8 = vld [vmem:[%s18712_s11 + $0xc0] sm:$0xff]  }
 0x3e0   : > { %16104 = vmatmul.mubr.msk.bf16.gmra.mrb[68].mxu1 %vm1257_vm2, %v4377_v39  ;;  %v18448_v39 = vld [vmem:[%s18712_s11 + $0x80] sm:$0xff]  }
 0x3e1   : > { %16107 = vmatprep.mubr.msk.bf16.mxu1 %vm1257_vm2, %v4379_v40  ;;  %v11089_v32 = vrot.slane %v18448_v39, 3  ;;  %v18449_v40 = vld [vmem:[%s18712_s11 + $0x88] sm:$0xff]  }
 0x3e2   : > { %v11091_v2 = vrot.slane %v18449_v40, 3  ;;  %v18465_v39 = vld [vmem:[%s18712_s11 + $0xc8] sm:$0xff]  }
 0x3e3   : > { %16726 = vmatmul.mubr.msk.bf16.vlgmr.msra.gmra.mrb[0].mxu0 %vm1257_vm2, %v11070_v43  ;;  %v11090_v43 = vsel %vm11065_vm7, %v11087_v29, %v11089_v32  ;;  %v4414_v29 = vrot.slane %v20609_v16, 1 }
 0x3e4   : > { %16729 = vmatprep.mubr.msk.bf16.mxu0 %vm1257_vm2, %v11072_v46  ;;  %v4402_v46 = vrot.slane %v20555_v26, 1 }
 0x3e6   : > { %v4403_v30 = vsel %vm2765_vm5, %v4400_v36, %v4402_v46  ;;  %v20627_v36 = vld [vmem:[%s18712_s11 + $0x1d8] sm:$0xff]  }
 0x3e8   : > { %16108 = vmatmul.mubr.msk.bf16.gmra.mrb[72].mxu1 %vm1257_vm2, %v4381_v23  ;;  %v11092_v23 = vsel %vm11065_vm7, %v11089_v32, %v11091_v2  ;;  %v11107_v32 = vrot.slane %v18465_v39, 3 }
 0x3e9   : > { %16111 = vmatprep.mubr.msk.bf16.mxu1 %vm1257_vm2, %v4383_v5  ;;  %v11093_v5 = vrot.slane %v18452_v9, 3 }
 0x3eb   : > { %16730 = vmatmul.mubr.msk.bf16.gmra.mrb[4].mxu0 %vm1257_vm2, %v11074_v38  ;;  %v20568_v38 = vld [vmem:[%s18712_s11 + $0x1a0] sm:$0xff]   ;;  %v11096_v35 = vsel %vm11065_vm7, %v11093_v5, %v11095_v59  ;;  %v11109_v59 = vrot.slane %v18468_v17, 3 }
 0x3ec   : > { %16733 = vmatprep.mubr.msk.bf16.mxu0 %vm1257_vm2, %v11076_v50  ;;  %v4404_v42 = vrot.slane %v20568_v38, 1  ;;  %v11094_v50 = vsel %vm11065_vm7, %v11091_v2, %v11093_v5  ;;  %v20700_v17 = vld [vmem:[%s18712_s11 + $0x200] sm:$0xff]  }
 0x3ed   : > { %v11110_v60 = vsel %vm11065_vm7, %v11107_v32, %v11109_v59 }
 0x3f0   : > { %16112 = vmatmul.mubr.msk.bf16.gmra.mrb[76].mxu1 %vm1257_vm2, %v4385_v53  ;;  %v20573_v53 = vld [vmem:[%s18712_s11 + $0x1a8] sm:$0xff]  }
 0x3f1   : > { %16115 = vmatprep.mubr.msk.bf16.mxu1 %vm1257_vm2, %v4387_v15  ;;  %v4406_v27 = vrot.slane %v20573_v53, 1  ;;  %v4405_v15 = vsel %vm2765_vm5, %v4402_v46, %v4404_v42 }
 0x3f3   : > { %16734 = vmatmul.mubr.msk.bf16.gmra.mrb[8].mxu0 %vm1257_vm2, %v11078_v45  ;;  %v4407_v52 = vsel %vm2765_vm5, %v4404_v42, %v4406_v27  ;;  %v18457_v45 = vld [vmem:[%s18712_s11 + $0xa8] sm:$0xff]  }
 0x3f4   : > { %16737 = vmatprep.mubr.msk.bf16.mxu0 %vm1257_vm2, %v11080_v41  ;;  %v11099_v14 = vrot.slane %v18457_v45, 3  ;;  %v20586_v41 = vld [vmem:[%s18712_s11 + $0x1b0] sm:$0xff]  }
 0x3f6   : > { %v11100_v51 = vsel %vm11065_vm7, %v11097_v34, %v11099_v14  ;;  %v20653_v34 = vld [vmem:[%s18712_s11 + $0x1e8] sm:$0xff]  }
 0x3f8   : > { %16116 = vmatmul.mubr.msk.bf16.gmra.mrb[80].mxu1 %vm1257_vm2, %v4389_v57  ;;  %v4408_v57 = vrot.slane %v20586_v41, 1 }
 0x3f9   : > { %16119 = vmatprep.mubr.msk.bf16.mxu1 %vm1257_vm2, %v4391_v54  ;;  %v4410_v54 = vrot.slane %v20591_v18, 1 }
 0x3fa   : > { %v4409_v37 = vsel %vm2765_vm5, %v4406_v27, %v4408_v57 }
 0x3fb   : > { %16738 = vmatmul.mubr.msk.bf16.gmra.mrb[12].mxu0 %vm1257_vm2, %v11082_v47  ;;  %v11101_v47 = vrot.slane %v18460_v6, 3  ;;  %v4411_v31 = vsel %vm2765_vm5, %v4408_v57, %v4410_v54 }
 0x3fc   : > { %16741 = vmatprep.mubr.msk.bf16.mxu0 %vm1257_vm2, %v11084_v63  ;;  %v18461_v63 = vld [vmem:[%s18712_s11 + $0xb8] sm:$0xff]  }
 0x400   : > { %16120 = vmatmul.mubr.msk.bf16.gmra.mrb[84].mxu1 %vm1257_vm2, %v4393_v10  ;;  %v11103_v10 = vrot.slane %v18461_v63, 3 }
 0x401   : > { %16123 = vmatprep.mubr.msk.bf16.mxu1 %vm1257_vm2, %v4395_v7  ;;  %v11102_v7 = vsel %vm11065_vm7, %v11099_v14, %v11101_v47 }
 0x402   : > { %v11104_v1 = vsel %vm11065_vm7, %v11101_v47, %v11103_v10 }
 0x403   : > { %16742 = vmatmul.mubr.msk.bf16.gmra.mrb[16].mxu0 %vm1257_vm2, %v11086_v13  ;;  %v4413_v13 = vsel %vm2765_vm5, %v4410_v54, %v4412_v48 }
 0x404   : > { %16745 = vmatprep.mubr.msk.bf16.mxu0 %vm1257_vm2, %v11088_v19  ;;  %v11105_v19 = vrot.slane %v18464_v8, 3 }
 0x406   : > { %v11106_v2 = vsel %vm11065_vm7, %v11103_v10, %v11105_v19  ;;  %v20674_v10 = vld [vmem:[%s18712_s11 + $0x1f0] sm:$0xff]  }
 0x408   : > { %16124 = vmatmul.mubr.msk.bf16.gmra.mrb[88].mxu1 %vm1257_vm2, %v4397_v20  ;;  %v4415_v20 = vsel %vm2765_vm5, %v4412_v48, %v4414_v29  ;;  %v4424_v48 = vrot.slane %v20674_v10, 1 }
 0x409   : > { %16127 = vmatprep.mubr.msk.bf16.mxu1 %vm1257_vm2, %v4399_v4  ;;  %v20622_v4 = vld [vmem:[%s18712_s11 + $0x1d0] sm:$0xff]  }
 0x40a   : > { %v4416_v40 = vrot.slane %v20622_v4, 1 }
 0x40b   : > { %16746 = vmatmul.mubr.msk.bf16.gmra.mrb[20].mxu0 %vm1257_vm2, %v11090_v43  ;;  %v4418_v43 = vrot.slane %v20627_v36, 1 }
 0x40c   : > { %16749 = vmatprep.mubr.msk.bf16.mxu0 %vm1257_vm2, %v11092_v23  ;;  %v11108_v23 = vsel %vm11065_vm7, %v11105_v19, %v11107_v32  ;;  %v4417_v5 = vsel %vm2765_vm5, %v4414_v29, %v4416_v40  ;;  %v20679_v29 = vld [vmem:[%s18712_s11 + $0x1f8] sm:$0xff]  }
 0x40d   : > { %v4419_v42 = vsel %vm2765_vm5, %v4416_v40, %v4418_v43  ;;  %v18476_v40 = vld [vmem:[%s18712_s11 + $0xf0] sm:$0xff]  }
 0x410   : > { %16128 = vmatmul.mubr.msk.bf16.gmra.mrb[92].mxu1 %vm1257_vm2, %v4401_v56 }
 0x411   : > { %16131 = vmatprep.mubr.msk.bf16.mxu1 %vm1257_vm2, %v4403_v30 }
 0x413   : > { %16750 = vmatmul.mubr.msk.bf16.gmra.mrb[24].mxu0 %vm1257_vm2, %v11094_v50  ;;  %v18469_v50 = vld [vmem:[%s18712_s11 + $0xd8] sm:$0xff]  }
 0x414   : > { %16753 = vmatprep.mubr.msk.bf16.mxu0 %vm1257_vm2, %v11096_v35  ;;  %v11111_v27 = vrot.slane %v18469_v50, 3  ;;  %v20648_v35 = vld [vmem:[%s18712_s11 + $0x1e0] sm:$0xff]   ;;  %v20705_v50 = vld [vmem:[%s18712_s11 + $0x208] sm:$0xff]  }
 0x416   : > { %v11112_v14 = vsel %vm11065_vm7, %v11109_v59, %v11111_v27  ;;  %v4428_v59 = vrot.slane %v20700_v17, 1 }
 0x418   : > { %16132 = vmatmul.mubr.msk.bf16.gmra.mrb[96].mxu1 %vm1257_vm2, %v4405_v15  ;;  %v4420_v15 = vrot.slane %v20648_v35, 1 }
 0x419   : > { %16135 = vmatprep.mubr.msk.bf16.mxu1 %vm1257_vm2, %v4407_v52  ;;  %v4422_v52 = vrot.slane %v20653_v34, 1 }
 0x41a   : > { %v4421_v54 = vsel %vm2765_vm5, %v4418_v43, %v4420_v15 }
 0x41b   : > { %16754 = vmatmul.mubr.msk.bf16.gmra.mrb[28].mxu0 %vm1257_vm2, %v11098_v25  ;;  %v4423_v47 = vsel %vm2765_vm5, %v4420_v15, %v4422_v52  ;;  %v4425_v39 = vsel %vm2765_vm5, %v4422_v52, %v4424_v48 }
 0x41c   : > { %16757 = vmatprep.mubr.msk.bf16.mxu0 %vm1257_vm2, %v11100_v51 }
 0x420   : > { %16136 = vmatmul.mubr.msk.bf16.gmra.mrb[100].mxu1 %vm1257_vm2, %v4409_v37  ;;  %v18472_v37 = vld [vmem:[%s18712_s11 + $0xe0] sm:$0xff]  }
 0x421   : > { %16139 = vmatprep.mubr.msk.bf16.mxu1 %vm1257_vm2, %v4411_v31  ;;  %v11113_v6 = vrot.slane %v18472_v37, 3  ;;  %v18473_v31 = vld [vmem:[%s18712_s11 + $0xe8] sm:$0xff]  }
 0x422   : > { %v11115_v63 = vrot.slane %v18473_v31, 3 }
 0x423   : > { %16758 = vmatmul.mubr.msk.bf16.gmra.mrb[32].mxu0 %vm1257_vm2, %v11102_v7  ;;  %v11114_v7 = vsel %vm11065_vm7, %v11111_v27, %v11113_v6  ;;  %v4430_v27 = vrot.slane %v20705_v50, 1 }
 0x424   : > { %16761 = vmatprep.mubr.msk.bf16.mxu0 %vm1257_vm2, %v11104_v1  ;;  %v4426_v1 = vrot.slane %v20679_v29, 1  ;;  %v11116_v8 = vsel %vm11065_vm7, %v11113_v6, %v11115_v63  ;;  %v18480_v6 = vld [vmem:[%s18712_s11 + $0x100] sm:$0xff]  }
 0x425   : > { %v4431_v31 = vsel %vm2765_vm5, %v4428_v59, %v4430_v27 }
 0x426   : > { %v4427_v43 = vsel %vm2765_vm5, %v4424_v48, %v4426_v1 }
 0x428   : > { %16140 = vmatmul.mubr.msk.bf16.gmra.mrb[104].mxu1 %vm1257_vm2, %v4413_v13 }
 0x429   : > { %16143 = vmatprep.mubr.msk.bf16.mxu1 %vm1257_vm2, %v4415_v20 }
 0x42b   : > { %v20630_v46 = vpop.f32.mrb[0].mxu1  ;;  %16762 = vmatmul.mubr.msk.bf16.gmra.mrb[36].mxu0 %vm1257_vm2, %v11106_v2  ;;  %v11117_v2 = vrot.slane %v18476_v40, 3 }
 0x42c   : > { %v20633_v56 = vpop.f32.mrb[1].mxu1  ;;  %16765 = vmatprep.mubr.msk.bf16.mxu0 %vm1257_vm2, %v11108_v23  ;;  %v18477_v23 = vld [vmem:[%s18712_s11 + $0xf8] sm:$0xff]  }
 0x42d   : > { %v20636_v9 = vpop.f32.mrb[2].mxu1 }
 0x42e   : > { %v20639_v30 = vpop.f32.mrb[3].mxu1 }
 0x430   : > { %16144 = vmatmul.mubr.msk.bf16.gmra.mrb[108].mxu1 %vm1257_vm2, %v4417_v5  ;;  %v11119_v5 = vrot.slane %v18477_v23, 3 }
 0x431   : > { %16147 = vmatprep.mubr.msk.bf16.mxu1 %vm1257_vm2, %v4419_v42  ;;  %v11118_v42 = vsel %vm11065_vm7, %v11115_v63, %v11117_v2  ;;  %v18481_v63 = vld [vmem:[%s18712_s11 + $0x108] sm:$0xff]  }
 0x432   : > { %v11123_v48 = vrot.slane %v18481_v63, 3 }
 0x433   : > { %v20656_v45 = vpop.f32.mrb[4].mxu1  ;;  %16766 = vmatmul.mubr.msk.bf16.gmra.mrb[40].mxu0 %vm1257_vm2, %v11110_v60  ;;  %v11120_v60 = vsel %vm11065_vm7, %v11117_v2, %v11119_v5 }
 0x434   : > { %v20659_v57 = vpop.f32.mrb[5].mxu1  ;;  %16769 = vmatprep.mubr.msk.bf16.mxu0 %vm1257_vm2, %v11112_v14 }
 0x435   : > { %v20662_v25 = vpop.f32.mrb[6].mxu1 }
 0x436   : > { %v20665_v51 = vpop.f32.mrb[7].mxu1 }
 0x438   : > { %16148 = vmatmul.mubr.msk.bf16.gmra.mrb[112].mxu1 %vm1257_vm2, %v4421_v54  ;;  %v4429_v54 = vsel %vm2765_vm5, %v4426_v1, %v4428_v59 }
 0x439   : > { %16151 = vmatprep.mubr.msk.bf16.mxu1 %vm1257_vm2, %v4423_v47  ;;  %v11121_v47 = vrot.slane %v18480_v6, 3 }
 0x43b   : > { %v20682_v13 = vpop.f32.mrb[8].mxu1  ;;  %16770 = vmatmul.mubr.msk.bf16.gmra.mrb[44].mxu0 %vm1257_vm2, %v11114_v7  ;;  %v20726_v7 = vld [vmem:[%s18712_s11 + $0x210] sm:$0xff]  }
 0x43c   : > { %v20685_v19 = vpop.f32.mrb[9].mxu1  ;;  %16773 = vmatprep.mubr.msk.bf16.mxu0 %vm1257_vm2, %v11116_v8  ;;  %v4432_v1 = vrot.slane %v20726_v7, 1  ;;  %v11122_v8 = vsel %vm11065_vm7, %v11119_v5, %v11121_v47  ;;  %v18484_v5 = vld [vmem:[%s18712_s11 + $0x110] sm:$0xff]  }
 0x43d   : > { %v20688_v20 = vpop.f32.mrb[10].mxu1 }
 0x43e   : > { %v20691_v32 = vpop.f32.mrb[11].mxu1 }
 0x440   : > { %16152 = vmatmul.mubr.msk.bf16.gmra.mrb[116].mxu1 %vm1257_vm2, %v4425_v39  ;;  %v20731_v39 = vld [vmem:[%s18712_s11 + $0x218] sm:$0xff]  }
 0x441   : > { %16155 = vmatprep.mubr.msk.bf16.mxu1 %vm1257_vm2, %v4427_v43  ;;  %v4434_v40 = vrot.slane %v20731_v39, 1  ;;  %v11124_v43 = vsel %vm11065_vm7, %v11121_v47, %v11123_v48  ;;  %v20752_v47 = vld [vmem:[%s18712_s11 + $0x220] sm:$0xff]  }
 0x443   : > { %v20708_v15 = vpop.f32.mrb[12].mxu1  ;;  %16774 = vmatmul.mubr.msk.bf16.gmra.mrb[48].mxu0 %vm1257_vm2, %v11118_v42  ;;  %v4433_v42 = vsel %vm2765_vm5, %v4430_v27, %v4432_v1  ;;  %v4435_v6 = vsel %vm2765_vm5, %v4432_v1, %v4434_v40  ;;  %v4436_v27 = vrot.slane %v20752_v47, 1  ;;  %v5684_v1 = vshrl.u32 %v20429_v58, 16 }
 0x444   : > { %21669 = vst [vmem:[#allocation8_spill] sm:$0xff] %v20708_v15  ;;  %v20711_v52 = vpop.f32.mrb[13].mxu1  ;;  %16777 = vmatprep.mubr.msk.bf16.mxu0 %vm1257_vm2, %v11120_v60 }
 0x445   : > { %21670 = vst [vmem:[#allocation9_spill] sm:$0xff] %v20711_v52  ;;  %v20714_v14 = vpop.f32.mrb[14].mxu1 }
 0x446   : > { %21671 = vst [vmem:[#allocation10_spill] sm:$0xff] %v20714_v14  ;;  %v20717_v37 = vpop.f32.mrb[15].mxu1 }
 0x447   : > { %21672 = vst [vmem:[#allocation13_spill] sm:$0xff] %v20717_v37  ;;  %v18488_v37 = vld [vmem:[%s18712_s11 + $0x120] sm:$0xff]  }
 0x448   : > { %16156 = vmatmul.mubr.msk.bf16.gmra.mrb[120].mxu1 %vm1257_vm2, %v4429_v54  ;;  %v11125_v54 = vrot.slane %v18484_v5, 3  ;;  %v5687_v5 = vshll.u32 %v20429_v58, 16  ;;  %v11129_v14 = vrot.slane %v18488_v37, 3  ;;  %v5702_v37 = vshrl.u32 %v20447_v3, 16 }
 0x449   : > { %16159 = vmatprep.mubr.msk.bf16.mxu1 %vm1257_vm2, %v4431_v31  ;;  %v18485_v31 = vld [vmem:[%s18712_s11 + $0x118] sm:$0xff]  }
 0x44a   : > { %v11127_v63 = vrot.slane %v18485_v31, 3  ;;  %v5689_v52 = vrot.slane %v5687_v5, 2 }
 0x44b   : > { %v20734_v2 = vpop.f32.mrb[16].mxu1  ;;  %16778 = vmatmul.mubr.msk.bf16.gmra.mrb[52].mxu0 %vm1257_vm2, %v11122_v8  ;;  %v11126_v8 = vsel %vm11065_vm7, %v11123_v48, %v11125_v54  ;;  %v4437_v48 = vsel %vm2765_vm5, %v4434_v40, %v4436_v27  ;;  %v5693_v40 = vshrl.u32 %v20442_v44, 16 }
 0x44c   : > { %21673 = vst [vmem:[#allocation11_spill] sm:$0xff] %v20734_v2  ;;  %v20737_v23 = vpop.f32.mrb[17].mxu1  ;;  %16781 = vmatprep.mubr.msk.bf16.mxu0 %vm1257_vm2, %v11124_v43 }
 0x44d   : > { %21674 = vst [vmem:[#allocation12_spill] sm:$0xff] %v20737_v23  ;;  %v20740_v59 = vpop.f32.mrb[18].mxu1  ;;  %v18232_v23 = vld [vmem:[%s18712_s11 + $0x230] ss:$0 sps:$4 sm:$0x11]  }
 0x44e   : > { %21675 = vst [vmem:[#allocation14_spill] sm:$0xff] %v20740_v59  ;;  %v20743_v60 = vpop.f32.mrb[19].mxu1 }
 0x44f   : > { %21676 = vst [vmem:[#allocation17_spill] sm:$0xff] %v20743_v60  ;;  %v20757_v60 = vld [vmem:[%s18712_s11 + $0x228] sm:$0xff]  }
 0x450   : > { %16160 = vmatmul.mubr.msk.bf16.gmra.mrb[124].mxu1 %vm1257_vm2, %v4433_v42  ;;  %21677 = vst [vmem:[#allocation15_spill] sm:$0xff] %v20757_v60  ;;  %v4438_v43 = vrot.slane %v20757_v60, 1  ;;  %v11128_v42 = vsel %vm11065_vm7, %v11125_v54, %v11127_v63  ;;  %v18489_v54 = vld [vmem:[%s18712_s11 + $0x128] sm:$0xff]  }
 0x451   : > { %16163 = vmatprep.mubr.msk.bf16.mxu1 %vm1257_vm2, %v4435_v6  ;;  %v11131_v15 = vrot.slane %v18489_v54, 3  ;;  %v21684_v54 = vld [vmem:[#allocation7_spill] sm:$0xff] }
 0x452   : > { %v4439_v58 = vsel %vm2765_vm5, %v4436_v27, %v4438_v43  ;;  %v5705_v27 = vshll.u32 %v20447_v3, 16  ;;  %v18490_v3 = vld [vmem:[%s18712_s11 + $0x130] sm:$0xff]  }
 0x453   : > { %v20762_v31 = vpop.f32.mrb[20].mxu1  ;;  %16782 = vmatmul.mubr.msk.bf16.gmra.mrb[56].mxu0 %vm1257_vm2, %v11126_v8  ;;  %v4440_v8 = vrot.slane %v18232_v23, 1  ;;  %v11132_v5 = vsel %vm11065_vm7, %v11129_v14, %v11131_v15 }
 0x454   : > { %21678 = vst [vmem:[#allocation16_spill] sm:$0xff] %v20762_v31  ;;  %v20765_v6 = vpop.f32.mrb[21].mxu1  ;;  %16785 = vmatprep.mubr.msk.bf16.mxu0 %vm1257_vm2, %v11128_v42  ;;  %v5686_v31 = vrot.slane %v5684_v1, 1  ;;  %v11130_v42 = vsel %vm11065_vm7, %v11127_v63, %v11129_v14  ;;  %v5704_v14 = vrot.slane %v5702_v37, 1  ;;  %v5723_v37 = vshll.u32 %v20465_v11, 16 }
 0x455   : > { %21679 = vst [vmem:[#allocation18_spill] sm:$0xff] %v20765_v6  ;;  %v20768_v59 = vpop.f32.mrb[22].mxu1  ;;  %v5707_v6 = vrot.slane %v5705_v27, 2 }
 0x456   : > { %21680 = vst [vmem:[#allocation21_spill] sm:$0xff] %v20768_v59  ;;  %v20772_v2 = vpop.f32.mrb[23].mxu1  ;;  %v5690_v59 = vor.u32 %v5689_v52, %v5686_v31  ;;  %v11133_v31 = vrot.slane %v18490_v3, 3 }
 0x457   : > { %21681 = vst [vmem:[#allocation19_spill] sm:$0xff] %v20772_v2  ;;  %v5696_v2 = vshll.u32 %v20442_v44, 16  ;;  %v4441_v44 = vsel %vm2765_vm5, %v4438_v43, %v4440_v8  ;;  %v5714_v8 = vshll.u32 %v20460_v21, 16 }
 0x458   : > { %16164 = vmatmul.mubr.msk.bf16.gmra.mrb[128].mxu1 %vm1257_vm2, %v4437_v48 }
 0x459   : > { %16167 = vmatprep.mubr.msk.bf16.mxu1 %vm1257_vm2, %v4439_v58  ;;  %v5695_v58 = vrot.slane %v5693_v40, 1  ;;  %v5698_v63 = vrot.slane %v5696_v2, 2  ;;  %v5711_v2 = vshrl.u32 %v20460_v21, 16  ;;  %v11134_v40 = vsel %vm11065_vm7, %v11131_v15, %v11133_v31 }
 0x45a   : > { %v5716_v15 = vrot.slane %v5714_v8, 2 }
 0x45b   : > { %v20785_v1 = vpop.f32.mrb[24].mxu1  ;;  %16786 = vmatmul.mubr.msk.bf16.gmra.mrb[60].mxu0 %vm1257_vm2, %v11130_v42  ;;  %v5699_v43 = vor.u32 %v5698_v63, %v5695_v58  ;;  %v5708_v42 = vor.u32 %v5707_v6, %v5704_v14  ;;  %v5713_v58 = vrot.slane %v5711_v2, 1  ;;  %v18493_v14 = vld [vmem:[%s18712_s11 + $0x148] sm:$0xff]   ;;  %v5732_v2 = vshll.u32 %v20478_v33, 16 }
 0x45c   : > { %21682 = vst [vmem:[#allocation20_spill] sm:$0xff] %v20785_v1  ;;  %v20788_v48 = vpop.f32.mrb[25].mxu1  ;;  %16789 = vmatprep.mubr.msk.bf16.mxu0 %vm1257_vm2, %v11132_v5  ;;  %v5691_v1 = vsel %vm5368_vm3, %v21684_v54, %v5690_v59  ;;  %v5720_v5 = vshrl.u32 %v20465_v11, 16  ;;  %v18492_v11 = vld [vmem:[%s18712_s11 + $0x140] sm:$0xff]  }
 0x45d   : > { %21683 = vst [vmem:[#allocation22_spill] sm:$0xff] %v20788_v48  ;;  %v20791_v23 = vpop.f32.mrb[26].mxu1  ;;  %v18491_v48 = vld [vmem:[%s18712_s11 + $0x138] sm:$0xff]   ;;  %v5700_v21 = vsel %vm5368_vm3, %v5690_v59, %v5699_v43  ;;  %v11137_v63 = vrot.slane %v18492_v11, 3  ;;  %v5709_v3 = vsel %vm5368_vm3, %v5699_v43, %v5708_v42  ;;  %v5729_v59 = vshrl.u32 %v20478_v33, 16 }
 0x45e   : > { %v20794_v52 = vpop.f32.mrb[27].mxu1  ;;  %v11135_v60 = vrot.slane %v18491_v48, 3  ;;  %v5722_v54 = vrot.slane %v5720_v5, 1  ;;  %v5738_v11 = vshrl.u32 %v20483_v24, 16  ;;  %v5741_v43 = vshll.u32 %v20483_v24, 16  ;;  %v18494_v24 = vld [vmem:[%s18712_s11 + $0x150] sm:$0xff]  }
 0x460   : > { %16168 = vmatmul.mubr.msk.bf16.gmra.mrb[132].mxu1 %vm1257_vm2, %v4441_v44  ;;  %v11136_v48 = vsel %vm11065_vm7, %v11133_v31, %v11135_v60  ;;  %v5725_v31 = vrot.slane %v5723_v37, 2  ;;  %v11138_v8 = vsel %vm11065_vm7, %v11135_v60, %v11137_v63  ;;  %v5734_v60 = vrot.slane %v5732_v2, 2 }
 0x461   : > { %16241 = vmatprep.mubr.msk.bf16.mxu1 %vm1257_vm2, %v5691_v1 }
 0x463   : > { %v20808_v27 = vpop.f32.mrb[28].mxu1  ;;  %16790 = vmatmul.mubr.msk.bf16.gmra.mrb[64].mxu0 %vm1257_vm2, %v11134_v40  ;;  %v5717_v40 = vor.u32 %v5716_v15, %v5713_v58  ;;  %v5731_v15 = vrot.slane %v5729_v59, 1  ;;  %v5750_v59 = vshll.u32 %v20496_v22, 16 }
 0x464   : > { %v20811_v44 = vpop.f32.mrb[29].mxu1  ;;  %16793 = vmatprep.mubr.msk.bf16.mxu0 %vm1257_vm2, %v11136_v48  ;;  %v5726_v48 = vor.u32 %v5725_v31, %v5722_v54  ;;  %v11141_v54 = vrot.slane %v18494_v24, 3  ;;  %v5756_v24 = vshrl.u32 %v20501_v12, 16 }
 0x465   : > { %21685 = vst [vmem:[#allocation25_spill] sm:$0xff] %v20811_v44  ;;  %v20814_v1 = vpop.f32.mrb[30].mxu1  ;;  %v11139_v44 = vrot.slane %v18493_v14, 3  ;;  %v5718_v33 = vsel %vm5368_vm3, %v5708_v42, %v5717_v40  ;;  %v5740_v14 = vrot.slane %v5738_v11, 1  ;;  %v5747_v42 = vshrl.u32 %v20496_v22, 16 }
 0x466   : > { %v20817_v6 = vpop.f32.mrb[31].mxu1  ;;  %v5727_v31 = vsel %vm5368_vm3, %v5717_v40, %v5726_v48  ;;  %v5759_v40 = vshll.u32 %v20501_v12, 16  ;;  %v18496_v12 = vld [vmem:[%s18712_s11 + $0x160] sm:$0xff]  }
 0x467   : > { %v11140_v37 = vsel %vm11065_vm7, %v11137_v63, %v11139_v44  ;;  %v5743_v63 = vrot.slane %v5741_v43, 2  ;;  %v11142_v2 = vsel %vm11065_vm7, %v11139_v44, %v11141_v54  ;;  %v5752_v44 = vrot.slane %v5750_v59, 2 }
 0x468   : > { %16242 = vmatmul.mubr.msk.bf16.vlgmr.msra.gmra.mrb[68].mxu1 %vm1257_vm2, %v5700_v21 }
 0x469   : > { %16245 = vmatprep.mubr.msk.bf16.mxu1 %vm1257_vm2, %v5709_v3 }
 0x46b   : > { %v20830_v5 = vpop.f32.mrb[32].mxu1  ;;  %16794 = vmatmul.mubr.msk.bf16.gmra.mrb[68].mxu0 %vm1257_vm2, %v11138_v8  ;;  %v5735_v8 = vor.u32 %v5734_v60, %v5731_v15  ;;  %v5749_v15 = vrot.slane %v5747_v42, 1  ;;  %v5768_v42 = vshll.u32 %v20514_v55, 16 }
 0x46c   : > { %21686 = vst [vmem:[#allocation23_spill] sm:$0xff] %v20830_v5  ;;  %v20833_v21 = vpop.f32.mrb[33].mxu1  ;;  %16797 = vmatprep.mubr.msk.bf16.mxu0 %vm1257_vm2, %v11140_v37  ;;  %v18495_v5 = vld [vmem:[%s18712_s11 + $0x158] sm:$0xff]   ;;  %v5744_v37 = vor.u32 %v5743_v63, %v5740_v14  ;;  %v5758_v63 = vrot.slane %v5756_v24, 1 }
 0x46d   : > { %21687 = vst [vmem:[#allocation24_spill] sm:$0xff] %v20833_v21  ;;  %v20836_v58 = vpop.f32.mrb[34].mxu1  ;;  %v11143_v21 = vrot.slane %v18495_v5, 3  ;;  %v5736_v22 = vsel %vm5368_vm3, %v5726_v48, %v5735_v8  ;;  %v5765_v48 = vshrl.u32 %v20514_v55, 16 }
 0x46e   : > { %v20839_v3 = vpop.f32.mrb[35].mxu1  ;;  %v5745_v14 = vsel %vm5368_vm3, %v5735_v8, %v5744_v37  ;;  %v5777_v8 = vshll.u32 %v20519_v61, 16 }
 0x46f   : > { %v11144_v43 = vsel %vm11065_vm7, %v11141_v54, %v11143_v21  ;;  %v5761_v54 = vrot.slane %v5759_v40, 2 }
 0x470   : > { %16246 = vmatmul.mubr.msk.bf16.gmra.mrb[72].mxu1 %vm1257_vm2, %v5718_v33 }
 0x471   : > { %16249 = vmatprep.mubr.msk.bf16.mxu1 %vm1257_vm2, %v5727_v31  ;;  %v11145_v31 = vrot.slane %v18496_v12, 3  ;;  %v5774_v12 = vshrl.u32 %v20519_v61, 16  ;;  %v18498_v61 = vld [vmem:[%s18712_s11 + $0x170] sm:$0xff]  }
 0x473   : > { %v20852_v11 = vpop.f32.mrb[36].mxu1  ;;  %16798 = vmatmul.mubr.msk.bf16.gmra.mrb[72].mxu0 %vm1257_vm2, %v11142_v2  ;;  %v5753_v2 = vor.u32 %v5752_v44, %v5749_v15  ;;  %v11146_v59 = vsel %vm11065_vm7, %v11143_v21, %v11145_v31  ;;  %v5767_v15 = vrot.slane %v5765_v48, 1  ;;  %v5770_v21 = vrot.slane %v5768_v42, 2 }
 0x474   : > { %21688 = vst [vmem:[#allocation26_spill] sm:$0xff] %v20852_v11  ;;  %v20855_v5 = vpop.f32.mrb[37].mxu1  ;;  %16801 = vmatprep.mubr.msk.bf16.mxu0 %vm1257_vm2, %v11144_v43  ;;  %v18497_v11 = vld [vmem:[%s18712_s11 + $0x168] sm:$0xff]   ;;  %v5762_v43 = vor.u32 %v5761_v54, %v5758_v63  ;;  %v5776_v54 = vrot.slane %v5774_v12, 1  ;;  %v5786_v48 = vshll.u32 %v20532_v49, 16 }
 0x475   : > { %21689 = vst [vmem:[#allocation29_spill] sm:$0xff] %v20855_v5  ;;  %v20858_v33 = vpop.f32.mrb[38].mxu1  ;;  %v11147_v5 = vrot.slane %v18497_v11, 3  ;;  %v5754_v55 = vsel %vm5368_vm3, %v5744_v37, %v5753_v2  ;;  %v5783_v37 = vshrl.u32 %v20532_v49, 16 }
 0x476   : > { %v20861_v60 = vpop.f32.mrb[39].mxu1  ;;  %v5763_v63 = vsel %vm5368_vm3, %v5753_v2, %v5762_v43  ;;  %v5795_v2 = vshll.u32 %v20537_v0, 16 }
 0x477   : > { %v11148_v40 = vsel %vm11065_vm7, %v11145_v31, %v11147_v5  ;;  %v5779_v31 = vrot.slane %v5777_v8, 2 }
 0x478   : > { %16250 = vmatmul.mubr.msk.bf16.gmra.mrb[76].mxu1 %vm1257_vm2, %v5736_v22 }
 0x479   : > { %16253 = vmatprep.mubr.msk.bf16.mxu1 %vm1257_vm2, %v5745_v14  ;;  %v11149_v14 = vrot.slane %v18498_v61, 3  ;;  %v5792_v61 = vshrl.u32 %v20537_v0, 16  ;;  %v18500_v0 = vld [vmem:[%s18712_s11 + $0x180] sm:$0xff]  }
 0x47b   : > { %v20874_v24 = vpop.f32.mrb[40].mxu1  ;;  %16802 = vmatmul.mubr.msk.bf16.gmra.mrb[76].mxu0 %vm1257_vm2, %v11146_v59  ;;  %v5771_v59 = vor.u32 %v5770_v21, %v5767_v15  ;;  %v11150_v42 = vsel %vm11065_vm7, %v11147_v5, %v11149_v14  ;;  %v5785_v15 = vrot.slane %v5783_v37, 1  ;;  %v5788_v5 = vrot.slane %v5786_v48, 2 }
 0x47c   : > { %21690 = vst [vmem:[#allocation27_spill] sm:$0xff] %v20874_v24  ;;  %v20877_v11 = vpop.f32.mrb[41].mxu1  ;;  %16805 = vmatprep.mubr.msk.bf16.mxu0 %vm1257_vm2, %v11148_v40  ;;  %v18499_v24 = vld [vmem:[%s18712_s11 + $0x178] sm:$0xff]   ;;  %v5780_v40 = vor.u32 %v5779_v31, %v5776_v54  ;;  %v5794_v31 = vrot.slane %v5792_v61, 1  ;;  %v5804_v37 = vshll.u32 %v20550_v28, 16 }
 0x47d   : > { %21691 = vst [vmem:[#allocation28_spill] sm:$0xff] %v20877_v11  ;;  %v20880_v22 = vpop.f32.mrb[42].mxu1  ;;  %v11151_v11 = vrot.slane %v18499_v24, 3  ;;  %v5772_v49 = vsel %vm5368_vm3, %v5762_v43, %v5771_v59  ;;  %v5801_v43 = vshrl.u32 %v20550_v28, 16 }
 0x47e   : > { %v20883_v44 = vpop.f32.mrb[43].mxu1  ;;  %v5781_v54 = vsel %vm5368_vm3, %v5771_v59, %v5780_v40  ;;  %v5813_v59 = vshll.u32 %v20555_v26, 16 }
 0x47f   : > { %v11152_v8 = vsel %vm11065_vm7, %v11149_v14, %v11151_v11  ;;  %v5797_v14 = vrot.slane %v5795_v2, 2 }
 0x480   : > { %16254 = vmatmul.mubr.msk.bf16.gmra.mrb[80].mxu1 %vm1257_vm2, %v5754_v55 }
 0x481   : > { %16257 = vmatprep.mubr.msk.bf16.mxu1 %vm1257_vm2, %v5763_v63  ;;  %v11153_v63 = vrot.slane %v18500_v0, 3  ;;  %v5810_v0 = vshrl.u32 %v20555_v26, 16  ;;  %v18502_v26 = vld [vmem:[%s18712_s11 + $0x190] sm:$0xff]  }
 0x483   : > { %v20896_v12 = vpop.f32.mrb[44].mxu1  ;;  %16806 = vmatmul.mubr.msk.bf16.gmra.mrb[80].mxu0 %vm1257_vm2, %v11150_v42  ;;  %v5789_v42 = vor.u32 %v5788_v5, %v5785_v15  ;;  %v11154_v48 = vsel %vm11065_vm7, %v11151_v11, %v11153_v63  ;;  %v5803_v15 = vrot.slane %v5801_v43, 1  ;;  %v5806_v11 = vrot.slane %v5804_v37, 2 }
 0x484   : > { %21692 = vst [vmem:[#allocation30_spill] sm:$0xff] %v20896_v12  ;;  %v20899_v24 = vpop.f32.mrb[45].mxu1  ;;  %16809 = vmatprep.mubr.msk.bf16.mxu0 %vm1257_vm2, %v11152_v8  ;;  %v18501_v12 = vld [vmem:[%s18712_s11 + $0x188] sm:$0xff]   ;;  %v5798_v8 = vor.u32 %v5797_v14, %v5794_v31  ;;  %v5812_v14 = vrot.slane %v5810_v0, 1  ;;  %v5822_v43 = vshll.u32 %v20568_v38, 16 }
 0x485   : > { %21693 = vst [vmem:[#allocation33_spill] sm:$0xff] %v20899_v24  ;;  %v20902_v55 = vpop.f32.mrb[46].mxu1  ;;  %v11155_v24 = vrot.slane %v18501_v12, 3  ;;  %v5790_v28 = vsel %vm5368_vm3, %v5780_v40, %v5789_v42  ;;  %v5819_v40 = vshrl.u32 %v20568_v38, 16 }
 0x486   : > { %v20905_v21 = vpop.f32.mrb[47].mxu1  ;;  %v5799_v31 = vsel %vm5368_vm3, %v5789_v42, %v5798_v8  ;;  %v5831_v42 = vshll.u32 %v20573_v53, 16 }
 0x487   : > { %v11156_v2 = vsel %vm11065_vm7, %v11153_v63, %v11155_v24  ;;  %v5815_v63 = vrot.slane %v5813_v59, 2 }
 0x488   : > { %16258 = vmatmul.mubr.msk.bf16.gmra.mrb[84].mxu1 %vm1257_vm2, %v5772_v49 }
 0x489   : > { %16261 = vmatprep.mubr.msk.bf16.mxu1 %vm1257_vm2, %v5781_v54  ;;  %v11157_v54 = vrot.slane %v18502_v26, 3  ;;  %v5828_v26 = vshrl.u32 %v20573_v53, 16  ;;  %v18504_v53 = vld [vmem:[%s18712_s11 + $0x1a0] sm:$0xff]  }
 0x48b   : > { %v20918_v61 = vpop.f32.mrb[48].mxu1  ;;  %16810 = vmatmul.mubr.msk.bf16.gmra.mrb[84].mxu0 %vm1257_vm2, %v11154_v48  ;;  %v5807_v48 = vor.u32 %v5806_v11, %v5803_v15  ;;  %v11158_v37 = vsel %vm11065_vm7, %v11155_v24, %v11157_v54  ;;  %v5821_v15 = vrot.slane %v5819_v40, 1  ;;  %v5824_v24 = vrot.slane %v5822_v43, 2 }
 0x48c   : > { %21694 = vst [vmem:[#allocation31_spill] sm:$0xff] %v20918_v61  ;;  %v20921_v12 = vpop.f32.mrb[49].mxu1  ;;  %16813 = vmatprep.mubr.msk.bf16.mxu0 %vm1257_vm2, %v11156_v2  ;;  %v18503_v61 = vld [vmem:[%s18712_s11 + $0x198] sm:$0xff]   ;;  %v5816_v2 = vor.u32 %v5815_v63, %v5812_v14  ;;  %v5830_v63 = vrot.slane %v5828_v26, 1  ;;  %v5840_v40 = vshll.u32 %v20586_v41, 16 }
 0x48d   : > { %21695 = vst [vmem:[#allocation32_spill] sm:$0xff] %v20921_v12  ;;  %v20924_v49 = vpop.f32.mrb[50].mxu1  ;;  %v11159_v12 = vrot.slane %v18503_v61, 3  ;;  %v5808_v38 = vsel %vm5368_vm3, %v5798_v8, %v5807_v48  ;;  %v5837_v8 = vshrl.u32 %v20586_v41, 16 }
 0x48e   : > { %v20927_v5 = vpop.f32.mrb[51].mxu1  ;;  %v5817_v14 = vsel %vm5368_vm3, %v5807_v48, %v5816_v2  ;;  %v5849_v48 = vshll.u32 %v20591_v18, 16 }
 0x48f   : > { %v11160_v59 = vsel %vm11065_vm7, %v11157_v54, %v11159_v12  ;;  %v5833_v54 = vrot.slane %v5831_v42, 2 }
 0x490   : > { %16262 = vmatmul.mubr.msk.bf16.gmra.mrb[88].mxu1 %vm1257_vm2, %v5790_v28 }
 0x491   : > { %16265 = vmatprep.mubr.msk.bf16.mxu1 %vm1257_vm2, %v5799_v31  ;;  %v11161_v31 = vrot.slane %v18504_v53, 3  ;;  %v5846_v53 = vshrl.u32 %v20591_v18, 16  ;;  %v18506_v18 = vld [vmem:[%s18712_s11 + $0x1b0] sm:$0xff]  }
 0x493   : > { %v20940_v0 = vpop.f32.mrb[52].mxu1  ;;  %16814 = vmatmul.mubr.msk.bf16.gmra.mrb[88].mxu0 %vm1257_vm2, %v11158_v37  ;;  %v5825_v37 = vor.u32 %v5824_v24, %v5821_v15  ;;  %v11162_v43 = vsel %vm11065_vm7, %v11159_v12, %v11161_v31  ;;  %v5839_v15 = vrot.slane %v5837_v8, 1  ;;  %v5842_v12 = vrot.slane %v5840_v40, 2 }
 0x494   : > { %21696 = vst [vmem:[#allocation34_spill] sm:$0xff] %v20940_v0  ;;  %v20943_v61 = vpop.f32.mrb[53].mxu1  ;;  %16817 = vmatprep.mubr.msk.bf16.mxu0 %vm1257_vm2, %v11160_v59  ;;  %v18505_v0 = vld [vmem:[%s18712_s11 + $0x1a8] sm:$0xff]   ;;  %v5834_v59 = vor.u32 %v5833_v54, %v5830_v63  ;;  %v5848_v54 = vrot.slane %v5846_v53, 1 }
 0x495   : > { %21697 = vst [vmem:[#allocation37_spill] sm:$0xff] %v20943_v61  ;;  %v20946_v28 = vpop.f32.mrb[54].mxu1  ;;  %v11163_v61 = vrot.slane %v18505_v0, 3  ;;  %v5826_v41 = vsel %vm5368_vm3, %v5816_v2, %v5825_v37  ;;  %v5843_v2 = vor.u32 %v5842_v12, %v5839_v15 }
 0x496   : > { %21698 = vst [vmem:[#allocation35_spill] sm:$0xff] %v20946_v28  ;;  %v20949_v11 = vpop.f32.mrb[55].mxu1  ;;  %v5835_v63 = vsel %vm5368_vm3, %v5825_v37, %v5834_v59  ;;  %v5867_v37 = vshll.u32 %v20609_v16, 16 }
 0x497   : > { %21699 = vst [vmem:[#allocation36_spill] sm:$0xff] %v20949_v11  ;;  %v11164_v42 = vsel %vm11065_vm7, %v11161_v31, %v11163_v61  ;;  %v5851_v31 = vrot.slane %v5849_v48, 2 }
 0x498   : > { %16266 = vmatmul.mubr.msk.bf16.gmra.mrb[92].mxu1 %vm1257_vm2, %v5808_v38 }
 0x499   : > { %16269 = vmatprep.mubr.msk.bf16.mxu1 %vm1257_vm2, %v5817_v14  ;;  %v11165_v14 = vrot.slane %v18506_v18, 3  ;;  %v5852_v40 = vor.u32 %v5851_v31, %v5848_v54  ;;  %v18509_v31 = vld [vmem:[%s18712_s11 + $0x1c8] sm:$0xff]  }
 0x49b   : > { %v20962_v26 = vpop.f32.mrb[56].mxu1  ;;  %16818 = vmatmul.mubr.msk.bf16.gmra.mrb[92].mxu0 %vm1257_vm2, %v11162_v43  ;;  %v5855_v43 = vshrl.u32 %v20604_v62, 16  ;;  %v11166_v8 = vsel %vm11065_vm7, %v11163_v61, %v11165_v14  ;;  %v5844_v61 = vsel %vm5368_vm3, %v5834_v59, %v5843_v2 }
 0x49c   : > { %21700 = vst [vmem:[#allocation38_spill] sm:$0xff] %v20962_v26  ;;  %v20965_v0 = vpop.f32.mrb[57].mxu1  ;;  %16821 = vmatprep.mubr.msk.bf16.mxu0 %vm1257_vm2, %v11164_v42  ;;  %v18507_v26 = vld [vmem:[%s18712_s11 + $0x1b8] sm:$0xff]   ;;  %v5864_v42 = vshrl.u32 %v20609_v16, 16  ;;  %v18508_v16 = vld [vmem:[%s18712_s11 + $0x1c0] sm:$0xff]  }
 0x49d   : > { %21701 = vst [vmem:[#allocation39_spill] sm:$0xff] %v20965_v0  ;;  %v20968_v38 = vpop.f32.mrb[58].mxu1  ;;  %v11167_v0 = vrot.slane %v18507_v26, 3  ;;  %v5857_v26 = vrot.slane %v5855_v43, 1  ;;  %v11169_v12 = vrot.slane %v18508_v16, 3  ;;  %v5882_v16 = vshrl.u32 %v20627_v36, 16 }
 0x49e   : > { %21702 = vst [vmem:[#allocation40_spill] sm:$0xff] %v20968_v38  ;;  %v20971_v24 = vpop.f32.mrb[59].mxu1  ;;  %v5858_v38 = vshll.u32 %v20604_v62, 16  ;;  %v5866_v54 = vrot.slane %v5864_v42, 1 }
 0x49f   : > { %21703 = vst [vmem:[#allocation6_spill] sm:$0xff] %v20971_v24  ;;  %v11168_v48 = vsel %vm11065_vm7, %v11165_v14, %v11167_v0  ;;  %v5869_v14 = vrot.slane %v5867_v37, 2  ;;  %v11170_v59 = vsel %vm11065_vm7, %v11167_v0, %v11169_v12  ;;  %v5894_v0 = vshll.u32 %v20648_v35, 16 }
 0x4a0   : > { %16270 = vmatmul.mubr.msk.bf16.gmra.mrb[96].mxu1 %vm1257_vm2, %v5826_v41  ;;  %v5860_v62 = vrot.slane %v5858_v38, 2  ;;  %v11171_v38 = vrot.slane %v18509_v31, 3 }
 0x4a1   : > { %16273 = vmatprep.mubr.msk.bf16.mxu1 %vm1257_vm2, %v5835_v63  ;;  %v5853_v63 = vsel %vm5368_vm3, %v5843_v2, %v5852_v40  ;;  %v5885_v2 = vshll.u32 %v20627_v36, 16  ;;  %v5900_v36 = vshrl.u32 %v20653_v34, 16 }
 0x4a2   : > { %v5861_v43 = vor.u32 %v5860_v62, %v5857_v26  ;;  %v11172_v37 = vsel %vm11065_vm7, %v11169_v12, %v11171_v38  ;;  %v5909_v12 = vshrl.u32 %v20674_v10, 16 }
 0x4a3   : > { %v20984_v53 = vpop.f32.mrb[60].mxu1  ;;  %16822 = vmatmul.mubr.msk.bf16.gmra.mrb[96].mxu0 %vm1257_vm2, %v11166_v8  ;;  %v5873_v8 = vshrl.u32 %v20622_v4, 16 }
 0x4a4   : > { %21704 = vst [vmem:[#allocation5_spill] sm:$0xff] %v20984_v53  ;;  %v20987_v18 = vpop.f32.mrb[61].mxu1  ;;  %16825 = vmatprep.mubr.msk.bf16.mxu0 %vm1257_vm2, %v11168_v48  ;;  %v5870_v48 = vor.u32 %v5869_v14, %v5866_v54  ;;  %v5862_v26 = vsel %vm5368_vm3, %v5852_v40, %v5861_v43  ;;  %v5903_v14 = vshll.u32 %v20653_v34, 16  ;;  %v5912_v40 = vshll.u32 %v20674_v10, 16  ;;  %v21044_v53 = vld [vmem:[%s18712_s11 + $0x200] sm:$0xff]  }
 0x4a5   : > { %21705 = vst [vmem:[#allocation7_spill] sm:$0xff] %v20987_v18  ;;  %v20990_v41 = vpop.f32.mrb[62].mxu1  ;;  %v5896_v18 = vrot.slane %v5894_v0, 2  ;;  %v5902_v10 = vrot.slane %v5900_v36, 1  ;;  %v18513_v36 = vld [vmem:[%s18712_s11 + $0x1e8] sm:$0xff]  }
 0x4a6   : > { %21706 = vst [vmem:[#allocation41_spill] sm:$0xff] %v20990_v41  ;;  %v20993_v15 = vpop.f32.mrb[63].mxu1  ;;  %v5876_v41 = vshll.u32 %v20622_v4, 16 }
 0x4a7   : > { %21707 = vst [vmem:[#allocation42_spill] sm:$0xff] %v20993_v15 }
 0x4a8   : > { %16274 = vmatmul.mubr.msk.bf16.gmra.mrb[100].mxu1 %vm1257_vm2, %v5844_v61  ;;  %v5875_v61 = vrot.slane %v5873_v8, 1  ;;  %v5878_v4 = vrot.slane %v5876_v41, 2  ;;  %v18510_v41 = vld [vmem:[%s18712_s11 + $0x1d0] sm:$0xff]  }
 0x4a9   : > { %16277 = vmatprep.mubr.msk.bf16.mxu1 %vm1257_vm2, %v5853_v63  ;;  %v5891_v63 = vshrl.u32 %v20648_v35, 16  ;;  %v11173_v8 = vrot.slane %v18510_v41, 3  ;;  %v5871_v35 = vsel %vm5368_vm3, %v5861_v43, %v5870_v48  ;;  %v5914_v41 = vrot.slane %v5912_v40, 2  ;;  %v18514_v40 = vld [vmem:[%s18712_s11 + $0x1f0] sm:$0xff]  }
 0x4aa   : > { %v5879_v34 = vor.u32 %v5878_v4, %v5875_v61  ;;  %v5927_v61 = vshrl.u32 %v20700_v17, 16  ;;  %v5930_v4 = vshll.u32 %v20700_v17, 16 }
 0x4ab   : > { %v21006_v42 = vpop.f32.mrb[64].mxu1  ;;  %16826 = vmatmul.mubr.msk.bf16.gmra.mrb[100].mxu0 %vm1257_vm2, %v11170_v59  ;;  %v5887_v59 = vrot.slane %v5885_v2, 2  ;;  %v5893_v15 = vrot.slane %v5891_v63, 1  ;;  %v11174_v43 = vsel %vm11065_vm7, %v11171_v38, %v11173_v8  ;;  %v5918_v2 = vshrl.u32 %v20679_v29, 16  ;;  %v18512_v63 = vld [vmem:[%s18712_s11 + $0x1e0] sm:$0xff]  }
 0x4ac   : > { %21708 = vst [vmem:[#allocation43_spill] sm:$0xff] %v21006_v42  ;;  %v21010_v62 = vpop.f32.mrb[65].mxu1  ;;  %16829 = vmatprep.mubr.msk.bf16.mxu0 %vm1257_vm2, %v11172_v37  ;;  %v18511_v42 = vld [vmem:[%s18712_s11 + $0x1d8] sm:$0xff]   ;;  %v5905_v37 = vrot.slane %v5903_v14, 2  ;;  %v11177_v0 = vrot.slane %v18512_v63, 3  ;;  %v11179_v14 = vrot.slane %v18513_v36, 3 }
 0x4ad   : > { %21709 = vst [vmem:[#allocation44_spill] sm:$0xff] %v21010_v62  ;;  %v21015_v54 = vpop.f32.mrb[66].mxu1  ;;  %v5884_v62 = vrot.slane %v5882_v16, 1  ;;  %v11181_v38 = vrot.slane %v18514_v40, 3  ;;  %v21595_v63 = vrot.slane %v21044_v53, 3  ;;  %v5920_v36 = vrot.slane %v5918_v2, 1 }
 0x4ae   : > { %21710 = vst [vmem:[#allocation45_spill] sm:$0xff] %v21015_v54  ;;  %v21021_v31 = vpop.f32.mrb[67].mxu1  ;;  %v11175_v54 = vrot.slane %v18511_v42, 3  ;;  %v5921_v42 = vshll.u32 %v20679_v29, 16  ;;  %v18515_v29 = vld [vmem:[%s18712_s11 + $0x1f8] sm:$0xff]   ;;  %v5932_v40 = vrot.slane %v5930_v4, 2 }
 0x4af   : > { %21711 = vst [vmem:[#allocation46_spill] sm:$0xff] %v21021_v31  ;;  %v5911_v31 = vrot.slane %v5909_v12, 1  ;;  %v5888_v16 = vor.u32 %v5887_v59, %v5884_v62  ;;  %v5897_v12 = vor.u32 %v5896_v18, %v5893_v15  ;;  %v5880_v62 = vsel %vm5368_vm3, %v5870_v48, %v5879_v34  ;;  %v21050_v48 = vld [vmem:[%s21539_s2] ss:$0 sm:$0xff] }
 0x4b0   : > { %16278 = vmatmul.mubr.msk.bf16.gmra.mrb[104].mxu1 %vm1257_vm2, %v5862_v26  ;;  %v11176_v26 = vsel %vm11065_vm7, %v11173_v8, %v11175_v54  ;;  %v11183_v59 = vrot.slane %v18515_v29, 3  ;;  %v5923_v18 = vrot.slane %v5921_v42, 2  ;;  %v5929_v15 = vrot.slane %v5927_v61, 1 }
 0x4b1   : > { %16281 = vmatprep.mubr.msk.bf16.mxu1 %vm1257_vm2, %v5871_v35  ;;  %v5906_v35 = vor.u32 %v5905_v37, %v5902_v10  ;;  %v5915_v8 = vor.u32 %v5914_v41, %v5911_v31  ;;  %v5889_v17 = vsel %vm5368_vm3, %v5879_v34, %v5888_v16  ;;  %v11178_v31 = vsel %vm11065_vm7, %v11175_v54, %v11177_v0 }
 0x4b2   : > { %v11180_v34 = vsel %vm11065_vm7, %v11177_v0, %v11179_v14  ;;  %v5898_v10 = vsel %vm5368_vm3, %v5888_v16, %v5897_v12  ;;  %v21057_v37 = vsel %vm11065_vm7, %v11179_v14, %v11181_v38  ;;  %v5924_v4 = vor.u32 %v5923_v18, %v5920_v36  ;;  %v18517_v0 = vld [vmem:[%s18712_s11 + $0x208] sm:$0xff]  }
 0x4b3   : > { %16830 = vmatmul.mubr.msk.bf16.gmra.mrb[104].mxu0 %vm1257_vm2, %v11174_v43  ;;  %v5907_v42 = vsel %vm5368_vm3, %v5897_v12, %v5906_v35  ;;  %v21066_v61 = vsel %vm5368_vm3, %v5906_v35, %v5915_v8  ;;  %v11187_v14 = vrot.slane %v18517_v0, 3  ;;  %v21078_v35 = vor.u32 %v5932_v40, %v5929_v15 }
 0x4b4   : > { %16833 = vmatprep.mubr.msk.bf16.mxu0 %vm1257_vm2, %v11176_v26  ;;  %v21063_v26 = vsel %vm11065_vm7, %v11181_v38, %v11183_v59  ;;  %v5945_v36 = vshrl.u32 %v20726_v7, 16  ;;  %v5948_v40 = vshll.u32 %v20726_v7, 16 }
 0x4b6   : > { %v16727_v43 = vpop.f32.mrb[0].mxu0 }
 0x4b7   : > { %v16863_v41 = vadd.f32 %v16727_v43, %v20630_v46  ;;  %v11444_v2 = vpop.f32.mrb[1].mxu0  ;;  %v21073_v46 = vsel %vm11065_vm7, %v11183_v59, %v21595_v63  ;;  %v5939_v59 = vshll.u32 %v20705_v50, 16 }
 0x4b8   : > { %16282 = vmatmul.mubr.msk.bf16.gmra.mrb[108].mxu1 %vm1257_vm2, %v5880_v62  ;;  %v16864_v54 = vadd.f32 %v11444_v2, %v20633_v56  ;;  %v16728_v16 = vpop.f32.mrb[2].mxu0  ;;  %v5936_v56 = vshrl.u32 %v20705_v50, 16 }
 0x4b9   : > { %16285 = vmatprep.mubr.msk.bf16.mxu1 %vm1257_vm2, %v5889_v17  ;;  %v12132_v12 = vadd.f32 %v16863_v41, %v21050_v48  ;;  %v16865_v38 = vadd.f32 %v16728_v16, %v20636_v9  ;;  %v11447_v62 = vpop.f32.mrb[3].mxu0  ;;  %v21092_v9 = vld [vmem:[%s18712_s11 + $0x210] sm:$0xff]   ;;  %v5925_v41 = vsel %vm5368_vm3, %v5915_v8, %v5924_v4  ;;  %v5941_v0 = vrot.slane %v5939_v59, 2 }
 0x4ba   : > { %v12130_v29 = vadd.f32 %v16864_v54, %v21050_v48  ;;  %v16866_v17 = vadd.f32 %v11447_v62, %v20639_v30  ;;  %v5938_v54 = vrot.slane %v5936_v56, 1  ;;  %v5950_v8 = vrot.slane %v5948_v40, 2 }
 0x4bb   : > { %v12404_v18 = vmul.f32 0.2, %v12132_v12  ;;  %v12133_v43 = vadd.f32 %v16865_v38, %v21050_v48  ;;  %16834 = vmatmul.mubr.msk.bf16.gmra.mrb[108].mxu0 %vm1257_vm2, %v11178_v31  ;;  %vm12268_vm8 = vcmp.ge.f32.partialorder %v12132_v12, 0.0  ;;  %v5947_v38 = vrot.slane %v5945_v36, 1 }
 0x4bc   : > { %v12402_v30 = vmul.f32 0.2, %v12130_v29  ;;  %v12131_v50 = vadd.f32 %v16866_v17, %v21050_v48  ;;  %16837 = vmatprep.mubr.msk.bf16.mxu0 %vm1257_vm2, %v11180_v34  ;;  %vm12266_vm9 = vcmp.ge.f32.partialorder %v12130_v29, 0.0 }
 0x4bd   : > { %vm12269_vm10 = vcmp.ge.f32.partialorder %v12133_v43, 0.0  ;;  %v12405_v2 = vmul.f32 0.2, %v12133_v43  ;;  %v12540_v7 = vsel %vm12268_vm8, %v12132_v12, %v12404_v18 }
 0x4be   : > { %vm12267_vm11 = vcmp.ge.f32.partialorder %v12131_v50, 0.0  ;;  %v12403_v31 = vmul.f32 0.2, %v12131_v50  ;;  %v16731_v16 = vpop.f32.mrb[4].mxu0  ;;  %v12538_v34 = vsel %vm12266_vm9, %v12130_v29, %v12402_v30  ;;  %v21117_v29 = vsel %vm5368_vm3, %v5924_v4, %v21078_v35 }
 0x4bf   : > { %v12541_v62 = vsel %vm12269_vm10, %v12133_v43, %v12405_v2  ;;  %v16867_v17 = vadd.f32 %v16731_v16, %v20656_v45  ;;  %v11460_v15 = vpop.f32.mrb[5].mxu0  ;;  %v21712_v45 = vrot.slane %v21044_v53, 3  ;;  %v5957_v2 = vshll.u32 %v20731_v39, 16 }
 0x4c0   : > { %16286 = vmatmul.mubr.msk.bf16.gmra.mrb[112].mxu1 %vm1257_vm2, %v5898_v10  ;;  %v14599_v63 = vpack.c.bf16 %v12541_v62, %v12540_v7  ;;  %v12539_v56 = vsel %vm12267_vm11, %v12131_v50, %v12403_v31  ;;  %v16868_v24 = vadd.f32 %v11460_v15, %v20659_v57  ;;  %v16732_v11 = vpop.f32.mrb[6].mxu0  ;;  %v21138_v15 = vld [vmem:[%s18712_s11 + $0x220] sm:$0xff]   ;;  %v5954_v50 = vshrl.u32 %v20731_v39, 16 }
 0x4c1   : > { %16289 = vmatprep.mubr.msk.bf16.mxu1 %vm1257_vm2, %v5907_v42  ;;  %v14594_v28 = vpack.c.bf16 %v12539_v56, %v12538_v34  ;;  %v12136_v10 = vadd.f32 %v16867_v17, %v21050_v48  ;;  %v16869_v12 = vadd.f32 %v16732_v11, %v20662_v25  ;;  %v11463_v59 = vpop.f32.mrb[7].mxu0  ;;  %v11188_v36 = vsel %vm11065_vm7, %v21712_v45, %v11187_v14 }
 0x4c2   : > { %14931 = vst [vmem:[%s21110_s18 + $0x8] sm:$0xff] %v14599_v63   ;;  %v12134_v42 = vadd.f32 %v16868_v24, %v21050_v48  ;;  %v16870_v57 = vadd.f32 %v11463_v59, %v20665_v51  ;;  %v21713_v25 = vrot.slane %v21092_v9, 3  ;;  %v5942_v24 = vor.u32 %v5941_v0, %v5938_v54  ;;  %v21129_v63 = vld [vmem:[%s18712_s11 + $0x218] sm:$0xff]  }
 0x4c3   : > { %14595 = vst [vmem:[%s21110_s18] sm:$0xff] %v14594_v28   ;;  %v12408_v53 = vmul.f32 0.2, %v12136_v10  ;;  %v12137_v18 = vadd.f32 %v16869_v12, %v21050_v48  ;;  %16838 = vmatmul.mubr.msk.bf16.gmra.mrb[112].mxu0 %vm1257_vm2, %v21057_v37  ;;  %v11191_v51 = vrot.slane %v21129_v63, 3  ;;  %vm12272_vm12 = vcmp.ge.f32.partialorder %v12136_v10, 0.0 }
 0x4c4   : > { %v21122_v11 = vsel %vm11065_vm7, %v11187_v14, %v21713_v25  ;;  %v12406_v4 = vmul.f32 0.2, %v12134_v42  ;;  %v12135_v43 = vadd.f32 %v16870_v57, %v21050_v48  ;;  %16841 = vmatprep.mubr.msk.bf16.mxu0 %vm1257_vm2, %v21063_v26  ;;  %v21135_v14 = vor.u32 %v5950_v8, %v5947_v38 }
 0x4c5   : > { %vm12270_vm13 = vcmp.ge.f32.partialorder %v12134_v42, 0.0  ;;  %vm12273_vm14 = vcmp.ge.f32.partialorder %v12137_v18, 0.0  ;;  %v12409_v28 = vmul.f32 0.2, %v12137_v18  ;;  %v11193_v37 = vrot.slane %v21138_v15, 3 }
 0x4c6   : > { %vm12271_vm15 = vcmp.ge.f32.partialorder %v12135_v43, 0.0  ;;  %v12407_v40 = vmul.f32 0.2, %v12135_v43  ;;  %v16735_v30 = vpop.f32.mrb[8].mxu0  ;;  %v12544_v26 = vsel %vm12272_vm12, %v12136_v10, %v12408_v53  ;;  %v5943_v0 = vsel %vm5368_vm3, %v21078_v35, %v5942_v24 }
 0x4c7   : > { %v12545_v54 = vsel %vm12273_vm14, %v12137_v18, %v12409_v28  ;;  %v16871_v31 = vadd.f32 %v16735_v30, %v20682_v13  ;;  %v11476_v16 = vpop.f32.mrb[9].mxu0  ;;  %v12542_v38 = vsel %vm12270_vm13, %v12134_v42, %v12406_v4  ;;  %v5963_v56 = vshrl.u32 %v20752_v47, 16 }
 0x4c8   : > { %16290 = vmatmul.mubr.msk.bf16.gmra.mrb[116].mxu1 %vm1257_vm2, %v21066_v61  ;;  %v14609_v61 = vpack.c.bf16 %v12545_v54, %v12544_v26  ;;  %v12543_v7 = vsel %vm12271_vm15, %v12135_v43, %v12407_v40  ;;  %v16872_v62 = vadd.f32 %v11476_v16, %v20685_v19  ;;  %v16736_v39 = vpop.f32.mrb[10].mxu0  ;;  %v5956_v10 = vrot.slane %v5954_v50, 1  ;;  %v21717_v54 = vld [vmem:[#allocation9_spill] sm:$0xff] }
 0x4c9   : > { %16293 = vmatprep.mubr.msk.bf16.mxu1 %vm1257_vm2, %v5925_v41  ;;  %v14604_v17 = vpack.c.bf16 %v12543_v7, %v12542_v38  ;;  %v12140_v8 = vadd.f32 %v16871_v31, %v21050_v48  ;;  %v16873_v34 = vadd.f32 %v16736_v39, %v20688_v20  ;;  %v11479_v13 = vpop.f32.mrb[11].mxu0  ;;  %v5959_v12 = vrot.slane %v5957_v2, 2  ;;  %v21718_v7 = vld [vmem:[#allocation10_spill] sm:$0xff] }
 0x4ca   : > { %14933 = vst [vmem:[%s21110_s18 + $0x18] sm:$0xff] %v14609_v61   ;;  %v12138_v41 = vadd.f32 %v16872_v62, %v21050_v48  ;;  %v16874_v35 = vadd.f32 %v11479_v13, %v20691_v32  ;;  %v21714_v20 = vmov %v21713_v25  ;;  %v5952_v42 = vsel %vm5368_vm3, %v5942_v24, %v21135_v14  ;;  %v21715_v24 = vld [vmem:[#allocation15_spill] sm:$0xff] }
 0x4cb   : > { %14932 = vst [vmem:[%s21110_s18 + $0x10] sm:$0xff] %v14604_v17   ;;  %v12412_v59 = vmul.f32 0.2, %v12140_v8  ;;  %v12141_v19 = vadd.f32 %v16873_v34, %v21050_v48  ;;  %16842 = vmatmul.mubr.msk.bf16.gmra.mrb[116].mxu0 %vm1257_vm2, %v21073_v46  ;;  %v11192_v45 = vsel %vm11065_vm7, %v21714_v20, %v11191_v51  ;;  %vm12276_vm0 = vcmp.ge.f32.partialorder %v12140_v8, 0.0 }
 0x4cc   : > { %v12410_v32 = vmul.f32 0.2, %v12138_v41  ;;  %v12139_v57 = vadd.f32 %v16874_v35, %v21050_v48  ;;  %16845 = vmatprep.mubr.msk.bf16.mxu0 %vm1257_vm2, %v11188_v36  ;;  %v5966_v25 = vshll.u32 %v20752_v47, 16  ;;  %vm12274_vm1 = vcmp.ge.f32.partialorder %v12138_v41, 0.0  ;;  %v21716_v36 = vld [vmem:[#allocation8_spill] sm:$0xff] }
 0x4cd   : > { %vm12277_vm4 = vcmp.ge.f32.partialorder %v12141_v19, 0.0  ;;  %v12413_v46 = vmul.f32 0.2, %v12141_v19  ;;  %v5965_v53 = vrot.slane %v5963_v56, 1  ;;  %v21174_v4 = vor.u32 %v5959_v12, %v5956_v10  ;;  %v21193_v56 = vld [vmem:[%s18712_s11 + $0x228] sm:$0xff]  }
 0x4ce   : > { %vm12275_vm5 = vcmp.ge.f32.partialorder %v12139_v57, 0.0  ;;  %v12411_v18 = vmul.f32 0.2, %v12139_v57  ;;  %v16739_v9 = vpop.f32.mrb[12].mxu0  ;;  %v5972_v43 = vshrl.u32 %v21715_v24, 16  ;;  %v12548_v28 = vsel %vm12276_vm0, %v12140_v8, %v12412_v59  ;;  %v21719_v8 = vld [vmem:[#allocation13_spill] sm:$0xff] }
 0x4cf   : > { %v12549_v40 = vsel %vm12277_vm4, %v12141_v19, %v12413_v46  ;;  %v16875_v30 = vadd.f32 %v16739_v9, %v21716_v36  ;;  %v11492_v47 = vpop.f32.mrb[13].mxu0  ;;  %v5975_v50 = vshll.u32 %v21715_v24, 16  ;;  %v12546_v2 = vsel %vm12274_vm1, %v12138_v41, %v12410_v32  ;;  %v21720_v24 = vld [vmem:[#allocation11_spill] sm:$0xff] }
 0x4d0   : > { %16294 = vmatmul.mubr.msk.bf16.gmra.mrb[120].mxu1 %vm1257_vm2, %v21117_v29  ;;  %v14619_v26 = vpack.c.bf16 %v12549_v40, %v12548_v28  ;;  %v12547_v29 = vsel %vm12275_vm5, %v12139_v57, %v12411_v18  ;;  %v16876_v31 = vadd.f32 %v11492_v47, %v21717_v54  ;;  %v16740_v16 = vpop.f32.mrb[14].mxu0  ;;  %v5968_v17 = vrot.slane %v5966_v25, 2  ;;  %v18522_v25 = vld [vmem:[%s18712_s11 + $0x230] ss:$0 sps:$4 sm:$0x33]  }
 0x4d1   : > { %16297 = vmatprep.mubr.msk.bf16.mxu1 %vm1257_vm2, %v5943_v0  ;;  %v14614_v38 = vpack.c.bf16 %v12547_v29, %v12546_v2  ;;  %v12144_v61 = vadd.f32 %v16875_v30, %v21050_v48  ;;  %v16877_v62 = vadd.f32 %v16740_v16, %v21718_v7  ;;  %v11495_v39 = vpop.f32.mrb[15].mxu0  ;;  %v11194_v13 = vsel %vm11065_vm7, %v11191_v51, %v11193_v37 }
 0x4d2   : > { %14935 = vst [vmem:[%s21110_s18 + $0x28] sm:$0xff] %v14619_v26   ;;  %v12142_v0 = vadd.f32 %v16876_v31, %v21050_v48  ;;  %v16878_v34 = vadd.f32 %v11495_v39, %v21719_v8  ;;  %v11195_v41 = vrot.slane %v21193_v56, 3  ;;  %v5974_v12 = vrot.slane %v5972_v43, 1  ;;  %v21722_v26 = vld [vmem:[#allocation14_spill] sm:$0xff] }
 0x4d3   : > { %14934 = vst [vmem:[%s21110_s18 + $0x20] sm:$0xff] %v14614_v38   ;;  %v12416_v35 = vmul.f32 0.2, %v12144_v61  ;;  %v12145_v10 = vadd.f32 %v16877_v62, %v21050_v48  ;;  %16846 = vmatmul.mubr.msk.bf16.gmra.mrb[120].mxu0 %vm1257_vm2, %v21122_v11  ;;  %v5977_v59 = vrot.slane %v5975_v50, 2  ;;  %vm12280_vm6 = vcmp.ge.f32.partialorder %v12144_v61, 0.0  ;;  %v21723_v38 = vld [vmem:[#allocation17_spill] sm:$0xff] }
 0x4d4   : > { %v12414_v19 = vmul.f32 0.2, %v12142_v0  ;;  %v12143_v63 = vadd.f32 %v16878_v34, %v21050_v48  ;;  %16849 = vmatprep.mubr.msk.bf16.mxu0 %vm1257_vm2, %v11192_v45  ;;  %v5961_v51 = vsel %vm5368_vm3, %v21135_v14, %v21174_v4  ;;  %vm12278_vm8 = vcmp.ge.f32.partialorder %v12142_v0, 0.0  ;;  %v18523_v62 = vld [vmem:[%s18712_s11 + $0x230] sm:$0xff]  }
 0x4d5   : > { %vm12281_vm9 = vcmp.ge.f32.partialorder %v12145_v10, 0.0  ;;  %v12417_v20 = vmul.f32 0.2, %v12145_v10  ;;  %v5969_v32 = vor.u32 %v5968_v17, %v5965_v53  ;;  %v5981_v46 = vshrl.u32 %v18522_v25, 16 }
 0x4d6   : > { %vm12279_vm10 = vcmp.ge.f32.partialorder %v12143_v63, 0.0  ;;  %v12415_v57 = vmul.f32 0.2, %v12143_v63  ;;  %v16743_v11 = vpop.f32.mrb[16].mxu0  ;;  %v5984_v18 = vshll.u32 %v18522_v25, 16  ;;  %v12552_v9 = vsel %vm12280_vm6, %v12144_v61, %v12416_v35 }
 0x4d7   : > { %v12553_v45 = vsel %vm12281_vm9, %v12145_v10, %v12417_v20  ;;  %v16879_v43 = vadd.f32 %v16743_v11, %v21720_v24  ;;  %v11508_v28 = vpop.f32.mrb[17].mxu0  ;;  %v5978_v14 = vor.u32 %v5977_v59, %v5974_v12  ;;  %v12550_v53 = vsel %vm12278_vm8, %v12142_v0, %v12414_v19  ;;  %v18524_v10 = vld [vmem:[%s18712_s11 + $0x238] sm:$0xff]   ;;  %v21724_v20 = vld [vmem:[#allocation16_spill] sm:$0xff] }
 0x4d8   : > { %16298 = vmatmul.mubr.msk.bf16.gmra.mrb[124].mxu1 %vm1257_vm2, %v5952_v42  ;;  %v14629_v40 = vpack.c.bf16 %v12553_v45, %v12552_v9  ;;  %v12551_v36 = vsel %vm12279_vm10, %v12143_v63, %v12415_v57  ;;  %v21721_v42 = vld [vmem:[#allocation12_spill] sm:$0xff]  ;;  %v16744_v47 = vpop.f32.mrb[18].mxu0  ;;  %v11196_v31 = vsel %vm11065_vm7, %v11193_v37, %v11195_v41  ;;  %v5970_v7 = vsel %vm5368_vm3, %v21174_v4, %v5969_v32  ;;  %v21725_v9 = vld [vmem:[#allocation18_spill] sm:$0xff] }
 0x4d9   : > { %16301 = vmatprep.mubr.msk.bf16.mxu1 %vm1257_vm2, %v5961_v51  ;;  %v16880_v30 = vadd.f32 %v11508_v28, %v21721_v42  ;;  %v14624_v50 = vpack.c.bf16 %v12551_v36, %v12550_v53  ;;  %v12148_v2 = vadd.f32 %v16879_v43, %v21050_v48  ;;  %v16881_v29 = vadd.f32 %v16744_v47, %v21722_v26  ;;  %v11511_v54 = vpop.f32.mrb[19].mxu0  ;;  %v21726_v43 = vld [vmem:[#allocation21_spill] sm:$0xff]  ;;  %v21727_v42 = vld [vmem:[#allocation19_spill] sm:$0xff]  ;;  %v18525_v26 = vld [vmem:[%s18712_s11 + $0x240] ss:$0 sps:$4 sm:$0x77]  }
 0x4da   : > { %14937 = vst [vmem:[%s21110_s18 + $0x38] sm:$0xff] %v14629_v40   ;;  %v16882_v61 = vadd.f32 %v11511_v54, %v21723_v38  ;;  %v11197_v39 = vrot.slane %v18523_v62, 3  ;;  %v5983_v15 = vrot.slane %v5981_v46, 1  ;;  %v5986_v8 = vrot.slane %v5984_v18, 2 }
 0x4db   : > { %v12146_v16 = vadd.f32 %v16880_v30, %v21050_v48  ;;  %14936 = vst [vmem:[%s21110_s18 + $0x30] sm:$0xff] %v14624_v50   ;;  %v12420_v17 = vmul.f32 0.2, %v12148_v2  ;;  %v12149_v0 = vadd.f32 %v16881_v29, %v21050_v48  ;;  %16850 = vmatmul.mubr.msk.bf16.gmra.mrb[124].mxu0 %vm1257_vm2, %v11194_v13  ;;  %vm12284_vm11 = vcmp.ge.f32.partialorder %v12148_v2, 0.0 }
 0x4dc   : > { %v12147_v34 = vadd.f32 %v16882_v61, %v21050_v48  ;;  %16853 = vmatprep.mubr.msk.bf16.mxu0 %vm1257_vm2, %v11196_v31  ;;  %v5979_v35 = vsel %vm5368_vm3, %v5969_v32, %v5978_v14  ;;  %v11199_v12 = vrot.slane %v18524_v10, 3  ;;  %v11198_v13 = vsel %vm11065_vm7, %v11195_v41, %v11197_v39 }
 0x4dd   : > { %v12418_v37 = vmul.f32 0.2, %v12146_v16  ;;  %vm12282_vm12 = vcmp.ge.f32.partialorder %v12146_v16, 0.0  ;;  %vm12285_vm13 = vcmp.ge.f32.partialorder %v12149_v0, 0.0  ;;  %v12421_v4 = vmul.f32 0.2, %v12149_v0 }
 0x4de   : > { %vm12283_vm14 = vcmp.ge.f32.partialorder %v12147_v34, 0.0  ;;  %v12419_v59 = vmul.f32 0.2, %v12147_v34  ;;  %v16747_v19 = vpop.f32.mrb[20].mxu0  ;;  %v12556_v63 = vsel %vm12284_vm11, %v12148_v2, %v12420_v17  ;;  %v5987_v11 = vor.u32 %v5986_v8, %v5983_v15 }
 0x4df   : > { %v12557_v51 = vsel %vm12285_vm13, %v12149_v0, %v12421_v4  ;;  %v16883_v57 = vadd.f32 %v16747_v19, %v21724_v20  ;;  %v11524_v32 = vpop.f32.mrb[21].mxu0  ;;  %v12554_v25 = vsel %vm12282_vm12, %v12146_v16, %v12418_v37  ;;  %v11200_v40 = vsel %vm11065_vm7, %v11197_v39, %v11199_v12 }
 0x4e0   : > { %16302 = vmatmul.mubr.msk.bf16.gmra.mrb[128].mxu1 %vm1257_vm2, %v5970_v7  ;;  %v14639_v46 = vpack.c.bf16 %v12557_v51, %v12556_v63  ;;  %v12555_v18 = vsel %vm12283_vm14, %v12147_v34, %v12419_v59  ;;  %v16884_v45 = vadd.f32 %v11524_v32, %v21725_v9  ;;  %v16748_v56 = vpop.f32.mrb[22].mxu0  ;;  %v5988_v2 = vsel %vm5368_vm3, %v5978_v14, %v5987_v11  ;;  %v21728_v14 = vld [vmem:[#allocation20_spill] sm:$0xff]  ;;  %v21729_v34 = vld [vmem:[#allocation22_spill] sm:$0xff] }
 0x4e1   : > { %16305 = vmatprep.mubr.msk.bf16.mxu1 %vm1257_vm2, %v5979_v35  ;;  %v14634_v24 = vpack.c.bf16 %v12555_v18, %v12554_v25  ;;  %v12152_v41 = vadd.f32 %v16883_v57, %v21050_v48  ;;  %v16885_v28 = vadd.f32 %v16748_v56, %v21726_v43  ;;  %v11527_v53 = vpop.f32.mrb[23].mxu0  ;;  %v11201_v29 = vrot.slane %v18525_v26, 3 }
 0x4e2   : > { %14939 = vst [vmem:[%s21110_s18 + $0x48] sm:$0xff] %v14639_v46   ;;  %v12150_v36 = vadd.f32 %v16884_v45, %v21050_v48  ;;  %v16886_v30 = vadd.f32 %v11527_v53, %v21727_v42 }
 0x4e3   : > { %14938 = vst [vmem:[%s21110_s18 + $0x40] sm:$0xff] %v14634_v24   ;;  %v12424_v47 = vmul.f32 0.2, %v12152_v41  ;;  %v12153_v50 = vadd.f32 %v16885_v28, %v21050_v48  ;;  %16854 = vmatmul.mubr.msk.bf16.gmra.mrb[128].mxu0 %vm1257_vm2, %v11198_v13  ;;  %vm12288_vm15 = vcmp.ge.f32.partialorder %v12152_v41, 0.0  ;;  %v11202_v0 = vsel %vm11065_vm7, %v11199_v12, %v11201_v29 }
 0x4e4   : > { %v12422_v54 = vmul.f32 0.2, %v12150_v36  ;;  %v12151_v31 = vadd.f32 %v16886_v30, %v21050_v48  ;;  %16857 = vmatprep.mubr.msk.bf16.mxu0 %vm1257_vm2, %v11200_v40  ;;  %vm12286_vm0 = vcmp.ge.f32.partialorder %v12150_v36, 0.0 }
 0x4e5   : > { %vm12289_vm1 = vcmp.ge.f32.partialorder %v12153_v50, 0.0  ;;  %v12425_v16 = vmul.f32 0.2, %v12153_v50  ;;  %v12560_v7 = vsel %vm12288_vm15, %v12152_v41, %v12424_v47  ;;  %v21730_v41 = vld [vmem:[#allocation25_spill] sm:$0xff] }
 0x4e6   : > { %vm12287_vm4 = vcmp.ge.f32.partialorder %v12151_v31, 0.0  ;;  %v12423_v38 = vmul.f32 0.2, %v12151_v31  ;;  %v16751_v61 = vpop.f32.mrb[24].mxu0  ;;  %v12558_v15 = vsel %vm12286_vm0, %v12150_v36, %v12422_v54 }
 0x4e7   : > { %v12561_v62 = vsel %vm12289_vm1, %v12153_v50, %v12425_v16  ;;  %v16887_v39 = vadd.f32 %v16751_v61, %v21728_v14  ;;  %v11540_v17 = vpop.f32.mrb[25].mxu0 }
 0x4e8   : > { %16306 = vmatmul.mubr.msk.bf16.gmra.mrb[132].mxu1 %vm1257_vm2, %v5988_v2  ;;  %v14649_v8 = vpack.c.bf16 %v12561_v62, %v12560_v7  ;;  %v12559_v37 = vsel %vm12287_vm4, %v12151_v31, %v12423_v38  ;;  %v16888_v35 = vadd.f32 %v11540_v17, %v21729_v34  ;;  %v16752_v4 = vpop.f32.mrb[26].mxu0  ;;  %v21731_v38 = vld [vmem:[#allocation23_spill] sm:$0xff] }
 0x4e9   : > { %v14644_v10 = vpack.c.bf16 %v12559_v37, %v12558_v15  ;;  %v12156_v59 = vadd.f32 %v16887_v39, %v21050_v48  ;;  %v16889_v19 = vadd.f32 %v16752_v4, %v20791_v23  ;;  %v11543_v13 = vpop.f32.mrb[27].mxu0  ;;  %v21732_v39 = vld [vmem:[#allocation24_spill] sm:$0xff] }
 0x4ea   : > { %14941 = vst [vmem:[%s21110_s18 + $0x58] sm:$0xff] %v14649_v8   ;;  %v12154_v63 = vadd.f32 %v16888_v35, %v21050_v48  ;;  %v16890_v51 = vadd.f32 %v11543_v13, %v20794_v52 }
 0x4eb   : > { %14940 = vst [vmem:[%s21110_s18 + $0x50] sm:$0xff] %v14644_v10   ;;  %v12428_v20 = vmul.f32 0.2, %v12156_v59  ;;  %v12157_v12 = vadd.f32 %v16889_v19, %v21050_v48  ;;  %16858 = vmatmul.mubr.msk.bf16.gmra.mrb[132].mxu0 %vm1257_vm2, %v11202_v0  ;;  %vm12292_vm3 = vcmp.ge.f32.partialorder %v12156_v59, 0.0 }
 0x4ec   : > { %v12426_v57 = vmul.f32 0.2, %v12154_v63  ;;  %v12155_v32 = vadd.f32 %v16890_v51, %v21050_v48  ;;  %vm12290_vm7 = vcmp.ge.f32.partialorder %v12154_v63, 0.0 }
 0x4ed   : > { %vm12293_vm5 = vcmp.ge.f32.partialorder %v12157_v12, 0.0  ;;  %v12429_v11 = vmul.f32 0.2, %v12157_v12  ;;  %v12564_v46 = vsel %vm12292_vm3, %v12156_v59, %v12428_v20 }
 0x4ee   : > { %vm12291_vm6 = vcmp.ge.f32.partialorder %v12155_v32, 0.0  ;;  %v12427_v23 = vmul.f32 0.2, %v12155_v32  ;;  %v16755_v25 = vpop.f32.mrb[28].mxu0  ;;  %v12562_v45 = vsel %vm12290_vm7, %v12154_v63, %v12426_v57  ;;  %v21733_v57 = vld [vmem:[#allocation26_spill] sm:$0xff] }
 0x4ef   : > { %v12565_v52 = vsel %vm12293_vm5, %v12157_v12, %v12429_v11  ;;  %v16891_v18 = vadd.f32 %v16755_v25, %v20808_v27  ;;  %v11556_v9 = vpop.f32.mrb[29].mxu0 }
 0x4f0   : > { %v14659_v56 = vpack.c.bf16 %v12565_v52, %v12564_v46  ;;  %v12563_v24 = vsel %vm12291_vm6, %v12155_v32, %v12427_v23  ;;  %v16892_v43 = vadd.f32 %v11556_v9, %v21730_v41  ;;  %v16756_v28 = vpop.f32.mrb[30].mxu0  ;;  %v21734_v46 = vld [vmem:[#allocation29_spill] sm:$0xff] }
 0x4f1   : > { %v14654_v53 = vpack.c.bf16 %v12563_v24, %v12562_v45  ;;  %v12160_v40 = vadd.f32 %v16891_v18, %v21050_v48  ;;  %v16893_v36 = vadd.f32 %v16756_v28, %v20814_v1  ;;  %v11559_v42 = vpop.f32.mrb[31].mxu0 }
 0x4f2   : > { %14943 = vst [vmem:[%s21110_s18 + $0x68] sm:$0xff] %v14659_v56   ;;  %v12158_v30 = vadd.f32 %v16892_v43, %v21050_v48  ;;  %v16894_v47 = vadd.f32 %v11559_v42, %v20817_v6 }
 0x4f3   : > { %14942 = vst [vmem:[%s21110_s18 + $0x60] sm:$0xff] %v14654_v53   ;;  %v12432_v27 = vmul.f32 0.2, %v12160_v40  ;;  %v12161_v50 = vadd.f32 %v16893_v36, %v21050_v48  ;;  %vm12296_vm2 = vcmp.ge.f32.partialorder %v12160_v40, 0.0 }
 0x4f4   : > { %v12430_v2 = vmul.f32 0.2, %v12158_v30  ;;  %v12159_v26 = vadd.f32 %v16894_v47, %v21050_v48  ;;  %vm12294_vm8 = vcmp.ge.f32.partialorder %v12158_v30, 0.0 }
 0x4f5   : > { %vm12297_vm9 = vcmp.ge.f32.partialorder %v12161_v50, 0.0  ;;  %v12433_v29 = vmul.f32 0.2, %v12161_v50  ;;  %v12568_v31 = vsel %vm12296_vm2, %v12160_v40, %v12432_v27 }
 0x4f6   : > { %vm12295_vm10 = vcmp.ge.f32.partialorder %v12159_v26, 0.0  ;;  %v12431_v1 = vmul.f32 0.2, %v12159_v26  ;;  %v16759_v54 = vpop.f32.mrb[32].mxu0  ;;  %v12566_v7 = vsel %vm12294_vm8, %v12158_v30, %v12430_v2 }
 0x4f7   : > { %v12569_v16 = vsel %vm12297_vm9, %v12161_v50, %v12433_v29  ;;  %v16895_v6 = vadd.f32 %v16759_v54, %v21731_v38  ;;  %v11572_v61 = vpop.f32.mrb[33].mxu0  ;;  %v21735_v50 = vld [vmem:[#allocation27_spill] sm:$0xff]  ;;  %v21736_v54 = vld [vmem:[#allocation28_spill] sm:$0xff] }
 0x4f8   : > { %v14669_v62 = vpack.c.bf16 %v12569_v16, %v12568_v31  ;;  %v12567_v14 = vsel %vm12295_vm10, %v12159_v26, %v12431_v1  ;;  %v16896_v17 = vadd.f32 %v11572_v61, %v21732_v39  ;;  %v16760_v0 = vpop.f32.mrb[34].mxu0 }
 0x4f9   : > { %v14664_v15 = vpack.c.bf16 %v12567_v14, %v12566_v7  ;;  %v12164_v8 = vadd.f32 %v16895_v6, %v21050_v48  ;;  %v16897_v37 = vadd.f32 %v16760_v0, %v20836_v58  ;;  %v11575_v34 = vpop.f32.mrb[35].mxu0 }
 0x4fa   : > { %14945 = vst [vmem:[%s21110_s18 + $0x78] sm:$0xff] %v14669_v62   ;;  %v12162_v35 = vadd.f32 %v16896_v17, %v21050_v48  ;;  %v16898_v4 = vadd.f32 %v11575_v34, %v20839_v3 }
 0x4fb   : > { %14944 = vst [vmem:[%s21110_s18 + $0x70] sm:$0xff] %v14664_v15   ;;  %v12436_v10 = vmul.f32 0.2, %v12164_v8  ;;  %v12165_v59 = vadd.f32 %v16897_v37, %v21050_v48  ;;  %vm12300_vm11 = vcmp.ge.f32.partialorder %v12164_v8, 0.0 }
 0x4fc   : > { %v12434_v19 = vmul.f32 0.2, %v12162_v35  ;;  %v12163_v13 = vadd.f32 %v16898_v4, %v21050_v48  ;;  %vm12298_vm12 = vcmp.ge.f32.partialorder %v12162_v35, 0.0  ;;  %v21737_v4 = vld [vmem:[#allocation30_spill] sm:$0xff] }
 0x4fd   : > { %vm12301_vm13 = vcmp.ge.f32.partialorder %v12165_v59, 0.0  ;;  %v12437_v63 = vmul.f32 0.2, %v12165_v59  ;;  %v12572_v20 = vsel %vm12300_vm11, %v12164_v8, %v12436_v10 }
 0x4fe   : > { %vm12299_vm14 = vcmp.ge.f32.partialorder %v12163_v13, 0.0  ;;  %v12435_v58 = vmul.f32 0.2, %v12163_v13  ;;  %v16763_v51 = vpop.f32.mrb[36].mxu0  ;;  %v12570_v11 = vsel %vm12298_vm12, %v12162_v35, %v12434_v19 }
 0x4ff   : > { %v12573_v12 = vsel %vm12301_vm13, %v12165_v59, %v12437_v63  ;;  %v16899_v3 = vadd.f32 %v16763_v51, %v21733_v57  ;;  %v11588_v32 = vpop.f32.mrb[37].mxu0  ;;  %v21738_v63 = vld [vmem:[#allocation33_spill] sm:$0xff] }
 0x500   : > { %v14679_v23 = vpack.c.bf16 %v12573_v12, %v12572_v20  ;;  %v12571_v25 = vsel %vm12299_vm14, %v12163_v13, %v12435_v58  ;;  %v16900_v52 = vadd.f32 %v11588_v32, %v21734_v46  ;;  %v16764_v18 = vpop.f32.mrb[38].mxu0 }
 0x501   : > { %v14674_v9 = vpack.c.bf16 %v12571_v25, %v12570_v11  ;;  %v12168_v45 = vadd.f32 %v16899_v3, %v21050_v48  ;;  %v16901_v56 = vadd.f32 %v16764_v18, %v20858_v33  ;;  %v11591_v24 = vpop.f32.mrb[39].mxu0 }
 0x502   : > { %14947 = vst [vmem:[%s21110_s18 + $0x88] sm:$0xff] %v14679_v23   ;;  %v12166_v41 = vadd.f32 %v16900_v52, %v21050_v48  ;;  %v16902_v43 = vadd.f32 %v11591_v24, %v20861_v60  ;;  %v21739_v24 = vld [vmem:[#allocation31_spill] sm:$0xff] }
 0x503   : > { %14946 = vst [vmem:[%s21110_s18 + $0x80] sm:$0xff] %v14674_v9   ;;  %v12440_v28 = vmul.f32 0.2, %v12168_v45  ;;  %v12169_v53 = vadd.f32 %v16901_v56, %v21050_v48  ;;  %vm12304_vm15 = vcmp.ge.f32.partialorder %v12168_v45, 0.0 }
 0x504   : > { %v12438_v40 = vmul.f32 0.2, %v12166_v41  ;;  %v12167_v36 = vadd.f32 %v16902_v43, %v21050_v48  ;;  %vm12302_vm0 = vcmp.ge.f32.partialorder %v12166_v41, 0.0 }
 0x505   : > { %vm12305_vm1 = vcmp.ge.f32.partialorder %v12169_v53, 0.0  ;;  %v12441_v42 = vmul.f32 0.2, %v12169_v53  ;;  %v12576_v47 = vsel %vm12304_vm15, %v12168_v45, %v12440_v28 }
 0x506   : > { %vm12303_vm4 = vcmp.ge.f32.partialorder %v12167_v36, 0.0  ;;  %v12439_v33 = vmul.f32 0.2, %v12167_v36  ;;  %v16767_v30 = vpop.f32.mrb[40].mxu0  ;;  %v12574_v26 = vsel %vm12302_vm0, %v12166_v41, %v12438_v40  ;;  %v21740_v40 = vld [vmem:[#allocation32_spill] sm:$0xff] }
 0x507   : > { %v12577_v27 = vsel %vm12305_vm1, %v12169_v53, %v12441_v42  ;;  %v16903_v60 = vadd.f32 %v16767_v30, %v21735_v50  ;;  %v11604_v2 = vpop.f32.mrb[41].mxu0 }
 0x508   : > { %v14689_v29 = vpack.c.bf16 %v12577_v27, %v12576_v47  ;;  %v12575_v1 = vsel %vm12303_vm4, %v12167_v36, %v12439_v33  ;;  %v16904_v31 = vadd.f32 %v11604_v2, %v21736_v54  ;;  %v16768_v16 = vpop.f32.mrb[42].mxu0 }
 0x509   : > { %v14684_v38 = vpack.c.bf16 %v12575_v1, %v12574_v26  ;;  %v12172_v6 = vadd.f32 %v16903_v60, %v21050_v48  ;;  %v16905_v61 = vadd.f32 %v16768_v16, %v20880_v22  ;;  %v11607_v7 = vpop.f32.mrb[43].mxu0 }
 0x50a   : > { %14949 = vst [vmem:[%s21110_s18 + $0x98] sm:$0xff] %v14689_v29   ;;  %v12170_v62 = vadd.f32 %v16904_v31, %v21050_v48  ;;  %v16906_v14 = vadd.f32 %v11607_v7, %v20883_v44 }
 0x50b   : > { %14948 = vst [vmem:[%s21110_s18 + $0x90] sm:$0xff] %v14684_v38   ;;  %v12444_v39 = vmul.f32 0.2, %v12172_v6  ;;  %v12173_v17 = vadd.f32 %v16905_v61, %v21050_v48  ;;  %vm12308_vm3 = vcmp.ge.f32.partialorder %v12172_v6, 0.0 }
 0x50c   : > { %v12442_v0 = vmul.f32 0.2, %v12170_v62  ;;  %v12171_v15 = vadd.f32 %v16906_v14, %v21050_v48  ;;  %vm12306_vm7 = vcmp.ge.f32.partialorder %v12170_v62, 0.0 }
 0x50d   : > { %vm12309_vm5 = vcmp.ge.f32.partialorder %v12173_v17, 0.0  ;;  %v12445_v8 = vmul.f32 0.2, %v12173_v17  ;;  %v12580_v34 = vsel %vm12308_vm3, %v12172_v6, %v12444_v39  ;;  %v21741_v6 = vld [vmem:[#allocation34_spill] sm:$0xff]  ;;  %v21742_v39 = vld [vmem:[#allocation37_spill] sm:$0xff] }
 0x50e   : > { %vm12307_vm6 = vcmp.ge.f32.partialorder %v12171_v15, 0.0  ;;  %v12443_v22 = vmul.f32 0.2, %v12171_v15  ;;  %v16771_v37 = vpop.f32.mrb[44].mxu0  ;;  %v12578_v59 = vsel %vm12306_vm7, %v12170_v62, %v12442_v0 }
 0x50f   : > { %v12581_v35 = vsel %vm12309_vm5, %v12173_v17, %v12445_v8  ;;  %v16907_v44 = vadd.f32 %v16771_v37, %v21737_v4  ;;  %v11620_v10 = vpop.f32.mrb[45].mxu0  ;;  %v21744_v4 = vld [vmem:[#allocation36_spill] sm:$0xff] }
 0x510   : > { %v14699_v19 = vpack.c.bf16 %v12581_v35, %v12580_v34  ;;  %v12579_v13 = vsel %vm12307_vm6, %v12171_v15, %v12443_v22  ;;  %v16908_v58 = vadd.f32 %v11620_v10, %v21738_v63  ;;  %v16772_v51 = vpop.f32.mrb[46].mxu0  ;;  %v21743_v22 = vld [vmem:[#allocation35_spill] sm:$0xff] }
 0x511   : > { %v14694_v20 = vpack.c.bf16 %v12579_v13, %v12578_v59  ;;  %v12176_v12 = vadd.f32 %v16907_v44, %v21050_v48  ;;  %v16909_v57 = vadd.f32 %v16772_v51, %v20902_v55  ;;  %v11623_v3 = vpop.f32.mrb[47].mxu0 }
 0x512   : > { %14951 = vst [vmem:[%s21110_s18 + $0xa8] sm:$0xff] %v14699_v19   ;;  %v12174_v32 = vadd.f32 %v16908_v58, %v21050_v48  ;;  %v16910_v11 = vadd.f32 %v11623_v3, %v20905_v21 }
 0x513   : > { %14950 = vst [vmem:[%s21110_s18 + $0xa0] sm:$0xff] %v14694_v20   ;;  %v12448_v23 = vmul.f32 0.2, %v12176_v12  ;;  %v12177_v25 = vadd.f32 %v16909_v57, %v21050_v48  ;;  %vm12312_vm2 = vcmp.ge.f32.partialorder %v12176_v12, 0.0  ;;  %v21745_v57 = vld [vmem:[#allocation38_spill] sm:$0xff] }
 0x514   : > { %v12446_v46 = vmul.f32 0.2, %v12174_v32  ;;  %v12175_v52 = vadd.f32 %v16910_v11, %v21050_v48  ;;  %vm12310_vm8 = vcmp.ge.f32.partialorder %v12174_v32, 0.0 }
 0x515   : > { %vm12313_vm9 = vcmp.ge.f32.partialorder %v12177_v25, 0.0  ;;  %v12449_v18 = vmul.f32 0.2, %v12177_v25  ;;  %v12584_v45 = vsel %vm12312_vm2, %v12176_v12, %v12448_v23 }
 0x516   : > { %vm12311_vm10 = vcmp.ge.f32.partialorder %v12175_v52, 0.0  ;;  %v12447_v55 = vmul.f32 0.2, %v12175_v52  ;;  %v16775_v9 = vpop.f32.mrb[48].mxu0  ;;  %v12582_v43 = vsel %vm12310_vm8, %v12174_v32, %v12446_v46  ;;  %v21746_v46 = vld [vmem:[#allocation39_spill] sm:$0xff] }
 0x517   : > { %v12585_v56 = vsel %vm12313_vm9, %v12177_v25, %v12449_v18  ;;  %v16911_v21 = vadd.f32 %v16775_v9, %v21739_v24  ;;  %v11636_v41 = vpop.f32.mrb[49].mxu0 }
 0x518   : > { %v14709_v28 = vpack.c.bf16 %v12585_v56, %v12584_v45  ;;  %v12583_v53 = vsel %vm12311_vm10, %v12175_v52, %v12447_v55  ;;  %v16912_v36 = vadd.f32 %v11636_v41, %v21740_v40  ;;  %v16776_v42 = vpop.f32.mrb[50].mxu0  ;;  %v21747_v45 = vld [vmem:[#allocation40_spill] sm:$0xff]  ;;  %v21748_v41 = vld [vmem:[#allocation6_spill] sm:$0xff] }
 0x519   : > { %v14704_v33 = vpack.c.bf16 %v12583_v53, %v12582_v43  ;;  %v12180_v30 = vadd.f32 %v16911_v21, %v21050_v48  ;;  %v16913_v47 = vadd.f32 %v16776_v42, %v20924_v49  ;;  %v11639_v27 = vpop.f32.mrb[51].mxu0 }
 0x51a   : > { %14953 = vst [vmem:[%s21110_s18 + $0xb8] sm:$0xff] %v14709_v28   ;;  %v12178_v50 = vadd.f32 %v16912_v36, %v21050_v48  ;;  %v16914_v60 = vadd.f32 %v11639_v27, %v20927_v5 }
 0x51b   : > { %14952 = vst [vmem:[%s21110_s18 + $0xb0] sm:$0xff] %v14704_v33   ;;  %v12452_v2 = vmul.f32 0.2, %v12180_v30  ;;  %v12181_v26 = vadd.f32 %v16913_v47, %v21050_v48  ;;  %vm12316_vm11 = vcmp.ge.f32.partialorder %v12180_v30, 0.0 }
 0x51c   : > { %v12450_v29 = vmul.f32 0.2, %v12178_v50  ;;  %v12179_v1 = vadd.f32 %v16914_v60, %v21050_v48  ;;  %vm12314_vm12 = vcmp.ge.f32.partialorder %v12178_v50, 0.0 }
 0x51d   : > { %vm12317_vm13 = vcmp.ge.f32.partialorder %v12181_v26, 0.0  ;;  %v12453_v54 = vmul.f32 0.2, %v12181_v26  ;;  %v12588_v16 = vsel %vm12316_vm11, %v12180_v30, %v12452_v2 }
 0x51e   : > { %vm12315_vm14 = vcmp.ge.f32.partialorder %v12179_v1, 0.0  ;;  %v12451_v49 = vmul.f32 0.2, %v12179_v1  ;;  %v16779_v31 = vpop.f32.mrb[52].mxu0  ;;  %v12586_v7 = vsel %vm12314_vm12, %v12178_v50, %v12450_v29  ;;  %v21749_v50 = vld [vmem:[#allocation5_spill] sm:$0xff] }
 0x51f   : > { %v12589_v38 = vsel %vm12317_vm13, %v12181_v26, %v12453_v54  ;;  %v16915_v5 = vadd.f32 %v16779_v31, %v21741_v6  ;;  %v11652_v61 = vpop.f32.mrb[53].mxu0  ;;  %v21750_v54 = vld [vmem:[#allocation7_spill] sm:$0xff]  ;;  %v21751_v6 = vld [vmem:[#allocation41_spill] sm:$0xff] }
 0x520   : > { %v14719_v62 = vpack.c.bf16 %v12589_v38, %v12588_v16  ;;  %v12587_v14 = vsel %vm12315_vm14, %v12179_v1, %v12451_v49  ;;  %v16916_v17 = vadd.f32 %v11652_v61, %v21742_v39  ;;  %v16780_v0 = vpop.f32.mrb[54].mxu0  ;;  %v21351_v16 = vld [vmem:[%s21539_s2] ss:$0 sm:$0xff] }
 0x521   : > { %v14714_v15 = vpack.c.bf16 %v12587_v14, %v12586_v7  ;;  %v12184_v8 = vadd.f32 %v16915_v5, %v21050_v48  ;;  %v16917_v37 = vadd.f32 %v16780_v0, %v21743_v22  ;;  %v11655_v34 = vpop.f32.mrb[55].mxu0 }
 0x522   : > { %14955 = vst [vmem:[%s21110_s18 + $0xc8] sm:$0xff] %v14719_v62   ;;  %v12182_v35 = vadd.f32 %v16916_v17, %v21050_v48  ;;  %v16918_v44 = vadd.f32 %v11655_v34, %v21744_v4  ;;  %v21752_v62 = vld [vmem:[#allocation42_spill] sm:$0xff]  ;;  %v21753_v4 = vld [vmem:[#allocation43_spill] sm:$0xff] }
 0x523   : > { %14954 = vst [vmem:[%s21110_s18 + $0xc0] sm:$0xff] %v14714_v15   ;;  %v12456_v10 = vmul.f32 0.2, %v12184_v8  ;;  %v12185_v59 = vadd.f32 %v16917_v37, %v21050_v48  ;;  %vm12320_vm15 = vcmp.ge.f32.partialorder %v12184_v8, 0.0 }
 0x524   : > { %v12454_v19 = vmul.f32 0.2, %v12182_v35  ;;  %v12183_v13 = vadd.f32 %v16918_v44, %v21050_v48  ;;  %vm12318_vm0 = vcmp.ge.f32.partialorder %v12182_v35, 0.0 }
 0x525   : > { %vm12321_vm1 = vcmp.ge.f32.partialorder %v12185_v59, 0.0  ;;  %v12457_v63 = vmul.f32 0.2, %v12185_v59  ;;  %v12592_v20 = vsel %vm12320_vm15, %v12184_v8, %v12456_v10 }
 0x526   : > { %vm12319_vm4 = vcmp.ge.f32.partialorder %v12183_v13, 0.0  ;;  %v12455_v58 = vmul.f32 0.2, %v12183_v13  ;;  %v16783_v51 = vpop.f32.mrb[56].mxu0  ;;  %v12590_v11 = vsel %vm12318_vm0, %v12182_v35, %v12454_v19 }
 0x527   : > { %v12593_v12 = vsel %vm12321_vm1, %v12185_v59, %v12457_v63  ;;  %v16919_v3 = vadd.f32 %v16783_v51, %v21745_v57  ;;  %v11668_v32 = vpop.f32.mrb[57].mxu0  ;;  %v21754_v63 = vld [vmem:[#allocation44_spill] sm:$0xff]  ;;  %v21755_v57 = vld [vmem:[#allocation45_spill] sm:$0xff] }
 0x528   : > { %v14729_v23 = vpack.c.bf16 %v12593_v12, %v12592_v20  ;;  %v12591_v25 = vsel %vm12319_vm4, %v12183_v13, %v12455_v58  ;;  %v16920_v52 = vadd.f32 %v11668_v32, %v21746_v46  ;;  %v16784_v18 = vpop.f32.mrb[58].mxu0 }
 0x529   : > { %v14724_v55 = vpack.c.bf16 %v12591_v25, %v12590_v11  ;;  %v12188_v9 = vadd.f32 %v16919_v3, %v21050_v48  ;;  %v16921_v56 = vadd.f32 %v16784_v18, %v21747_v45  ;;  %v11671_v24 = vpop.f32.mrb[59].mxu0  ;;  %v21756_v25 = vld [vmem:[#allocation46_spill] sm:$0xff] }
 0x52a   : > { %14957 = vst [vmem:[%s21110_s18 + $0xd8] sm:$0xff] %v14729_v23   ;;  %v12186_v21 = vadd.f32 %v16920_v52, %v21050_v48  ;;  %v16922_v43 = vadd.f32 %v11671_v24, %v21748_v41 }
 0x52b   : > { %14956 = vst [vmem:[%s21110_s18 + $0xd0] sm:$0xff] %v14724_v55   ;;  %v12460_v28 = vmul.f32 0.2, %v12188_v9  ;;  %v12189_v53 = vadd.f32 %v16921_v56, %v21050_v48  ;;  %vm12324_vm3 = vcmp.ge.f32.partialorder %v12188_v9, 0.0 }
 0x52c   : > { %v12458_v40 = vmul.f32 0.2, %v12186_v21  ;;  %v12187_v36 = vadd.f32 %v16922_v43, %v21050_v48  ;;  %vm12322_vm7 = vcmp.ge.f32.partialorder %v12186_v21, 0.0 }
 0x52d   : > { %vm12325_vm5 = vcmp.ge.f32.partialorder %v12189_v53, 0.0  ;;  %v12461_v42 = vmul.f32 0.2, %v12189_v53  ;;  %v12596_v47 = vsel %vm12324_vm3, %v12188_v9, %v12460_v28 }
 0x52e   : > { %vm12323_vm6 = vcmp.ge.f32.partialorder %v12187_v36, 0.0  ;;  %v12459_v33 = vmul.f32 0.2, %v12187_v36  ;;  %v16787_v30 = vpop.f32.mrb[60].mxu0  ;;  %v12594_v26 = vsel %vm12322_vm7, %v12186_v21, %v12458_v40 }
 0x52f   : > { %v12597_v27 = vsel %vm12325_vm5, %v12189_v53, %v12461_v42  ;;  %v16923_v60 = vadd.f32 %v16787_v30, %v21749_v50  ;;  %v11684_v2 = vpop.f32.mrb[61].mxu0 }
 0x530   : > { %v14739_v29 = vpack.c.bf16 %v12597_v27, %v12596_v47  ;;  %v12595_v1 = vsel %vm12323_vm6, %v12187_v36, %v12459_v33  ;;  %v16924_v49 = vadd.f32 %v11684_v2, %v21750_v54  ;;  %v16788_v31 = vpop.f32.mrb[62].mxu0 }
 0x531   : > { %v14734_v48 = vpack.c.bf16 %v12595_v1, %v12594_v26  ;;  %v12192_v38 = vadd.f32 %v21351_v16, %v16923_v60  ;;  %v16925_v5 = vadd.f32 %v16788_v31, %v21751_v6  ;;  %v11687_v61 = vpop.f32.mrb[63].mxu0 }
 0x532   : > { %14959 = vst [vmem:[%s21110_s18 + $0xe8] sm:$0xff] %v14739_v29   ;;  %v12190_v7 = vadd.f32 %v21351_v16, %v16924_v49  ;;  %v16926_v14 = vadd.f32 %v11687_v61, %v21752_v62 }
 0x533   : > { %14958 = vst [vmem:[%s21110_s18 + $0xe0] sm:$0xff] %v14734_v48   ;;  %v12464_v39 = vmul.f32 0.2, %v12192_v38  ;;  %v12193_v17 = vadd.f32 %v21351_v16, %v16925_v5  ;;  %vm12328_vm2 = vcmp.ge.f32.partialorder %v12192_v38, 0.0 }
 0x534   : > { %v12462_v0 = vmul.f32 0.2, %v12190_v7  ;;  %v12191_v15 = vadd.f32 %v21351_v16, %v16926_v14  ;;  %vm12326_vm8 = vcmp.ge.f32.partialorder %v12190_v7, 0.0 }
 0x535   : > { %vm12329_vm9 = vcmp.ge.f32.partialorder %v12193_v17, 0.0  ;;  %v12465_v8 = vmul.f32 0.2, %v12193_v17  ;;  %v12600_v34 = vsel %vm12328_vm2, %v12192_v38, %v12464_v39 }
 0x536   : > { %vm12327_vm10 = vcmp.ge.f32.partialorder %v12191_v15, 0.0  ;;  %v12463_v22 = vmul.f32 0.2, %v12191_v15  ;;  %v16791_v37 = vpop.f32.mrb[64].mxu0  ;;  %v12598_v59 = vsel %vm12326_vm8, %v12190_v7, %v12462_v0 }
 0x537   : > { %v12601_v35 = vsel %vm12329_vm9, %v12193_v17, %v12465_v8  ;;  %v16927_v44 = vadd.f32 %v16791_v37, %v21753_v4  ;;  %v11700_v10 = vpop.f32.mrb[65].mxu0 }
 0x538   : > { %v14749_v19 = vpack.c.bf16 %v12601_v35, %v12600_v34  ;;  %v12599_v13 = vsel %vm12327_vm10, %v12191_v15, %v12463_v22  ;;  %v16928_v58 = vadd.f32 %v11700_v10, %v21754_v63  ;;  %v16792_v51 = vpop.f32.mrb[66].mxu0 }
 0x539   : > { %v14744_v20 = vpack.c.bf16 %v12599_v13, %v12598_v59  ;;  %v12196_v12 = vadd.f32 %v21351_v16, %v16927_v44  ;;  %v16929_v3 = vadd.f32 %v16792_v51, %v21755_v57  ;;  %v11703_v32 = vpop.f32.mrb[67].mxu0 }
 0x53a   : > { %14961 = vst [vmem:[%s21110_s18 + $0xf8] sm:$0xff] %v14749_v19   ;;  %v12194_v23 = vadd.f32 %v21351_v16, %v16928_v58  ;;  %v16930_v46 = vadd.f32 %v11703_v32, %v21756_v25 }
 0x53b   : > { %v16243_v11 = vpop.f32.mrb[68].mxu1  ;;  %14960 = vst [vmem:[%s21110_s18 + $0xf0] sm:$0xff] %v14744_v20   ;;  %v12468_v18 = vmul.f32 0.2, %v12196_v12  ;;  %v12197_v55 = vadd.f32 %v21351_v16, %v16929_v3  ;;  %vm12332_vm11 = vcmp.ge.f32.partialorder %v12196_v12, 0.0 }
 0x53c   : > { %v6502_v52 = vpop.f32.mrb[69].mxu1  ;;  %v12466_v45 = vmul.f32 0.2, %v12194_v23  ;;  %v12195_v56 = vadd.f32 %v21351_v16, %v16930_v46  ;;  %vm12330_vm12 = vcmp.ge.f32.partialorder %v12194_v23, 0.0 }
 0x53d   : > { %v16244_v9 = vpop.f32.mrb[70].mxu1  ;;  %vm12333_vm13 = vcmp.ge.f32.partialorder %v12197_v55, 0.0  ;;  %v12469_v21 = vmul.f32 0.2, %v12197_v55  ;;  %v12604_v28 = vsel %vm12332_vm11, %v12196_v12, %v12468_v18 }
 0x53e   : > { %v6505_v24 = vpop.f32.mrb[71].mxu1  ;;  %vm12331_vm14 = vcmp.ge.f32.partialorder %v12195_v56, 0.0  ;;  %v12467_v41 = vmul.f32 0.2, %v12195_v56  ;;  %v16795_v43 = vpop.f32.mrb[68].mxu0  ;;  %v12602_v42 = vsel %vm12330_vm12, %v12194_v23, %v12466_v45 }
 0x53f   : > { %v12605_v53 = vsel %vm12333_vm13, %v12197_v55, %v12469_v21  ;;  %v16931_v40 = vadd.f32 %v16795_v43, %v16243_v11  ;;  %v11716_v36 = vpop.f32.mrb[69].mxu0 }
 0x540   : > { %v14759_v33 = vpack.c.bf16 %v12605_v53, %v12604_v28  ;;  %v12603_v30 = vsel %vm12331_vm14, %v12195_v56, %v12467_v41  ;;  %v16932_v47 = vadd.f32 %v11716_v36, %v6502_v52  ;;  %v16796_v27 = vpop.f32.mrb[70].mxu0 }
 0x541   : > { %v14754_v50 = vpack.c.bf16 %v12603_v30, %v12602_v42  ;;  %v12200_v60 = vadd.f32 %v21351_v16, %v16931_v40  ;;  %v16933_v2 = vadd.f32 %v16796_v27, %v16244_v9  ;;  %v11719_v26 = vpop.f32.mrb[71].mxu0 }
 0x542   : > { %14963 = vst [vmem:[%s21110_s18 + $0x108] sm:$0xff] %v14759_v33   ;;  %v12198_v1 = vadd.f32 %v21351_v16, %v16932_v47  ;;  %v16934_v54 = vadd.f32 %v11719_v26, %v6505_v24 }
 0x543   : > { %v16247_v29 = vpop.f32.mrb[72].mxu1  ;;  %14962 = vst [vmem:[%s21110_s18 + $0x100] sm:$0xff] %v14754_v50   ;;  %v12472_v31 = vmul.f32 0.2, %v12200_v60  ;;  %v12201_v48 = vadd.f32 %v21351_v16, %v16933_v2  ;;  %vm12336_vm15 = vcmp.ge.f32.partialorder %v12200_v60, 0.0 }
 0x544   : > { %v6518_v49 = vpop.f32.mrb[73].mxu1  ;;  %v12470_v6 = vmul.f32 0.2, %v12198_v1  ;;  %v12199_v5 = vadd.f32 %v21351_v16, %v16934_v54  ;;  %vm12334_vm0 = vcmp.ge.f32.partialorder %v12198_v1, 0.0 }
 0x545   : > { %v16248_v38 = vpop.f32.mrb[74].mxu1  ;;  %vm12337_vm1 = vcmp.ge.f32.partialorder %v12201_v48, 0.0  ;;  %v12473_v7 = vmul.f32 0.2, %v12201_v48  ;;  %v12608_v39 = vsel %vm12336_vm15, %v12200_v60, %v12472_v31 }
 0x546   : > { %v6521_v61 = vpop.f32.mrb[75].mxu1  ;;  %vm12335_vm4 = vcmp.ge.f32.partialorder %v12199_v5, 0.0  ;;  %v12471_v62 = vmul.f32 0.2, %v12199_v5  ;;  %v16799_v14 = vpop.f32.mrb[72].mxu0  ;;  %v12606_v8 = vsel %vm12334_vm0, %v12198_v1, %v12470_v6 }
 0x547   : > { %v12609_v17 = vsel %vm12337_vm1, %v12201_v48, %v12473_v7  ;;  %v16935_v0 = vadd.f32 %v16799_v14, %v16247_v29  ;;  %v11732_v15 = vpop.f32.mrb[73].mxu0 }
 0x548   : > { %v14769_v22 = vpack.c.bf16 %v12609_v17, %v12608_v39  ;;  %v12607_v37 = vsel %vm12335_vm4, %v12199_v5, %v12471_v62  ;;  %v16936_v34 = vadd.f32 %v11732_v15, %v6518_v49  ;;  %v16800_v35 = vpop.f32.mrb[74].mxu0 }
 0x549   : > { %v14764_v4 = vpack.c.bf16 %v12607_v37, %v12606_v8  ;;  %v12204_v44 = vadd.f32 %v21351_v16, %v16935_v0  ;;  %v16937_v10 = vadd.f32 %v16800_v35, %v16248_v38  ;;  %v11735_v59 = vpop.f32.mrb[75].mxu0 }
 0x54a   : > { %14965 = vst [vmem:[%s21110_s18 + $0x118] sm:$0xff] %v14769_v22   ;;  %v12202_v13 = vadd.f32 %v21351_v16, %v16936_v34  ;;  %v16938_v63 = vadd.f32 %v11735_v59, %v6521_v61 }
 0x54b   : > { %v16251_v19 = vpop.f32.mrb[76].mxu1  ;;  %14964 = vst [vmem:[%s21110_s18 + $0x110] sm:$0xff] %v14764_v4   ;;  %v12476_v51 = vmul.f32 0.2, %v12204_v44  ;;  %v12205_v20 = vadd.f32 %v21351_v16, %v16937_v10  ;;  %vm12340_vm3 = vcmp.ge.f32.partialorder %v12204_v44, 0.0 }
 0x54c   : > { %v6534_v58 = vpop.f32.mrb[77].mxu1  ;;  %v12474_v57 = vmul.f32 0.2, %v12202_v13  ;;  %v12203_v3 = vadd.f32 %v21351_v16, %v16938_v63  ;;  %vm12338_vm7 = vcmp.ge.f32.partialorder %v12202_v13, 0.0 }
 0x54d   : > { %v16252_v12 = vpop.f32.mrb[78].mxu1  ;;  %vm12341_vm5 = vcmp.ge.f32.partialorder %v12205_v20, 0.0  ;;  %v12477_v11 = vmul.f32 0.2, %v12205_v20  ;;  %v12612_v46 = vsel %vm12340_vm3, %v12204_v44, %v12476_v51 }
 0x54e   : > { %v6537_v32 = vpop.f32.mrb[79].mxu1  ;;  %vm12339_vm6 = vcmp.ge.f32.partialorder %v12203_v3, 0.0  ;;  %v12475_v23 = vmul.f32 0.2, %v12203_v3  ;;  %v16803_v25 = vpop.f32.mrb[76].mxu0  ;;  %v12610_v9 = vsel %vm12338_vm7, %v12202_v13, %v12474_v57 }
 0x54f   : > { %v12613_v52 = vsel %vm12341_vm5, %v12205_v20, %v12477_v11  ;;  %v16939_v18 = vadd.f32 %v16803_v25, %v16251_v19  ;;  %v11748_v55 = vpop.f32.mrb[77].mxu0 }
 0x550   : > { %v14779_v45 = vpack.c.bf16 %v12613_v52, %v12612_v46  ;;  %v12611_v56 = vsel %vm12339_vm6, %v12203_v3, %v12475_v23  ;;  %v16940_v24 = vadd.f32 %v11748_v55, %v6534_v58  ;;  %v16804_v21 = vpop.f32.mrb[78].mxu0 }
 0x551   : > { %v14774_v41 = vpack.c.bf16 %v12611_v56, %v12610_v9  ;;  %v12208_v43 = vadd.f32 %v21351_v16, %v16939_v18  ;;  %v16941_v28 = vadd.f32 %v16804_v21, %v16252_v12  ;;  %v11751_v53 = vpop.f32.mrb[79].mxu0 }
 0x552   : > { %14967 = vst [vmem:[%s21110_s18 + $0x128] sm:$0xff] %v14779_v45   ;;  %v12206_v36 = vadd.f32 %v21351_v16, %v16940_v24  ;;  %v16942_v42 = vadd.f32 %v11751_v53, %v6537_v32 }
 0x553   : > { %v16255_v40 = vpop.f32.mrb[80].mxu1  ;;  %14966 = vst [vmem:[%s21110_s18 + $0x120] sm:$0xff] %v14774_v41   ;;  %v12480_v30 = vmul.f32 0.2, %v12208_v43  ;;  %v12209_v47 = vadd.f32 %v21351_v16, %v16941_v28  ;;  %vm12344_vm2 = vcmp.ge.f32.partialorder %v12208_v43, 0.0 }
 0x554   : > { %v6550_v33 = vpop.f32.mrb[81].mxu1  ;;  %v12478_v50 = vmul.f32 0.2, %v12206_v36  ;;  %v12207_v60 = vadd.f32 %v21351_v16, %v16942_v42  ;;  %vm12342_vm8 = vcmp.ge.f32.partialorder %v12206_v36, 0.0 }
 0x555   : > { %v16256_v27 = vpop.f32.mrb[82].mxu1  ;;  %vm12345_vm9 = vcmp.ge.f32.partialorder %v12209_v47, 0.0  ;;  %v12481_v26 = vmul.f32 0.2, %v12209_v47  ;;  %v12616_v54 = vsel %vm12344_vm2, %v12208_v43, %v12480_v30 }
 0x556   : > { %v6553_v2 = vpop.f32.mrb[83].mxu1  ;;  %vm12343_vm10 = vcmp.ge.f32.partialorder %v12207_v60, 0.0  ;;  %v12479_v29 = vmul.f32 0.2, %v12207_v60  ;;  %v16807_v1 = vpop.f32.mrb[80].mxu0  ;;  %v12614_v38 = vsel %vm12342_vm8, %v12206_v36, %v12478_v50 }
 0x557   : > { %v12617_v49 = vsel %vm12345_vm9, %v12209_v47, %v12481_v26  ;;  %v16943_v31 = vadd.f32 %v16807_v1, %v16255_v40  ;;  %v11764_v48 = vpop.f32.mrb[81].mxu0 }
 0x558   : > { %v14789_v6 = vpack.c.bf16 %v12617_v49, %v12616_v54  ;;  %v12615_v5 = vsel %vm12343_vm10, %v12207_v60, %v12479_v29  ;;  %v16944_v61 = vadd.f32 %v11764_v48, %v6550_v33  ;;  %v16808_v7 = vpop.f32.mrb[82].mxu0 }
 0x559   : > { %v14784_v62 = vpack.c.bf16 %v12615_v5, %v12614_v38  ;;  %v12212_v14 = vadd.f32 %v21351_v16, %v16943_v31  ;;  %v16945_v39 = vadd.f32 %v16808_v7, %v16256_v27  ;;  %v11767_v17 = vpop.f32.mrb[83].mxu0 }
 0x55a   : > { %14969 = vst [vmem:[%s21110_s18 + $0x138] sm:$0xff] %v14789_v6   ;;  %v12210_v15 = vadd.f32 %v21351_v16, %v16944_v61  ;;  %v16946_v8 = vadd.f32 %v11767_v17, %v6553_v2 }
 0x55b   : > { %v16259_v0 = vpop.f32.mrb[84].mxu1  ;;  %14968 = vst [vmem:[%s21110_s18 + $0x130] sm:$0xff] %v14784_v62   ;;  %v12484_v37 = vmul.f32 0.2, %v12212_v14  ;;  %v12213_v34 = vadd.f32 %v21351_v16, %v16945_v39  ;;  %vm12348_vm11 = vcmp.ge.f32.partialorder %v12212_v14, 0.0 }
 0x55c   : > { %v6566_v22 = vpop.f32.mrb[85].mxu1  ;;  %v12482_v4 = vmul.f32 0.2, %v12210_v15  ;;  %v12211_v44 = vadd.f32 %v21351_v16, %v16946_v8  ;;  %vm12346_vm12 = vcmp.ge.f32.partialorder %v12210_v15, 0.0 }
 0x55d   : > { %v16260_v35 = vpop.f32.mrb[86].mxu1  ;;  %vm12349_vm13 = vcmp.ge.f32.partialorder %v12213_v34, 0.0  ;;  %v12485_v59 = vmul.f32 0.2, %v12213_v34  ;;  %v12620_v63 = vsel %vm12348_vm11, %v12212_v14, %v12484_v37 }
 0x55e   : > { %v6569_v10 = vpop.f32.mrb[87].mxu1  ;;  %vm12347_vm14 = vcmp.ge.f32.partialorder %v12211_v44, 0.0  ;;  %v12483_v19 = vmul.f32 0.2, %v12211_v44  ;;  %v16811_v13 = vpop.f32.mrb[84].mxu0  ;;  %v12618_v12 = vsel %vm12346_vm12, %v12210_v15, %v12482_v4 }
 0x55f   : > { %v12621_v58 = vsel %vm12349_vm13, %v12213_v34, %v12485_v59  ;;  %v16947_v51 = vadd.f32 %v16811_v13, %v16259_v0  ;;  %v11780_v20 = vpop.f32.mrb[85].mxu0 }
 0x560   : > { %v14799_v57 = vpack.c.bf16 %v12621_v58, %v12620_v63  ;;  %v12619_v3 = vsel %vm12347_vm14, %v12211_v44, %v12483_v19  ;;  %v16948_v32 = vadd.f32 %v11780_v20, %v6566_v22  ;;  %v16812_v11 = vpop.f32.mrb[86].mxu0 }
 0x561   : > { %v14794_v23 = vpack.c.bf16 %v12619_v3, %v12618_v12  ;;  %v12216_v25 = vadd.f32 %v21351_v16, %v16947_v51  ;;  %v16949_v46 = vadd.f32 %v16812_v11, %v16260_v35  ;;  %v11783_v52 = vpop.f32.mrb[87].mxu0 }
 0x562   : > { %14971 = vst [vmem:[%s21110_s18 + $0x148] sm:$0xff] %v14799_v57   ;;  %v12214_v55 = vadd.f32 %v21351_v16, %v16948_v32  ;;  %v16950_v9 = vadd.f32 %v11783_v52, %v6569_v10 }
 0x563   : > { %v16263_v18 = vpop.f32.mrb[88].mxu1  ;;  %14970 = vst [vmem:[%s21110_s18 + $0x140] sm:$0xff] %v14794_v23   ;;  %v12488_v56 = vmul.f32 0.2, %v12216_v25  ;;  %v12217_v24 = vadd.f32 %v21351_v16, %v16949_v46  ;;  %vm12352_vm15 = vcmp.ge.f32.partialorder %v12216_v25, 0.0 }
 0x564   : > { %v6582_v45 = vpop.f32.mrb[89].mxu1  ;;  %v12486_v41 = vmul.f32 0.2, %v12214_v55  ;;  %v12215_v43 = vadd.f32 %v21351_v16, %v16950_v9  ;;  %vm12350_vm0 = vcmp.ge.f32.partialorder %v12214_v55, 0.0 }
 0x565   : > { %v16264_v21 = vpop.f32.mrb[90].mxu1  ;;  %vm12353_vm1 = vcmp.ge.f32.partialorder %v12217_v24, 0.0  ;;  %v12489_v53 = vmul.f32 0.2, %v12217_v24  ;;  %v12624_v42 = vsel %vm12352_vm15, %v12216_v25, %v12488_v56 }
 0x566   : > { %v6585_v28 = vpop.f32.mrb[91].mxu1  ;;  %vm12351_vm4 = vcmp.ge.f32.partialorder %v12215_v43, 0.0  ;;  %v12487_v40 = vmul.f32 0.2, %v12215_v43  ;;  %v16815_v36 = vpop.f32.mrb[88].mxu0  ;;  %v12622_v27 = vsel %vm12350_vm0, %v12214_v55, %v12486_v41 }
 0x567   : > { %v12625_v33 = vsel %vm12353_vm1, %v12217_v24, %v12489_v53  ;;  %v16951_v30 = vadd.f32 %v16815_v36, %v16263_v18  ;;  %v11796_v47 = vpop.f32.mrb[89].mxu0 }
 0x568   : > { %v14809_v50 = vpack.c.bf16 %v12625_v33, %v12624_v42  ;;  %v12623_v60 = vsel %vm12351_vm4, %v12215_v43, %v12487_v40  ;;  %v16952_v2 = vadd.f32 %v11796_v47, %v6582_v45  ;;  %v16816_v26 = vpop.f32.mrb[90].mxu0 }
 0x569   : > { %v14804_v29 = vpack.c.bf16 %v12623_v60, %v12622_v27  ;;  %v12220_v1 = vadd.f32 %v21351_v16, %v16951_v30  ;;  %v16953_v54 = vadd.f32 %v16816_v26, %v16264_v21  ;;  %v11799_v49 = vpop.f32.mrb[91].mxu0 }
 0x56a   : > { %14973 = vst [vmem:[%s21110_s18 + $0x158] sm:$0xff] %v14809_v50   ;;  %v12218_v48 = vadd.f32 %v21351_v16, %v16952_v2  ;;  %v16954_v38 = vadd.f32 %v11799_v49, %v6585_v28 }
 0x56b   : > { %v16267_v31 = vpop.f32.mrb[92].mxu1  ;;  %14972 = vst [vmem:[%s21110_s18 + $0x150] sm:$0xff] %v14804_v29   ;;  %v12492_v5 = vmul.f32 0.2, %v12220_v1  ;;  %v12221_v61 = vadd.f32 %v21351_v16, %v16953_v54  ;;  %vm12356_vm3 = vcmp.ge.f32.partialorder %v12220_v1, 0.0 }
 0x56c   : > { %v6598_v6 = vpop.f32.mrb[93].mxu1  ;;  %v12490_v62 = vmul.f32 0.2, %v12218_v48  ;;  %v12219_v14 = vadd.f32 %v21351_v16, %v16954_v38  ;;  %vm12354_vm7 = vcmp.ge.f32.partialorder %v12218_v48, 0.0 }
 0x56d   : > { %v16268_v7 = vpop.f32.mrb[94].mxu1  ;;  %vm12357_vm5 = vcmp.ge.f32.partialorder %v12221_v61, 0.0  ;;  %v12493_v17 = vmul.f32 0.2, %v12221_v61  ;;  %v12628_v8 = vsel %vm12356_vm3, %v12220_v1, %v12492_v5 }
 0x56e   : > { %v6601_v39 = vpop.f32.mrb[95].mxu1  ;;  %vm12355_vm6 = vcmp.ge.f32.partialorder %v12219_v14, 0.0  ;;  %v12491_v0 = vmul.f32 0.2, %v12219_v14  ;;  %v16819_v15 = vpop.f32.mrb[92].mxu0  ;;  %v12626_v35 = vsel %vm12354_vm7, %v12218_v48, %v12490_v62 }
 0x56f   : > { %v12629_v22 = vsel %vm12357_vm5, %v12221_v61, %v12493_v17  ;;  %v16955_v37 = vadd.f32 %v16819_v15, %v16267_v31  ;;  %v11812_v34 = vpop.f32.mrb[93].mxu0 }
 0x570   : > { %v14819_v4 = vpack.c.bf16 %v12629_v22, %v12628_v8  ;;  %v12627_v44 = vsel %vm12355_vm6, %v12219_v14, %v12491_v0  ;;  %v16956_v10 = vadd.f32 %v11812_v34, %v6598_v6  ;;  %v16820_v59 = vpop.f32.mrb[94].mxu0 }
 0x571   : > { %v14814_v19 = vpack.c.bf16 %v12627_v44, %v12626_v35  ;;  %v12224_v13 = vadd.f32 %v21351_v16, %v16955_v37  ;;  %v16957_v63 = vadd.f32 %v16820_v59, %v16268_v7  ;;  %v11815_v58 = vpop.f32.mrb[95].mxu0 }
 0x572   : > { %14975 = vst [vmem:[%s21110_s18 + $0x168] sm:$0xff] %v14819_v4   ;;  %v12222_v20 = vadd.f32 %v21351_v16, %v16956_v10  ;;  %v16958_v12 = vadd.f32 %v11815_v58, %v6601_v39 }
 0x573   : > { %v16271_v51 = vpop.f32.mrb[96].mxu1  ;;  %14974 = vst [vmem:[%s21110_s18 + $0x160] sm:$0xff] %v14814_v19   ;;  %v12496_v3 = vmul.f32 0.2, %v12224_v13  ;;  %v12225_v32 = vadd.f32 %v21351_v16, %v16957_v63  ;;  %vm12360_vm2 = vcmp.ge.f32.partialorder %v12224_v13, 0.0 }
 0x574   : > { %v6614_v57 = vpop.f32.mrb[97].mxu1  ;;  %v12494_v23 = vmul.f32 0.2, %v12222_v20  ;;  %v12223_v25 = vadd.f32 %v21351_v16, %v16958_v12  ;;  %vm12358_vm8 = vcmp.ge.f32.partialorder %v12222_v20, 0.0 }
 0x575   : > { %v16272_v11 = vpop.f32.mrb[98].mxu1  ;;  %vm12361_vm9 = vcmp.ge.f32.partialorder %v12225_v32, 0.0  ;;  %v12497_v52 = vmul.f32 0.2, %v12225_v32  ;;  %v12632_v9 = vsel %vm12360_vm2, %v12224_v13, %v12496_v3 }
 0x576   : > { %v6617_v46 = vpop.f32.mrb[99].mxu1  ;;  %vm12359_vm10 = vcmp.ge.f32.partialorder %v12223_v25, 0.0  ;;  %v12495_v18 = vmul.f32 0.2, %v12223_v25  ;;  %v16823_v55 = vpop.f32.mrb[96].mxu0  ;;  %v12630_v21 = vsel %vm12358_vm8, %v12222_v20, %v12494_v23 }
 0x577   : > { %v12633_v45 = vsel %vm12361_vm9, %v12225_v32, %v12497_v52  ;;  %v16959_v56 = vadd.f32 %v16823_v55, %v16271_v51  ;;  %v11828_v24 = vpop.f32.mrb[97].mxu0 }
 0x578   : > { %v14829_v41 = vpack.c.bf16 %v12633_v45, %v12632_v9  ;;  %v12631_v43 = vsel %vm12359_vm10, %v12223_v25, %v12495_v18  ;;  %v16960_v28 = vadd.f32 %v11828_v24, %v6614_v57  ;;  %v16824_v53 = vpop.f32.mrb[98].mxu0 }
 0x579   : > { %v14824_v40 = vpack.c.bf16 %v12631_v43, %v12630_v21  ;;  %v12228_v36 = vadd.f32 %v21351_v16, %v16959_v56  ;;  %v16961_v42 = vadd.f32 %v16824_v53, %v16272_v11  ;;  %v11831_v33 = vpop.f32.mrb[99].mxu0 }
 0x57a   : > { %14977 = vst [vmem:[%s21110_s18 + $0x178] sm:$0xff] %v14829_v41   ;;  %v12226_v47 = vadd.f32 %v21351_v16, %v16960_v28  ;;  %v16962_v27 = vadd.f32 %v11831_v33, %v6617_v46 }
 0x57b   : > { %v16275_v30 = vpop.f32.mrb[100].mxu1  ;;  %14976 = vst [vmem:[%s21110_s18 + $0x170] sm:$0xff] %v14824_v40   ;;  %v12500_v60 = vmul.f32 0.2, %v12228_v36  ;;  %v12229_v2 = vadd.f32 %v21351_v16, %v16961_v42  ;;  %vm12364_vm11 = vcmp.ge.f32.partialorder %v12228_v36, 0.0 }
 0x57c   : > { %v6630_v50 = vpop.f32.mrb[101].mxu1  ;;  %v12498_v29 = vmul.f32 0.2, %v12226_v47  ;;  %v12227_v1 = vadd.f32 %v21351_v16, %v16962_v27  ;;  %vm12362_vm12 = vcmp.ge.f32.partialorder %v12226_v47, 0.0 }
 0x57d   : > { %v16276_v26 = vpop.f32.mrb[102].mxu1  ;;  %vm12365_vm13 = vcmp.ge.f32.partialorder %v12229_v2, 0.0  ;;  %v12501_v49 = vmul.f32 0.2, %v12229_v2  ;;  %v12636_v38 = vsel %vm12364_vm11, %v12228_v36, %v12500_v60 }
 0x57e   : > { %v6633_v54 = vpop.f32.mrb[103].mxu1  ;;  %vm12363_vm14 = vcmp.ge.f32.partialorder %v12227_v1, 0.0  ;;  %v12499_v31 = vmul.f32 0.2, %v12227_v1  ;;  %v16827_v48 = vpop.f32.mrb[100].mxu0  ;;  %v12634_v7 = vsel %vm12362_vm12, %v12226_v47, %v12498_v29 }
 0x57f   : > { %v12637_v6 = vsel %vm12365_vm13, %v12229_v2, %v12501_v49  ;;  %v16963_v5 = vadd.f32 %v16827_v48, %v16275_v30  ;;  %v11844_v61 = vpop.f32.mrb[101].mxu0 }
 0x580   : > { %v14839_v62 = vpack.c.bf16 %v12637_v6, %v12636_v38  ;;  %v12635_v14 = vsel %vm12363_vm14, %v12227_v1, %v12499_v31  ;;  %v16964_v39 = vadd.f32 %v11844_v61, %v6630_v50  ;;  %v16828_v17 = vpop.f32.mrb[102].mxu0 }
 0x581   : > { %v14834_v0 = vpack.c.bf16 %v12635_v14, %v12634_v7  ;;  %v12232_v15 = vadd.f32 %v21351_v16, %v16963_v5  ;;  %v16965_v8 = vadd.f32 %v16828_v17, %v16276_v26  ;;  %v11847_v22 = vpop.f32.mrb[103].mxu0 }
 0x582   : > { %14979 = vst [vmem:[%s21110_s18 + $0x188] sm:$0xff] %v14839_v62   ;;  %v12230_v34 = vadd.f32 %v21351_v16, %v16964_v39  ;;  %v16966_v35 = vadd.f32 %v11847_v22, %v6633_v54 }
 0x583   : > { %v16279_v37 = vpop.f32.mrb[104].mxu1  ;;  %14978 = vst [vmem:[%s21110_s18 + $0x180] sm:$0xff] %v14834_v0   ;;  %v12504_v44 = vmul.f32 0.2, %v12232_v15  ;;  %v12233_v10 = vadd.f32 %v21351_v16, %v16965_v8  ;;  %vm12368_vm15 = vcmp.ge.f32.partialorder %v12232_v15, 0.0 }
 0x584   : > { %v6646_v4 = vpop.f32.mrb[105].mxu1  ;;  %v12502_v19 = vmul.f32 0.2, %v12230_v34  ;;  %v12231_v13 = vadd.f32 %v21351_v16, %v16966_v35  ;;  %vm12366_vm0 = vcmp.ge.f32.partialorder %v12230_v34, 0.0 }
 0x585   : > { %v16280_v59 = vpop.f32.mrb[106].mxu1  ;;  %vm12369_vm1 = vcmp.ge.f32.partialorder %v12233_v10, 0.0  ;;  %v12505_v58 = vmul.f32 0.2, %v12233_v10  ;;  %v12640_v12 = vsel %vm12368_vm15, %v12232_v15, %v12504_v44 }
 0x586   : > { %v6649_v63 = vpop.f32.mrb[107].mxu1  ;;  %vm12367_vm4 = vcmp.ge.f32.partialorder %v12231_v13, 0.0  ;;  %v12503_v51 = vmul.f32 0.2, %v12231_v13  ;;  %v16831_v20 = vpop.f32.mrb[104].mxu0  ;;  %v12638_v11 = vsel %vm12366_vm0, %v12230_v34, %v12502_v19 }
 0x587   : > { %v12641_v57 = vsel %vm12369_vm1, %v12233_v10, %v12505_v58  ;;  %v16967_v3 = vadd.f32 %v16831_v20, %v16279_v37  ;;  %v11860_v32 = vpop.f32.mrb[105].mxu0 }
 0x588   : > { %v14849_v23 = vpack.c.bf16 %v12641_v57, %v12640_v12  ;;  %v12639_v25 = vsel %vm12367_vm4, %v12231_v13, %v12503_v51  ;;  %v16968_v46 = vadd.f32 %v11860_v32, %v6646_v4  ;;  %v16832_v52 = vpop.f32.mrb[106].mxu0 }
 0x589   : > { %v14844_v18 = vpack.c.bf16 %v12639_v25, %v12638_v11  ;;  %v12236_v55 = vadd.f32 %v21351_v16, %v16967_v3  ;;  %v16969_v9 = vadd.f32 %v16832_v52, %v16280_v59  ;;  %v11863_v45 = vpop.f32.mrb[107].mxu0 }
 0x58a   : > { %14981 = vst [vmem:[%s21110_s18 + $0x198] sm:$0xff] %v14849_v23   ;;  %v12234_v24 = vadd.f32 %v21351_v16, %v16968_v46  ;;  %v16970_v21 = vadd.f32 %v11863_v45, %v6649_v63 }
 0x58b   : > { %v16283_v56 = vpop.f32.mrb[108].mxu1  ;;  %14980 = vst [vmem:[%s21110_s18 + $0x190] sm:$0xff] %v14844_v18   ;;  %v12508_v43 = vmul.f32 0.2, %v12236_v55  ;;  %v12237_v28 = vadd.f32 %v21351_v16, %v16969_v9  ;;  %vm12372_vm3 = vcmp.ge.f32.partialorder %v12236_v55, 0.0 }
 0x58c   : > { %v6662_v41 = vpop.f32.mrb[109].mxu1  ;;  %v12506_v40 = vmul.f32 0.2, %v12234_v24  ;;  %v12235_v36 = vadd.f32 %v21351_v16, %v16970_v21  ;;  %vm12370_vm7 = vcmp.ge.f32.partialorder %v12234_v24, 0.0 }
 0x58d   : > { %v16284_v53 = vpop.f32.mrb[110].mxu1  ;;  %vm12373_vm5 = vcmp.ge.f32.partialorder %v12237_v28, 0.0  ;;  %v12509_v33 = vmul.f32 0.2, %v12237_v28  ;;  %v12644_v27 = vsel %vm12372_vm3, %v12236_v55, %v12508_v43 }
 0x58e   : > { %v6665_v42 = vpop.f32.mrb[111].mxu1  ;;  %vm12371_vm6 = vcmp.ge.f32.partialorder %v12235_v36, 0.0  ;;  %v12507_v30 = vmul.f32 0.2, %v12235_v36  ;;  %v16835_v47 = vpop.f32.mrb[108].mxu0  ;;  %v12642_v26 = vsel %vm12370_vm7, %v12234_v24, %v12506_v40 }
 0x58f   : > { %v12645_v50 = vsel %vm12373_vm5, %v12237_v28, %v12509_v33  ;;  %v16971_v60 = vadd.f32 %v16835_v47, %v16283_v56  ;;  %v11876_v2 = vpop.f32.mrb[109].mxu0 }
 0x590   : > { %v14859_v29 = vpack.c.bf16 %v12645_v50, %v12644_v27  ;;  %v12643_v1 = vsel %vm12371_vm6, %v12235_v36, %v12507_v30  ;;  %v16972_v54 = vadd.f32 %v11876_v2, %v6662_v41  ;;  %v16836_v49 = vpop.f32.mrb[110].mxu0 }
 0x591   : > { %v14854_v31 = vpack.c.bf16 %v12643_v1, %v12642_v26  ;;  %v12240_v48 = vadd.f32 %v21351_v16, %v16971_v60  ;;  %v16973_v38 = vadd.f32 %v16836_v49, %v16284_v53  ;;  %v11879_v6 = vpop.f32.mrb[111].mxu0 }
 0x592   : > { %14983 = vst [vmem:[%s21110_s18 + $0x1a8] sm:$0xff] %v14859_v29   ;;  %v12238_v61 = vadd.f32 %v21351_v16, %v16972_v54  ;;  %v16974_v7 = vadd.f32 %v11879_v6, %v6665_v42 }
 0x593   : > { %v16287_v5 = vpop.f32.mrb[112].mxu1  ;;  %14982 = vst [vmem:[%s21110_s18 + $0x1a0] sm:$0xff] %v14854_v31   ;;  %v12512_v14 = vmul.f32 0.2, %v12240_v48  ;;  %v12241_v39 = vadd.f32 %v21351_v16, %v16973_v38  ;;  %vm12376_vm2 = vcmp.ge.f32.partialorder %v12240_v48, 0.0 }
 0x594   : > { %v6678_v62 = vpop.f32.mrb[113].mxu1  ;;  %v12510_v0 = vmul.f32 0.2, %v12238_v61  ;;  %v12239_v15 = vadd.f32 %v21351_v16, %v16974_v7  ;;  %vm12374_vm8 = vcmp.ge.f32.partialorder %v12238_v61, 0.0 }
 0x595   : > { %v16288_v17 = vpop.f32.mrb[114].mxu1  ;;  %vm12377_vm9 = vcmp.ge.f32.partialorder %v12241_v39, 0.0  ;;  %v12513_v22 = vmul.f32 0.2, %v12241_v39  ;;  %v12648_v35 = vsel %vm12376_vm2, %v12240_v48, %v12512_v14 }
 0x596   : > { %v6681_v8 = vpop.f32.mrb[115].mxu1  ;;  %vm12375_vm10 = vcmp.ge.f32.partialorder %v12239_v15, 0.0  ;;  %v12511_v37 = vmul.f32 0.2, %v12239_v15  ;;  %v16839_v34 = vpop.f32.mrb[112].mxu0  ;;  %v12646_v59 = vsel %vm12374_vm8, %v12238_v61, %v12510_v0 }
 0x597   : > { %v12649_v4 = vsel %vm12377_vm9, %v12241_v39, %v12513_v22  ;;  %v16975_v44 = vadd.f32 %v16839_v34, %v16287_v5  ;;  %v11892_v10 = vpop.f32.mrb[113].mxu0 }
 0x598   : > { %v14869_v19 = vpack.c.bf16 %v12649_v4, %v12648_v35  ;;  %v12647_v13 = vsel %vm12375_vm10, %v12239_v15, %v12511_v37  ;;  %v16976_v63 = vadd.f32 %v11892_v10, %v6678_v62  ;;  %v16840_v58 = vpop.f32.mrb[114].mxu0 }
 0x599   : > { %v14864_v51 = vpack.c.bf16 %v12647_v13, %v12646_v59  ;;  %v12244_v20 = vadd.f32 %v21351_v16, %v16975_v44  ;;  %v16977_v12 = vadd.f32 %v16840_v58, %v16288_v17  ;;  %v11895_v57 = vpop.f32.mrb[115].mxu0 }
 0x59a   : > { %14985 = vst [vmem:[%s21110_s18 + $0x1b8] sm:$0xff] %v14869_v19   ;;  %v12242_v32 = vadd.f32 %v21351_v16, %v16976_v63  ;;  %v16978_v11 = vadd.f32 %v11895_v57, %v6681_v8 }
 0x59b   : > { %v16291_v3 = vpop.f32.mrb[116].mxu1  ;;  %14984 = vst [vmem:[%s21110_s18 + $0x1b0] sm:$0xff] %v14864_v51   ;;  %v12516_v25 = vmul.f32 0.2, %v12244_v20  ;;  %v12245_v46 = vadd.f32 %v21351_v16, %v16977_v12  ;;  %vm12380_vm11 = vcmp.ge.f32.partialorder %v12244_v20, 0.0 }
 0x59c   : > { %v6694_v23 = vpop.f32.mrb[117].mxu1  ;;  %v12514_v18 = vmul.f32 0.2, %v12242_v32  ;;  %v12243_v55 = vadd.f32 %v21351_v16, %v16978_v11  ;;  %vm12378_vm12 = vcmp.ge.f32.partialorder %v12242_v32, 0.0 }
 0x59d   : > { %v16292_v52 = vpop.f32.mrb[118].mxu1  ;;  %vm12381_vm13 = vcmp.ge.f32.partialorder %v12245_v46, 0.0  ;;  %v12517_v45 = vmul.f32 0.2, %v12245_v46  ;;  %v12652_v21 = vsel %vm12380_vm11, %v12244_v20, %v12516_v25 }
 0x59e   : > { %v6697_v9 = vpop.f32.mrb[119].mxu1  ;;  %vm12379_vm14 = vcmp.ge.f32.partialorder %v12243_v55, 0.0  ;;  %v12515_v56 = vmul.f32 0.2, %v12243_v55  ;;  %v16843_v24 = vpop.f32.mrb[116].mxu0  ;;  %v12650_v53 = vsel %vm12378_vm12, %v12242_v32, %v12514_v18 }
 0x59f   : > { %v12653_v41 = vsel %vm12381_vm13, %v12245_v46, %v12517_v45  ;;  %v16979_v43 = vadd.f32 %v16843_v24, %v16291_v3  ;;  %v11908_v28 = vpop.f32.mrb[117].mxu0 }
 0x5a0   : > { %v14879_v40 = vpack.c.bf16 %v12653_v41, %v12652_v21  ;;  %v12651_v36 = vsel %vm12379_vm14, %v12243_v55, %v12515_v56  ;;  %v16980_v42 = vadd.f32 %v11908_v28, %v6694_v23  ;;  %v16844_v33 = vpop.f32.mrb[118].mxu0  ;;  %v21460_v28 = vld [vmem:[%s21539_s2] ss:$0 sm:$0xff] }
 0x5a1   : > { %v14874_v30 = vpack.c.bf16 %v12651_v36, %v12650_v53  ;;  %v12248_v47 = vadd.f32 %v21351_v16, %v16979_v43  ;;  %v16981_v27 = vadd.f32 %v16844_v33, %v16292_v52  ;;  %v11911_v50 = vpop.f32.mrb[119].mxu0 }
 0x5a2   : > { %14987 = vst [vmem:[%s21110_s18 + $0x1c8] sm:$0xff] %v14879_v40   ;;  %v12246_v2 = vadd.f32 %v21351_v16, %v16980_v42  ;;  %v16982_v26 = vadd.f32 %v11911_v50, %v6697_v9 }
 0x5a3   : > { %v16295_v60 = vpop.f32.mrb[120].mxu1  ;;  %14986 = vst [vmem:[%s21110_s18 + $0x1c0] sm:$0xff] %v14874_v30   ;;  %v12520_v1 = vmul.f32 0.2, %v12248_v47  ;;  %v12249_v54 = vadd.f32 %v21351_v16, %v16981_v27  ;;  %vm12384_vm15 = vcmp.ge.f32.partialorder %v12248_v47, 0.0 }
 0x5a4   : > { %v6710_v29 = vpop.f32.mrb[121].mxu1  ;;  %v12518_v31 = vmul.f32 0.2, %v12246_v2  ;;  %v12247_v48 = vadd.f32 %v21351_v16, %v16982_v26  ;;  %vm12382_vm0 = vcmp.ge.f32.partialorder %v12246_v2, 0.0 }
 0x5a5   : > { %v16296_v49 = vpop.f32.mrb[122].mxu1  ;;  %vm12385_vm1 = vcmp.ge.f32.partialorder %v12249_v54, 0.0  ;;  %v12521_v6 = vmul.f32 0.2, %v12249_v54  ;;  %v12656_v7 = vsel %vm12384_vm15, %v12248_v47, %v12520_v1 }
 0x5a6   : > { %v6713_v38 = vpop.f32.mrb[123].mxu1  ;;  %vm12383_vm4 = vcmp.ge.f32.partialorder %v12247_v48, 0.0  ;;  %v12519_v5 = vmul.f32 0.2, %v12247_v48  ;;  %v16847_v61 = vpop.f32.mrb[120].mxu0  ;;  %v12654_v17 = vsel %vm12382_vm0, %v12246_v2, %v12518_v31 }
 0x5a7   : > { %v12657_v62 = vsel %vm12385_vm1, %v12249_v54, %v12521_v6  ;;  %v16983_v14 = vadd.f32 %v16847_v61, %v16295_v60  ;;  %v11924_v39 = vpop.f32.mrb[121].mxu0 }
 0x5a8   : > { %v14889_v0 = vpack.c.bf16 %v12657_v62, %v12656_v7  ;;  %v12655_v15 = vsel %vm12383_vm4, %v12247_v48, %v12519_v5  ;;  %v16984_v8 = vadd.f32 %v11924_v39, %v6710_v29  ;;  %v16848_v22 = vpop.f32.mrb[122].mxu0 }
 0x5a9   : > { %v14884_v37 = vpack.c.bf16 %v12655_v15, %v12654_v17  ;;  %v12252_v34 = vadd.f32 %v21351_v16, %v16983_v14  ;;  %v16985_v35 = vadd.f32 %v16848_v22, %v16296_v49  ;;  %v11927_v4 = vpop.f32.mrb[123].mxu0 }
 0x5aa   : > { %14989 = vst [vmem:[%s21110_s18 + $0x1d8] sm:$0xff] %v14889_v0   ;;  %v12250_v10 = vadd.f32 %v21351_v16, %v16984_v8  ;;  %v16986_v59 = vadd.f32 %v11927_v4, %v6713_v38 }
 0x5ab   : > { %v16299_v44 = vpop.f32.mrb[124].mxu1  ;;  %14988 = vst [vmem:[%s21110_s18 + $0x1d0] sm:$0xff] %v14884_v37   ;;  %v12524_v13 = vmul.f32 0.2, %v12252_v34  ;;  %v12253_v63 = vadd.f32 %v21351_v16, %v16985_v35  ;;  %vm12388_vm3 = vcmp.ge.f32.partialorder %v12252_v34, 0.0 }
 0x5ac   : > { %v6726_v19 = vpop.f32.mrb[125].mxu1  ;;  %v12522_v51 = vmul.f32 0.2, %v12250_v10  ;;  %v12251_v20 = vadd.f32 %v21351_v16, %v16986_v59  ;;  %vm12386_vm7 = vcmp.ge.f32.partialorder %v12250_v10, 0.0 }
 0x5ad   : > { %v16300_v58 = vpop.f32.mrb[126].mxu1  ;;  %vm12389_vm5 = vcmp.ge.f32.partialorder %v12253_v63, 0.0  ;;  %v12525_v57 = vmul.f32 0.2, %v12253_v63  ;;  %v12660_v11 = vsel %vm12388_vm3, %v12252_v34, %v12524_v13 }
 0x5ae   : > { %v6729_v12 = vpop.f32.mrb[127].mxu1  ;;  %vm12387_vm6 = vcmp.ge.f32.partialorder %v12251_v20, 0.0  ;;  %v12523_v3 = vmul.f32 0.2, %v12251_v20  ;;  %v16851_v32 = vpop.f32.mrb[124].mxu0  ;;  %v12658_v52 = vsel %vm12386_vm7, %v12250_v10, %v12522_v51 }
 0x5af   : > { %v12661_v23 = vsel %vm12389_vm5, %v12253_v63, %v12525_v57  ;;  %v16987_v25 = vadd.f32 %v16851_v32, %v16299_v44  ;;  %v11940_v46 = vpop.f32.mrb[125].mxu0 }
 0x5b0   : > { %v14899_v18 = vpack.c.bf16 %v12661_v23, %v12660_v11  ;;  %v12659_v55 = vsel %vm12387_vm6, %v12251_v20, %v12523_v3  ;;  %v16988_v9 = vadd.f32 %v11940_v46, %v6726_v19  ;;  %v16852_v45 = vpop.f32.mrb[126].mxu0 }
 0x5b1   : > { %v14894_v56 = vpack.c.bf16 %v12659_v55, %v12658_v52  ;;  %v12256_v24 = vadd.f32 %v21351_v16, %v16987_v25  ;;  %v16989_v21 = vadd.f32 %v16852_v45, %v16300_v58  ;;  %v11943_v41 = vpop.f32.mrb[127].mxu0 }
 0x5b2   : > { %14991 = vst [vmem:[%s21110_s18 + $0x1e8] sm:$0xff] %v14899_v18   ;;  %v12254_v53 = vadd.f32 %v21460_v28, %v16988_v9  ;;  %v16990_v40 = vadd.f32 %v11943_v41, %v6729_v12 }
 0x5b3   : > { %v16303_v43 = vpop.f32.mrb[128].mxu1  ;;  %14990 = vst [vmem:[%s21110_s18 + $0x1e0] sm:$0xff] %v14894_v56   ;;  %v12528_v42 = vmul.f32 0.2, %v12256_v24  ;;  %v12257_v33 = vadd.f32 %v21460_v28, %v16989_v21  ;;  %vm12392_vm2 = vcmp.ge.f32.partialorder %v12256_v24, 0.0 }
 0x5b4   : > { %v6742_v36 = vpop.f32.mrb[129].mxu1  ;;  %v12526_v16 = vmul.f32 0.2, %v12254_v53  ;;  %v12255_v47 = vadd.f32 %v21460_v28, %v16990_v40  ;;  %vm12390_vm8 = vcmp.ge.f32.partialorder %v12254_v53, 0.0 }
 0x5b5   : > { %v16304_v30 = vpop.f32.mrb[130].mxu1  ;;  %vm12393_vm9 = vcmp.ge.f32.partialorder %v12257_v33, 0.0  ;;  %v12529_v50 = vmul.f32 0.2, %v12257_v33  ;;  %v12664_v26 = vsel %vm12392_vm2, %v12256_v24, %v12528_v42 }
 0x5b6   : > { %v6745_v27 = vpop.f32.mrb[131].mxu1  ;;  %vm12391_vm10 = vcmp.ge.f32.partialorder %v12255_v47, 0.0  ;;  %v12527_v60 = vmul.f32 0.2, %v12255_v47  ;;  %v16855_v2 = vpop.f32.mrb[128].mxu0  ;;  %v12662_v49 = vsel %vm12390_vm8, %v12254_v53, %v12526_v16 }
 0x5b7   : > { %v12665_v29 = vsel %vm12393_vm9, %v12257_v33, %v12529_v50  ;;  %v16991_v1 = vadd.f32 %v16855_v2, %v16303_v43  ;;  %v11956_v54 = vpop.f32.mrb[129].mxu0 }
 0x5b8   : > { %v14909_v31 = vpack.c.bf16 %v12665_v29, %v12664_v26  ;;  %v12663_v48 = vsel %vm12391_vm10, %v12255_v47, %v12527_v60  ;;  %v16992_v38 = vadd.f32 %v11956_v54, %v6742_v36  ;;  %v16856_v6 = vpop.f32.mrb[130].mxu0 }
 0x5b9   : > { %v14904_v5 = vpack.c.bf16 %v12663_v48, %v12662_v49  ;;  %v12260_v61 = vadd.f32 %v21460_v28, %v16991_v1  ;;  %v16993_v7 = vadd.f32 %v16856_v6, %v16304_v30  ;;  %v11959_v62 = vpop.f32.mrb[131].mxu0 }
 0x5ba   : > { %14993 = vst [vmem:[%s21110_s18 + $0x1f8] sm:$0xff] %v14909_v31   ;;  %v12258_v39 = vadd.f32 %v21460_v28, %v16992_v38  ;;  %v16994_v17 = vadd.f32 %v11959_v62, %v6745_v27 }
 0x5bb   : > { %v16307_v14 = vpop.f32.mrb[132].mxu1  ;;  %14992 = vst [vmem:[%s21110_s18 + $0x1f0] sm:$0xff] %v14904_v5   ;;  %v12532_v15 = vmul.f32 0.2, %v12260_v61  ;;  %v12261_v8 = vadd.f32 %v21460_v28, %v16993_v7  ;;  %vm12396_vm11 = vcmp.ge.f32.partialorder %v12260_v61, 0.0 }
 0x5bc   : > { %v6758_v0 = vpop.f32.mrb[133].mxu1  ;;  %v12530_v37 = vmul.f32 0.2, %v12258_v39  ;;  %v12259_v34 = vadd.f32 %v21460_v28, %v16994_v17  ;;  %vm12394_vm12 = vcmp.ge.f32.partialorder %v12258_v39, 0.0 }
 0x5bd   : > { %v16308_v22 = vpop.f32.mrb[134].mxu1  ;;  %vm12397_vm13 = vcmp.ge.f32.partialorder %v12261_v8, 0.0  ;;  %v12533_v4 = vmul.f32 0.2, %v12261_v8  ;;  %v12668_v59 = vsel %vm12396_vm11, %v12260_v61, %v12532_v15 }
 0x5be   : > { %v6761_v35 = vpop.f32.mrb[135].mxu1  ;;  %vm12395_vm14 = vcmp.ge.f32.partialorder %v12259_v34, 0.0  ;;  %v12531_v44 = vmul.f32 0.2, %v12259_v34  ;;  %v16859_v10 = vpop.f32.mrb[132].mxu0  ;;  %v12666_v58 = vsel %vm12394_vm12, %v12258_v39, %v12530_v37 }
 0x5bf   : > { %v12669_v19 = vsel %vm12397_vm13, %v12261_v8, %v12533_v4  ;;  %v16995_v13 = vadd.f32 %v16859_v10, %v16307_v14  ;;  %v11972_v63 = vpop.f32.mrb[133].mxu0 }
 0x5c0   : > { %v14919_v51 = vpack.c.bf16 %v12669_v19, %v12668_v59  ;;  %v12667_v20 = vsel %vm12395_vm14, %v12259_v34, %v12531_v44  ;;  %v16996_v12 = vadd.f32 %v11972_v63, %v6758_v0  ;;  %v16860_v57 = vpop.f32.mrb[134].mxu0 }
 0x5c1   : > { %v14914_v3 = vpack.c.bf16 %v12667_v20, %v12666_v58  ;;  %v12264_v32 = vadd.f32 %v21460_v28, %v16995_v13  ;;  %v16997_v11 = vadd.f32 %v16860_v57, %v16308_v22  ;;  %v11975_v23 = vpop.f32.mrb[135].mxu0 }
 0x5c2   : > { %14995 = vst [vmem:[%s21110_s18 + $0x208] sm:$0xff] %v14919_v51   ;;  %v12262_v25 = vadd.f32 %v21460_v28, %v16996_v12  ;;  %v16998_v46 = vadd.f32 %v11975_v23, %v6761_v35 }
 0x5c3   : > { %14994 = vst [vmem:[%s21110_s18 + $0x200] sm:$0xff] %v14914_v3   ;;  %v12536_v52 = vmul.f32 0.2, %v12264_v32  ;;  %v12265_v18 = vadd.f32 %v21460_v28, %v16997_v11  ;;  %vm12400_vm15 = vcmp.ge.f32.partialorder %v12264_v32, 0.0 }
 0x5c4   : > { %v12534_v55 = vmul.f32 0.2, %v12262_v25  ;;  %v12263_v9 = vadd.f32 %v21460_v28, %v16998_v46  ;;  %vm12398_vm0 = vcmp.ge.f32.partialorder %v12262_v25, 0.0 }
 0x5c5   : > { %vm12401_vm1 = vcmp.ge.f32.partialorder %v12265_v18, 0.0  ;;  %v12537_v45 = vmul.f32 0.2, %v12265_v18  ;;  %v12672_v24 = vsel %vm12400_vm15, %v12264_v32, %v12536_v52 }
 0x5c6   : > { %vm12399_vm4 = vcmp.ge.f32.partialorder %v12263_v9, 0.0  ;;  %v12535_v56 = vmul.f32 0.2, %v12263_v9  ;;  %v12670_v41 = vsel %vm12398_vm0, %v12262_v25, %v12534_v55 }
 0x5c7   : > { %v12673_v21 = vsel %vm12401_vm1, %v12265_v18, %v12537_v45 }
 0x5c8   : > { %v14929_v43 = vpack.c.bf16 %v12673_v21, %v12672_v24  ;;  %v12671_v53 = vsel %vm12399_vm4, %v12263_v9, %v12535_v56 }
 0x5c9   : > { %v14924_v28 = vpack.c.bf16 %v12671_v53, %v12670_v41 }
 0x5ca   : > { %14997 = vst [vmem:[%s21110_s18 + $0x218] sm:$0xff] %v14929_v43  }
 0x5cb   : > { %14996 = vst [vmem:[%s21110_s18 + $0x210] sm:$0xff] %v14924_v28  }
 0x5cc   : > { %18541 = shalt.err (!%p18538_p5)
}
 0x5cd   : > { %s18542_s8 = scalar_lea.hbm %s21483_s30, 8704  ;;  %s18546_s18 = scalar_lea.hbm %s21540_s3, 17408 }
 0x5ce   : > { %p18543_p6 = scmp.ne.s32.totalorder %s21483_s30, %s18542_s8  ;;  %p18547_p10 = scmp.lt.u32.totalorder %s21483_s30, %s21540_s3 }
 0x5cf   : > { %p18548_p11 = scmp.lt.u32.totalorder %s18546_s18, %s18542_s8  ;;  %p18550_p13 = scmp.lt.u32.totalorder %s18542_s8, %s21483_s30 }
 0x5d0   : > { %p18544_p7 = pnand %p18543_p6, %p18671_p4 }
 0x5d1   : > { %p18549_p12 = por %p18548_p11, %p18547_p10 }
 0x5d2   : > { %p18545_p9 = pneg %p18544_p7 }
 0x5d3   : > { %p18551_p0 = por %p18550_p13, %p18549_p12 }
 0x5d5   : > { %p18552_p1 = pnand %p18551_p0, %p18545_p9 }
 0x5d7   : > { %18555 = shalt.err (!%p18552_p1)
}
 0x5d8   : > { %s18609_s21 = smov 64   ;;  %s18610_s23 = smov 4  }
 0x5d9   : > { %17964 = dma.vmem_to_hbm [thread:$0]  (%p18671_p4), %s21485_s27, 8704, %s21483_s30, %s21491_s15, %s18609_s21, %s18609_s21, %s18610_s23  }
 0x5da PF: > { %p17970_p2 = scmp.ge.s32.totalorder %s18606_s17, 2  ;;  %s13386_s26 = sand.u32 1, %s18586_s12  }
 0x5db   : > { %s13387_s28 = scalar_lea.sflag [#allocation3], %s13386_s26 }
 0x5dc   : > { %p17967_p3 = pnand %p17970_p2, %p18678_p8 }
 0x5de   : > { %18581 = dma.done.wait (!%p17967_p3), %s13387_s28, 8704  }
 0x5df   : > { %18583 = vsyncadd (!%p17967_p3), %s13387_s28, 4294958592  ;;  %s16_s17 = sadd.s32 1, %s18606_s17   ;;  %s21757_s12 = smov %s18590_s13 }
 0x5e0   : > { %p13_p5 = scmp.ge.s32.totalorder %s16_s17, 4   ;;  %s21758_s13 = smov %s18594_s14 }
 0x5e1   : > { %s21759_s14 = smov %s18684_s25  ;;  %s21760_s15 = smov %s18602_s16 }
 0x5e2   : > { %s21761_s16 = smov %s21763_s20  ;;  %15 = sbr.rel (!%p13_p5) target bundleno = 4 (0x4), region = 81 }
 0x5e9   :  { %13392 = vsyncpa [#allocation3], 1 }
 0x5ea   :  { %13394 = vsyncpa [#allocation3 + $0x1], 1 }

</bundles_post_ra>
